<compile_context>
chip_gen: v5e
topology: v5e:2x2
jax: 0.10.0
libtpu: 0.0.40
codegen_flags: <defaults>
</compile_context>

<pallas_src>
import jax
import jax.numpy as jnp
from jax.experimental import pallas as pl
from jax.experimental.pallas import tpu as pltpu

AMINO_ACIDS = "ACDEFGHIKLMNPQRSTVWY"
LATENT_DIM = 20
HIDDEN_DIM = 20
SEQUENCE_LENGTH = 1000
NUM_AA = len(AMINO_ACIDS)                   # 20
OUT_DIM = SEQUENCE_LENGTH * NUM_AA          # 20000  (softmax + store over full width)

MAX_BATCH_TILE = 64      # multiple of 8; VMEM-safe on v5e/v6e/v7x (out block <= ~5 MiB)
TARGET_GRID_STEPS = 4    # >=2 enables writeback/compute overlap + dual-TC sharding on v7x


def _round_up(x, m):
    return (x + m - 1) // m * m


def _choose_batch_tile(B):
    """Pick a batch tile: multiple of 8, <= MAX_BATCH_TILE, aiming for ~4 grid steps."""
    n_steps = max(TARGET_GRID_STEPS, pl.cdiv(B, MAX_BATCH_TILE))
    tb = min(_round_up(pl.cdiv(B, n_steps), 8), MAX_BATCH_TILE)
    return tb, pl.cdiv(B, tb)


def generator_kernel(z_ref, w1_ref, b1_ref, w2_ref, b2_ref, out_ref):
    """out = softmax(relu(z @ W1 + b1) @ W2 + b2) over the flat 20000-wide dim."""
    z = z_ref[...]                                                       # (TB, 20) f32
    h = jnp.dot(z, w1_ref[...], preferred_element_type=jnp.float32) + b1_ref[...]
    h = jnp.maximum(h, 0.0)                                              # ReLU
    # Second matmul on the MXU in bf16 (W2 shipped as bf16), accumulate in f32.
    logits = jnp.dot(h.astype(w2_ref.dtype), w2_ref[...],
                     preferred_element_type=jnp.float32) + b2_ref[...]   # (TB, 20000) f32
    # Safe softmax over the full feature dim.  NOTE(v7x micro-opt): once HBM is no longer
    # the binding slot, the max-subtraction pass could be dropped because the logits are
    # tiny with this init -- kept here for numerical robustness if weights grow.
    m = jnp.max(logits, axis=-1, keepdims=True)
    e = jnp.exp(logits - m)
    s = jnp.sum(e, axis=-1, keepdims=True)
    out_ref[...] = e * pl.reciprocal(s, approx=True)


def prepare_params(w1, b1, w2, b2):
    """One-time prep (bf16 W2, 2-D biases). Reuse the result across forward calls."""
    return (w1.astype(jnp.float32),
            b1.reshape(1, -1).astype(jnp.float32),
            w2.astype(jnp.bfloat16),
            b2.reshape(1, -1).astype(jnp.float32))


def generator_forward(z, params):
    """z: (B, latent_dim) f32, params from prepare_params -> (B, 1000, 20) f32."""
    w1, b1_2d, w2_bf16, b2_2d = params
    B = z.shape[0]
    TB, n_b = _choose_batch_tile(B)
    z = z.astype(jnp.float32)

    cost = pl.CostEstimate(
        flops=2 * B * (LATENT_DIM * HIDDEN_DIM + HIDDEN_DIM * OUT_DIM),
        transcendentals=B * OUT_DIM,
        bytes_accessed=(z.size * 4 + w1.size * 4 + b1_2d.size * 4
                        + w2_bf16.size * 2 + b2_2d.size * 4
                        + B * OUT_DIM * 4),
    )

    flat = pl.pallas_call(
        generator_kernel,
        out_shape=jax.ShapeDtypeStruct((B, OUT_DIM), jnp.float32),
        grid_spec=pltpu.PrefetchScalarGridSpec(
            num_scalar_prefetch=0,
            grid=(n_b,),
            in_specs=[
                pl.BlockSpec((TB, LATENT_DIM), lambda i: (i, 0)),          # z: batch-tiled
                pl.BlockSpec((LATENT_DIM, HIDDEN_DIM), lambda i: (0, 0)),  # W1: resident
                pl.BlockSpec((1, HIDDEN_DIM), lambda i: (0, 0)),           # b1: resident
                pl.BlockSpec((HIDDEN_DIM, OUT_DIM), lambda i: (0, 0)),     # W2 (bf16): resident
                pl.BlockSpec((1, OUT_DIM), lambda i: (0, 0)),              # b2: resident
                # NOTE: pipeline_mode=pl.Buffered(1) on the four resident operands would
                # save ~2 MiB of VMEM (constant index_map => no revolving buffer needed);
                # skipped here to avoid any compile risk -- headroom is already ample.
            ],
            out_specs=pl.BlockSpec((TB, OUT_DIM), lambda i: (i, 0)),
        ),
        compiler_params=pltpu.CompilerParams(
            dimension_semantics=("parallel",),   # shards batch tiles across TCs on v7x
            vmem_limit_bytes=40 << 20,           # ~25 MiB worst-case use; < 64 MiB physical
        ),
        cost_estimate=cost,
    )(z, w1, b1_2d, w2_bf16, b2_2d)

    # Trailing view to (B, 1000, 20) matches the PyTorch module's output shape (free
    # reshape of a contiguous dim).  Downstream consumers that can work on the flat
    # (B, 20000) layout should prefer it (a last-dim-20 layout is lane-padded 20->128).
    return flat.reshape(B, SEQUENCE_LENGTH, NUM_AA)


def init_params(key):
    """Deterministic init mirroring nn.Linear's default U(-1/sqrt(fan_in), 1/sqrt(fan_in)).

    Weights stored (in_features, out_features) — already transposed vs. PyTorch's (out, in).
    """
    k1, k2, k3, k4 = jax.random.split(key, 4)
    bound1 = 1.0 / jnp.sqrt(LATENT_DIM)
    bound2 = 1.0 / jnp.sqrt(HIDDEN_DIM)
    w1 = jax.random.uniform(k1, (LATENT_DIM, HIDDEN_DIM), jnp.float32, -bound1, bound1)
    b1 = jax.random.uniform(k2, (HIDDEN_DIM,), jnp.float32, -bound1, bound1)
    w2 = jax.random.uniform(k3, (HIDDEN_DIM, OUT_DIM), jnp.float32, -bound2, bound2)
    b2 = jax.random.uniform(k4, (OUT_DIM,), jnp.float32, -bound2, bound2)
    return w1, b1, w2, b2


def _reference_forward(z, w1, b1, w2, b2):
    """Pure-JAX f32 reference (PyTorch semantics: softmax over the flat dim=1)."""
    h = jnp.maximum(z @ w1 + b1, 0.0)
    logits = h @ w2 + b2
    p = jax.nn.softmax(logits, axis=-1)
    return p.reshape(z.shape[0], SEQUENCE_LENGTH, NUM_AA)


if __name__ == "__main__":
    key = jax.random.PRNGKey(0)
    k_params, k_z = jax.random.split(key)

    batch = 2
    w1, b1, w2, b2 = init_params(k_params)
    z = jax.random.normal(k_z, (batch, LATENT_DIM), dtype=jnp.float32)

    params = prepare_params(w1, b1, w2, b2)
    out = generator_forward(z, params)
    out = jax.block_until_ready(out)

    assert out.shape == (batch, SEQUENCE_LENGTH, NUM_AA)

    # Softmax over dim=1 of the flat (B, 20000) logits => each batch row sums to 1
    # (tolerance loosened for bf16 W2 + approx reciprocal).
    row_sums = jnp.sum(out.reshape(batch, -1), axis=-1)
    assert jnp.allclose(row_sums, 1.0, atol=2e-3), row_sums

    # Element-wise check against the f32 reference (probabilities are ~5e-5 each;
    # bf16 W2 / approx reciprocal perturb them well below 1e-5 absolute).
    ref = _reference_forward(z, w1, b1, w2, b2)
    max_err = jnp.max(jnp.abs(out - ref))
    assert max_err < 1e-5, max_err

    print("KERNEL_OK")
</pallas_src>

<mosaic_0001>
module attributes {stable_mosaic.version = 11 : i64} {
  func.func @generator_kernel(%arg0: i32, %arg1: memref<8x20xf32, #tpu.memory_space<vmem>>, %arg2: memref<20x20xf32, #tpu.memory_space<vmem>>, %arg3: memref<1x20xf32, #tpu.memory_space<vmem>>, %arg4: memref<20x20000xbf16, #tpu.memory_space<vmem>>, %arg5: memref<1x20000xf32, #tpu.memory_space<vmem>>, %arg6: memref<8x20000xf32, #tpu.memory_space<vmem>>) attributes {dimension_semantics = [#tpu.dimension_semantics<parallel>], iteration_bounds = array<i64: 1>, scalar_prefetch = 0 : i64, scratch_operands = 0 : i64, tpu.core_type = #tpu.core_type<tc>, window_params = [{transform_indices = @transform_0, window_bounds = array<i64: 8, 20>}, {pipeline_mode = #tpu.pipeline_mode<synchronous>, transform_indices = @transform_1, window_bounds = array<i64: 20, 20>}, {pipeline_mode = #tpu.pipeline_mode<synchronous>, transform_indices = @transform_2, window_bounds = array<i64: 1, 20>}, {pipeline_mode = #tpu.pipeline_mode<synchronous>, transform_indices = @transform_3, window_bounds = array<i64: 20, 20000>}, {pipeline_mode = #tpu.pipeline_mode<synchronous>, transform_indices = @transform_4, window_bounds = array<i64: 1, 20000>}, {transform_indices = @transform_5, window_bounds = array<i64: 8, 20000>}]} {
    %c0 = arith.constant 0 : index
    %c0_0 = arith.constant 0 : index
    %0 = vector.load %arg1[%c0, %c0_0] : memref<8x20xf32, #tpu.memory_space<vmem>>, vector<8x20xf32>
    %c0_1 = arith.constant 0 : index
    %c0_2 = arith.constant 0 : index
    %1 = vector.load %arg2[%c0_1, %c0_2] : memref<20x20xf32, #tpu.memory_space<vmem>>, vector<20x20xf32>
    %cst = arith.constant dense<0.000000e+00> : vector<8x20xf32>
    %2 = tpu.matmul %0, %1, %cst {dimension_numbers = #tpu.dot_dimension_numbers<[1], [0], [0], [1], [0, 0, 1, 1], [], []>} : vector<8x20xf32>, vector<20x20xf32>, vector<8x20xf32> -> vector<8x20xf32>
    %c0_3 = arith.constant 0 : index
    %c0_4 = arith.constant 0 : index
    %3 = vector.load %arg3[%c0_3, %c0_4] : memref<1x20xf32, #tpu.memory_space<vmem>>, vector<1x20xf32>
    %4 = vector.broadcast %3 : vector<1x20xf32> to vector<8x20xf32>
    %5 = arith.addf %2, %4 : vector<8x20xf32>
    %cst_5 = arith.constant 0.000000e+00 : f32
    %6 = vector.broadcast %cst_5 : f32 to vector<8x20xf32>
    %7 = arith.maximumf %5, %6 : vector<8x20xf32>
    %8 = arith.truncf %7 : vector<8x20xf32> to vector<8x20xbf16>
    %c0_6 = arith.constant 0 : index
    %c0_7 = arith.constant 0 : index
    %9 = vector.load %arg4[%c0_6, %c0_7] : memref<20x20000xbf16, #tpu.memory_space<vmem>>, vector<20x20000xbf16>
    %cst_8 = arith.constant dense<0.000000e+00> : vector<8x20000xf32>
    %10 = tpu.matmul %8, %9, %cst_8 {dimension_numbers = #tpu.dot_dimension_numbers<[1], [0], [0], [1], [0, 0, 1, 1], [], []>} : vector<8x20xbf16>, vector<20x20000xbf16>, vector<8x20000xf32> -> vector<8x20000xf32>
    %c0_9 = arith.constant 0 : index
    %c0_10 = arith.constant 0 : index
    %11 = vector.load %arg5[%c0_9, %c0_10] : memref<1x20000xf32, #tpu.memory_space<vmem>>, vector<1x20000xf32>
    %12 = vector.broadcast %11 : vector<1x20000xf32> to vector<8x20000xf32>
    %13 = arith.addf %10, %12 : vector<8x20000xf32>
    %cst_11 = arith.constant dense<0xFF800000> : vector<8xf32>
    %14 = vector.multi_reduction <maximumf>, %13, %cst_11 [1] : vector<8x20000xf32> to vector<8xf32>
    %15 = vector.shape_cast %14 : vector<8xf32> to vector<8x1xf32>
    %16 = vector.broadcast %15 : vector<8x1xf32> to vector<8x20000xf32>
    %17 = arith.subf %13, %16 : vector<8x20000xf32>
    %18 = math.exp %17 : vector<8x20000xf32>
    %cst_12 = arith.constant dense<0.000000e+00> : vector<8xf32>
    %19 = vector.multi_reduction <add>, %18, %cst_12 [1] : vector<8x20000xf32> to vector<8xf32>
    %20 = vector.shape_cast %19 : vector<8xf32> to vector<8x1xf32>
    %21 = tpu.reciprocal %20 {approx = true} : vector<8x1xf32> -> vector<8x1xf32>
    %22 = vector.broadcast %21 : vector<8x1xf32> to vector<8x20000xf32>
    %23 = arith.mulf %18, %22 : vector<8x20000xf32>
    %c0_13 = arith.constant 0 : index
    %c0_14 = arith.constant 0 : index
    %24 = vector.load %arg6[%c0_13, %c0_14] : memref<8x20000xf32, #tpu.memory_space<vmem>>, vector<8x20000xf32>
    tpu.vector_store %arg6[%c0_13, %c0_14], %23 {strides = array<i32>} : memref<8x20000xf32, #tpu.memory_space<vmem>>, vector<8x20000xf32>,
    return
  }
  func.func @transform_0(%arg0: i32) -> (i32, i32) {
    %c0_i32 = arith.constant 0 : i32
    %c0_i32_0 = arith.constant 0 : i32
    return %arg0, %c0_i32 : i32, i32
  }
  func.func @transform_1(%arg0: i32) -> (i32, i32) {
    %c0_i32 = arith.constant 0 : i32
    %c0_i32_0 = arith.constant 0 : i32
    %c0_i32_1 = arith.constant 0 : i32
    return %c0_i32, %c0_i32_0 : i32, i32
  }
  func.func @transform_2(%arg0: i32) -> (i32, i32) {
    %c0_i32 = arith.constant 0 : i32
    %c0_i32_0 = arith.constant 0 : i32
    %c0_i32_1 = arith.constant 0 : i32
    return %c0_i32, %c0_i32_0 : i32, i32
  }
  func.func @transform_3(%arg0: i32) -> (i32, i32) {
    %c0_i32 = arith.constant 0 : i32
    %c0_i32_0 = arith.constant 0 : i32
    %c0_i32_1 = arith.constant 0 : i32
    return %c0_i32, %c0_i32_0 : i32, i32
  }
  func.func @transform_4(%arg0: i32) -> (i32, i32) {
    %c0_i32 = arith.constant 0 : i32
    %c0_i32_0 = arith.constant 0 : i32
    %c0_i32_1 = arith.constant 0 : i32
    return %c0_i32, %c0_i32_0 : i32, i32
  }
  func.func @transform_5(%arg0: i32) -> (i32, i32) {
    %c0_i32 = arith.constant 0 : i32
    %c0_i32_0 = arith.constant 0 : i32
    return %arg0, %c0_i32 : i32, i32
  }
}

</mosaic_0001>

<bundles_post_ra>
// kernel: tpu_custom_call.1
= control target key start
LH: loop header
LB: loop body
LE: loop exit
PB: predicated region body
PF: predicated region fallthrough
CT: control target
= control target key end

     0   :  { %10 = vsyncpa [#allocation3], 0  ;;  %s12380_s0 = inlined_call_operand.hbm [shape: f32[2,20], index: 0, kind: input, shape index: {}]   ;;  %s12381_s1 = inlined_call_operand.hbm [shape: f32[20,20], index: 1, kind: input, shape index: {}]   ;;  %s12382_s2 = inlined_call_operand.vmem [shape: f32[1,20], index: 2, kind: input, shape index: {}]   ;;  %s12383_s3 = inlined_call_operand.hbm [shape: bf16[20,20000], index: 3, kind: input, shape index: {}]   ;;  %s12384_s4 = inlined_call_operand.hbm [shape: f32[1,20000], index: 4, kind: input, shape index: {}]   ;;  %s12385_s5 = inlined_call_operand.hbm [shape: f32[2,20000], index: 5, kind: output, shape index: {}]  }
   0x1   :  { %11 = vsyncpa [#allocation6], 0 }
   0x2   :  { %12 = vsyncpa [#allocation9], 0 }
   0x3   :  { %13 = vsyncpa [#allocation4], 0  ;;  %s31_s20 = sshll.u32 %s12381_s1, 4  ;;  %s32_s20 = int_to_ptr.hbm [resolvable:$true] %s31_s20 }
   0x4   :  { %17 = vsyncadd [#allocation3], 96  ;;  %s7964_s21 = smov [#allocation5]   ;;  %s18_s25 = sshll.u32 %s12380_s0, 4  ;;  %s19_s25 = int_to_ptr.hbm [resolvable:$true] %s18_s25 }
   0x5   :  { %s33_s22 = sshll.u32 %s7964_s21, 4  ;;  %s7965_s26 = smov 128   ;;  %s34_s22 = int_to_ptr.vmem [resolvable:$true] %s33_s22 }
   0x6   :  { %s7966_s27 = smov 8   ;;  %s7967_s28 = smov [#allocation2]  }
   0x7   :  { %39 = dma.hbm_to_vmem [thread:$0]  %s32_s20, 384, %s34_s22, [#allocation6], %s7965_s26, %s7965_s26, %s7966_s27  }
   0x8   :  { %s20_s29 = sshll.u32 %s7967_s28, 4  ;;  %s7968_s30 = smov 32   ;;  %s21_s29 = int_to_ptr.vmem [resolvable:$true] %s20_s29 }
   0x9   :  { %s7969_s6 = smov 2   ;;  %s46_s8 = sshll.u32 %s12383_s3, 4  ;;  %s47_s8 = int_to_ptr.hbm [resolvable:$true] %s46_s8 }
   0xa   :  { %26 = dma.hbm_to_vmem [thread:$0]  %s19_s25, 32, %s21_s29, [#allocation3], %s7968_s30, %s7968_s30, %s7969_s6  }
   0xb   :  { %s7970_s9 = smov [#allocation7]   ;;  %s60_s12 = sshll.u32 %s12384_s4, 4  ;;  %s61_s12 = int_to_ptr.hbm [resolvable:$true] %s60_s12 }
   0xc   :  { %s48_s10 = sshll.u32 %s7970_s9, 4  ;;  %s7971_s13 = smov 10048   ;;  %s49_s10 = int_to_ptr.vmem [resolvable:$true] %s48_s10 }
   0xd   :  { %s7972_s14 = smov 628   ;;  %s7973_s15 = smov [#allocation8]  }
   0xe   :  { %54 = dma.hbm_to_vmem [thread:$0]  %s47_s8, 30144, %s49_s10, [#allocation6], %s7971_s13, %s7971_s13, %s7972_s14  }
   0xf   :  { %s62_s16 = sshll.u32 %s7973_s15, 4  ;;  %s63_s16 = int_to_ptr.vmem [resolvable:$true] %s62_s16 }
  0x10   :  { %65 = dma.hbm_to_vmem [thread:$0]  %s61_s12, 2512, %s63_s16, [#allocation9]  }
  0x11   :  { %7956 = dma.done.wait [#allocation3], 128  }
  0x12   :  { %7957 = vsyncadd [#allocation3], 4294967168 }
  0x13   :  { %7958 = dma.done.wait [#allocation6], 30528  }
  0x14   :  { %7959 = vsyncadd [#allocation6], 4294936768 }
  0x15   :  { %7960 = dma.done.wait [#allocation9], 2512  }
  0x16   :  { %7961 = vsyncadd [#allocation9], 4294964784  ;;  %vm95_vm0 = vcmask 1043456   ;;  %v86_v0 = vld [vmem:[#allocation5 + $0x10] sm:$0xf]  ;;  %v85_v1 = vld [vmem:[#allocation5 + $0x8] sm:$0xff] }
  0x17   :  { %6562 = vmatpush.msk.msra.mxu0 %vm95_vm0, %v86_v0  ;;  %v84_v2 = vld [vmem:[#allocation5] sm:$0xff]  ;;  %v83_v3 = vld [vmem:[#allocation2] sm:$0xff]  ;;  %vm91_vm1 = vcmask 162816   ;;  %v280_v5 = vld [vmem:[#allocation7 + $0x4f0] sm:$0x33]  ;;  %vm1894_vm2 = vcmask 1041408  }
  0x18   :  { %v279_v4 = vld [vmem:[#allocation7 + $0x4e8] sm:$0x33]  ;;  %v1265_v8 = vunpack.c.l.b16 %v280_v5  ;;  %v1266_v9 = vunpack.c.h.b16 %v280_v5  ;;  %v6566_v18 = vld [vmem:[#allocation7] sm:$0xf]  ;;  %v7427_v19 = vld [vmem:[#allocation7 + $0x270] sm:$0xf0] }
  0x19   :  { %113 = vmatpush.msra.mxu0 %v85_v1  ;;  %v1263_v6 = vunpack.c.l.b16 %v279_v4  ;;  %v1264_v7 = vunpack.c.h.b16 %v279_v4  ;;  %v7349_v20 = vld [vmem:[#allocation7 + $0x4] sm:$0xf]  ;;  %v6567_v21 = vor.u32 %v7427_v19, %v6566_v18  ;;  %v6568_v22 = vld [vmem:[#allocation7 + $0x274] sm:$0xf0]  ;;  %v6574_v23 = vld [vmem:[#allocation7 + $0x8] sm:$0xf] }
  0x1a   :  { %v1579_v12 = vpack.c.b16 %v1265_v8, %v1265_v8  ;;  %v1580_v13 = vpack.c.b16 %v1266_v9, %v1266_v9  ;;  %v7428_v24 = vld [vmem:[#allocation7 + $0x278] sm:$0xf0]  ;;  %v6571_v25 = vor.u32 %v7349_v20, %v6568_v22  ;;  %v7350_v27 = vld [vmem:[#allocation7 + $0xc] sm:$0xf]  ;;  %v6576_v28 = vld [vmem:[#allocation7 + $0x27c] sm:$0xf0] }
  0x1b   :  { %114 = vmatpush.msra.mxu0 %v84_v2  ;;  %v1577_v10 = vpack.c.b16 %v1263_v6, %v1263_v6  ;;  %v1578_v11 = vpack.c.b16 %v1264_v7, %v1264_v7  ;;  %v6575_v26 = vor.u32 %v7428_v24, %v6574_v23  ;;  %v6579_v29 = vor.u32 %v7350_v27, %v6576_v28  ;;  %v281_v30 = vld [vmem:[#allocation7 + $0x4f8] sm:$0x33]  ;;  %v282_v33 = vld [vmem:[#allocation7 + $0x500] sm:$0x33]  ;;  %v6582_v34 = vld [vmem:[#allocation7 + $0x10] sm:$0xf] }
  0x1c   :  { %6563 = vmatmul.msk.f32.vlgmr.msra.gmra.mxu0 %vm91_vm1, %v83_v3  ;;  %v1902_v16 = vsel %vm1894_vm2, %v1579_v12, 0  ;;  %v1905_v17 = vsel %vm1894_vm2, %v1580_v13, 0  ;;  %v1267_v31 = vunpack.c.l.b16 %v281_v30  ;;  %v1268_v32 = vunpack.c.h.b16 %v281_v30  ;;  %v7429_v35 = vld [vmem:[#allocation7 + $0x280] sm:$0xf0]  ;;  %v7351_v40 = vld [vmem:[#allocation7 + $0x14] sm:$0xf] }
  0x1d   :  { %v1896_v14 = vsel %vm1894_vm2, %v1577_v10, 0  ;;  %v1899_v15 = vsel %vm1894_vm2, %v1578_v11, 0  ;;  %2398 = vmatpush.bf16.msra.mxu3 %v1902_v16  ;;  %2411 = vmatpush.bf16.msrb.mxu0 %v1905_v17  ;;  %v1269_v36 = vunpack.c.l.b16 %v282_v33  ;;  %v1270_v37 = vunpack.c.h.b16 %v282_v33  ;;  %v6584_v41 = vld [vmem:[#allocation7 + $0x284] sm:$0xf0]  ;;  %v6590_v42 = vld [vmem:[#allocation7 + $0x18] sm:$0xf] }
  0x1e   :  { %2372 = vmatpush.bf16.msra.mxu1 %v1896_v14  ;;  %2385 = vmatpush.bf16.msra.mxu2 %v1899_v15  ;;  %v1581_v38 = vpack.c.b16 %v1267_v31, %v1267_v31  ;;  %v1582_v39 = vpack.c.b16 %v1268_v32, %v1268_v32  ;;  %v7430_v45 = vld [vmem:[#allocation7 + $0x288] sm:$0xf0]  ;;  %v7352_v46 = vld [vmem:[#allocation7 + $0x1c] sm:$0xf]  ;;  %v6592_v47 = vld [vmem:[#allocation7 + $0x28c] sm:$0xf0]  ;;  %v6583_v50 = vor.u32 %v7429_v35, %v6582_v34 }
  0x1f   :  { %v1583_v43 = vpack.c.b16 %v1269_v36, %v1269_v36  ;;  %v1584_v44 = vpack.c.b16 %v1270_v37, %v1270_v37  ;;  %v6587_v53 = vor.u32 %v7351_v40, %v6584_v41  ;;  %v6591_v54 = vor.u32 %v7430_v45, %v6590_v42  ;;  %v283_v56 = vld [vmem:[#allocation7 + $0x508] sm:$0x33]  ;;  %v284_v57 = vld [vmem:[#allocation7 + $0x510] sm:$0x33]  ;;  %v7519_v58 = vld [vmem:[%s12382_s2] ss:$0 sm:$0xff] }
  0x20   :  { %v1908_v48 = vsel %vm1894_vm2, %v1581_v38, 0  ;;  %v1911_v49 = vsel %vm1894_vm2, %v1582_v39, 0  ;;  %v6595_v55 = vor.u32 %v7352_v46, %v6592_v47  ;;  %v1271_v59 = vunpack.c.l.b16 %v283_v56  ;;  %v6598_v6 = vld [vmem:[#allocation7 + $0x20] sm:$0xf]  ;;  %v7431_v8 = vld [vmem:[#allocation7 + $0x290] sm:$0xf0] }
  0x21   :  { %2399 = vmatpush.bf16.msra.mxu3 %v6575_v26  ;;  %2412 = vmatpush.bf16.msrb.mxu0 %v6579_v29  ;;  %v1914_v51 = vsel %vm1894_vm2, %v1583_v43, 0  ;;  %v1917_v52 = vsel %vm1894_vm2, %v1584_v44, 0  ;;  %v1272_v60 = vunpack.c.h.b16 %v283_v56  ;;  %v1273_v61 = vunpack.c.l.b16 %v284_v57  ;;  %v7353_v9 = vld [vmem:[#allocation7 + $0x24] sm:$0xf]  ;;  %v6600_v10 = vld [vmem:[#allocation7 + $0x294] sm:$0xf0] }
  0x22   :  { %2373 = vmatpush.bf16.msra.mxu1 %v6567_v21  ;;  %2386 = vmatpush.bf16.msra.mxu2 %v6571_v25  ;;  %v1274_v62 = vunpack.c.h.b16 %v284_v57  ;;  %v1585_v1 = vpack.c.b16 %v1271_v59, %v1271_v59  ;;  %v6606_v13 = vld [vmem:[#allocation7 + $0x28] sm:$0xf]  ;;  %v7432_v14 = vld [vmem:[#allocation7 + $0x298] sm:$0xf0]  ;;  %v7354_v17 = vld [vmem:[#allocation7 + $0x2c] sm:$0xf]  ;;  %v6599_v19 = vor.u32 %v7431_v8, %v6598_v6  ;;  %v6603_v20 = vor.u32 %v7353_v9, %v6600_v10 }
  0x23   :  { %v1586_v2 = vpack.c.b16 %v1272_v60, %v1272_v60  ;;  %v1587_v4 = vpack.c.b16 %v1273_v61, %v1273_v61  ;;  %v6608_v18 = vld [vmem:[#allocation7 + $0x29c] sm:$0xf0]  ;;  %v6607_v21 = vor.u32 %v7432_v14, %v6606_v13  ;;  %v285_v23 = vld [vmem:[#allocation7 + $0x518] sm:$0x33]  ;;  %v6614_v33 = vld [vmem:[#allocation7 + $0x30] sm:$0xf] }
  0x24   :  { %v1588_v5 = vpack.c.b16 %v1274_v62, %v1274_v62  ;;  %v1920_v11 = vsel %vm1894_vm2, %v1585_v1, 0  ;;  %v6611_v22 = vor.u32 %v7354_v17, %v6608_v18  ;;  %v286_v24 = vld [vmem:[#allocation7 + $0x520] sm:$0x33]  ;;  %v1275_v25 = vunpack.c.l.b16 %v285_v23  ;;  %v7355_v35 = vld [vmem:[#allocation7 + $0x34] sm:$0xf] }
  0x25   :  { %2450 = vmatpush.bf16.msrb.mxu3 %v1914_v51  ;;  %2463 = vmatpush.bf16.msra.mxu0 %v1917_v52  ;;  %v1923_v12 = vsel %vm1894_vm2, %v1586_v2, 0  ;;  %v1926_v15 = vsel %vm1894_vm2, %v1587_v4, 0  ;;  %v1276_v26 = vunpack.c.h.b16 %v285_v23  ;;  %v1277_v27 = vunpack.c.l.b16 %v286_v24  ;;  %v7433_v34 = vld [vmem:[#allocation7 + $0x2a0] sm:$0xf0]  ;;  %v6616_v36 = vld [vmem:[#allocation7 + $0x2a4] sm:$0xf0] }
  0x26   :  { %2424 = vmatpush.bf16.msrb.mxu1 %v1908_v48  ;;  %2437 = vmatpush.bf16.msrb.mxu2 %v1911_v49  ;;  %v1929_v16 = vsel %vm1894_vm2, %v1588_v5, 0  ;;  %v1278_v28 = vunpack.c.h.b16 %v286_v24  ;;  %v1589_v29 = vpack.c.b16 %v1275_v25, %v1275_v25  ;;  %v6622_v39 = vld [vmem:[#allocation7 + $0x38] sm:$0xf]  ;;  %v7434_v40 = vld [vmem:[#allocation7 + $0x2a8] sm:$0xf0]  ;;  %v6615_v45 = vor.u32 %v7433_v34, %v6614_v33 }
  0x27   :  { %v1590_v30 = vpack.c.b16 %v1276_v26, %v1276_v26  ;;  %v1591_v31 = vpack.c.b16 %v1277_v27, %v1277_v27  ;;  %v7356_v43 = vld [vmem:[#allocation7 + $0x3c] sm:$0xf]  ;;  %v6624_v44 = vld [vmem:[#allocation7 + $0x2ac] sm:$0xf0]  ;;  %v6619_v46 = vor.u32 %v7355_v35, %v6616_v36  ;;  %v6623_v47 = vor.u32 %v7434_v40, %v6622_v39  ;;  %v287_v49 = vld [vmem:[#allocation7 + $0x528] sm:$0x33] }
  0x28   :  { %v1592_v32 = vpack.c.b16 %v1278_v28, %v1278_v28  ;;  %v1932_v37 = vsel %vm1894_vm2, %v1589_v29, 0  ;;  %v6627_v48 = vor.u32 %v7356_v43, %v6624_v44  ;;  %v1279_v51 = vunpack.c.l.b16 %v287_v49  ;;  %v6630_v59 = vld [vmem:[#allocation7 + $0x40] sm:$0xf]  ;;  %v7435_v60 = vld [vmem:[#allocation7 + $0x2b0] sm:$0xf0] }
  0x29   :  { %2451 = vmatpush.bf16.msrb.mxu3 %v6591_v54  ;;  %2464 = vmatpush.bf16.msra.mxu0 %v6595_v55  ;;  %v1935_v38 = vsel %vm1894_vm2, %v1590_v30, 0  ;;  %v1938_v41 = vsel %vm1894_vm2, %v1591_v31, 0  ;;  %v1280_v52 = vunpack.c.h.b16 %v287_v49  ;;  %v7357_v61 = vld [vmem:[#allocation7 + $0x44] sm:$0xf]  ;;  %v6632_v62 = vld [vmem:[#allocation7 + $0x2b4] sm:$0xf0]  ;;  %v6631_v8 = vor.u32 %v7435_v60, %v6630_v59 }
  0x2a   :  { %2425 = vmatpush.bf16.msrb.mxu1 %v6583_v50  ;;  %2438 = vmatpush.bf16.msrb.mxu2 %v6587_v53  ;;  %v1941_v42 = vsel %vm1894_vm2, %v1592_v32, 0  ;;  %v288_v50 = vld [vmem:[#allocation7 + $0x530] sm:$0x33]  ;;  %v1593_v55 = vpack.c.b16 %v1279_v51, %v1279_v51  ;;  %v6638_v1 = vld [vmem:[#allocation7 + $0x48] sm:$0xf]  ;;  %v6635_v9 = vor.u32 %v7357_v61, %v6632_v62  ;;  %vm4559_vm3 = vcmask 261120  }
  0x2b   :  { %v1281_v53 = vunpack.c.l.b16 %v288_v50  ;;  %v1282_v54 = vunpack.c.h.b16 %v288_v50  ;;  %v1594_v56 = vpack.c.b16 %v1280_v52, %v1280_v52  ;;  %v7436_v2 = vld [vmem:[#allocation7 + $0x2b8] sm:$0xf0]  ;;  %v7358_v5 = vld [vmem:[#allocation7 + $0x4c] sm:$0xf]  ;;  %v6640_v6 = vld [vmem:[#allocation7 + $0x2bc] sm:$0xf0] }
  0x2c   :  { %v6639_v10 = vor.u32 %v7436_v2, %v6638_v1  ;;  %v290_v13 = vld [vmem:[#allocation7 + $0x540] sm:$0x33]  ;;  %v7359_v24 = vld [vmem:[#allocation7 + $0x54] sm:$0xf]  ;;  %v6648_v25 = vld [vmem:[#allocation7 + $0x2c4] sm:$0xf0] }
  0x2d   :  { %v1595_v57 = vpack.c.b16 %v1281_v53, %v1281_v53  ;;  %v1286_v17 = vunpack.c.h.b16 %v290_v13  ;;  %v7437_v23 = vld [vmem:[#allocation7 + $0x2c0] sm:$0xf0]  ;;  %v6654_v28 = vld [vmem:[#allocation7 + $0x58] sm:$0xf]  ;;  %v7438_v29 = vld [vmem:[#allocation7 + $0x2c8] sm:$0xf0]  ;;  %v6651_v35 = vor.u32 %v7359_v24, %v6648_v25 }
  0x2e   :  { %v7360_v32 = vld [vmem:[#allocation7 + $0x5c] sm:$0xf]  ;;  %v6656_v33 = vld [vmem:[#allocation7 + $0x2cc] sm:$0xf0]  ;;  %v6655_v36 = vor.u32 %v7438_v29, %v6654_v28  ;;  %v7439_v49 = vld [vmem:[#allocation7 + $0x2d0] sm:$0xf0] }
  0x2f   :  { %v292_v39 = vld [vmem:[#allocation7 + $0x550] sm:$0x33]  ;;  %v7361_v50 = vld [vmem:[#allocation7 + $0x64] sm:$0xf]  ;;  %v6664_v51 = vld [vmem:[#allocation7 + $0x2d4] sm:$0xf0] }
  0x30   :  { %v1290_v43 = vunpack.c.h.b16 %v292_v39  ;;  %v6672_v59 = vld [vmem:[#allocation7 + $0x2dc] sm:$0xf0]  ;;  %v6667_v61 = vor.u32 %v7361_v50, %v6664_v51  ;;  %v296_v28 = vld [vmem:[#allocation7 + $0x570] sm:$0x33]  ;;  %vm6419_vm4 = vcmask 254976   ;;  %vm5630_vm5 = vcmask 1045508  }
  0x31   :  { %v294_v1 = vld [vmem:[#allocation7 + $0x560] sm:$0x33]  ;;  %vm5747_vm6 = vcmask 1043458   ;;  %vm5749_vm7 = vcmask 1045504   ;;  %vm5751_vm8 = vcmask 1045506  }
  0x99   :  { %v116_v63 = vpop.f32.mrf.mxu0 }
  0x9a   :  { %v117_v0 = vadd.f32 %v7519_v58, %v116_v63  ;;  %v1596_v58 = vpack.c.b16 %v1282_v54, %v1282_v54  ;;  %v1944_v63 = vsel %vm1894_vm2, %v1593_v55, 0  ;;  %v6670_v54 = vld [vmem:[#allocation7 + $0x68] sm:$0xf]  ;;  %v7440_v55 = vld [vmem:[#allocation7 + $0x2d8] sm:$0xf0] }
  0x9b   :  { %v6671_v62 = vor.u32 %v7440_v55, %v6670_v54  ;;  %v298_v54 = vld [vmem:[#allocation7 + $0x580] sm:$0x33] }
  0x9c   :  { %v119_v3 = vmax.f32 %v117_v0, 0.0  ;;  %v1947_v0 = vsel %vm1894_vm2, %v1594_v56, 0  ;;  %v1953_v4 = vsel %vm1894_vm2, %v1596_v58, 0  ;;  %v7362_v58 = vld [vmem:[#allocation7 + $0x6c] sm:$0xf] }
  0x9e   :  { %v8032_v7 = vpack.c.bf16 %v119_v3, %v119_v3  ;;  %v1950_v3 = vsel %vm1894_vm2, %v1595_v57, 0 }
  0xa0   :  { %7192 = vmatmul.msk.bf16.vlgmr.msra.gmra.mxu1 %vm91_vm1, %v8032_v7  ;;  %7193 = vmatmul.msk.bf16.vlgmr.msra.gmra.mxu2 %vm91_vm1, %v8032_v7 }
  0xa1   :  { %7194 = vmatmul.msk.bf16.vlgmr.msra.gmra.mxu3 %vm91_vm1, %v8032_v7  ;;  %7195 = vmatmul.msk.bf16.vlgmr.msrb.gmra.mxu0 %vm91_vm1, %v8032_v7 }
  0xa2   :  { %2476 = vmatpush.bf16.msra.mxu1 %v1920_v11  ;;  %2489 = vmatpush.bf16.msra.mxu2 %v1923_v12  ;;  %v6643_v11 = vor.u32 %v7358_v5, %v6640_v6  ;;  %v289_v12 = vld [vmem:[#allocation7 + $0x538] sm:$0x33]  ;;  %v1294_v5 = vunpack.c.h.b16 %v294_v1 }
  0xa3   :  { %2502 = vmatpush.bf16.msra.mxu3 %v1926_v15  ;;  %2515 = vmatpush.bf16.msrb.mxu0 %v1929_v16  ;;  %v1283_v14 = vunpack.c.l.b16 %v289_v12  ;;  %v1284_v15 = vunpack.c.h.b16 %v289_v12  ;;  %v1285_v16 = vunpack.c.l.b16 %v290_v13  ;;  %v7441_v12 = vld [vmem:[#allocation7 + $0x2e0] sm:$0xf0]  ;;  %v7363_v13 = vld [vmem:[#allocation7 + $0x74] sm:$0xf] }
  0xa5   :  { %v1597_v18 = vpack.c.b16 %v1283_v14, %v1283_v14  ;;  %v6680_v14 = vld [vmem:[#allocation7 + $0x2e4] sm:$0xf0] }
  0xa6   :  { %2477 = vmatpush.bf16.msra.mxu1 %v6599_v19  ;;  %2490 = vmatpush.bf16.msra.mxu2 %v6603_v20  ;;  %v1598_v19 = vpack.c.b16 %v1284_v15, %v1284_v15  ;;  %v1599_v20 = vpack.c.b16 %v1285_v16, %v1285_v16  ;;  %v6683_v24 = vor.u32 %v7363_v13, %v6680_v14 }
  0xa7   :  { %2503 = vmatpush.bf16.msra.mxu3 %v6607_v21  ;;  %2516 = vmatpush.bf16.msrb.mxu0 %v6611_v22  ;;  %v1600_v21 = vpack.c.b16 %v1286_v17, %v1286_v17  ;;  %v6646_v22 = vld [vmem:[#allocation7 + $0x50] sm:$0xf]  ;;  %v1956_v26 = vsel %vm1894_vm2, %v1597_v18, 0  ;;  %v6686_v17 = vld [vmem:[#allocation7 + $0x78] sm:$0xf] }
  0xa8   :  { %v1959_v27 = vsel %vm1894_vm2, %v1598_v19, 0  ;;  %v1962_v30 = vsel %vm1894_vm2, %v1599_v20, 0  ;;  %v6647_v34 = vor.u32 %v7437_v23, %v6646_v22  ;;  %v7442_v18 = vld [vmem:[#allocation7 + $0x2e8] sm:$0xf0]  ;;  %v6688_v22 = vld [vmem:[#allocation7 + $0x2ec] sm:$0xf0] }
  0xa9   :  { %v1965_v31 = vsel %vm1894_vm2, %v1600_v21, 0  ;;  %v7364_v21 = vld [vmem:[#allocation7 + $0x7c] sm:$0xf]  ;;  %v6687_v25 = vor.u32 %v7442_v18, %v6686_v17  ;;  %v300_v17 = vld [vmem:[#allocation7 + $0x590] sm:$0x33] }
  0xb0   :  { %7196 = vmatmul.msk.bf16.vlgmr.msrb.gmra.mxu1 %vm91_vm1, %v8032_v7  ;;  %7197 = vmatmul.msk.bf16.vlgmr.msrb.gmra.mxu2 %vm91_vm1, %v8032_v7 }
  0xb1   :  { %7198 = vmatmul.msk.bf16.vlgmr.msrb.gmra.mxu3 %vm91_vm1, %v8032_v7  ;;  %7199 = vmatmul.msk.bf16.vlgmr.msra.gmra.mxu0 %vm91_vm1, %v8032_v7 }
  0xb2   :  { %2528 = vmatpush.bf16.msrb.mxu1 %v1932_v37  ;;  %2541 = vmatpush.bf16.msrb.mxu2 %v1935_v38  ;;  %v6659_v37 = vor.u32 %v7360_v32, %v6656_v33  ;;  %v291_v38 = vld [vmem:[#allocation7 + $0x548] sm:$0x33]  ;;  %v1298_v32 = vunpack.c.h.b16 %v296_v28 }
  0xb3   :  { %2554 = vmatpush.bf16.msrb.mxu3 %v1938_v41  ;;  %2567 = vmatpush.bf16.msra.mxu0 %v1941_v42  ;;  %v1287_v40 = vunpack.c.l.b16 %v291_v38  ;;  %v1288_v41 = vunpack.c.h.b16 %v291_v38  ;;  %v1289_v42 = vunpack.c.l.b16 %v292_v39  ;;  %v7443_v39 = vld [vmem:[#allocation7 + $0x2f0] sm:$0xf0] }
  0xb5   :  { %v1601_v44 = vpack.c.b16 %v1287_v40, %v1287_v40 }
  0xb6   :  { %2529 = vmatpush.bf16.msrb.mxu1 %v6615_v45  ;;  %2542 = vmatpush.bf16.msrb.mxu2 %v6619_v46  ;;  %v1602_v45 = vpack.c.b16 %v1288_v41, %v1288_v41  ;;  %v1603_v46 = vpack.c.b16 %v1289_v42, %v1289_v42 }
  0xb7   :  { %2555 = vmatpush.bf16.msrb.mxu3 %v6623_v47  ;;  %2568 = vmatpush.bf16.msra.mxu0 %v6627_v48  ;;  %v1604_v47 = vpack.c.b16 %v1290_v43, %v1290_v43  ;;  %v6662_v48 = vld [vmem:[#allocation7 + $0x60] sm:$0xf]  ;;  %v1968_v52 = vsel %vm1894_vm2, %v1601_v44, 0  ;;  %v7365_v43 = vld [vmem:[#allocation7 + $0x84] sm:$0xf] }
  0xb8   :  { %v1971_v53 = vsel %vm1894_vm2, %v1602_v45, 0  ;;  %v1974_v56 = vsel %vm1894_vm2, %v1603_v46, 0  ;;  %v6663_v60 = vor.u32 %v7439_v49, %v6662_v48  ;;  %v6696_v44 = vld [vmem:[#allocation7 + $0x2f4] sm:$0xf0]  ;;  %v6702_v45 = vld [vmem:[#allocation7 + $0x88] sm:$0xf] }
  0xb9   :  { %v1977_v57 = vsel %vm1894_vm2, %v1604_v47, 0  ;;  %v7444_v46 = vld [vmem:[#allocation7 + $0x2f8] sm:$0xf0]  ;;  %v7366_v47 = vld [vmem:[#allocation7 + $0x8c] sm:$0xf]  ;;  %v6699_v50 = vor.u32 %v7365_v43, %v6696_v44 }
  0xba   :  { %v6704_v48 = vld [vmem:[#allocation7 + $0x2fc] sm:$0xf0]  ;;  %v6703_v51 = vor.u32 %v7444_v46, %v6702_v45  ;;  %v301_v45 = vld [vmem:[#allocation7 + $0x598] sm:$0x33] }
  0xc0   :  { %7200 = vmatmul.msk.bf16.vlgmr.msra.gmra.mxu1 %vm91_vm1, %v8032_v7  ;;  %7201 = vmatmul.msk.bf16.vlgmr.msra.gmra.mxu2 %vm91_vm1, %v8032_v7 }
  0xc1   :  { %7202 = vmatmul.msk.bf16.vlgmr.msra.gmra.mxu3 %vm91_vm1, %v8032_v7  ;;  %7203 = vmatmul.msk.bf16.vlgmr.msrb.gmra.mxu0 %vm91_vm1, %v8032_v7 }
  0xc2   :  { %2580 = vmatpush.bf16.msra.mxu1 %v1944_v63  ;;  %2593 = vmatpush.bf16.msra.mxu2 %v1947_v0  ;;  %v6675_v63 = vor.u32 %v7362_v58, %v6672_v59  ;;  %v293_v0 = vld [vmem:[#allocation7 + $0x558] sm:$0x33]  ;;  %v1302_v58 = vunpack.c.h.b16 %v298_v54 }
  0xc3   :  { %2606 = vmatpush.bf16.msra.mxu3 %v1950_v3  ;;  %2619 = vmatpush.bf16.msrb.mxu0 %v1953_v4  ;;  %v1291_v2 = vunpack.c.l.b16 %v293_v0  ;;  %v1292_v3 = vunpack.c.h.b16 %v293_v0  ;;  %v1293_v4 = vunpack.c.l.b16 %v294_v1  ;;  %v7445_v1 = vld [vmem:[#allocation7 + $0x300] sm:$0xf0] }
  0xc5   :  { %v1605_v6 = vpack.c.b16 %v1291_v2, %v1291_v2 }
  0xc6   :  { %2581 = vmatpush.bf16.msra.mxu1 %v6631_v8  ;;  %2594 = vmatpush.bf16.msra.mxu2 %v6635_v9  ;;  %v1606_v8 = vpack.c.b16 %v1292_v3, %v1292_v3  ;;  %v1607_v9 = vpack.c.b16 %v1293_v4, %v1293_v4 }
  0xc7   :  { %2607 = vmatpush.bf16.msra.mxu3 %v6639_v10  ;;  %2620 = vmatpush.bf16.msrb.mxu0 %v6643_v11  ;;  %v1608_v10 = vpack.c.b16 %v1294_v5, %v1294_v5  ;;  %v6678_v11 = vld [vmem:[#allocation7 + $0x70] sm:$0xf]  ;;  %v1980_v15 = vsel %vm1894_vm2, %v1605_v6, 0  ;;  %v7367_v5 = vld [vmem:[#allocation7 + $0x94] sm:$0xf] }
  0xc8   :  { %v1983_v16 = vsel %vm1894_vm2, %v1606_v8, 0  ;;  %v1986_v19 = vsel %vm1894_vm2, %v1607_v9, 0  ;;  %v6679_v23 = vor.u32 %v7441_v12, %v6678_v11  ;;  %v6712_v6 = vld [vmem:[#allocation7 + $0x304] sm:$0xf0]  ;;  %v6718_v8 = vld [vmem:[#allocation7 + $0x98] sm:$0xf] }
  0xc9   :  { %v1989_v20 = vsel %vm1894_vm2, %v1608_v10, 0  ;;  %v7446_v9 = vld [vmem:[#allocation7 + $0x308] sm:$0xf0]  ;;  %v7368_v10 = vld [vmem:[#allocation7 + $0x9c] sm:$0xf]  ;;  %v6715_v13 = vor.u32 %v7367_v5, %v6712_v6 }
  0xca   :  { %v6720_v11 = vld [vmem:[#allocation7 + $0x30c] sm:$0xf0]  ;;  %v6719_v14 = vor.u32 %v7446_v9, %v6718_v8  ;;  %v6744_v5 = vld [vmem:[#allocation7 + $0x324] sm:$0xf0]  ;;  %v6750_v6 = vld [vmem:[#allocation7 + $0xb8] sm:$0xf] }
  0xcb   :  { %v7450_v8 = vld [vmem:[#allocation7 + $0x328] sm:$0xf0]  ;;  %v7372_v9 = vld [vmem:[#allocation7 + $0xbc] sm:$0xf] }
  0xd0   :  { %7204 = vmatmul.msk.bf16.vlgmr.msrb.gmra.mxu1 %vm91_vm1, %v8032_v7  ;;  %7205 = vmatmul.msk.bf16.vlgmr.msrb.gmra.mxu2 %vm91_vm1, %v8032_v7 }
  0xd1   :  { %7206 = vmatmul.msk.bf16.vlgmr.msrb.gmra.mxu3 %vm91_vm1, %v8032_v7  ;;  %7207 = vmatmul.msk.bf16.vlgmr.msra.gmra.mxu0 %vm91_vm1, %v8032_v7 }
  0xd2   :  { %2632 = vmatpush.bf16.msrb.mxu1 %v1956_v26  ;;  %2645 = vmatpush.bf16.msrb.mxu2 %v1959_v27  ;;  %v6691_v26 = vor.u32 %v7364_v21, %v6688_v22  ;;  %v295_v27 = vld [vmem:[#allocation7 + $0x568] sm:$0x33]  ;;  %v1306_v21 = vunpack.c.h.b16 %v300_v17 }
  0xd3   :  { %2658 = vmatpush.bf16.msrb.mxu3 %v1962_v30  ;;  %2671 = vmatpush.bf16.msra.mxu0 %v1965_v31  ;;  %v1295_v29 = vunpack.c.l.b16 %v295_v27  ;;  %v1296_v30 = vunpack.c.h.b16 %v295_v27  ;;  %v1297_v31 = vunpack.c.l.b16 %v296_v28  ;;  %v6726_v27 = vld [vmem:[#allocation7 + $0xa0] sm:$0xf] }
  0xd5   :  { %v1609_v33 = vpack.c.b16 %v1295_v29, %v1295_v29 }
  0xd6   :  { %2633 = vmatpush.bf16.msrb.mxu1 %v6647_v34  ;;  %2646 = vmatpush.bf16.msrb.mxu2 %v6651_v35  ;;  %v1610_v34 = vpack.c.b16 %v1296_v30, %v1296_v30  ;;  %v1611_v35 = vpack.c.b16 %v1297_v31, %v1297_v31  ;;  %v7447_v30 = vld [vmem:[#allocation7 + $0x310] sm:$0xf0] }
  0xd7   :  { %2659 = vmatpush.bf16.msrb.mxu3 %v6655_v36  ;;  %2672 = vmatpush.bf16.msra.mxu0 %v6659_v37  ;;  %v1612_v36 = vpack.c.b16 %v1298_v32, %v1298_v32  ;;  %v6694_v37 = vld [vmem:[#allocation7 + $0x80] sm:$0xf]  ;;  %v1992_v38 = vsel %vm1894_vm2, %v1609_v33, 0 }
  0xd8   :  { %v1995_v40 = vsel %vm1894_vm2, %v1610_v34, 0  ;;  %v1998_v41 = vsel %vm1894_vm2, %v1611_v35, 0  ;;  %v6695_v49 = vor.u32 %v7443_v39, %v6694_v37  ;;  %v7369_v34 = vld [vmem:[#allocation7 + $0xa4] sm:$0xf]  ;;  %v6728_v35 = vld [vmem:[#allocation7 + $0x314] sm:$0xf0] }
  0xd9   :  { %v2001_v42 = vsel %vm1894_vm2, %v1612_v36, 0  ;;  %v6734_v36 = vld [vmem:[#allocation7 + $0xa8] sm:$0xf]  ;;  %v7448_v37 = vld [vmem:[#allocation7 + $0x318] sm:$0xf0] }
  0xda   :  { %v6736_v39 = vld [vmem:[#allocation7 + $0x31c] sm:$0xf0]  ;;  %v6735_v43 = vor.u32 %v7448_v37, %v6734_v36  ;;  %v7451_v37 = vld [vmem:[#allocation7 + $0x330] sm:$0xf0] }
  0xe0   :  { %7208 = vmatmul.msk.bf16.vlgmr.msra.gmra.mxu1 %vm91_vm1, %v8032_v7  ;;  %7209 = vmatmul.msk.bf16.vlgmr.msra.gmra.mxu2 %vm91_vm1, %v8032_v7 }
  0xe1   :  { %7210 = vmatmul.msk.bf16.vlgmr.msra.gmra.mxu3 %vm91_vm1, %v8032_v7  ;;  %7211 = vmatmul.msk.bf16.vlgmr.msrb.gmra.mxu0 %vm91_vm1, %v8032_v7 }
  0xe2   :  { %2684 = vmatpush.bf16.msra.mxu1 %v1968_v52  ;;  %2697 = vmatpush.bf16.msra.mxu2 %v1971_v53  ;;  %v6707_v52 = vor.u32 %v7366_v47, %v6704_v48  ;;  %v297_v53 = vld [vmem:[#allocation7 + $0x578] sm:$0x33]  ;;  %v302_v47 = vld [vmem:[#allocation7 + $0x5a0] sm:$0x33] }
  0xe3   :  { %2710 = vmatpush.bf16.msra.mxu3 %v1974_v56  ;;  %2723 = vmatpush.bf16.msrb.mxu0 %v1977_v57  ;;  %v1299_v55 = vunpack.c.l.b16 %v297_v53  ;;  %v1300_v56 = vunpack.c.h.b16 %v297_v53  ;;  %v1301_v57 = vunpack.c.l.b16 %v298_v54  ;;  %v1310_v53 = vunpack.c.h.b16 %v302_v47 }
  0xe5   :  { %v1613_v59 = vpack.c.b16 %v1299_v55, %v1299_v55 }
  0xe6   :  { %2685 = vmatpush.bf16.msra.mxu1 %v6663_v60  ;;  %2698 = vmatpush.bf16.msra.mxu2 %v6667_v61  ;;  %v1614_v60 = vpack.c.b16 %v1300_v56, %v1300_v56  ;;  %v1615_v61 = vpack.c.b16 %v1301_v57, %v1301_v57  ;;  %v1624_v57 = vpack.c.b16 %v1310_v53, %v1310_v53 }
  0xe7   :  { %2711 = vmatpush.bf16.msra.mxu3 %v6671_v62  ;;  %2724 = vmatpush.bf16.msrb.mxu0 %v6675_v63  ;;  %v1616_v62 = vpack.c.b16 %v1302_v58, %v1302_v58  ;;  %v6710_v63 = vld [vmem:[#allocation7 + $0x90] sm:$0xf]  ;;  %v2004_v0 = vsel %vm1894_vm2, %v1613_v59, 0 }
  0xe8   :  { %v2007_v2 = vsel %vm1894_vm2, %v1614_v60, 0  ;;  %v2010_v3 = vsel %vm1894_vm2, %v1615_v61, 0  ;;  %v6711_v12 = vor.u32 %v7445_v1, %v6710_v63  ;;  %v6742_v61 = vld [vmem:[#allocation7 + $0xb0] sm:$0xf] }
  0xe9   :  { %v2013_v4 = vsel %vm1894_vm2, %v1616_v62, 0 }
  0xf0   :  { %7212 = vmatmul.msk.bf16.vlgmr.msrb.gmra.mxu1 %vm91_vm1, %v8032_v7  ;;  %7213 = vmatmul.msk.bf16.vlgmr.msrb.gmra.mxu2 %vm91_vm1, %v8032_v7 }
  0xf1   :  { %7214 = vmatmul.msk.bf16.vlgmr.msrb.gmra.mxu3 %vm91_vm1, %v8032_v7  ;;  %7215 = vmatmul.msk.bf16.vlgmr.msra.gmra.mxu0 %vm91_vm1, %v8032_v7 }
  0xf2   :  { %2736 = vmatpush.bf16.msrb.mxu1 %v1980_v15  ;;  %2749 = vmatpush.bf16.msrb.mxu2 %v1983_v16  ;;  %v6723_v15 = vor.u32 %v7368_v10, %v6720_v11  ;;  %v299_v16 = vld [vmem:[#allocation7 + $0x588] sm:$0x33]  ;;  %v6752_v10 = vld [vmem:[#allocation7 + $0x32c] sm:$0xf0] }
  0xf3   :  { %2762 = vmatpush.bf16.msrb.mxu3 %v1986_v19  ;;  %2775 = vmatpush.bf16.msra.mxu0 %v1989_v20  ;;  %v1303_v18 = vunpack.c.l.b16 %v299_v16  ;;  %v1304_v19 = vunpack.c.h.b16 %v299_v16  ;;  %v1305_v20 = vunpack.c.l.b16 %v300_v17  ;;  %v303_v16 = vld [vmem:[#allocation7 + $0x5a8] sm:$0x33] }
  0xf5   :  { %v1617_v22 = vpack.c.b16 %v1303_v18, %v1303_v18  ;;  %v304_v18 = vld [vmem:[#allocation7 + $0x5b0] sm:$0x33] }
  0xf6   :  { %2737 = vmatpush.bf16.msrb.mxu1 %v6679_v23  ;;  %2750 = vmatpush.bf16.msrb.mxu2 %v6683_v24  ;;  %v1618_v23 = vpack.c.b16 %v1304_v19, %v1304_v19  ;;  %v1619_v24 = vpack.c.b16 %v1305_v20, %v1305_v20 }
  0xf7   :  { %2763 = vmatpush.bf16.msrb.mxu3 %v6687_v25  ;;  %2776 = vmatpush.bf16.msra.mxu0 %v6691_v26  ;;  %v1620_v25 = vpack.c.b16 %v1306_v21, %v1306_v21  ;;  %v2016_v29 = vsel %vm1894_vm2, %v1617_v22, 0  ;;  %v1311_v21 = vunpack.c.l.b16 %v303_v16  ;;  %v1312_v22 = vunpack.c.h.b16 %v303_v16 }
  0xf8   :  { %v2019_v31 = vsel %vm1894_vm2, %v1618_v23, 0  ;;  %v2022_v32 = vsel %vm1894_vm2, %v1619_v24, 0  ;;  %v1313_v23 = vunpack.c.l.b16 %v304_v18  ;;  %v1314_v24 = vunpack.c.h.b16 %v304_v18  ;;  %v7375_v18 = vld [vmem:[#allocation7 + $0xd4] sm:$0xf] }
  0xf9   :  { %v2025_v33 = vsel %vm1894_vm2, %v1620_v25, 0  ;;  %v1625_v25 = vpack.c.b16 %v1311_v21, %v1311_v21  ;;  %v7454_v21 = vld [vmem:[#allocation7 + $0x348] sm:$0xf0] }
  0xfb   :  { %v2040_v36 = vsel %vm1894_vm2, %v1625_v25, 0 }
 0x100   :  { %7216 = vmatmul.msk.bf16.vlgmr.msra.gmra.mxu1 %vm91_vm1, %v8032_v7  ;;  %7217 = vmatmul.msk.bf16.vlgmr.msra.gmra.mxu2 %vm91_vm1, %v8032_v7 }
 0x101   :  { %7218 = vmatmul.msk.bf16.vlgmr.msra.gmra.mxu3 %vm91_vm1, %v8032_v7  ;;  %7219 = vmatmul.msk.bf16.vlgmr.msrb.gmra.mxu0 %vm91_vm1, %v8032_v7 }
 0x102   :  { %2788 = vmatpush.bf16.msra.mxu1 %v1992_v38  ;;  %2801 = vmatpush.bf16.msra.mxu2 %v1995_v40  ;;  %v7370_v38 = vld [vmem:[#allocation7 + $0xac] sm:$0xf]  ;;  %v6727_v40 = vor.u32 %v7447_v30, %v6726_v27  ;;  %v1626_v27 = vpack.c.b16 %v1312_v22, %v1312_v22  ;;  %v1628_v30 = vpack.c.b16 %v1314_v24, %v1314_v24  ;;  %v7376_v22 = vld [vmem:[#allocation7 + $0xdc] sm:$0xf] }
 0x103   :  { %2814 = vmatpush.bf16.msra.mxu3 %v1998_v41  ;;  %2827 = vmatpush.bf16.msrb.mxu0 %v2001_v42  ;;  %v6731_v41 = vor.u32 %v7369_v34, %v6728_v35  ;;  %v6739_v44 = vor.u32 %v7370_v38, %v6736_v39  ;;  %v6758_v34 = vld [vmem:[#allocation7 + $0xc0] sm:$0xf] }
 0x104   :  { %v2043_v38 = vsel %vm1894_vm2, %v1626_v27, 0 }
 0x106   :  { %2789 = vmatpush.bf16.msra.mxu1 %v6695_v49  ;;  %2802 = vmatpush.bf16.msra.mxu2 %v6699_v50  ;;  %v1307_v50 = vunpack.c.l.b16 %v301_v45 }
 0x107   :  { %2815 = vmatpush.bf16.msra.mxu3 %v6703_v51  ;;  %2828 = vmatpush.bf16.msrb.mxu0 %v6707_v52  ;;  %v1308_v51 = vunpack.c.h.b16 %v301_v45  ;;  %v1309_v52 = vunpack.c.l.b16 %v302_v47  ;;  %v7452_v45 = vld [vmem:[#allocation7 + $0x338] sm:$0xf0]  ;;  %v7374_v47 = vld [vmem:[#allocation7 + $0xcc] sm:$0xf] }
 0x108   :  { %v1621_v54 = vpack.c.b16 %v1307_v50, %v1307_v50 }
 0x109   :  { %v1622_v55 = vpack.c.b16 %v1308_v51, %v1308_v51  ;;  %v1623_v56 = vpack.c.b16 %v1309_v52, %v1309_v52 }
 0x10a   :  { %v2028_v63 = vsel %vm1894_vm2, %v1621_v54, 0  ;;  %v305_v54 = vld [vmem:[#allocation7 + $0x5b8] sm:$0x33] }
 0x10b   :  { %v2031_v1 = vsel %vm1894_vm2, %v1622_v55, 0 }
 0x110   :  { %7220 = vmatmul.msk.bf16.vlgmr.msrb.gmra.mxu1 %vm91_vm1, %v8032_v7  ;;  %7221 = vmatmul.msk.bf16.vlgmr.msrb.gmra.mxu2 %vm91_vm1, %v8032_v7 }
 0x111   :  { %7222 = vmatmul.msk.bf16.vlgmr.msrb.gmra.mxu3 %vm91_vm1, %v8032_v7  ;;  %7223 = vmatmul.msk.bf16.vlgmr.msra.gmra.mxu0 %vm91_vm1, %v8032_v7 }
 0x112   :  { %2840 = vmatpush.bf16.msrb.mxu1 %v2004_v0  ;;  %2853 = vmatpush.bf16.msrb.mxu2 %v2007_v2  ;;  %v7449_v0 = vld [vmem:[#allocation7 + $0x320] sm:$0xf0]  ;;  %v2034_v2 = vsel %vm1894_vm2, %v1623_v56, 0 }
 0x113   :  { %2866 = vmatpush.bf16.msrb.mxu3 %v2010_v3  ;;  %2879 = vmatpush.bf16.msra.mxu0 %v2013_v4  ;;  %v2037_v3 = vsel %vm1894_vm2, %v1624_v57, 0  ;;  %v7371_v4 = vld [vmem:[#allocation7 + $0xb4] sm:$0xf]  ;;  %v6743_v11 = vor.u32 %v7449_v0, %v6742_v61  ;;  %v306_v56 = vld [vmem:[#allocation7 + $0x5c0] sm:$0x33]  ;;  %v1316_v61 = vunpack.c.h.b16 %v305_v54 }
 0x114   :  { %v1318_v0 = vunpack.c.h.b16 %v306_v56 }
 0x116   :  { %2841 = vmatpush.bf16.msrb.mxu1 %v6711_v12  ;;  %2854 = vmatpush.bf16.msrb.mxu2 %v6715_v13  ;;  %v6747_v12 = vor.u32 %v7371_v4, %v6744_v5  ;;  %v1632_v4 = vpack.c.b16 %v1318_v0, %v1318_v0  ;;  %v6798_v0 = vld [vmem:[#allocation7 + $0xe8] sm:$0xf] }
 0x117   :  { %2867 = vmatpush.bf16.msrb.mxu3 %v6719_v14  ;;  %2880 = vmatpush.bf16.msra.mxu0 %v6723_v15  ;;  %v6751_v14 = vor.u32 %v7450_v8, %v6750_v6  ;;  %v6755_v15 = vor.u32 %v7372_v9, %v6752_v10  ;;  %v6774_v9 = vld [vmem:[#allocation7 + $0xd0] sm:$0xf] }
 0x118   :  { %v2061_v16 = vsel %vm1894_vm2, %v1632_v4, 0 }
 0x11d   :  { %v8130_v26 = vpop.f32.mrf.mxu1 }
 0x11e   :  { %v8132_v28 = vpop.f32.mrf.mxu0 }
 0x120   :  { %7224 = vmatmul.msk.bf16.vlgmr.msra.gmra.mxu1 %vm91_vm1, %v8032_v7  ;;  %7225 = vmatmul.msk.bf16.vlgmr.msra.gmra.mxu2 %vm91_vm1, %v8032_v7 }
 0x121   :  { %7226 = vmatmul.msk.bf16.vlgmr.msra.gmra.mxu3 %vm91_vm1, %v8032_v7  ;;  %7227 = vmatmul.msk.bf16.vlgmr.msrb.gmra.mxu0 %vm91_vm1, %v8032_v7 }
 0x122   :  { %2892 = vmatpush.bf16.msra.mxu1 %v2016_v29  ;;  %2905 = vmatpush.bf16.msra.mxu2 %v2019_v31  ;;  %v1627_v29 = vpack.c.b16 %v1313_v23, %v1313_v23  ;;  %v6784_v23 = vld [vmem:[#allocation7 + $0x34c] sm:$0xf0] }
 0x123   :  { %v8146_v42 = vpop.f32.mrf.mxu2  ;;  %2918 = vmatpush.bf16.msra.mxu3 %v2022_v32  ;;  %2931 = vmatpush.bf16.msrb.mxu0 %v2025_v33 }
 0x124   :  { %v8148_v46 = vpop.f32.mrf.mxu3  ;;  %v2046_v39 = vsel %vm1894_vm2, %v1627_v29, 0 }
 0x125   :  { %v2377_v48 = vpop.f32.mrf.mxu1 }
 0x126   :  { %v2416_v49 = vpop.f32.mrf.mxu0  ;;  %2893 = vmatpush.bf16.msra.mxu1 %v6727_v40  ;;  %2906 = vmatpush.bf16.msra.mxu2 %v6731_v41  ;;  %v2049_v40 = vsel %vm1894_vm2, %v1628_v30, 0  ;;  %v7373_v41 = vld [vmem:[#allocation7 + $0xc4] sm:$0xf]  ;;  %v6768_v48 = vld [vmem:[#allocation7 + $0x33c] sm:$0xf0]  ;;  %v6787_v30 = vor.u32 %v7376_v22, %v6784_v23 }
 0x127   :  { %2919 = vmatpush.bf16.msra.mxu3 %v6735_v43  ;;  %2932 = vmatpush.bf16.msrb.mxu0 %v6739_v44  ;;  %v6760_v43 = vld [vmem:[#allocation7 + $0x334] sm:$0xf0]  ;;  %v6766_v44 = vld [vmem:[#allocation7 + $0xc8] sm:$0xf]  ;;  %v6759_v49 = vor.u32 %v7451_v37, %v6758_v34  ;;  %v6771_v53 = vor.u32 %v7374_v47, %v6768_v48  ;;  %v308_v34 = vld [vmem:[#allocation7 + $0x5d0] sm:$0x33] }
 0x128   :  { %v6763_v50 = vor.u32 %v7373_v41, %v6760_v43  ;;  %v6767_v52 = vor.u32 %v7452_v45, %v6766_v44  ;;  %v1322_v41 = vunpack.c.h.b16 %v308_v34 }
 0x12a   :  { %v1636_v47 = vpack.c.b16 %v1322_v41, %v1322_v41 }
 0x12b   :  { %v2390_v58 = vpop.f32.mrf.mxu2 }
 0x12c   :  { %v2403_v59 = vpop.f32.mrf.mxu3 }
 0x12d   :  { %v8150_v60 = vpop.f32.mrf.mxu1  ;;  %v1315_v59 = vunpack.c.l.b16 %v305_v54 }
 0x12e   :  { %v8152_v62 = vpop.f32.mrf.mxu0 }
 0x130   :  { %7228 = vmatmul.msk.bf16.vlgmr.msrb.gmra.mxu1 %vm91_vm1, %v8032_v7  ;;  %7229 = vmatmul.msk.bf16.vlgmr.msrb.gmra.mxu2 %vm91_vm1, %v8032_v7 }
 0x131   :  { %7230 = vmatmul.msk.bf16.vlgmr.msrb.gmra.mxu3 %vm91_vm1, %v8032_v7  ;;  %7231 = vmatmul.msk.bf16.vlgmr.msra.gmra.mxu0 %vm91_vm1, %v8032_v7 }
 0x132   :  { %2944 = vmatpush.bf16.msrb.mxu1 %v2028_v63  ;;  %2957 = vmatpush.bf16.msrb.mxu2 %v2031_v1  ;;  %v1317_v63 = vunpack.c.l.b16 %v306_v56  ;;  %v1629_v1 = vpack.c.b16 %v1315_v59, %v1315_v59  ;;  %v7455_v56 = vld [vmem:[#allocation7 + $0x350] sm:$0xf0]  ;;  %v2073_v59 = vsel %vm1894_vm2, %v1636_v47, 0  ;;  %v6814_v47 = vld [vmem:[#allocation7 + $0xf8] sm:$0xf] }
 0x133   :  { %v8166_v13 = vpop.f32.mrf.mxu2  ;;  %2970 = vmatpush.bf16.msrb.mxu3 %v2034_v2  ;;  %2983 = vmatpush.bf16.msra.mxu0 %v2037_v3  ;;  %v1630_v2 = vpack.c.b16 %v1316_v61, %v1316_v61  ;;  %v7377_v61 = vld [vmem:[#allocation7 + $0xe4] sm:$0xf] }
 0x134   :  { %v8168_v17 = vpop.f32.mrf.mxu3  ;;  %v1631_v3 = vpack.c.b16 %v1317_v63, %v1317_v63  ;;  %v6792_v63 = vld [vmem:[#allocation7 + $0x354] sm:$0xf0] }
 0x135   :  { %v2429_v19 = vpop.f32.mrf.mxu1 }
 0x136   :  { %v2468_v20 = vpop.f32.mrf.mxu0  ;;  %2945 = vmatpush.bf16.msrb.mxu1 %v6743_v11  ;;  %2958 = vmatpush.bf16.msrb.mxu2 %v6747_v12  ;;  %v2052_v11 = vsel %vm1894_vm2, %v1629_v1, 0  ;;  %v7453_v12 = vld [vmem:[#allocation7 + $0x340] sm:$0xf0]  ;;  %v6776_v19 = vld [vmem:[#allocation7 + $0x344] sm:$0xf0] }
 0x137   :  { %2971 = vmatpush.bf16.msrb.mxu3 %v6751_v14  ;;  %2984 = vmatpush.bf16.msra.mxu0 %v6755_v15  ;;  %v2055_v14 = vsel %vm1894_vm2, %v1630_v2, 0  ;;  %v2058_v15 = vsel %vm1894_vm2, %v1631_v3, 0  ;;  %v6782_v20 = vld [vmem:[#allocation7 + $0xd8] sm:$0xf]  ;;  %v6775_v24 = vor.u32 %v7453_v12, %v6774_v9  ;;  %v6779_v25 = vor.u32 %v7375_v18, %v6776_v19  ;;  %v7456_v1 = vld [vmem:[#allocation7 + $0x358] sm:$0xf0] }
 0x138   :  { %v6783_v29 = vor.u32 %v7454_v21, %v6782_v20  ;;  %v7378_v2 = vld [vmem:[#allocation7 + $0xec] sm:$0xf]  ;;  %v6800_v3 = vld [vmem:[#allocation7 + $0x35c] sm:$0xf0]  ;;  %v6799_v9 = vor.u32 %v7456_v1, %v6798_v0  ;;  %v309_v12 = vld [vmem:[#allocation7 + $0x5d8] sm:$0x33] }
 0x139   :  { %v1323_v19 = vunpack.c.l.b16 %v309_v12  ;;  %v1324_v20 = vunpack.c.h.b16 %v309_v12  ;;  %v312_v0 = vld [vmem:[#allocation7 + $0x5f0] sm:$0x33] }
 0x13b   :  { %v2442_v31 = vpop.f32.mrf.mxu2  ;;  %v1637_v23 = vpack.c.b16 %v1323_v19, %v1323_v19 }
 0x13c   :  { %v2455_v32 = vpop.f32.mrf.mxu3  ;;  %v307_v31 = vld [vmem:[#allocation7 + $0x5c8] sm:$0x33] }
 0x13d   :  { %v8170_v33 = vpop.f32.mrf.mxu1 }
 0x13e   :  { %v8172_v35 = vpop.f32.mrf.mxu0 }
 0x140   :  { %7232 = vmatmul.msk.bf16.vlgmr.msra.gmra.mxu1 %vm91_vm1, %v8032_v7  ;;  %7233 = vmatmul.msk.bf16.vlgmr.msra.gmra.mxu2 %vm91_vm1, %v8032_v7 }
 0x141   :  { %7234 = vmatmul.msk.bf16.vlgmr.msra.gmra.mxu3 %vm91_vm1, %v8032_v7  ;;  %7235 = vmatmul.msk.bf16.vlgmr.msrb.gmra.mxu0 %vm91_vm1, %v8032_v7 }
 0x142   :  { %2996 = vmatpush.bf16.msra.mxu1 %v2040_v36  ;;  %3009 = vmatpush.bf16.msra.mxu2 %v2043_v38  ;;  %v1319_v38 = vunpack.c.l.b16 %v307_v31 }
 0x143   :  { %v8186_v51 = vpop.f32.mrf.mxu2  ;;  %3022 = vmatpush.bf16.msra.mxu3 %v2046_v39  ;;  %3035 = vmatpush.bf16.msrb.mxu0 %v2049_v40  ;;  %v1320_v39 = vunpack.c.h.b16 %v307_v31  ;;  %v1321_v40 = vunpack.c.l.b16 %v308_v34 }
 0x144   :  { %v8188_v55 = vpop.f32.mrf.mxu3  ;;  %v1633_v43 = vpack.c.b16 %v1319_v38, %v1319_v38  ;;  %v2076_v38 = vsel %vm1894_vm2, %v1637_v23, 0 }
 0x145   :  { %v2481_v57 = vpop.f32.mrf.mxu1  ;;  %v1634_v44 = vpack.c.b16 %v1320_v39, %v1320_v39  ;;  %v1635_v45 = vpack.c.b16 %v1321_v40, %v1321_v40  ;;  %v7457_v39 = vld [vmem:[#allocation7 + $0x360] sm:$0xf0] }
 0x146   :  { %v2520_v58 = vpop.f32.mrf.mxu0  ;;  %2997 = vmatpush.bf16.msra.mxu1 %v6759_v49  ;;  %3010 = vmatpush.bf16.msra.mxu2 %v6763_v50  ;;  %v2064_v54 = vsel %vm1894_vm2, %v1633_v43, 0 }
 0x147   :  { %3023 = vmatpush.bf16.msra.mxu3 %v6767_v52  ;;  %3036 = vmatpush.bf16.msrb.mxu0 %v6771_v53  ;;  %v6790_v52 = vld [vmem:[#allocation7 + $0xe0] sm:$0xf]  ;;  %v2067_v57 = vsel %vm1894_vm2, %v1634_v44, 0  ;;  %v2070_v58 = vsel %vm1894_vm2, %v1635_v45, 0  ;;  %v7379_v44 = vld [vmem:[#allocation7 + $0xf4] sm:$0xf] }
 0x148   :  { %v6791_v4 = vor.u32 %v7455_v56, %v6790_v52  ;;  %v6808_v45 = vld [vmem:[#allocation7 + $0x364] sm:$0xf0]  ;;  %v6816_v52 = vld [vmem:[#allocation7 + $0x36c] sm:$0xf0] }
 0x149   :  { %v6811_v56 = vor.u32 %v7379_v44, %v6808_v45 }
 0x14b   :  { %v2494_v5 = vpop.f32.mrf.mxu2 }
 0x14c   :  { %v2507_v6 = vpop.f32.mrf.mxu3  ;;  %v6795_v5 = vor.u32 %v7377_v61, %v6792_v63  ;;  %v311_v61 = vld [vmem:[#allocation7 + $0x5e8] sm:$0x33] }
 0x14d   :  { %v8190_v8 = vpop.f32.mrf.mxu1 }
 0x14e   :  { %v8192_v10 = vpop.f32.mrf.mxu0 }
 0x150   :  { %7236 = vmatmul.msk.bf16.vlgmr.msrb.gmra.mxu1 %vm91_vm1, %v8032_v7  ;;  %7237 = vmatmul.msk.bf16.vlgmr.msrb.gmra.mxu2 %vm91_vm1, %v8032_v7 }
 0x151   :  { %7238 = vmatmul.msk.bf16.vlgmr.msrb.gmra.mxu3 %vm91_vm1, %v8032_v7  ;;  %7239 = vmatmul.msk.bf16.vlgmr.msra.gmra.mxu0 %vm91_vm1, %v8032_v7 }
 0x152   :  { %3048 = vmatpush.bf16.msrb.mxu1 %v2052_v11  ;;  %3061 = vmatpush.bf16.msrb.mxu2 %v2055_v14  ;;  %v6803_v11 = vor.u32 %v7378_v2, %v6800_v3  ;;  %v1327_v3 = vunpack.c.l.b16 %v311_v61 }
 0x153   :  { %v8206_v27 = vpop.f32.mrf.mxu2  ;;  %3074 = vmatpush.bf16.msrb.mxu3 %v2058_v15  ;;  %3087 = vmatpush.bf16.msra.mxu0 %v2061_v16  ;;  %v310_v15 = vld [vmem:[#allocation7 + $0x5e0] sm:$0x33] }
 0x154   :  { %v8208_v32 = vpop.f32.mrf.mxu3  ;;  %v1325_v21 = vunpack.c.l.b16 %v310_v15  ;;  %v1326_v22 = vunpack.c.h.b16 %v310_v15 }
 0x155   :  { %v2533_v36 = vpop.f32.mrf.mxu1 }
 0x156   :  { %v2572_v37 = vpop.f32.mrf.mxu0  ;;  %3049 = vmatpush.bf16.msrb.mxu1 %v6775_v24  ;;  %3062 = vmatpush.bf16.msrb.mxu2 %v6779_v25  ;;  %v1638_v24 = vpack.c.b16 %v1324_v20, %v1324_v20  ;;  %v1639_v25 = vpack.c.b16 %v1325_v21, %v1325_v21  ;;  %v6806_v36 = vld [vmem:[#allocation7 + $0xf0] sm:$0xf]  ;;  %v6822_v21 = vld [vmem:[#allocation7 + $0x100] sm:$0xf] }
 0x157   :  { %3075 = vmatpush.bf16.msrb.mxu3 %v6783_v29  ;;  %3088 = vmatpush.bf16.msra.mxu0 %v6787_v30  ;;  %v1640_v29 = vpack.c.b16 %v1326_v22, %v1326_v22 }
 0x158   :  { %v2079_v40 = vsel %vm1894_vm2, %v1638_v24, 0  ;;  %v2082_v41 = vsel %vm1894_vm2, %v1639_v25, 0  ;;  %v7459_v24 = vld [vmem:[#allocation7 + $0x370] sm:$0xf0] }
 0x159   :  { %v2085_v43 = vsel %vm1894_vm2, %v1640_v29, 0 }
 0x15b   :  { %v2546_v48 = vpop.f32.mrf.mxu2 }
 0x15c   :  { %v2559_v49 = vpop.f32.mrf.mxu3  ;;  %v7458_v48 = vld [vmem:[#allocation7 + $0x368] sm:$0xf0] }
 0x15d   :  { %v8210_v50 = vpop.f32.mrf.mxu1  ;;  %v7380_v49 = vld [vmem:[#allocation7 + $0xfc] sm:$0xf] }
 0x15e   :  { %v8212_v53 = vpop.f32.mrf.mxu0 }
 0x160   :  { %7240 = vmatmul.msk.bf16.vlgmr.msra.gmra.mxu1 %vm91_vm1, %v8032_v7  ;;  %7241 = vmatmul.msk.bf16.vlgmr.msra.gmra.mxu2 %vm91_vm1, %v8032_v7 }
 0x161   :  { %7242 = vmatmul.msk.bf16.vlgmr.msra.gmra.mxu3 %vm91_vm1, %v8032_v7  ;;  %7243 = vmatmul.msk.bf16.vlgmr.msrb.gmra.mxu0 %vm91_vm1, %v8032_v7 }
 0x162   :  { %3100 = vmatpush.bf16.msra.mxu1 %v2064_v54  ;;  %3113 = vmatpush.bf16.msra.mxu2 %v2067_v57  ;;  %v6807_v54 = vor.u32 %v7457_v39, %v6806_v36  ;;  %v6824_v36 = vld [vmem:[#allocation7 + $0x374] sm:$0xf0]  ;;  %v7460_v39 = vld [vmem:[#allocation7 + $0x378] sm:$0xf0] }
 0x163   :  { %v8226_v6 = vpop.f32.mrf.mxu2  ;;  %3126 = vmatpush.bf16.msra.mxu3 %v2070_v58  ;;  %3139 = vmatpush.bf16.msrb.mxu0 %v2073_v59  ;;  %v6815_v58 = vor.u32 %v7458_v48, %v6814_v47  ;;  %v6819_v59 = vor.u32 %v7380_v49, %v6816_v52  ;;  %v313_v49 = vld [vmem:[#allocation7 + $0x5f8] sm:$0x33] }
 0x164   :  { %v8228_v14 = vpop.f32.mrf.mxu3 }
 0x165   :  { %v2585_v16 = vpop.f32.mrf.mxu1 }
 0x166   :  { %v2624_v18 = vpop.f32.mrf.mxu0  ;;  %3101 = vmatpush.bf16.msra.mxu1 %v6791_v4  ;;  %3114 = vmatpush.bf16.msra.mxu2 %v6795_v5  ;;  %v1328_v4 = vunpack.c.h.b16 %v311_v61  ;;  %v1329_v5 = vunpack.c.l.b16 %v312_v0  ;;  %v1332_v61 = vunpack.c.h.b16 %v313_v49 }
 0x167   :  { %3127 = vmatpush.bf16.msra.mxu3 %v6799_v9  ;;  %3140 = vmatpush.bf16.msrb.mxu0 %v6803_v11  ;;  %v1330_v9 = vunpack.c.h.b16 %v312_v0  ;;  %v1641_v11 = vpack.c.b16 %v1327_v3, %v1327_v3 }
 0x168   :  { %v1642_v12 = vpack.c.b16 %v1328_v4, %v1328_v4  ;;  %v1643_v15 = vpack.c.b16 %v1329_v5, %v1329_v5  ;;  %v1646_v3 = vpack.c.b16 %v1332_v61, %v1332_v61 }
 0x169   :  { %v1644_v16 = vpack.c.b16 %v1330_v9, %v1330_v9  ;;  %v2088_v23 = vsel %vm1894_vm2, %v1641_v11, 0 }
 0x16a   :  { %v2091_v25 = vsel %vm1894_vm2, %v1642_v12, 0  ;;  %v2094_v29 = vsel %vm1894_vm2, %v1643_v15, 0  ;;  %v6838_v15 = vld [vmem:[#allocation7 + $0x110] sm:$0xf] }
 0x16b   :  { %v2598_v30 = vpop.f32.mrf.mxu2 }
 0x16c   :  { %v2611_v31 = vpop.f32.mrf.mxu3  ;;  %v2097_v30 = vsel %vm1894_vm2, %v1644_v16, 0 }
 0x16d   :  { %v8230_v34 = vpop.f32.mrf.mxu1  ;;  %v7381_v31 = vld [vmem:[#allocation7 + $0x104] sm:$0xf] }
 0x16e   :  { %v8232_v37 = vpop.f32.mrf.mxu0  ;;  %v6827_v44 = vor.u32 %v7381_v31, %v6824_v36  ;;  %v7462_v31 = vld [vmem:[#allocation7 + $0x388] sm:$0xf0]  ;;  %v7384_v36 = vld [vmem:[#allocation7 + $0x11c] sm:$0xf] }
 0x170   :  { %7244 = vmatmul.msk.bf16.vlgmr.msrb.gmra.mxu1 %vm91_vm1, %v8032_v7  ;;  %7245 = vmatmul.msk.bf16.vlgmr.msrb.gmra.mxu2 %vm91_vm1, %v8032_v7 }
 0x171   :  { %7246 = vmatmul.msk.bf16.vlgmr.msrb.gmra.mxu3 %vm91_vm1, %v8032_v7  ;;  %7247 = vmatmul.msk.bf16.vlgmr.msra.gmra.mxu0 %vm91_vm1, %v8032_v7 }
 0x172   :  { %3152 = vmatpush.bf16.msrb.mxu1 %v2076_v38  ;;  %3165 = vmatpush.bf16.msrb.mxu2 %v2079_v40  ;;  %v6830_v38 = vld [vmem:[#allocation7 + $0x108] sm:$0xf]  ;;  %v7382_v40 = vld [vmem:[#allocation7 + $0x10c] sm:$0xf] }
 0x173   :  { %v8246_v57 = vpop.f32.mrf.mxu2  ;;  %3178 = vmatpush.bf16.msrb.mxu3 %v2082_v41  ;;  %3191 = vmatpush.bf16.msra.mxu0 %v2085_v43  ;;  %v6832_v41 = vld [vmem:[#allocation7 + $0x37c] sm:$0xf0]  ;;  %v6823_v43 = vor.u32 %v7459_v24, %v6822_v21  ;;  %v6831_v47 = vor.u32 %v7460_v39, %v6830_v38  ;;  %v2103_v21 = vsel %vm1894_vm2, %v1646_v3, 0  ;;  %v6848_v38 = vld [vmem:[#allocation7 + $0x38c] sm:$0xf0] }
 0x174   :  { %v8248_v63 = vpop.f32.mrf.mxu3  ;;  %v6835_v48 = vor.u32 %v7382_v40, %v6832_v41 }
 0x175   :  { %v2637_v1 = vpop.f32.mrf.mxu1 }
 0x176   :  { %v2676_v2 = vpop.f32.mrf.mxu0  ;;  %3153 = vmatpush.bf16.msrb.mxu1 %v6807_v54  ;;  %3166 = vmatpush.bf16.msrb.mxu2 %v6811_v56  ;;  %v314_v54 = vld [vmem:[#allocation7 + $0x600] sm:$0x33] }
 0x177   :  { %3179 = vmatpush.bf16.msrb.mxu3 %v6815_v58  ;;  %3192 = vmatpush.bf16.msra.mxu0 %v6819_v59  ;;  %v1331_v59 = vunpack.c.l.b16 %v313_v49  ;;  %v1333_v0 = vunpack.c.l.b16 %v314_v54  ;;  %v1334_v1 = vunpack.c.h.b16 %v314_v54  ;;  %v316_v49 = vld [vmem:[#allocation7 + $0x610] sm:$0x33] }
 0x178   :  { %v1337_v61 = vunpack.c.l.b16 %v316_v49 }
 0x179   :  { %v1645_v2 = vpack.c.b16 %v1331_v59, %v1331_v59  ;;  %v1647_v4 = vpack.c.b16 %v1333_v0, %v1333_v0  ;;  %v1648_v5 = vpack.c.b16 %v1334_v1, %v1334_v1  ;;  %v1338_v0 = vunpack.c.h.b16 %v316_v49 }
 0x17a   :  { %v1651_v3 = vpack.c.b16 %v1337_v61, %v1337_v61 }
 0x17b   :  { %v2650_v18 = vpop.f32.mrf.mxu2  ;;  %v2109_v24 = vsel %vm1894_vm2, %v1648_v5, 0 }
 0x17c   :  { %v2663_v19 = vpop.f32.mrf.mxu3  ;;  %v2100_v18 = vsel %vm1894_vm2, %v1645_v2, 0 }
 0x17d   :  { %v8250_v20 = vpop.f32.mrf.mxu1  ;;  %v7461_v19 = vld [vmem:[#allocation7 + $0x380] sm:$0xf0] }
 0x17e   :  { %v8252_v22 = vpop.f32.mrf.mxu0  ;;  %v6839_v39 = vor.u32 %v7461_v19, %v6838_v15  ;;  %v6854_v15 = vld [vmem:[#allocation7 + $0x120] sm:$0xf] }
 0x180   :  { %7248 = vmatmul.msk.bf16.vlgmr.msra.gmra.mxu1 %vm91_vm1, %v8032_v7  ;;  %7249 = vmatmul.msk.bf16.vlgmr.msra.gmra.mxu2 %vm91_vm1, %v8032_v7 }
 0x181   :  { %7250 = vmatmul.msk.bf16.vlgmr.msra.gmra.mxu3 %vm91_vm1, %v8032_v7  ;;  %7251 = vmatmul.msk.bf16.vlgmr.msrb.gmra.mxu0 %vm91_vm1, %v8032_v7 }
 0x182   :  { %3204 = vmatpush.bf16.msra.mxu1 %v2088_v23  ;;  %3217 = vmatpush.bf16.msra.mxu2 %v2091_v25  ;;  %v2106_v23 = vsel %vm1894_vm2, %v1647_v4, 0  ;;  %v7383_v25 = vld [vmem:[#allocation7 + $0x114] sm:$0xf]  ;;  %v1652_v4 = vpack.c.b16 %v1338_v0, %v1338_v0 }
 0x183   :  { %v8266_v45 = vpop.f32.mrf.mxu2  ;;  %3230 = vmatpush.bf16.msra.mxu3 %v2094_v29  ;;  %3243 = vmatpush.bf16.msrb.mxu0 %v2097_v30  ;;  %v6840_v29 = vld [vmem:[#allocation7 + $0x384] sm:$0xf0]  ;;  %v6846_v30 = vld [vmem:[#allocation7 + $0x118] sm:$0xf] }
 0x184   :  { %v8268_v52 = vpop.f32.mrf.mxu3  ;;  %v6843_v40 = vor.u32 %v7383_v25, %v6840_v29  ;;  %v2121_v25 = vsel %vm1894_vm2, %v1652_v4, 0  ;;  %v7385_v29 = vld [vmem:[#allocation7 + $0x124] sm:$0xf] }
 0x185   :  { %v2689_v56 = vpop.f32.mrf.mxu1 }
 0x186   :  { %v2728_v58 = vpop.f32.mrf.mxu0  ;;  %3205 = vmatpush.bf16.msra.mxu1 %v6823_v43  ;;  %3218 = vmatpush.bf16.msra.mxu2 %v6827_v44  ;;  %v6847_v43 = vor.u32 %v7462_v31, %v6846_v30  ;;  %v6851_v44 = vor.u32 %v7384_v36, %v6848_v38  ;;  %v6856_v30 = vld [vmem:[#allocation7 + $0x394] sm:$0xf0]  ;;  %v6862_v31 = vld [vmem:[#allocation7 + $0x128] sm:$0xf]  ;;  %v7464_v36 = vld [vmem:[#allocation7 + $0x398] sm:$0xf0] }
 0x187   :  { %3231 = vmatpush.bf16.msra.mxu3 %v6831_v47  ;;  %3244 = vmatpush.bf16.msrb.mxu0 %v6835_v48  ;;  %v315_v47 = vld [vmem:[#allocation7 + $0x608] sm:$0x33] }
 0x188   :  { %v1335_v58 = vunpack.c.l.b16 %v315_v47  ;;  %v1336_v59 = vunpack.c.h.b16 %v315_v47  ;;  %v7386_v38 = vld [vmem:[#allocation7 + $0x12c] sm:$0xf]  ;;  %v6863_v47 = vor.u32 %v7464_v36, %v6862_v31 }
 0x18a   :  { %v1649_v1 = vpack.c.b16 %v1335_v58, %v1335_v58  ;;  %v1650_v2 = vpack.c.b16 %v1336_v59, %v1336_v59  ;;  %v318_v58 = vld [vmem:[#allocation7 + $0x620] sm:$0x33] }
 0x18b   :  { %v2702_v9 = vpop.f32.mrf.mxu2 }
 0x18c   :  { %v2715_v11 = vpop.f32.mrf.mxu3  ;;  %v2112_v19 = vsel %vm1894_vm2, %v1649_v1, 0 }
 0x18d   :  { %v8270_v12 = vpop.f32.mrf.mxu1 }
 0x18e   :  { %v8272_v16 = vpop.f32.mrf.mxu0 }
 0x190   :  { %7252 = vmatmul.msk.bf16.vlgmr.msrb.gmra.mxu1 %vm91_vm1, %v8032_v7  ;;  %7253 = vmatmul.msk.bf16.vlgmr.msrb.gmra.mxu2 %vm91_vm1, %v8032_v7 }
 0x191   :  { %7254 = vmatmul.msk.bf16.vlgmr.msrb.gmra.mxu3 %vm91_vm1, %v8032_v7  ;;  %7255 = vmatmul.msk.bf16.vlgmr.msra.gmra.mxu0 %vm91_vm1, %v8032_v7 }
 0x192   :  { %3256 = vmatpush.bf16.msrb.mxu1 %v2100_v18  ;;  %3269 = vmatpush.bf16.msrb.mxu2 %v2103_v21  ;;  %v7463_v21 = vld [vmem:[#allocation7 + $0x390] sm:$0xf0] }
 0x193   :  { %v8286_v41 = vpop.f32.mrf.mxu2  ;;  %3282 = vmatpush.bf16.msrb.mxu3 %v2106_v23  ;;  %3295 = vmatpush.bf16.msra.mxu0 %v2109_v24  ;;  %v2115_v23 = vsel %vm1894_vm2, %v1650_v2, 0  ;;  %v2118_v24 = vsel %vm1894_vm2, %v1651_v3, 0  ;;  %v1341_v2 = vunpack.c.l.b16 %v318_v58  ;;  %v1342_v3 = vunpack.c.h.b16 %v318_v58 }
 0x194   :  { %v8288_v48 = vpop.f32.mrf.mxu3 }
 0x195   :  { %v2741_v54 = vpop.f32.mrf.mxu1 }
 0x196   :  { %v2780_v56 = vpop.f32.mrf.mxu0  ;;  %3257 = vmatpush.bf16.msrb.mxu1 %v6839_v39  ;;  %3270 = vmatpush.bf16.msrb.mxu2 %v6843_v40  ;;  %v6864_v39 = vld [vmem:[#allocation7 + $0x39c] sm:$0xf0]  ;;  %v6855_v40 = vor.u32 %v7463_v21, %v6854_v15  ;;  %v317_v54 = vld [vmem:[#allocation7 + $0x618] sm:$0x33]  ;;  %v1656_v15 = vpack.c.b16 %v1342_v3, %v1342_v3 }
 0x197   :  { %3283 = vmatpush.bf16.msrb.mxu3 %v6847_v43  ;;  %3296 = vmatpush.bf16.msra.mxu0 %v6851_v44  ;;  %v6859_v43 = vor.u32 %v7385_v29, %v6856_v30  ;;  %v6867_v49 = vor.u32 %v7386_v38, %v6864_v39  ;;  %v1339_v0 = vunpack.c.l.b16 %v317_v54  ;;  %v1340_v1 = vunpack.c.h.b16 %v317_v54  ;;  %v7465_v30 = vld [vmem:[#allocation7 + $0x3a0] sm:$0xf0]  ;;  %v7387_v39 = vld [vmem:[#allocation7 + $0x134] sm:$0xf]  ;;  %v6880_v54 = vld [vmem:[#allocation7 + $0x3ac] sm:$0xf0] }
 0x198   :  { %v2133_v38 = vsel %vm1894_vm2, %v1656_v15, 0 }
 0x199   :  { %v1653_v4 = vpack.c.b16 %v1339_v0, %v1339_v0 }
 0x19b   :  { %v2754_v5 = vpop.f32.mrf.mxu2  ;;  %v2124_v29 = vsel %vm1894_vm2, %v1653_v4, 0  ;;  %v320_v4 = vld [vmem:[#allocation7 + $0x630] sm:$0x33] }
 0x19c   :  { %v2767_v9 = vpop.f32.mrf.mxu3  ;;  %v1654_v5 = vpack.c.b16 %v1340_v1, %v1340_v1 }
 0x19d   :  { %v8290_v11 = vpop.f32.mrf.mxu1  ;;  %v1655_v9 = vpack.c.b16 %v1341_v2, %v1341_v2  ;;  %v319_v2 = vld [vmem:[#allocation7 + $0x628] sm:$0x33] }
 0x19e   :  { %v8292_v18 = vpop.f32.mrf.mxu0  ;;  %v2127_v31 = vsel %vm1894_vm2, %v1654_v5, 0  ;;  %v1343_v15 = vunpack.c.l.b16 %v319_v2 }
 0x19f   :  { %v2130_v36 = vsel %vm1894_vm2, %v1655_v9, 0 }
 0x1a0   :  { %7256 = vmatmul.msk.bf16.vlgmr.msra.gmra.mxu1 %vm91_vm1, %v8032_v7  ;;  %7257 = vmatmul.msk.bf16.vlgmr.msra.gmra.mxu2 %vm91_vm1, %v8032_v7 }
 0x1a1   :  { %7258 = vmatmul.msk.bf16.vlgmr.msra.gmra.mxu3 %vm91_vm1, %v8032_v7  ;;  %7259 = vmatmul.msk.bf16.vlgmr.msrb.gmra.mxu0 %vm91_vm1, %v8032_v7 }
 0x1a2   :  { %3308 = vmatpush.bf16.msra.mxu1 %v2112_v19  ;;  %3321 = vmatpush.bf16.msra.mxu2 %v2115_v23 }
 0x1a3   :  { %v8306_v44 = vpop.f32.mrf.mxu2  ;;  %3334 = vmatpush.bf16.msra.mxu3 %v2118_v24  ;;  %3347 = vmatpush.bf16.msrb.mxu0 %v2121_v25  ;;  %v6870_v24 = vld [vmem:[#allocation7 + $0x130] sm:$0xf] }
 0x1a4   :  { %v8308_v56 = vpop.f32.mrf.mxu3  ;;  %v6871_v58 = vor.u32 %v7465_v30, %v6870_v24  ;;  %v1346_v24 = vunpack.c.h.b16 %v320_v4 }
 0x1a5   :  { %v2793_v59 = vpop.f32.mrf.mxu1 }
 0x1a6   :  { %v2832_v61 = vpop.f32.mrf.mxu0  ;;  %3309 = vmatpush.bf16.msra.mxu1 %v6855_v40  ;;  %3322 = vmatpush.bf16.msra.mxu2 %v6859_v43  ;;  %v6872_v40 = vld [vmem:[#allocation7 + $0x3a4] sm:$0xf0]  ;;  %v6878_v43 = vld [vmem:[#allocation7 + $0x138] sm:$0xf] }
 0x1a7   :  { %3335 = vmatpush.bf16.msra.mxu3 %v6863_v47  ;;  %3348 = vmatpush.bf16.msrb.mxu0 %v6867_v49  ;;  %v7466_v47 = vld [vmem:[#allocation7 + $0x3a8] sm:$0xf0]  ;;  %v7388_v49 = vld [vmem:[#allocation7 + $0x13c] sm:$0xf]  ;;  %v6875_v59 = vor.u32 %v7387_v39, %v6872_v40 }
 0x1a8   :  { %v6879_v0 = vor.u32 %v7466_v47, %v6878_v43  ;;  %v6883_v1 = vor.u32 %v7388_v49, %v6880_v54  ;;  %v6886_v43 = vld [vmem:[#allocation7 + $0x140] sm:$0xf]  ;;  %v7467_v54 = vld [vmem:[#allocation7 + $0x3b0] sm:$0xf0] }
 0x1ab   :  { %v2806_v19 = vpop.f32.mrf.mxu2 }
 0x1ac   :  { %v2819_v21 = vpop.f32.mrf.mxu3  ;;  %v1344_v19 = vunpack.c.h.b16 %v319_v2  ;;  %v6888_v2 = vld [vmem:[#allocation7 + $0x3b4] sm:$0xf0] }
 0x1ad   :  { %v8310_v23 = vpop.f32.mrf.mxu1  ;;  %v1345_v21 = vunpack.c.l.b16 %v320_v4  ;;  %v6894_v4 = vld [vmem:[#allocation7 + $0x148] sm:$0xf] }
 0x1ae   :  { %v8312_v25 = vpop.f32.mrf.mxu0  ;;  %v1658_v30 = vpack.c.b16 %v1344_v19, %v1344_v19  ;;  %v6887_v19 = vor.u32 %v7467_v54, %v6886_v43 }
 0x1b0   :  { %7260 = vmatmul.msk.bf16.vlgmr.msrb.gmra.mxu1 %vm91_vm1, %v8032_v7  ;;  %7261 = vmatmul.msk.bf16.vlgmr.msrb.gmra.mxu2 %vm91_vm1, %v8032_v7 }
 0x1b1   :  { %7262 = vmatmul.msk.bf16.vlgmr.msrb.gmra.mxu3 %vm91_vm1, %v8032_v7  ;;  %7263 = vmatmul.msk.bf16.vlgmr.msra.gmra.mxu0 %vm91_vm1, %v8032_v7 }
 0x1b2   :  { %3360 = vmatpush.bf16.msrb.mxu1 %v2124_v29  ;;  %3373 = vmatpush.bf16.msrb.mxu2 %v2127_v31  ;;  %v1657_v29 = vpack.c.b16 %v1343_v15, %v1343_v15  ;;  %v1659_v31 = vpack.c.b16 %v1345_v21, %v1345_v21  ;;  %v6896_v15 = vld [vmem:[#allocation7 + $0x3bc] sm:$0xf0] }
 0x1b3   :  { %v8326_v61 = vpop.f32.mrf.mxu2  ;;  %3386 = vmatpush.bf16.msrb.mxu3 %v2130_v36  ;;  %3399 = vmatpush.bf16.msra.mxu0 %v2133_v38  ;;  %v1660_v36 = vpack.c.b16 %v1346_v24, %v1346_v24 }
 0x1b4   :  { %v8328_v3 = vpop.f32.mrf.mxu3  ;;  %v2136_v49 = vsel %vm1894_vm2, %v1657_v29, 0 }
 0x1b5   :  { %12847 = vst [vmem:[#allocation15_spill] sm:$0xff] %v8328_v3  ;;  %v2845_v5 = vpop.f32.mrf.mxu1 }
 0x1b6   :  { %v2884_v9 = vpop.f32.mrf.mxu0  ;;  %3361 = vmatpush.bf16.msrb.mxu1 %v6871_v58  ;;  %3374 = vmatpush.bf16.msrb.mxu2 %v6875_v59  ;;  %v2139_v58 = vsel %vm1894_vm2, %v1658_v30, 0  ;;  %v2142_v59 = vsel %vm1894_vm2, %v1659_v31, 0  ;;  %v7468_v5 = vld [vmem:[#allocation7 + $0x3b8] sm:$0xf0] }
 0x1b7   :  { %3387 = vmatpush.bf16.msrb.mxu3 %v6879_v0  ;;  %3400 = vmatpush.bf16.msra.mxu0 %v6883_v1  ;;  %v2145_v0 = vsel %vm1894_vm2, %v1660_v36, 0  ;;  %v7389_v1 = vld [vmem:[#allocation7 + $0x144] sm:$0xf]  ;;  %v7390_v9 = vld [vmem:[#allocation7 + $0x14c] sm:$0xf]  ;;  %v6895_v29 = vor.u32 %v7468_v5, %v6894_v4 }
 0x1b8   :  { %v6891_v21 = vor.u32 %v7389_v1, %v6888_v2  ;;  %v6899_v30 = vor.u32 %v7390_v9, %v6896_v15  ;;  %v321_v31 = vld [vmem:[#allocation7 + $0x638] sm:$0x33]  ;;  %v6902_v5 = vld [vmem:[#allocation7 + $0x150] sm:$0xf]  ;;  %v7469_v15 = vld [vmem:[#allocation7 + $0x3c0] sm:$0xf0] }
 0x1b9   :  { %v1348_v3 = vunpack.c.h.b16 %v321_v31 }
 0x1bb   :  { %v2858_v38 = vpop.f32.mrf.mxu2 }
 0x1bc   :  { %v2871_v39 = vpop.f32.mrf.mxu3  ;;  %v322_v38 = vld [vmem:[#allocation7 + $0x640] sm:$0x33] }
 0x1bd   :  { %v8330_v40 = vpop.f32.mrf.mxu1  ;;  %v1350_v43 = vunpack.c.h.b16 %v322_v38 }
 0x1be   :  { %12848 = vst [vmem:[#allocation16_spill] sm:$0xff] %v8330_v40  ;;  %v8332_v47 = vpop.f32.mrf.mxu0  ;;  %v1347_v40 = vunpack.c.l.b16 %v321_v31  ;;  %v7470_v31 = vld [vmem:[#allocation7 + $0x3c8] sm:$0xf0] }
 0x1bf   :  { %12849 = vst [vmem:[#allocation17_spill] sm:$0xff] %v8332_v47 }
 0x1c0   :  { %7264 = vmatmul.msk.bf16.vlgmr.msra.gmra.mxu1 %vm91_vm1, %v8032_v7  ;;  %7265 = vmatmul.msk.bf16.vlgmr.msra.gmra.mxu2 %vm91_vm1, %v8032_v7  ;;  %v1661_v54 = vpack.c.b16 %v1347_v40, %v1347_v40  ;;  %v7391_v40 = vld [vmem:[#allocation7 + $0x154] sm:$0xf] }
 0x1c1   :  { %7266 = vmatmul.msk.bf16.vlgmr.msra.gmra.mxu3 %vm91_vm1, %v8032_v7  ;;  %7267 = vmatmul.msk.bf16.vlgmr.msrb.gmra.mxu0 %vm91_vm1, %v8032_v7 }
 0x1c2   :  { %3412 = vmatpush.bf16.msra.mxu1 %v2136_v49  ;;  %3425 = vmatpush.bf16.msra.mxu2 %v2139_v58  ;;  %v1349_v49 = vunpack.c.l.b16 %v322_v38  ;;  %v1662_v58 = vpack.c.b16 %v1348_v3, %v1348_v3  ;;  %v6904_v3 = vld [vmem:[#allocation7 + $0x3c4] sm:$0xf0]  ;;  %v7392_v38 = vld [vmem:[#allocation7 + $0x15c] sm:$0xf] }
 0x1c3   :  { %v8346_v24 = vpop.f32.mrf.mxu2  ;;  %3438 = vmatpush.bf16.msra.mxu3 %v2142_v59  ;;  %3451 = vmatpush.bf16.msrb.mxu0 %v2145_v0  ;;  %v1664_v0 = vpack.c.b16 %v1350_v43, %v1350_v43  ;;  %v6907_v43 = vor.u32 %v7391_v40, %v6904_v3 }
 0x1c4   :  { %12850 = vst [vmem:[#allocation18_spill] sm:$0xff] %v8346_v24  ;;  %v8348_v36 = vpop.f32.mrf.mxu3  ;;  %v1663_v59 = vpack.c.b16 %v1349_v49, %v1349_v49  ;;  %v6903_v49 = vor.u32 %v7469_v15, %v6902_v5 }
 0x1c5   :  { %12851 = vst [vmem:[#allocation19_spill] sm:$0xff] %v8348_v36  ;;  %v2897_v39 = vpop.f32.mrf.mxu1 }
 0x1c6   :  { %v2936_v47 = vpop.f32.mrf.mxu0  ;;  %3413 = vmatpush.bf16.msra.mxu1 %v6887_v19  ;;  %3426 = vmatpush.bf16.msra.mxu2 %v6891_v21  ;;  %v2151_v19 = vsel %vm1894_vm2, %v1662_v58, 0  ;;  %v2154_v21 = vsel %vm1894_vm2, %v1663_v59, 0  ;;  %v6912_v39 = vld [vmem:[#allocation7 + $0x3cc] sm:$0xf0] }
 0x1c7   :  { %3439 = vmatpush.bf16.msra.mxu3 %v6895_v29  ;;  %3452 = vmatpush.bf16.msrb.mxu0 %v6899_v30  ;;  %v2148_v47 = vsel %vm1894_vm2, %v1661_v54, 0  ;;  %v2157_v29 = vsel %vm1894_vm2, %v1664_v0, 0  ;;  %v6910_v30 = vld [vmem:[#allocation7 + $0x158] sm:$0xf]  ;;  %v6915_v59 = vor.u32 %v7392_v38, %v6912_v39  ;;  %v323_v0 = vld [vmem:[#allocation7 + $0x648] sm:$0x33] }
 0x1c8   :  { %v6911_v58 = vor.u32 %v7470_v31, %v6910_v30  ;;  %v1351_v36 = vunpack.c.l.b16 %v323_v0  ;;  %v1352_v24 = vunpack.c.h.b16 %v323_v0  ;;  %v6918_v31 = vld [vmem:[#allocation7 + $0x160] sm:$0xf]  ;;  %v7394_v0 = vld [vmem:[#allocation7 + $0x16c] sm:$0xf] }
 0x1ca   :  { %v1665_v15 = vpack.c.b16 %v1351_v36, %v1351_v36  ;;  %v7393_v36 = vld [vmem:[#allocation7 + $0x164] sm:$0xf] }
 0x1cb   :  { %v2910_v1 = vpop.f32.mrf.mxu2 }
 0x1cc   :  { %v2923_v2 = vpop.f32.mrf.mxu3 }
 0x1cd   :  { %v8350_v4 = vpop.f32.mrf.mxu1  ;;  %v324_v2 = vld [vmem:[#allocation7 + $0x650] sm:$0x33] }
 0x1ce   :  { %12852 = vst [vmem:[#allocation20_spill] sm:$0xff] %v8350_v4  ;;  %v8352_v9 = vpop.f32.mrf.mxu0  ;;  %v1354_v5 = vunpack.c.h.b16 %v324_v2 }
 0x1cf   :  { %12853 = vst [vmem:[#allocation21_spill] sm:$0xff] %v8352_v9 }
 0x1d0   :  { %7268 = vmatmul.msk.bf16.vlgmr.msrb.gmra.mxu1 %vm91_vm1, %v8032_v7  ;;  %7269 = vmatmul.msk.bf16.vlgmr.msrb.gmra.mxu2 %vm91_vm1, %v8032_v7 }
 0x1d1   :  { %7270 = vmatmul.msk.bf16.vlgmr.msrb.gmra.mxu3 %vm91_vm1, %v8032_v7  ;;  %7271 = vmatmul.msk.bf16.vlgmr.msra.gmra.mxu0 %vm91_vm1, %v8032_v7 }
 0x1d2   :  { %3464 = vmatpush.bf16.msrb.mxu1 %v2148_v47  ;;  %3477 = vmatpush.bf16.msrb.mxu2 %v2151_v19  ;;  %v1353_v47 = vunpack.c.l.b16 %v324_v2  ;;  %v1666_v19 = vpack.c.b16 %v1352_v24, %v1352_v24  ;;  %v6920_v24 = vld [vmem:[#allocation7 + $0x3d4] sm:$0xf0]  ;;  %v6928_v2 = vld [vmem:[#allocation7 + $0x3dc] sm:$0xf0] }
 0x1d3   :  { %v8366_v54 = vpop.f32.mrf.mxu2  ;;  %3490 = vmatpush.bf16.msrb.mxu3 %v2154_v21  ;;  %3503 = vmatpush.bf16.msra.mxu0 %v2157_v29  ;;  %v1668_v29 = vpack.c.b16 %v1354_v5, %v1354_v5  ;;  %v6923_v5 = vor.u32 %v7393_v36, %v6920_v24 }
 0x1d4   :  { %12854 = vst [vmem:[#allocation22_spill] sm:$0xff] %v8366_v54  ;;  %v8368_v1 = vpop.f32.mrf.mxu3  ;;  %v1667_v21 = vpack.c.b16 %v1353_v47, %v1353_v47  ;;  %v2163_v39 = vsel %vm1894_vm2, %v1666_v19, 0 }
 0x1d5   :  { %12855 = vst [vmem:[#allocation23_spill] sm:$0xff] %v8368_v1  ;;  %v2949_v9 = vpop.f32.mrf.mxu1 }
 0x1d6   :  { %v2988_v4 = vpop.f32.mrf.mxu0  ;;  %3465 = vmatpush.bf16.msrb.mxu1 %v6903_v49  ;;  %3478 = vmatpush.bf16.msrb.mxu2 %v6907_v43  ;;  %v7471_v9 = vld [vmem:[#allocation7 + $0x3d0] sm:$0xf0]  ;;  %v2166_v49 = vsel %vm1894_vm2, %v1667_v21, 0  ;;  %v2169_v43 = vsel %vm1894_vm2, %v1668_v29, 0  ;;  %v6931_v21 = vor.u32 %v7394_v0, %v6928_v2  ;;  %v325_v29 = vld [vmem:[#allocation7 + $0x658] sm:$0x33] }
 0x1d7   :  { %3491 = vmatpush.bf16.msrb.mxu3 %v6911_v58  ;;  %3504 = vmatpush.bf16.msra.mxu0 %v6915_v59  ;;  %v2160_v4 = vsel %vm1894_vm2, %v1665_v15, 0  ;;  %v6926_v58 = vld [vmem:[#allocation7 + $0x168] sm:$0xf]  ;;  %v7472_v59 = vld [vmem:[#allocation7 + $0x3d8] sm:$0xf0]  ;;  %v6919_v47 = vor.u32 %v7471_v9, %v6918_v31  ;;  %v1355_v1 = vunpack.c.l.b16 %v325_v29  ;;  %v1356_v54 = vunpack.c.h.b16 %v325_v29 }
 0x1d8   :  { %v6927_v19 = vor.u32 %v7472_v59, %v6926_v58  ;;  %v6934_v59 = vld [vmem:[#allocation7 + $0x170] sm:$0xf]  ;;  %v7396_v29 = vld [vmem:[#allocation7 + $0x17c] sm:$0xf] }
 0x1d9   :  { %v1669_v9 = vpack.c.b16 %v1355_v1, %v1355_v1  ;;  %v7395_v1 = vld [vmem:[#allocation7 + $0x174] sm:$0xf] }
 0x1db   :  { %v2962_v40 = vpop.f32.mrf.mxu2 }
 0x1dc   :  { %v2975_v3 = vpop.f32.mrf.mxu3 }
 0x1dd   :  { %v8370_v30 = vpop.f32.mrf.mxu1  ;;  %v326_v3 = vld [vmem:[#allocation7 + $0x660] sm:$0x33] }
 0x1de   :  { %12856 = vst [vmem:[#allocation24_spill] sm:$0xff] %v8370_v30  ;;  %v8372_v38 = vpop.f32.mrf.mxu0  ;;  %v1358_v31 = vunpack.c.h.b16 %v326_v3 }
 0x1df   :  { %12857 = vst [vmem:[#allocation25_spill] sm:$0xff] %v8372_v38 }
 0x1e0   :  { %7272 = vmatmul.msk.bf16.vlgmr.msra.gmra.mxu1 %vm91_vm1, %v8032_v7  ;;  %7273 = vmatmul.msk.bf16.vlgmr.msra.gmra.mxu2 %vm91_vm1, %v8032_v7 }
 0x1e1   :  { %7274 = vmatmul.msk.bf16.vlgmr.msra.gmra.mxu3 %vm91_vm1, %v8032_v7  ;;  %7275 = vmatmul.msk.bf16.vlgmr.msrb.gmra.mxu0 %vm91_vm1, %v8032_v7 }
 0x1e2   :  { %3516 = vmatpush.bf16.msra.mxu1 %v2160_v4  ;;  %3529 = vmatpush.bf16.msra.mxu2 %v2163_v39  ;;  %v1357_v4 = vunpack.c.l.b16 %v326_v3  ;;  %v1670_v39 = vpack.c.b16 %v1356_v54, %v1356_v54  ;;  %v6936_v54 = vld [vmem:[#allocation7 + $0x3e4] sm:$0xf0]  ;;  %v6944_v3 = vld [vmem:[#allocation7 + $0x3ec] sm:$0xf0] }
 0x1e3   :  { %v8386_v15 = vpop.f32.mrf.mxu2  ;;  %3542 = vmatpush.bf16.msra.mxu3 %v2166_v49  ;;  %3555 = vmatpush.bf16.msrb.mxu0 %v2169_v43  ;;  %v1672_v43 = vpack.c.b16 %v1358_v31, %v1358_v31  ;;  %v6939_v31 = vor.u32 %v7395_v1, %v6936_v54 }
 0x1e4   :  { %12858 = vst [vmem:[#allocation26_spill] sm:$0xff] %v8386_v15  ;;  %v8388_v40 = vpop.f32.mrf.mxu3  ;;  %v1671_v49 = vpack.c.b16 %v1357_v4, %v1357_v4  ;;  %v2175_v2 = vsel %vm1894_vm2, %v1670_v39, 0 }
 0x1e5   :  { %12859 = vst [vmem:[#allocation27_spill] sm:$0xff] %v8388_v40  ;;  %v3001_v38 = vpop.f32.mrf.mxu1 }
 0x1e6   :  { %v3040_v30 = vpop.f32.mrf.mxu0  ;;  %3517 = vmatpush.bf16.msra.mxu1 %v6919_v47  ;;  %3530 = vmatpush.bf16.msra.mxu2 %v6923_v5  ;;  %v7473_v38 = vld [vmem:[#allocation7 + $0x3e0] sm:$0xf0]  ;;  %v2178_v47 = vsel %vm1894_vm2, %v1671_v49, 0  ;;  %v2181_v5 = vsel %vm1894_vm2, %v1672_v43, 0  ;;  %v6947_v49 = vor.u32 %v7396_v29, %v6944_v3  ;;  %v327_v43 = vld [vmem:[#allocation7 + $0x668] sm:$0x33] }
 0x1e7   :  { %3543 = vmatpush.bf16.msra.mxu3 %v6927_v19  ;;  %3556 = vmatpush.bf16.msrb.mxu0 %v6931_v21  ;;  %v2172_v30 = vsel %vm1894_vm2, %v1669_v9, 0  ;;  %v6942_v19 = vld [vmem:[#allocation7 + $0x178] sm:$0xf]  ;;  %v7474_v21 = vld [vmem:[#allocation7 + $0x3e8] sm:$0xf0]  ;;  %v6935_v4 = vor.u32 %v7473_v38, %v6934_v59  ;;  %v1359_v40 = vunpack.c.l.b16 %v327_v43  ;;  %v1360_v15 = vunpack.c.h.b16 %v327_v43 }
 0x1e8   :  { %v6943_v39 = vor.u32 %v7474_v21, %v6942_v19  ;;  %v6950_v21 = vld [vmem:[#allocation7 + $0x180] sm:$0xf]  ;;  %v7398_v43 = vld [vmem:[#allocation7 + $0x18c] sm:$0xf] }
 0x1e9   :  { %v1673_v38 = vpack.c.b16 %v1359_v40, %v1359_v40  ;;  %v7397_v40 = vld [vmem:[#allocation7 + $0x184] sm:$0xf] }
 0x1eb   :  { %v3014_v36 = vpop.f32.mrf.mxu2 }
 0x1ec   :  { %v3027_v24 = vpop.f32.mrf.mxu3 }
 0x1ed   :  { %v8390_v58 = vpop.f32.mrf.mxu1  ;;  %v328_v24 = vld [vmem:[#allocation7 + $0x670] sm:$0x33] }
 0x1ee   :  { %12860 = vst [vmem:[#allocation28_spill] sm:$0xff] %v8390_v58  ;;  %v8392_v0 = vpop.f32.mrf.mxu0  ;;  %v1362_v59 = vunpack.c.h.b16 %v328_v24 }
 0x1ef   :  { %12861 = vst [vmem:[#allocation29_spill] sm:$0xff] %v8392_v0 }
 0x1f0   :  { %7276 = vmatmul.msk.bf16.vlgmr.msrb.gmra.mxu1 %vm91_vm1, %v8032_v7  ;;  %7277 = vmatmul.msk.bf16.vlgmr.msrb.gmra.mxu2 %vm91_vm1, %v8032_v7 }
 0x1f1   :  { %7278 = vmatmul.msk.bf16.vlgmr.msrb.gmra.mxu3 %vm91_vm1, %v8032_v7  ;;  %7279 = vmatmul.msk.bf16.vlgmr.msra.gmra.mxu0 %vm91_vm1, %v8032_v7 }
 0x1f2   :  { %3568 = vmatpush.bf16.msrb.mxu1 %v2172_v30  ;;  %3581 = vmatpush.bf16.msrb.mxu2 %v2175_v2  ;;  %v1361_v30 = vunpack.c.l.b16 %v328_v24  ;;  %v1674_v2 = vpack.c.b16 %v1360_v15, %v1360_v15  ;;  %v6952_v15 = vld [vmem:[#allocation7 + $0x3f4] sm:$0xf0]  ;;  %v6960_v24 = vld [vmem:[#allocation7 + $0x3fc] sm:$0xf0] }
 0x1f3   :  { %v8406_v9 = vpop.f32.mrf.mxu2  ;;  %3594 = vmatpush.bf16.msrb.mxu3 %v2178_v47  ;;  %3607 = vmatpush.bf16.msra.mxu0 %v2181_v5  ;;  %v1676_v5 = vpack.c.b16 %v1362_v59, %v1362_v59  ;;  %v6955_v59 = vor.u32 %v7397_v40, %v6952_v15 }
 0x1f4   :  { %12862 = vst [vmem:[#allocation30_spill] sm:$0xff] %v8406_v9  ;;  %v8408_v36 = vpop.f32.mrf.mxu3  ;;  %v1675_v47 = vpack.c.b16 %v1361_v30, %v1361_v30  ;;  %v2187_v3 = vsel %vm1894_vm2, %v1674_v2, 0 }
 0x1f5   :  { %12863 = vst [vmem:[#allocation31_spill] sm:$0xff] %v8408_v36  ;;  %v3053_v0 = vpop.f32.mrf.mxu1 }
 0x1f6   :  { %v3092_v58 = vpop.f32.mrf.mxu0  ;;  %3569 = vmatpush.bf16.msrb.mxu1 %v6935_v4  ;;  %3582 = vmatpush.bf16.msrb.mxu2 %v6939_v31  ;;  %v7475_v0 = vld [vmem:[#allocation7 + $0x3f0] sm:$0xf0]  ;;  %v2190_v4 = vsel %vm1894_vm2, %v1675_v47, 0  ;;  %v2193_v31 = vsel %vm1894_vm2, %v1676_v5, 0  ;;  %v6963_v47 = vor.u32 %v7398_v43, %v6960_v24  ;;  %v329_v5 = vld [vmem:[#allocation7 + $0x678] sm:$0x33] }
 0x1f7   :  { %3595 = vmatpush.bf16.msrb.mxu3 %v6943_v39  ;;  %3608 = vmatpush.bf16.msra.mxu0 %v6947_v49  ;;  %v2184_v58 = vsel %vm1894_vm2, %v1673_v38, 0  ;;  %v6958_v39 = vld [vmem:[#allocation7 + $0x188] sm:$0xf]  ;;  %v7476_v49 = vld [vmem:[#allocation7 + $0x3f8] sm:$0xf0]  ;;  %v6951_v30 = vor.u32 %v7475_v0, %v6950_v21  ;;  %v1363_v36 = vunpack.c.l.b16 %v329_v5  ;;  %v1364_v9 = vunpack.c.h.b16 %v329_v5 }
 0x1f8   :  { %v6959_v2 = vor.u32 %v7476_v49, %v6958_v39  ;;  %v6966_v49 = vld [vmem:[#allocation7 + $0x190] sm:$0xf]  ;;  %v7400_v5 = vld [vmem:[#allocation7 + $0x19c] sm:$0xf] }
 0x1f9   :  { %v1677_v0 = vpack.c.b16 %v1363_v36, %v1363_v36  ;;  %v7399_v36 = vld [vmem:[#allocation7 + $0x194] sm:$0xf] }
 0x1fb   :  { %v3066_v1 = vpop.f32.mrf.mxu2 }
 0x1fc   :  { %v3079_v54 = vpop.f32.mrf.mxu3 }
 0x1fd   :  { %v8410_v19 = vpop.f32.mrf.mxu1  ;;  %v330_v54 = vld [vmem:[#allocation7 + $0x680] sm:$0x33] }
 0x1fe   :  { %12864 = vst [vmem:[#allocation32_spill] sm:$0xff] %v8410_v19  ;;  %v8412_v29 = vpop.f32.mrf.mxu0  ;;  %v1366_v21 = vunpack.c.h.b16 %v330_v54 }
 0x1ff   :  { %12865 = vst [vmem:[#allocation33_spill] sm:$0xff] %v8412_v29 }
 0x200   :  { %7280 = vmatmul.msk.bf16.vlgmr.msra.gmra.mxu1 %vm91_vm1, %v8032_v7  ;;  %7281 = vmatmul.msk.bf16.vlgmr.msra.gmra.mxu2 %vm91_vm1, %v8032_v7 }
 0x201   :  { %7282 = vmatmul.msk.bf16.vlgmr.msra.gmra.mxu3 %vm91_vm1, %v8032_v7  ;;  %7283 = vmatmul.msk.bf16.vlgmr.msrb.gmra.mxu0 %vm91_vm1, %v8032_v7 }
 0x202   :  { %3620 = vmatpush.bf16.msra.mxu1 %v2184_v58  ;;  %3633 = vmatpush.bf16.msra.mxu2 %v2187_v3  ;;  %v1365_v58 = vunpack.c.l.b16 %v330_v54  ;;  %v1678_v3 = vpack.c.b16 %v1364_v9, %v1364_v9  ;;  %v6968_v9 = vld [vmem:[#allocation7 + $0x404] sm:$0xf0]  ;;  %v6976_v54 = vld [vmem:[#allocation7 + $0x40c] sm:$0xf0] }
 0x203   :  { %v8426_v38 = vpop.f32.mrf.mxu2  ;;  %3646 = vmatpush.bf16.msra.mxu3 %v2190_v4  ;;  %3659 = vmatpush.bf16.msrb.mxu0 %v2193_v31  ;;  %v1680_v31 = vpack.c.b16 %v1366_v21, %v1366_v21  ;;  %v6971_v21 = vor.u32 %v7399_v36, %v6968_v9 }
 0x204   :  { %12866 = vst [vmem:[#allocation34_spill] sm:$0xff] %v8426_v38  ;;  %v8428_v1 = vpop.f32.mrf.mxu3  ;;  %v1679_v4 = vpack.c.b16 %v1365_v58, %v1365_v58  ;;  %v2199_v24 = vsel %vm1894_vm2, %v1678_v3, 0 }
 0x205   :  { %12867 = vst [vmem:[#allocation35_spill] sm:$0xff] %v8428_v1  ;;  %v3105_v29 = vpop.f32.mrf.mxu1 }
 0x206   :  { %v3144_v19 = vpop.f32.mrf.mxu0  ;;  %3621 = vmatpush.bf16.msra.mxu1 %v6951_v30  ;;  %3634 = vmatpush.bf16.msra.mxu2 %v6955_v59  ;;  %v7477_v29 = vld [vmem:[#allocation7 + $0x400] sm:$0xf0]  ;;  %v2202_v30 = vsel %vm1894_vm2, %v1679_v4, 0  ;;  %v2205_v59 = vsel %vm1894_vm2, %v1680_v31, 0  ;;  %v6979_v4 = vor.u32 %v7400_v5, %v6976_v54  ;;  %v331_v31 = vld [vmem:[#allocation7 + $0x688] sm:$0x33] }
 0x207   :  { %3647 = vmatpush.bf16.msra.mxu3 %v6959_v2  ;;  %3660 = vmatpush.bf16.msrb.mxu0 %v6963_v47  ;;  %v2196_v19 = vsel %vm1894_vm2, %v1677_v0, 0  ;;  %v6974_v2 = vld [vmem:[#allocation7 + $0x198] sm:$0xf]  ;;  %v7478_v47 = vld [vmem:[#allocation7 + $0x408] sm:$0xf0]  ;;  %v6967_v58 = vor.u32 %v7477_v29, %v6966_v49  ;;  %v1367_v1 = vunpack.c.l.b16 %v331_v31  ;;  %v1368_v38 = vunpack.c.h.b16 %v331_v31 }
 0x208   :  { %v6975_v3 = vor.u32 %v7478_v47, %v6974_v2  ;;  %v6982_v47 = vld [vmem:[#allocation7 + $0x1a0] sm:$0xf]  ;;  %v7402_v31 = vld [vmem:[#allocation7 + $0x1ac] sm:$0xf] }
 0x209   :  { %v1681_v29 = vpack.c.b16 %v1367_v1, %v1367_v1  ;;  %v7401_v1 = vld [vmem:[#allocation7 + $0x1a4] sm:$0xf] }
 0x20b   :  { %v3118_v40 = vpop.f32.mrf.mxu2 }
 0x20c   :  { %v3131_v15 = vpop.f32.mrf.mxu3 }
 0x20d   :  { %v8430_v39 = vpop.f32.mrf.mxu1  ;;  %v332_v15 = vld [vmem:[#allocation7 + $0x690] sm:$0x33] }
 0x20e   :  { %12868 = vst [vmem:[#allocation36_spill] sm:$0xff] %v8430_v39  ;;  %v8432_v43 = vpop.f32.mrf.mxu0  ;;  %v1370_v49 = vunpack.c.h.b16 %v332_v15 }
 0x20f   :  { %12869 = vst [vmem:[#allocation37_spill] sm:$0xff] %v8432_v43 }
 0x210   :  { %7284 = vmatmul.msk.bf16.vlgmr.msrb.gmra.mxu1 %vm91_vm1, %v8032_v7  ;;  %7285 = vmatmul.msk.bf16.vlgmr.msrb.gmra.mxu2 %vm91_vm1, %v8032_v7 }
 0x211   :  { %7286 = vmatmul.msk.bf16.vlgmr.msrb.gmra.mxu3 %vm91_vm1, %v8032_v7  ;;  %7287 = vmatmul.msk.bf16.vlgmr.msra.gmra.mxu0 %vm91_vm1, %v8032_v7 }
 0x212   :  { %3672 = vmatpush.bf16.msrb.mxu1 %v2196_v19  ;;  %3685 = vmatpush.bf16.msrb.mxu2 %v2199_v24  ;;  %v1369_v19 = vunpack.c.l.b16 %v332_v15  ;;  %v1682_v24 = vpack.c.b16 %v1368_v38, %v1368_v38  ;;  %v6984_v38 = vld [vmem:[#allocation7 + $0x414] sm:$0xf0]  ;;  %v6992_v15 = vld [vmem:[#allocation7 + $0x41c] sm:$0xf0] }
 0x213   :  { %v8446_v0 = vpop.f32.mrf.mxu2  ;;  %3698 = vmatpush.bf16.msrb.mxu3 %v2202_v30  ;;  %3711 = vmatpush.bf16.msra.mxu0 %v2205_v59  ;;  %v1684_v59 = vpack.c.b16 %v1370_v49, %v1370_v49  ;;  %v6987_v49 = vor.u32 %v7401_v1, %v6984_v38 }
 0x214   :  { %12870 = vst [vmem:[#allocation38_spill] sm:$0xff] %v8446_v0  ;;  %v8448_v40 = vpop.f32.mrf.mxu3  ;;  %v1683_v30 = vpack.c.b16 %v1369_v19, %v1369_v19  ;;  %v2211_v54 = vsel %vm1894_vm2, %v1682_v24, 0 }
 0x215   :  { %12871 = vst [vmem:[#allocation39_spill] sm:$0xff] %v8448_v40  ;;  %v3157_v43 = vpop.f32.mrf.mxu1 }
 0x216   :  { %v3196_v39 = vpop.f32.mrf.mxu0  ;;  %3673 = vmatpush.bf16.msrb.mxu1 %v6967_v58  ;;  %3686 = vmatpush.bf16.msrb.mxu2 %v6971_v21  ;;  %v7479_v43 = vld [vmem:[#allocation7 + $0x410] sm:$0xf0]  ;;  %v2214_v58 = vsel %vm1894_vm2, %v1683_v30, 0  ;;  %v2217_v21 = vsel %vm1894_vm2, %v1684_v59, 0  ;;  %v6995_v30 = vor.u32 %v7402_v31, %v6992_v15  ;;  %v333_v59 = vld [vmem:[#allocation7 + $0x698] sm:$0x33] }
 0x217   :  { %3699 = vmatpush.bf16.msrb.mxu3 %v6975_v3  ;;  %3712 = vmatpush.bf16.msra.mxu0 %v6979_v4  ;;  %v2208_v39 = vsel %vm1894_vm2, %v1681_v29, 0  ;;  %v6990_v3 = vld [vmem:[#allocation7 + $0x1a8] sm:$0xf]  ;;  %v7480_v4 = vld [vmem:[#allocation7 + $0x418] sm:$0xf0]  ;;  %v6983_v19 = vor.u32 %v7479_v43, %v6982_v47  ;;  %v1371_v40 = vunpack.c.l.b16 %v333_v59  ;;  %v1372_v0 = vunpack.c.h.b16 %v333_v59 }
 0x218   :  { %v6991_v24 = vor.u32 %v7480_v4, %v6990_v3  ;;  %v6998_v4 = vld [vmem:[#allocation7 + $0x1b0] sm:$0xf]  ;;  %v7404_v59 = vld [vmem:[#allocation7 + $0x1bc] sm:$0xf] }
 0x219   :  { %v1685_v43 = vpack.c.b16 %v1371_v40, %v1371_v40  ;;  %v7403_v40 = vld [vmem:[#allocation7 + $0x1b4] sm:$0xf] }
 0x21b   :  { %v3170_v36 = vpop.f32.mrf.mxu2 }
 0x21c   :  { %v3183_v9 = vpop.f32.mrf.mxu3 }
 0x21d   :  { %v8450_v2 = vpop.f32.mrf.mxu1  ;;  %v334_v9 = vld [vmem:[#allocation7 + $0x6a0] sm:$0x33] }
 0x21e   :  { %12872 = vst [vmem:[#allocation40_spill] sm:$0xff] %v8450_v2  ;;  %v8452_v5 = vpop.f32.mrf.mxu0  ;;  %v1374_v47 = vunpack.c.h.b16 %v334_v9 }
 0x21f   :  { %12873 = vst [vmem:[#allocation41_spill] sm:$0xff] %v8452_v5 }
 0x220   :  { %7288 = vmatmul.msk.bf16.vlgmr.msra.gmra.mxu1 %vm91_vm1, %v8032_v7  ;;  %7289 = vmatmul.msk.bf16.vlgmr.msra.gmra.mxu2 %vm91_vm1, %v8032_v7 }
 0x221   :  { %7290 = vmatmul.msk.bf16.vlgmr.msra.gmra.mxu3 %vm91_vm1, %v8032_v7  ;;  %7291 = vmatmul.msk.bf16.vlgmr.msrb.gmra.mxu0 %vm91_vm1, %v8032_v7 }
 0x222   :  { %3724 = vmatpush.bf16.msra.mxu1 %v2208_v39  ;;  %3737 = vmatpush.bf16.msra.mxu2 %v2211_v54  ;;  %v1373_v39 = vunpack.c.l.b16 %v334_v9  ;;  %v1686_v54 = vpack.c.b16 %v1372_v0, %v1372_v0  ;;  %v7000_v0 = vld [vmem:[#allocation7 + $0x424] sm:$0xf0]  ;;  %v7008_v9 = vld [vmem:[#allocation7 + $0x42c] sm:$0xf0] }
 0x223   :  { %v8466_v29 = vpop.f32.mrf.mxu2  ;;  %3750 = vmatpush.bf16.msra.mxu3 %v2214_v58  ;;  %3763 = vmatpush.bf16.msrb.mxu0 %v2217_v21  ;;  %v1688_v21 = vpack.c.b16 %v1374_v47, %v1374_v47  ;;  %v7003_v47 = vor.u32 %v7403_v40, %v7000_v0 }
 0x224   :  { %12874 = vst [vmem:[#allocation42_spill] sm:$0xff] %v8466_v29  ;;  %v8468_v36 = vpop.f32.mrf.mxu3  ;;  %v1687_v58 = vpack.c.b16 %v1373_v39, %v1373_v39  ;;  %v2223_v15 = vsel %vm1894_vm2, %v1686_v54, 0 }
 0x225   :  { %12875 = vst [vmem:[#allocation43_spill] sm:$0xff] %v8468_v36  ;;  %v3209_v5 = vpop.f32.mrf.mxu1 }
 0x226   :  { %v3248_v2 = vpop.f32.mrf.mxu0  ;;  %3725 = vmatpush.bf16.msra.mxu1 %v6983_v19  ;;  %3738 = vmatpush.bf16.msra.mxu2 %v6987_v49  ;;  %v7481_v5 = vld [vmem:[#allocation7 + $0x420] sm:$0xf0]  ;;  %v2226_v19 = vsel %vm1894_vm2, %v1687_v58, 0  ;;  %v2229_v49 = vsel %vm1894_vm2, %v1688_v21, 0  ;;  %v7011_v58 = vor.u32 %v7404_v59, %v7008_v9  ;;  %v335_v21 = vld [vmem:[#allocation7 + $0x6a8] sm:$0x33] }
 0x227   :  { %3751 = vmatpush.bf16.msra.mxu3 %v6991_v24  ;;  %3764 = vmatpush.bf16.msrb.mxu0 %v6995_v30  ;;  %v2220_v2 = vsel %vm1894_vm2, %v1685_v43, 0  ;;  %v7006_v24 = vld [vmem:[#allocation7 + $0x1b8] sm:$0xf]  ;;  %v7482_v30 = vld [vmem:[#allocation7 + $0x428] sm:$0xf0]  ;;  %v6999_v39 = vor.u32 %v7481_v5, %v6998_v4  ;;  %v1375_v36 = vunpack.c.l.b16 %v335_v21  ;;  %v1376_v29 = vunpack.c.h.b16 %v335_v21 }
 0x228   :  { %v7007_v54 = vor.u32 %v7482_v30, %v7006_v24  ;;  %v7014_v30 = vld [vmem:[#allocation7 + $0x1c0] sm:$0xf]  ;;  %v7406_v21 = vld [vmem:[#allocation7 + $0x1cc] sm:$0xf] }
 0x229   :  { %v1689_v5 = vpack.c.b16 %v1375_v36, %v1375_v36  ;;  %v7405_v36 = vld [vmem:[#allocation7 + $0x1c4] sm:$0xf] }
 0x22b   :  { %v3222_v1 = vpop.f32.mrf.mxu2 }
 0x22c   :  { %v3235_v38 = vpop.f32.mrf.mxu3 }
 0x22d   :  { %v8470_v3 = vpop.f32.mrf.mxu1  ;;  %v336_v38 = vld [vmem:[#allocation7 + $0x6b0] sm:$0x33] }
 0x22e   :  { %12876 = vst [vmem:[#allocation44_spill] sm:$0xff] %v8470_v3  ;;  %v8472_v31 = vpop.f32.mrf.mxu0  ;;  %v1378_v4 = vunpack.c.h.b16 %v336_v38 }
 0x22f   :  { %12877 = vst [vmem:[#allocation45_spill] sm:$0xff] %v8472_v31 }
 0x230   :  { %7292 = vmatmul.msk.bf16.vlgmr.msrb.gmra.mxu1 %vm91_vm1, %v8032_v7  ;;  %7293 = vmatmul.msk.bf16.vlgmr.msrb.gmra.mxu2 %vm91_vm1, %v8032_v7 }
 0x231   :  { %7294 = vmatmul.msk.bf16.vlgmr.msrb.gmra.mxu3 %vm91_vm1, %v8032_v7  ;;  %7295 = vmatmul.msk.bf16.vlgmr.msra.gmra.mxu0 %vm91_vm1, %v8032_v7 }
 0x232   :  { %3776 = vmatpush.bf16.msrb.mxu1 %v2220_v2  ;;  %3789 = vmatpush.bf16.msrb.mxu2 %v2223_v15  ;;  %v1377_v2 = vunpack.c.l.b16 %v336_v38  ;;  %v1690_v15 = vpack.c.b16 %v1376_v29, %v1376_v29  ;;  %v7016_v29 = vld [vmem:[#allocation7 + $0x434] sm:$0xf0]  ;;  %v7024_v38 = vld [vmem:[#allocation7 + $0x43c] sm:$0xf0] }
 0x233   :  { %v8486_v43 = vpop.f32.mrf.mxu2  ;;  %3802 = vmatpush.bf16.msrb.mxu3 %v2226_v19  ;;  %3815 = vmatpush.bf16.msra.mxu0 %v2229_v49  ;;  %v1692_v49 = vpack.c.b16 %v1378_v4, %v1378_v4  ;;  %v7019_v4 = vor.u32 %v7405_v36, %v7016_v29 }
 0x234   :  { %12878 = vst [vmem:[#allocation46_spill] sm:$0xff] %v8486_v43  ;;  %v8488_v1 = vpop.f32.mrf.mxu3  ;;  %v1691_v19 = vpack.c.b16 %v1377_v2, %v1377_v2  ;;  %v2235_v9 = vsel %vm1894_vm2, %v1690_v15, 0 }
 0x235   :  { %12879 = vst [vmem:[#allocation47_spill] sm:$0xff] %v8488_v1  ;;  %v3261_v31 = vpop.f32.mrf.mxu1 }
 0x236   :  { %v3300_v3 = vpop.f32.mrf.mxu0  ;;  %3777 = vmatpush.bf16.msrb.mxu1 %v6999_v39  ;;  %3790 = vmatpush.bf16.msrb.mxu2 %v7003_v47  ;;  %v7483_v31 = vld [vmem:[#allocation7 + $0x430] sm:$0xf0]  ;;  %v2238_v39 = vsel %vm1894_vm2, %v1691_v19, 0  ;;  %v2241_v47 = vsel %vm1894_vm2, %v1692_v49, 0  ;;  %v7027_v19 = vor.u32 %v7406_v21, %v7024_v38  ;;  %v337_v49 = vld [vmem:[#allocation7 + $0x6b8] sm:$0x33] }
 0x237   :  { %3803 = vmatpush.bf16.msrb.mxu3 %v7007_v54  ;;  %3816 = vmatpush.bf16.msra.mxu0 %v7011_v58  ;;  %v2232_v3 = vsel %vm1894_vm2, %v1689_v5, 0  ;;  %v7022_v54 = vld [vmem:[#allocation7 + $0x1c8] sm:$0xf]  ;;  %v7484_v58 = vld [vmem:[#allocation7 + $0x438] sm:$0xf0]  ;;  %v7015_v2 = vor.u32 %v7483_v31, %v7014_v30  ;;  %v1379_v1 = vunpack.c.l.b16 %v337_v49  ;;  %v1380_v43 = vunpack.c.h.b16 %v337_v49 }
 0x238   :  { %v7023_v15 = vor.u32 %v7484_v58, %v7022_v54  ;;  %v7030_v58 = vld [vmem:[#allocation7 + $0x1d0] sm:$0xf]  ;;  %v7408_v49 = vld [vmem:[#allocation7 + $0x1dc] sm:$0xf] }
 0x239   :  { %v1693_v31 = vpack.c.b16 %v1379_v1, %v1379_v1  ;;  %v7407_v1 = vld [vmem:[#allocation7 + $0x1d4] sm:$0xf] }
 0x23b   :  { %v3274_v40 = vpop.f32.mrf.mxu2 }
 0x23c   :  { %v3287_v0 = vpop.f32.mrf.mxu3 }
 0x23d   :  { %v8490_v24 = vpop.f32.mrf.mxu1  ;;  %v338_v0 = vld [vmem:[#allocation7 + $0x6c0] sm:$0x33] }
 0x23e   :  { %12880 = vst [vmem:[#allocation48_spill] sm:$0xff] %v8490_v24  ;;  %v8492_v59 = vpop.f32.mrf.mxu0  ;;  %v1382_v30 = vunpack.c.h.b16 %v338_v0 }
 0x23f   :  { %12881 = vst [vmem:[#allocation49_spill] sm:$0xff] %v8492_v59 }
 0x240   :  { %7296 = vmatmul.msk.bf16.vlgmr.msra.gmra.mxu1 %vm91_vm1, %v8032_v7  ;;  %7297 = vmatmul.msk.bf16.vlgmr.msra.gmra.mxu2 %vm91_vm1, %v8032_v7 }
 0x241   :  { %7298 = vmatmul.msk.bf16.vlgmr.msra.gmra.mxu3 %vm91_vm1, %v8032_v7  ;;  %7299 = vmatmul.msk.bf16.vlgmr.msrb.gmra.mxu0 %vm91_vm1, %v8032_v7 }
 0x242   :  { %3828 = vmatpush.bf16.msra.mxu1 %v2232_v3  ;;  %3841 = vmatpush.bf16.msra.mxu2 %v2235_v9  ;;  %v1381_v3 = vunpack.c.l.b16 %v338_v0  ;;  %v1694_v9 = vpack.c.b16 %v1380_v43, %v1380_v43  ;;  %v7032_v43 = vld [vmem:[#allocation7 + $0x444] sm:$0xf0]  ;;  %v7040_v0 = vld [vmem:[#allocation7 + $0x44c] sm:$0xf0] }
 0x243   :  { %v8506_v5 = vpop.f32.mrf.mxu2  ;;  %3854 = vmatpush.bf16.msra.mxu3 %v2238_v39  ;;  %3867 = vmatpush.bf16.msrb.mxu0 %v2241_v47  ;;  %v1696_v47 = vpack.c.b16 %v1382_v30, %v1382_v30  ;;  %v7035_v30 = vor.u32 %v7407_v1, %v7032_v43 }
 0x244   :  { %12882 = vst [vmem:[#allocation50_spill] sm:$0xff] %v8506_v5  ;;  %v8508_v40 = vpop.f32.mrf.mxu3  ;;  %v1695_v39 = vpack.c.b16 %v1381_v3, %v1381_v3  ;;  %v2247_v38 = vsel %vm1894_vm2, %v1694_v9, 0 }
 0x245   :  { %12883 = vst [vmem:[#allocation51_spill] sm:$0xff] %v8508_v40  ;;  %v3313_v59 = vpop.f32.mrf.mxu1 }
 0x246   :  { %v3352_v24 = vpop.f32.mrf.mxu0  ;;  %3829 = vmatpush.bf16.msra.mxu1 %v7015_v2  ;;  %3842 = vmatpush.bf16.msra.mxu2 %v7019_v4  ;;  %v7485_v59 = vld [vmem:[#allocation7 + $0x440] sm:$0xf0]  ;;  %v2250_v2 = vsel %vm1894_vm2, %v1695_v39, 0  ;;  %v2253_v4 = vsel %vm1894_vm2, %v1696_v47, 0  ;;  %v7043_v39 = vor.u32 %v7408_v49, %v7040_v0  ;;  %v339_v47 = vld [vmem:[#allocation7 + $0x6c8] sm:$0x33] }
 0x247   :  { %3855 = vmatpush.bf16.msra.mxu3 %v7023_v15  ;;  %3868 = vmatpush.bf16.msrb.mxu0 %v7027_v19  ;;  %v2244_v24 = vsel %vm1894_vm2, %v1693_v31, 0  ;;  %v7038_v15 = vld [vmem:[#allocation7 + $0x1d8] sm:$0xf]  ;;  %v7486_v19 = vld [vmem:[#allocation7 + $0x448] sm:$0xf0]  ;;  %v7031_v3 = vor.u32 %v7485_v59, %v7030_v58  ;;  %v1383_v40 = vunpack.c.l.b16 %v339_v47  ;;  %v1384_v5 = vunpack.c.h.b16 %v339_v47 }
 0x248   :  { %v7039_v9 = vor.u32 %v7486_v19, %v7038_v15  ;;  %v7046_v19 = vld [vmem:[#allocation7 + $0x1e0] sm:$0xf]  ;;  %v7410_v47 = vld [vmem:[#allocation7 + $0x1ec] sm:$0xf] }
 0x249   :  { %v1697_v59 = vpack.c.b16 %v1383_v40, %v1383_v40  ;;  %v7409_v40 = vld [vmem:[#allocation7 + $0x1e4] sm:$0xf] }
 0x24b   :  { %v3326_v36 = vpop.f32.mrf.mxu2 }
 0x24c   :  { %v3339_v29 = vpop.f32.mrf.mxu3 }
 0x24d   :  { %v8510_v54 = vpop.f32.mrf.mxu1  ;;  %v340_v29 = vld [vmem:[#allocation7 + $0x6d0] sm:$0x33] }
 0x24e   :  { %12884 = vst [vmem:[#allocation52_spill] sm:$0xff] %v8510_v54  ;;  %v8512_v21 = vpop.f32.mrf.mxu0  ;;  %v1386_v58 = vunpack.c.h.b16 %v340_v29 }
 0x24f   :  { %12885 = vst [vmem:[#allocation53_spill] sm:$0xff] %v8512_v21 }
 0x250   :  { %7300 = vmatmul.msk.bf16.vlgmr.msrb.gmra.mxu1 %vm91_vm1, %v8032_v7  ;;  %7301 = vmatmul.msk.bf16.vlgmr.msrb.gmra.mxu2 %vm91_vm1, %v8032_v7 }
 0x251   :  { %7302 = vmatmul.msk.bf16.vlgmr.msrb.gmra.mxu3 %vm91_vm1, %v8032_v7  ;;  %7303 = vmatmul.msk.bf16.vlgmr.msra.gmra.mxu0 %vm91_vm1, %v8032_v7 }
 0x252   :  { %3880 = vmatpush.bf16.msrb.mxu1 %v2244_v24  ;;  %3893 = vmatpush.bf16.msrb.mxu2 %v2247_v38  ;;  %v1385_v24 = vunpack.c.l.b16 %v340_v29  ;;  %v1698_v38 = vpack.c.b16 %v1384_v5, %v1384_v5  ;;  %v7048_v5 = vld [vmem:[#allocation7 + $0x454] sm:$0xf0]  ;;  %v7056_v29 = vld [vmem:[#allocation7 + $0x45c] sm:$0xf0] }
 0x253   :  { %v8526_v31 = vpop.f32.mrf.mxu2  ;;  %3906 = vmatpush.bf16.msrb.mxu3 %v2250_v2  ;;  %3919 = vmatpush.bf16.msra.mxu0 %v2253_v4  ;;  %v1700_v4 = vpack.c.b16 %v1386_v58, %v1386_v58  ;;  %v7051_v58 = vor.u32 %v7409_v40, %v7048_v5 }
 0x254   :  { %12886 = vst [vmem:[#allocation54_spill] sm:$0xff] %v8526_v31  ;;  %v8528_v36 = vpop.f32.mrf.mxu3  ;;  %v1699_v2 = vpack.c.b16 %v1385_v24, %v1385_v24  ;;  %v2259_v0 = vsel %vm1894_vm2, %v1698_v38, 0 }
 0x255   :  { %12887 = vst [vmem:[#allocation55_spill] sm:$0xff] %v8528_v36  ;;  %v3365_v21 = vpop.f32.mrf.mxu1 }
 0x256   :  { %v3404_v54 = vpop.f32.mrf.mxu0  ;;  %3881 = vmatpush.bf16.msrb.mxu1 %v7031_v3  ;;  %3894 = vmatpush.bf16.msrb.mxu2 %v7035_v30  ;;  %v7487_v21 = vld [vmem:[#allocation7 + $0x450] sm:$0xf0]  ;;  %v2262_v3 = vsel %vm1894_vm2, %v1699_v2, 0  ;;  %v2265_v30 = vsel %vm1894_vm2, %v1700_v4, 0  ;;  %v7059_v2 = vor.u32 %v7410_v47, %v7056_v29  ;;  %v341_v4 = vld [vmem:[#allocation7 + $0x6d8] sm:$0x33] }
 0x257   :  { %3907 = vmatpush.bf16.msrb.mxu3 %v7039_v9  ;;  %3920 = vmatpush.bf16.msra.mxu0 %v7043_v39  ;;  %v2256_v54 = vsel %vm1894_vm2, %v1697_v59, 0  ;;  %v7054_v9 = vld [vmem:[#allocation7 + $0x1e8] sm:$0xf]  ;;  %v7488_v39 = vld [vmem:[#allocation7 + $0x458] sm:$0xf0]  ;;  %v7047_v24 = vor.u32 %v7487_v21, %v7046_v19  ;;  %v1387_v36 = vunpack.c.l.b16 %v341_v4  ;;  %v1388_v31 = vunpack.c.h.b16 %v341_v4 }
 0x258   :  { %v7055_v38 = vor.u32 %v7488_v39, %v7054_v9  ;;  %v7062_v39 = vld [vmem:[#allocation7 + $0x1f0] sm:$0xf]  ;;  %v7412_v4 = vld [vmem:[#allocation7 + $0x1fc] sm:$0xf] }
 0x259   :  { %v1701_v21 = vpack.c.b16 %v1387_v36, %v1387_v36  ;;  %v7411_v36 = vld [vmem:[#allocation7 + $0x1f4] sm:$0xf] }
 0x25b   :  { %v3378_v1 = vpop.f32.mrf.mxu2 }
 0x25c   :  { %v3391_v43 = vpop.f32.mrf.mxu3 }
 0x25d   :  { %v8530_v15 = vpop.f32.mrf.mxu1  ;;  %v342_v43 = vld [vmem:[#allocation7 + $0x6e0] sm:$0x33] }
 0x25e   :  { %12888 = vst [vmem:[#allocation56_spill] sm:$0xff] %v8530_v15  ;;  %v8532_v49 = vpop.f32.mrf.mxu0  ;;  %v1390_v19 = vunpack.c.h.b16 %v342_v43 }
 0x25f   :  { %12889 = vst [vmem:[#allocation57_spill] sm:$0xff] %v8532_v49 }
 0x260   :  { %7304 = vmatmul.msk.bf16.vlgmr.msra.gmra.mxu1 %vm91_vm1, %v8032_v7  ;;  %7305 = vmatmul.msk.bf16.vlgmr.msra.gmra.mxu2 %vm91_vm1, %v8032_v7 }
 0x261   :  { %7306 = vmatmul.msk.bf16.vlgmr.msra.gmra.mxu3 %vm91_vm1, %v8032_v7  ;;  %7307 = vmatmul.msk.bf16.vlgmr.msrb.gmra.mxu0 %vm91_vm1, %v8032_v7 }
 0x262   :  { %3932 = vmatpush.bf16.msra.mxu1 %v2256_v54  ;;  %3945 = vmatpush.bf16.msra.mxu2 %v2259_v0  ;;  %v1389_v54 = vunpack.c.l.b16 %v342_v43  ;;  %v1702_v0 = vpack.c.b16 %v1388_v31, %v1388_v31  ;;  %v7064_v31 = vld [vmem:[#allocation7 + $0x464] sm:$0xf0]  ;;  %v7072_v43 = vld [vmem:[#allocation7 + $0x46c] sm:$0xf0] }
 0x263   :  { %v8546_v59 = vpop.f32.mrf.mxu2  ;;  %3958 = vmatpush.bf16.msra.mxu3 %v2262_v3  ;;  %3971 = vmatpush.bf16.msrb.mxu0 %v2265_v30  ;;  %v1704_v30 = vpack.c.b16 %v1390_v19, %v1390_v19  ;;  %v7067_v19 = vor.u32 %v7411_v36, %v7064_v31 }
 0x264   :  { %12890 = vst [vmem:[#allocation58_spill] sm:$0xff] %v8546_v59  ;;  %v8548_v1 = vpop.f32.mrf.mxu3  ;;  %v1703_v3 = vpack.c.b16 %v1389_v54, %v1389_v54  ;;  %v2271_v29 = vsel %vm1894_vm2, %v1702_v0, 0 }
 0x265   :  { %12891 = vst [vmem:[#allocation59_spill] sm:$0xff] %v8548_v1  ;;  %v3417_v49 = vpop.f32.mrf.mxu1 }
 0x266   :  { %v3456_v15 = vpop.f32.mrf.mxu0  ;;  %3933 = vmatpush.bf16.msra.mxu1 %v7047_v24  ;;  %3946 = vmatpush.bf16.msra.mxu2 %v7051_v58  ;;  %v7489_v49 = vld [vmem:[#allocation7 + $0x460] sm:$0xf0]  ;;  %v2274_v24 = vsel %vm1894_vm2, %v1703_v3, 0  ;;  %v2277_v58 = vsel %vm1894_vm2, %v1704_v30, 0  ;;  %v7075_v3 = vor.u32 %v7412_v4, %v7072_v43  ;;  %v343_v30 = vld [vmem:[#allocation7 + $0x6e8] sm:$0x33] }
 0x267   :  { %3959 = vmatpush.bf16.msra.mxu3 %v7055_v38  ;;  %3972 = vmatpush.bf16.msrb.mxu0 %v7059_v2  ;;  %v2268_v15 = vsel %vm1894_vm2, %v1701_v21, 0  ;;  %v7070_v38 = vld [vmem:[#allocation7 + $0x1f8] sm:$0xf]  ;;  %v7490_v2 = vld [vmem:[#allocation7 + $0x468] sm:$0xf0]  ;;  %v7063_v54 = vor.u32 %v7489_v49, %v7062_v39  ;;  %v1391_v1 = vunpack.c.l.b16 %v343_v30  ;;  %v1392_v59 = vunpack.c.h.b16 %v343_v30 }
 0x268   :  { %v7071_v0 = vor.u32 %v7490_v2, %v7070_v38  ;;  %v7078_v2 = vld [vmem:[#allocation7 + $0x200] sm:$0xf]  ;;  %v7414_v30 = vld [vmem:[#allocation7 + $0x20c] sm:$0xf] }
 0x269   :  { %v1705_v49 = vpack.c.b16 %v1391_v1, %v1391_v1  ;;  %v7413_v1 = vld [vmem:[#allocation7 + $0x204] sm:$0xf] }
 0x26b   :  { %v3430_v40 = vpop.f32.mrf.mxu2 }
 0x26c   :  { %v3443_v5 = vpop.f32.mrf.mxu3 }
 0x26d   :  { %v8550_v9 = vpop.f32.mrf.mxu1  ;;  %v344_v5 = vld [vmem:[#allocation7 + $0x6f0] sm:$0x33] }
 0x26e   :  { %12892 = vst [vmem:[#allocation60_spill] sm:$0xff] %v8550_v9  ;;  %v8552_v47 = vpop.f32.mrf.mxu0  ;;  %v1394_v39 = vunpack.c.h.b16 %v344_v5 }
 0x26f   :  { %12893 = vst [vmem:[#allocation61_spill] sm:$0xff] %v8552_v47 }
 0x270   :  { %7308 = vmatmul.msk.bf16.vlgmr.msrb.gmra.mxu1 %vm91_vm1, %v8032_v7  ;;  %7309 = vmatmul.msk.bf16.vlgmr.msrb.gmra.mxu2 %vm91_vm1, %v8032_v7 }
 0x271   :  { %7310 = vmatmul.msk.bf16.vlgmr.msrb.gmra.mxu3 %vm91_vm1, %v8032_v7  ;;  %7311 = vmatmul.msk.bf16.vlgmr.msra.gmra.mxu0 %vm91_vm1, %v8032_v7 }
 0x272   :  { %3984 = vmatpush.bf16.msrb.mxu1 %v2268_v15  ;;  %3997 = vmatpush.bf16.msrb.mxu2 %v2271_v29  ;;  %v1393_v15 = vunpack.c.l.b16 %v344_v5  ;;  %v1706_v29 = vpack.c.b16 %v1392_v59, %v1392_v59  ;;  %v7080_v59 = vld [vmem:[#allocation7 + $0x474] sm:$0xf0]  ;;  %v7088_v5 = vld [vmem:[#allocation7 + $0x47c] sm:$0xf0] }
 0x273   :  { %v8566_v21 = vpop.f32.mrf.mxu2  ;;  %4010 = vmatpush.bf16.msrb.mxu3 %v2274_v24  ;;  %4023 = vmatpush.bf16.msra.mxu0 %v2277_v58  ;;  %v1708_v58 = vpack.c.b16 %v1394_v39, %v1394_v39  ;;  %v7083_v39 = vor.u32 %v7413_v1, %v7080_v59 }
 0x274   :  { %12894 = vst [vmem:[#allocation62_spill] sm:$0xff] %v8566_v21  ;;  %v8568_v40 = vpop.f32.mrf.mxu3  ;;  %v1707_v24 = vpack.c.b16 %v1393_v15, %v1393_v15  ;;  %v2283_v43 = vsel %vm1894_vm2, %v1706_v29, 0 }
 0x275   :  { %12895 = vst [vmem:[#allocation63_spill] sm:$0xff] %v8568_v40  ;;  %v3469_v47 = vpop.f32.mrf.mxu1 }
 0x276   :  { %v3508_v9 = vpop.f32.mrf.mxu0  ;;  %3985 = vmatpush.bf16.msrb.mxu1 %v7063_v54  ;;  %3998 = vmatpush.bf16.msrb.mxu2 %v7067_v19  ;;  %v7491_v47 = vld [vmem:[#allocation7 + $0x470] sm:$0xf0]  ;;  %v2286_v54 = vsel %vm1894_vm2, %v1707_v24, 0  ;;  %v2289_v19 = vsel %vm1894_vm2, %v1708_v58, 0  ;;  %v7091_v24 = vor.u32 %v7414_v30, %v7088_v5  ;;  %v345_v58 = vld [vmem:[#allocation7 + $0x6f8] sm:$0x33] }
 0x277   :  { %4011 = vmatpush.bf16.msrb.mxu3 %v7071_v0  ;;  %4024 = vmatpush.bf16.msra.mxu0 %v7075_v3  ;;  %v2280_v9 = vsel %vm1894_vm2, %v1705_v49, 0  ;;  %v7086_v0 = vld [vmem:[#allocation7 + $0x208] sm:$0xf]  ;;  %v7492_v3 = vld [vmem:[#allocation7 + $0x478] sm:$0xf0]  ;;  %v7079_v15 = vor.u32 %v7491_v47, %v7078_v2  ;;  %v1395_v40 = vunpack.c.l.b16 %v345_v58  ;;  %v1396_v21 = vunpack.c.h.b16 %v345_v58 }
 0x278   :  { %v7087_v29 = vor.u32 %v7492_v3, %v7086_v0  ;;  %v7094_v3 = vld [vmem:[#allocation7 + $0x210] sm:$0xf]  ;;  %v7416_v58 = vld [vmem:[#allocation7 + $0x21c] sm:$0xf] }
 0x279   :  { %v1709_v47 = vpack.c.b16 %v1395_v40, %v1395_v40  ;;  %v7415_v40 = vld [vmem:[#allocation7 + $0x214] sm:$0xf] }
 0x27b   :  { %v3482_v36 = vpop.f32.mrf.mxu2 }
 0x27c   :  { %v3495_v31 = vpop.f32.mrf.mxu3 }
 0x27d   :  { %v8570_v38 = vpop.f32.mrf.mxu1  ;;  %v346_v31 = vld [vmem:[#allocation7 + $0x700] sm:$0x33] }
 0x27e   :  { %12896 = vst [vmem:[#allocation64_spill] sm:$0xff] %v8570_v38  ;;  %v8572_v4 = vpop.f32.mrf.mxu0  ;;  %v1398_v2 = vunpack.c.h.b16 %v346_v31 }
 0x27f   :  { %12897 = vst [vmem:[#allocation65_spill] sm:$0xff] %v8572_v4 }
 0x280   :  { %7312 = vmatmul.msk.bf16.vlgmr.msra.gmra.mxu1 %vm91_vm1, %v8032_v7  ;;  %7313 = vmatmul.msk.bf16.vlgmr.msra.gmra.mxu2 %vm91_vm1, %v8032_v7 }
 0x281   :  { %7314 = vmatmul.msk.bf16.vlgmr.msra.gmra.mxu3 %vm91_vm1, %v8032_v7  ;;  %7315 = vmatmul.msk.bf16.vlgmr.msrb.gmra.mxu0 %vm91_vm1, %v8032_v7 }
 0x282   :  { %4036 = vmatpush.bf16.msra.mxu1 %v2280_v9  ;;  %4049 = vmatpush.bf16.msra.mxu2 %v2283_v43  ;;  %v1397_v9 = vunpack.c.l.b16 %v346_v31  ;;  %v1710_v43 = vpack.c.b16 %v1396_v21, %v1396_v21  ;;  %v7096_v21 = vld [vmem:[#allocation7 + $0x484] sm:$0xf0]  ;;  %v7104_v31 = vld [vmem:[#allocation7 + $0x48c] sm:$0xf0] }
 0x283   :  { %v8586_v49 = vpop.f32.mrf.mxu2  ;;  %4062 = vmatpush.bf16.msra.mxu3 %v2286_v54  ;;  %4075 = vmatpush.bf16.msrb.mxu0 %v2289_v19  ;;  %v1712_v19 = vpack.c.b16 %v1398_v2, %v1398_v2  ;;  %v7099_v2 = vor.u32 %v7415_v40, %v7096_v21 }
 0x284   :  { %12898 = vst [vmem:[#allocation66_spill] sm:$0xff] %v8586_v49  ;;  %v8588_v36 = vpop.f32.mrf.mxu3  ;;  %v1711_v54 = vpack.c.b16 %v1397_v9, %v1397_v9  ;;  %v2295_v5 = vsel %vm1894_vm2, %v1710_v43, 0 }
 0x285   :  { %12899 = vst [vmem:[#allocation67_spill] sm:$0xff] %v8588_v36  ;;  %v3521_v4 = vpop.f32.mrf.mxu1 }
 0x286   :  { %v3560_v38 = vpop.f32.mrf.mxu0  ;;  %4037 = vmatpush.bf16.msra.mxu1 %v7079_v15  ;;  %4050 = vmatpush.bf16.msra.mxu2 %v7083_v39  ;;  %v7493_v4 = vld [vmem:[#allocation7 + $0x480] sm:$0xf0]  ;;  %v2298_v15 = vsel %vm1894_vm2, %v1711_v54, 0  ;;  %v2301_v39 = vsel %vm1894_vm2, %v1712_v19, 0  ;;  %v7107_v54 = vor.u32 %v7416_v58, %v7104_v31  ;;  %v347_v19 = vld [vmem:[#allocation7 + $0x708] sm:$0x33] }
 0x287   :  { %4063 = vmatpush.bf16.msra.mxu3 %v7087_v29  ;;  %4076 = vmatpush.bf16.msrb.mxu0 %v7091_v24  ;;  %v2292_v38 = vsel %vm1894_vm2, %v1709_v47, 0  ;;  %v7102_v29 = vld [vmem:[#allocation7 + $0x218] sm:$0xf]  ;;  %v7494_v24 = vld [vmem:[#allocation7 + $0x488] sm:$0xf0]  ;;  %v7095_v9 = vor.u32 %v7493_v4, %v7094_v3  ;;  %v1399_v36 = vunpack.c.l.b16 %v347_v19  ;;  %v1400_v49 = vunpack.c.h.b16 %v347_v19 }
 0x288   :  { %v7103_v43 = vor.u32 %v7494_v24, %v7102_v29  ;;  %v7110_v24 = vld [vmem:[#allocation7 + $0x220] sm:$0xf]  ;;  %v7418_v19 = vld [vmem:[#allocation7 + $0x22c] sm:$0xf] }
 0x289   :  { %v1713_v4 = vpack.c.b16 %v1399_v36, %v1399_v36  ;;  %v7417_v36 = vld [vmem:[#allocation7 + $0x224] sm:$0xf] }
 0x28b   :  { %v3534_v1 = vpop.f32.mrf.mxu2 }
 0x28c   :  { %v3547_v59 = vpop.f32.mrf.mxu3 }
 0x28d   :  { %v8590_v0 = vpop.f32.mrf.mxu1  ;;  %v348_v59 = vld [vmem:[#allocation7 + $0x710] sm:$0x33] }
 0x28e   :  { %12900 = vst [vmem:[#allocation68_spill] sm:$0xff] %v8590_v0  ;;  %v8592_v30 = vpop.f32.mrf.mxu0  ;;  %v1402_v3 = vunpack.c.h.b16 %v348_v59 }
 0x28f   :  { %12901 = vst [vmem:[#allocation69_spill] sm:$0xff] %v8592_v30 }
 0x290   :  { %7316 = vmatmul.msk.bf16.vlgmr.msrb.gmra.mxu1 %vm91_vm1, %v8032_v7  ;;  %7317 = vmatmul.msk.bf16.vlgmr.msrb.gmra.mxu2 %vm91_vm1, %v8032_v7 }
 0x291   :  { %7318 = vmatmul.msk.bf16.vlgmr.msrb.gmra.mxu3 %vm91_vm1, %v8032_v7  ;;  %7319 = vmatmul.msk.bf16.vlgmr.msra.gmra.mxu0 %vm91_vm1, %v8032_v7 }
 0x292   :  { %4088 = vmatpush.bf16.msrb.mxu1 %v2292_v38  ;;  %4101 = vmatpush.bf16.msrb.mxu2 %v2295_v5  ;;  %v1401_v38 = vunpack.c.l.b16 %v348_v59  ;;  %v1714_v5 = vpack.c.b16 %v1400_v49, %v1400_v49  ;;  %v7112_v49 = vld [vmem:[#allocation7 + $0x494] sm:$0xf0]  ;;  %v7120_v59 = vld [vmem:[#allocation7 + $0x49c] sm:$0xf0] }
 0x293   :  { %v8606_v47 = vpop.f32.mrf.mxu2  ;;  %4114 = vmatpush.bf16.msrb.mxu3 %v2298_v15  ;;  %4127 = vmatpush.bf16.msra.mxu0 %v2301_v39  ;;  %v1716_v39 = vpack.c.b16 %v1402_v3, %v1402_v3  ;;  %v7115_v3 = vor.u32 %v7417_v36, %v7112_v49 }
 0x294   :  { %12902 = vst [vmem:[#allocation70_spill] sm:$0xff] %v8606_v47  ;;  %v8608_v1 = vpop.f32.mrf.mxu3  ;;  %v1715_v15 = vpack.c.b16 %v1401_v38, %v1401_v38  ;;  %v2307_v31 = vsel %vm1894_vm2, %v1714_v5, 0 }
 0x295   :  { %12903 = vst [vmem:[#allocation71_spill] sm:$0xff] %v8608_v1  ;;  %v3573_v30 = vpop.f32.mrf.mxu1 }
 0x296   :  { %v3612_v0 = vpop.f32.mrf.mxu0  ;;  %4089 = vmatpush.bf16.msrb.mxu1 %v7095_v9  ;;  %4102 = vmatpush.bf16.msrb.mxu2 %v7099_v2  ;;  %v7495_v30 = vld [vmem:[#allocation7 + $0x490] sm:$0xf0]  ;;  %v2310_v9 = vsel %vm1894_vm2, %v1715_v15, 0  ;;  %v2313_v2 = vsel %vm1894_vm2, %v1716_v39, 0  ;;  %v7123_v15 = vor.u32 %v7418_v19, %v7120_v59  ;;  %v349_v39 = vld [vmem:[#allocation7 + $0x718] sm:$0x33] }
 0x297   :  { %4115 = vmatpush.bf16.msrb.mxu3 %v7103_v43  ;;  %4128 = vmatpush.bf16.msra.mxu0 %v7107_v54  ;;  %v2304_v0 = vsel %vm1894_vm2, %v1713_v4, 0  ;;  %v7118_v43 = vld [vmem:[#allocation7 + $0x228] sm:$0xf]  ;;  %v7496_v54 = vld [vmem:[#allocation7 + $0x498] sm:$0xf0]  ;;  %v7111_v38 = vor.u32 %v7495_v30, %v7110_v24  ;;  %v1403_v1 = vunpack.c.l.b16 %v349_v39  ;;  %v1404_v47 = vunpack.c.h.b16 %v349_v39 }
 0x298   :  { %v7119_v5 = vor.u32 %v7496_v54, %v7118_v43  ;;  %v7126_v54 = vld [vmem:[#allocation7 + $0x230] sm:$0xf]  ;;  %v7420_v39 = vld [vmem:[#allocation7 + $0x23c] sm:$0xf] }
 0x299   :  { %v1717_v30 = vpack.c.b16 %v1403_v1, %v1403_v1  ;;  %v7419_v1 = vld [vmem:[#allocation7 + $0x234] sm:$0xf] }
 0x29b   :  { %v3586_v40 = vpop.f32.mrf.mxu2 }
 0x29c   :  { %v3599_v21 = vpop.f32.mrf.mxu3 }
 0x29d   :  { %v8610_v29 = vpop.f32.mrf.mxu1  ;;  %v350_v21 = vld [vmem:[#allocation7 + $0x720] sm:$0x33] }
 0x29e   :  { %12904 = vst [vmem:[#allocation72_spill] sm:$0xff] %v8610_v29  ;;  %v8612_v58 = vpop.f32.mrf.mxu0  ;;  %v1406_v24 = vunpack.c.h.b16 %v350_v21 }
 0x29f   :  { %12905 = vst [vmem:[#allocation73_spill] sm:$0xff] %v8612_v58 }
 0x2a0   :  { %7320 = vmatmul.msk.bf16.vlgmr.msra.gmra.mxu1 %vm91_vm1, %v8032_v7  ;;  %7321 = vmatmul.msk.bf16.vlgmr.msra.gmra.mxu2 %vm91_vm1, %v8032_v7 }
 0x2a1   :  { %7322 = vmatmul.msk.bf16.vlgmr.msra.gmra.mxu3 %vm91_vm1, %v8032_v7  ;;  %7323 = vmatmul.msk.bf16.vlgmr.msrb.gmra.mxu0 %vm91_vm1, %v8032_v7 }
 0x2a2   :  { %4140 = vmatpush.bf16.msra.mxu1 %v2304_v0  ;;  %4153 = vmatpush.bf16.msra.mxu2 %v2307_v31  ;;  %v1405_v0 = vunpack.c.l.b16 %v350_v21  ;;  %v1718_v31 = vpack.c.b16 %v1404_v47, %v1404_v47  ;;  %v7128_v47 = vld [vmem:[#allocation7 + $0x4a4] sm:$0xf0]  ;;  %v7136_v21 = vld [vmem:[#allocation7 + $0x4ac] sm:$0xf0] }
 0x2a3   :  { %v8626_v4 = vpop.f32.mrf.mxu2  ;;  %4166 = vmatpush.bf16.msra.mxu3 %v2310_v9  ;;  %4179 = vmatpush.bf16.msrb.mxu0 %v2313_v2  ;;  %v1720_v2 = vpack.c.b16 %v1406_v24, %v1406_v24  ;;  %v7131_v24 = vor.u32 %v7419_v1, %v7128_v47 }
 0x2a4   :  { %12906 = vst [vmem:[#allocation74_spill] sm:$0xff] %v8626_v4  ;;  %v8628_v40 = vpop.f32.mrf.mxu3  ;;  %v1719_v9 = vpack.c.b16 %v1405_v0, %v1405_v0  ;;  %v2319_v59 = vsel %vm1894_vm2, %v1718_v31, 0 }
 0x2a5   :  { %12907 = vst [vmem:[#allocation75_spill] sm:$0xff] %v8628_v40  ;;  %v3625_v58 = vpop.f32.mrf.mxu1 }
 0x2a6   :  { %v3664_v29 = vpop.f32.mrf.mxu0  ;;  %4141 = vmatpush.bf16.msra.mxu1 %v7111_v38  ;;  %4154 = vmatpush.bf16.msra.mxu2 %v7115_v3  ;;  %v7497_v58 = vld [vmem:[#allocation7 + $0x4a0] sm:$0xf0]  ;;  %v2322_v38 = vsel %vm1894_vm2, %v1719_v9, 0  ;;  %v2325_v3 = vsel %vm1894_vm2, %v1720_v2, 0  ;;  %v7139_v9 = vor.u32 %v7420_v39, %v7136_v21  ;;  %v351_v2 = vld [vmem:[#allocation7 + $0x728] sm:$0x33] }
 0x2a7   :  { %4167 = vmatpush.bf16.msra.mxu3 %v7119_v5  ;;  %4180 = vmatpush.bf16.msrb.mxu0 %v7123_v15  ;;  %v2316_v29 = vsel %vm1894_vm2, %v1717_v30, 0  ;;  %v7134_v5 = vld [vmem:[#allocation7 + $0x238] sm:$0xf]  ;;  %v7498_v15 = vld [vmem:[#allocation7 + $0x4a8] sm:$0xf0]  ;;  %v7127_v0 = vor.u32 %v7497_v58, %v7126_v54  ;;  %v1407_v40 = vunpack.c.l.b16 %v351_v2  ;;  %v1408_v4 = vunpack.c.h.b16 %v351_v2 }
 0x2a8   :  { %v7135_v31 = vor.u32 %v7498_v15, %v7134_v5  ;;  %v7142_v15 = vld [vmem:[#allocation7 + $0x240] sm:$0xf]  ;;  %v7422_v2 = vld [vmem:[#allocation7 + $0x24c] sm:$0xf] }
 0x2a9   :  { %v1721_v58 = vpack.c.b16 %v1407_v40, %v1407_v40  ;;  %v7421_v40 = vld [vmem:[#allocation7 + $0x244] sm:$0xf] }
 0x2ab   :  { %v3638_v36 = vpop.f32.mrf.mxu2 }
 0x2ac   :  { %v3651_v49 = vpop.f32.mrf.mxu3 }
 0x2ad   :  { %v8630_v43 = vpop.f32.mrf.mxu1  ;;  %v352_v49 = vld [vmem:[#allocation7 + $0x730] sm:$0x33] }
 0x2ae   :  { %12908 = vst [vmem:[#allocation76_spill] sm:$0xff] %v8630_v43  ;;  %v8632_v19 = vpop.f32.mrf.mxu0  ;;  %v1410_v54 = vunpack.c.h.b16 %v352_v49 }
 0x2af   :  { %12909 = vst [vmem:[#allocation77_spill] sm:$0xff] %v8632_v19 }
 0x2b0   :  { %7324 = vmatmul.msk.bf16.vlgmr.msrb.gmra.mxu1 %vm91_vm1, %v8032_v7  ;;  %7325 = vmatmul.msk.bf16.vlgmr.msrb.gmra.mxu2 %vm91_vm1, %v8032_v7 }
 0x2b1   :  { %7326 = vmatmul.msk.bf16.vlgmr.msrb.gmra.mxu3 %vm91_vm1, %v8032_v7  ;;  %7327 = vmatmul.msk.bf16.vlgmr.msra.gmra.mxu0 %vm91_vm1, %v8032_v7 }
 0x2b2   :  { %4192 = vmatpush.bf16.msrb.mxu1 %v2316_v29  ;;  %4205 = vmatpush.bf16.msrb.mxu2 %v2319_v59  ;;  %v1409_v29 = vunpack.c.l.b16 %v352_v49  ;;  %v1722_v59 = vpack.c.b16 %v1408_v4, %v1408_v4  ;;  %v7144_v4 = vld [vmem:[#allocation7 + $0x4b4] sm:$0xf0]  ;;  %v7152_v49 = vld [vmem:[#allocation7 + $0x4bc] sm:$0xf0] }
 0x2b3   :  { %v8646_v30 = vpop.f32.mrf.mxu2  ;;  %4218 = vmatpush.bf16.msrb.mxu3 %v2322_v38  ;;  %4231 = vmatpush.bf16.msra.mxu0 %v2325_v3  ;;  %v1724_v3 = vpack.c.b16 %v1410_v54, %v1410_v54  ;;  %v7147_v54 = vor.u32 %v7421_v40, %v7144_v4 }
 0x2b4   :  { %12910 = vst [vmem:[#allocation78_spill] sm:$0xff] %v8646_v30  ;;  %v8648_v36 = vpop.f32.mrf.mxu3  ;;  %v1723_v38 = vpack.c.b16 %v1409_v29, %v1409_v29  ;;  %v2331_v21 = vsel %vm1894_vm2, %v1722_v59, 0 }
 0x2b5   :  { %12911 = vst [vmem:[#allocation79_spill] sm:$0xff] %v8648_v36  ;;  %v3677_v19 = vpop.f32.mrf.mxu1 }
 0x2b6   :  { %v3716_v43 = vpop.f32.mrf.mxu0  ;;  %4193 = vmatpush.bf16.msrb.mxu1 %v7127_v0  ;;  %4206 = vmatpush.bf16.msrb.mxu2 %v7131_v24  ;;  %v7499_v19 = vld [vmem:[#allocation7 + $0x4b0] sm:$0xf0]  ;;  %v2334_v0 = vsel %vm1894_vm2, %v1723_v38, 0  ;;  %v2337_v24 = vsel %vm1894_vm2, %v1724_v3, 0  ;;  %v7155_v38 = vor.u32 %v7422_v2, %v7152_v49  ;;  %v353_v3 = vld [vmem:[#allocation7 + $0x738] sm:$0x33] }
 0x2b7   :  { %4219 = vmatpush.bf16.msrb.mxu3 %v7135_v31  ;;  %4232 = vmatpush.bf16.msra.mxu0 %v7139_v9  ;;  %v2328_v43 = vsel %vm1894_vm2, %v1721_v58, 0  ;;  %v7150_v31 = vld [vmem:[#allocation7 + $0x248] sm:$0xf]  ;;  %v7500_v9 = vld [vmem:[#allocation7 + $0x4b8] sm:$0xf0]  ;;  %v7143_v29 = vor.u32 %v7499_v19, %v7142_v15  ;;  %v1411_v36 = vunpack.c.l.b16 %v353_v3  ;;  %v1412_v30 = vunpack.c.h.b16 %v353_v3 }
 0x2b8   :  { %v7151_v59 = vor.u32 %v7500_v9, %v7150_v31  ;;  %v7158_v9 = vld [vmem:[#allocation7 + $0x250] sm:$0xf]  ;;  %v7424_v3 = vld [vmem:[#allocation7 + $0x25c] sm:$0xf] }
 0x2b9   :  { %v1725_v19 = vpack.c.b16 %v1411_v36, %v1411_v36  ;;  %v7423_v36 = vld [vmem:[#allocation7 + $0x254] sm:$0xf] }
 0x2bb   :  { %v3690_v1 = vpop.f32.mrf.mxu2 }
 0x2bc   :  { %v3703_v47 = vpop.f32.mrf.mxu3 }
 0x2bd   :  { %v8650_v5 = vpop.f32.mrf.mxu1  ;;  %v354_v47 = vld [vmem:[#allocation7 + $0x740] sm:$0x33] }
 0x2be   :  { %12912 = vst [vmem:[#allocation80_spill] sm:$0xff] %v8650_v5  ;;  %v8652_v39 = vpop.f32.mrf.mxu0  ;;  %v1414_v15 = vunpack.c.h.b16 %v354_v47 }
 0x2bf   :  { %12913 = vst [vmem:[#allocation81_spill] sm:$0xff] %v8652_v39 }
 0x2c0   :  { %7328 = vmatmul.msk.bf16.vlgmr.msra.gmra.mxu1 %vm91_vm1, %v8032_v7  ;;  %7329 = vmatmul.msk.bf16.vlgmr.msra.gmra.mxu2 %vm91_vm1, %v8032_v7 }
 0x2c1   :  { %7330 = vmatmul.msk.bf16.vlgmr.msra.gmra.mxu3 %vm91_vm1, %v8032_v7  ;;  %7331 = vmatmul.msk.bf16.vlgmr.msrb.gmra.mxu0 %vm91_vm1, %v8032_v7 }
 0x2c2   :  { %4244 = vmatpush.bf16.msra.mxu1 %v2328_v43  ;;  %4257 = vmatpush.bf16.msra.mxu2 %v2331_v21  ;;  %v1413_v43 = vunpack.c.l.b16 %v354_v47  ;;  %v1726_v21 = vpack.c.b16 %v1412_v30, %v1412_v30  ;;  %v7160_v30 = vld [vmem:[#allocation7 + $0x4c4] sm:$0xf0]  ;;  %v7168_v47 = vld [vmem:[#allocation7 + $0x4cc] sm:$0xf0] }
 0x2c3   :  { %v8666_v58 = vpop.f32.mrf.mxu2  ;;  %4270 = vmatpush.bf16.msra.mxu3 %v2334_v0  ;;  %4283 = vmatpush.bf16.msrb.mxu0 %v2337_v24  ;;  %v1728_v24 = vpack.c.b16 %v1414_v15, %v1414_v15  ;;  %v7163_v15 = vor.u32 %v7423_v36, %v7160_v30 }
 0x2c4   :  { %12914 = vst [vmem:[#allocation82_spill] sm:$0xff] %v8666_v58  ;;  %v8668_v1 = vpop.f32.mrf.mxu3  ;;  %v1727_v0 = vpack.c.b16 %v1413_v43, %v1413_v43  ;;  %v2343_v49 = vsel %vm1894_vm2, %v1726_v21, 0 }
 0x2c5   :  { %12915 = vst [vmem:[#allocation83_spill] sm:$0xff] %v8668_v1  ;;  %v3729_v39 = vpop.f32.mrf.mxu1 }
 0x2c6   :  { %v3768_v5 = vpop.f32.mrf.mxu0  ;;  %4245 = vmatpush.bf16.msra.mxu1 %v7143_v29  ;;  %4258 = vmatpush.bf16.msra.mxu2 %v7147_v54  ;;  %v7501_v39 = vld [vmem:[#allocation7 + $0x4c0] sm:$0xf0]  ;;  %v2346_v29 = vsel %vm1894_vm2, %v1727_v0, 0  ;;  %v2349_v54 = vsel %vm1894_vm2, %v1728_v24, 0  ;;  %v7171_v0 = vor.u32 %v7424_v3, %v7168_v47  ;;  %v355_v24 = vld [vmem:[#allocation7 + $0x748] sm:$0x33] }
 0x2c7   :  { %4271 = vmatpush.bf16.msra.mxu3 %v7151_v59  ;;  %4284 = vmatpush.bf16.msrb.mxu0 %v7155_v38  ;;  %v2340_v5 = vsel %vm1894_vm2, %v1725_v19, 0  ;;  %v7166_v59 = vld [vmem:[#allocation7 + $0x258] sm:$0xf]  ;;  %v7502_v38 = vld [vmem:[#allocation7 + $0x4c8] sm:$0xf0]  ;;  %v7159_v43 = vor.u32 %v7501_v39, %v7158_v9  ;;  %v1415_v1 = vunpack.c.l.b16 %v355_v24  ;;  %v1416_v58 = vunpack.c.h.b16 %v355_v24 }
 0x2c8   :  { %v7167_v21 = vor.u32 %v7502_v38, %v7166_v59  ;;  %v7174_v38 = vld [vmem:[#allocation7 + $0x260] sm:$0xf]  ;;  %v7426_v24 = vld [vmem:[#allocation7 + $0x26c] sm:$0xf] }
 0x2c9   :  { %v1729_v39 = vpack.c.b16 %v1415_v1, %v1415_v1  ;;  %v7425_v1 = vld [vmem:[#allocation7 + $0x264] sm:$0xf] }
 0x2cb   :  { %v3742_v40 = vpop.f32.mrf.mxu2 }
 0x2cc   :  { %v3755_v4 = vpop.f32.mrf.mxu3 }
 0x2cd   :  { %v8670_v31 = vpop.f32.mrf.mxu1  ;;  %v356_v4 = vld [vmem:[#allocation7 + $0x750] sm:$0x33] }
 0x2ce   :  { %12916 = vst [vmem:[#allocation84_spill] sm:$0xff] %v8670_v31  ;;  %v8672_v2 = vpop.f32.mrf.mxu0  ;;  %v1418_v9 = vunpack.c.h.b16 %v356_v4 }
 0x2cf   :  { %12917 = vst [vmem:[#allocation85_spill] sm:$0xff] %v8672_v2 }
 0x2d0   :  { %7332 = vmatmul.msk.bf16.vlgmr.msrb.gmra.mxu1 %vm91_vm1, %v8032_v7  ;;  %7333 = vmatmul.msk.bf16.vlgmr.msrb.gmra.mxu2 %vm91_vm1, %v8032_v7 }
 0x2d1   :  { %7334 = vmatmul.msk.bf16.vlgmr.msrb.gmra.mxu3 %vm91_vm1, %v8032_v7  ;;  %7335 = vmatmul.msk.bf16.vlgmr.msra.gmra.mxu0 %vm91_vm1, %v8032_v7 }
 0x2d2   :  { %4296 = vmatpush.bf16.msrb.mxu1 %v2340_v5  ;;  %4309 = vmatpush.bf16.msrb.mxu2 %v2343_v49  ;;  %v1417_v5 = vunpack.c.l.b16 %v356_v4  ;;  %v1730_v49 = vpack.c.b16 %v1416_v58, %v1416_v58  ;;  %v7176_v58 = vld [vmem:[#allocation7 + $0x4d4] sm:$0xf0]  ;;  %v7184_v4 = vld [vmem:[#allocation7 + $0x4dc] sm:$0xf0] }
 0x2d3   :  { %v8686_v19 = vpop.f32.mrf.mxu2  ;;  %4322 = vmatpush.bf16.msrb.mxu3 %v2346_v29  ;;  %4335 = vmatpush.bf16.msra.mxu0 %v2349_v54  ;;  %v1732_v54 = vpack.c.b16 %v1418_v9, %v1418_v9  ;;  %v7179_v9 = vor.u32 %v7425_v1, %v7176_v58  ;;  %v7505_v58 = vld [vmem:[#allocation7 + $0x4e0] sm:$0xf0] }
 0x2d4   :  { %v8688_v40 = vpop.f32.mrf.mxu3  ;;  %v1731_v29 = vpack.c.b16 %v1417_v5, %v1417_v5  ;;  %v2355_v47 = vsel %vm1894_vm2, %v1730_v49, 0 }
 0x2d5   :  { %v3781_v2 = vpop.f32.mrf.mxu1 }
 0x2d6   :  { %v3820_v31 = vpop.f32.mrf.mxu0  ;;  %4297 = vmatpush.bf16.msrb.mxu1 %v7159_v43  ;;  %4310 = vmatpush.bf16.msrb.mxu2 %v7163_v15  ;;  %v7503_v2 = vld [vmem:[#allocation7 + $0x4d0] sm:$0xf0]  ;;  %v2358_v43 = vsel %vm1894_vm2, %v1731_v29, 0  ;;  %v2361_v15 = vsel %vm1894_vm2, %v1732_v54, 0  ;;  %v7187_v29 = vor.u32 %v7426_v24, %v7184_v4 }
 0x2d7   :  { %4323 = vmatpush.bf16.msrb.mxu3 %v7167_v21  ;;  %4336 = vmatpush.bf16.msra.mxu0 %v7171_v0  ;;  %v2352_v31 = vsel %vm1894_vm2, %v1729_v39, 0  ;;  %v7182_v21 = vld [vmem:[#allocation7 + $0x268] sm:$0xf]  ;;  %v7504_v0 = vld [vmem:[#allocation7 + $0x4d8] sm:$0xf0]  ;;  %v7175_v5 = vor.u32 %v7503_v2, %v7174_v38 }
 0x2d8   :  { %v7183_v49 = vor.u32 %v7504_v0, %v7182_v21 }
 0x2db   :  { %v3794_v36 = vpop.f32.mrf.mxu2 }
 0x2dc   :  { %v3807_v30 = vpop.f32.mrf.mxu3  ;;  %v357_v36 = vld [vmem:[#allocation7 + $0x758] sm:$0x3] }
 0x2dd   :  { %v8690_v59 = vpop.f32.mrf.mxu1 }
 0x2de   :  { %12918 = vst [vmem:[#allocation86_spill] sm:$0xff] %v8690_v59  ;;  %v8692_v3 = vpop.f32.mrf.mxu0  ;;  %v1419_v59 = vunpack.c.l.b16 %v357_v36 }
 0x2df   :  { %12919 = vst [vmem:[#allocation87_spill] sm:$0xff] %v8692_v3 }
 0x2e0   :  { %7336 = vmatmul.msk.bf16.vlgmr.msra.gmra.mxu1 %vm91_vm1, %v8032_v7  ;;  %7337 = vmatmul.msk.bf16.vlgmr.msra.gmra.mxu2 %vm91_vm1, %v8032_v7  ;;  %v1733_v38 = vpack.c.b16 %v1419_v59, %v1419_v59 }
 0x2e1   :  { %7338 = vmatmul.msk.bf16.vlgmr.msra.gmra.mxu3 %vm91_vm1, %v8032_v7  ;;  %7339 = vmatmul.msk.bf16.vlgmr.msrb.gmra.mxu0 %vm91_vm1, %v8032_v7 }
 0x2e2   :  { %4348 = vmatpush.bf16.msra.mxu1 %v2352_v31  ;;  %4361 = vmatpush.bf16.msra.mxu2 %v2355_v47 }
 0x2e3   :  { %v8706_v39 = vpop.f32.mrf.mxu2  ;;  %4374 = vmatpush.bf16.msra.mxu3 %v2358_v43  ;;  %4387 = vmatpush.bf16.msrb.mxu0 %v2361_v15  ;;  %v2364_v43 = vsel %vm1894_vm2, %v1733_v38, 0  ;;  %v7190_v15 = vld [vmem:[#allocation7 + $0x270] sm:$0xf] }
 0x2e4   :  { %v8708_v54 = vpop.f32.mrf.mxu3  ;;  %v7191_v59 = vor.u32 %v7505_v58, %v7190_v15 }
 0x2e5   :  { %v3833_v30 = vpop.f32.mrf.mxu1 }
 0x2e6   :  { %v3872_v3 = vpop.f32.mrf.mxu0  ;;  %4349 = vmatpush.bf16.msra.mxu1 %v7175_v5  ;;  %4362 = vmatpush.bf16.msra.mxu2 %v7179_v9 }
 0x2e7   :  { %4375 = vmatpush.bf16.msra.mxu3 %v7183_v49  ;;  %4388 = vmatpush.bf16.msrb.mxu0 %v7187_v29 }
 0x2eb   :  { %v3846_v31 = vpop.f32.mrf.mxu2 }
 0x2ec   :  { %v3859_v2 = vpop.f32.mrf.mxu3 }
 0x2ed   :  { %v8710_v47 = vpop.f32.mrf.mxu1 }
 0x2ee   :  { %12920 = vst [vmem:[#allocation88_spill] sm:$0xff] %v8710_v47  ;;  %v8712_v1 = vpop.f32.mrf.mxu0 }
 0x2ef   :  { %12921 = vst [vmem:[#allocation89_spill] sm:$0xff] %v8712_v1 }
 0x2f0   :  { %7340 = vmatmul.msk.bf16.vlgmr.msrb.gmra.mxu1 %vm91_vm1, %v8032_v7  ;;  %7341 = vmatmul.msk.bf16.vlgmr.msrb.gmra.mxu2 %vm91_vm1, %v8032_v7 }
 0x2f1   :  { %7342 = vmatmul.msk.bf16.vlgmr.msrb.gmra.mxu3 %vm91_vm1, %v8032_v7  ;;  %7343 = vmatmul.msk.bf16.vlgmr.msra.gmra.mxu0 %vm91_vm1, %v8032_v7 }
 0x2f2   :  { %4400 = vmatpush.bf16.msrb.mxu1 %v2364_v43 }
 0x2f3   :  { %v8723_v3 = vpop.f32.mrf.mxu2 }
 0x2f4   :  { %12922 = vst [vmem:[#allocation90_spill] sm:$0xff] %v8723_v3  ;;  %v8725_v21 = vpop.f32.mrf.mxu3 }
 0x2f5   :  { %12923 = vst [vmem:[#allocation91_spill] sm:$0xff] %v8725_v21  ;;  %v3885_v0 = vpop.f32.mrf.mxu1 }
 0x2f6   :  { %v3924_v24 = vpop.f32.mrf.mxu0  ;;  %4401 = vmatpush.bf16.msrb.mxu1 %v7191_v59 }
 0x2fb   :  { %v3898_v4 = vpop.f32.mrf.mxu2 }
 0x2fc   :  { %v3911_v5 = vpop.f32.mrf.mxu3  ;;  %v358_v4 = vld [vmem:[#allocation8] sm:$0xff] }
 0x2fd   :  { %v8727_v9 = vpop.f32.mrf.mxu1  ;;  %v359_v5 = vld [vmem:[#allocation8 + $0x8] sm:$0xff] }
 0x2fe   :  { %12924 = vst [vmem:[#allocation92_spill] sm:$0xff] %v8727_v9  ;;  %v8729_v49 = vpop.f32.mrf.mxu0  ;;  %v400_v9 = vperm.slane %v358_v4, 2  ;;  %v409_v21 = vperm.slane %v359_v5, 3 }
 0x2ff   :  { %12925 = vst [vmem:[#allocation93_spill] sm:$0xff] %v8729_v49  ;;  %v406_v49 = vperm.slane %v359_v5, 0 }
 0x300   :  { %7344 = vmatmul.msk.bf16.vlgmr.msra.gmra.mxu1 %vm91_vm1, %v8032_v7  ;;  %7345 = vmatmul.msk.bf16.vlgmr.msra.gmra.mxu2 %vm91_vm1, %v8032_v7 }
 0x301   :  { %7346 = vmatmul.msk.bf16.vlgmr.msra.gmra.mxu3 %vm91_vm1, %v8032_v7  ;;  %7347 = vmatmul.msk.bf16.vlgmr.msrb.gmra.mxu0 %vm91_vm1, %v8032_v7 }
 0x303   :  { %v8739_v29 = vpop.f32.mrf.mxu2 }
 0x304   :  { %12926 = vst [vmem:[#allocation94_spill] sm:$0xff] %v8739_v29  ;;  %v8741_v36 = vpop.f32.mrf.mxu3  ;;  %v399_v29 = vperm.slane %v358_v4, 1 }
 0x305   :  { %12927 = vst [vmem:[#allocation95_spill] sm:$0xff] %v8741_v36  ;;  %v3937_v30 = vpop.f32.mrf.mxu1  ;;  %v402_v36 = vperm.slane %v358_v4, 4 }
 0x306   :  { %v3976_v31 = vpop.f32.mrf.mxu0  ;;  %v405_v30 = vperm.slane %v358_v4, 7 }
 0x307   :  { %v398_v31 = vperm.slane %v358_v4, 0 }
 0x309   :  { %v8762_v1 = vadd.f32 %v8130_v26, %v398_v31  ;;  %v360_v26 = vld [vmem:[#allocation8 + $0x10] sm:$0xff]  ;;  %v8782_v31 = vadd.f32 %v8148_v46, %v400_v9  ;;  %v412_v9 = vperm.slane %v359_v5, 6 }
 0x30b   :  { %v3950_v38 = vpop.f32.mrf.mxu2 }
 0x30c   :  { %v3963_v2 = vpop.f32.mrf.mxu3  ;;  %v401_v38 = vperm.slane %v358_v4, 3 }
 0x30d   :  { %v8743_v43 = vpop.f32.mrf.mxu1  ;;  %v403_v2 = vperm.slane %v358_v4, 5 }
 0x30e   :  { %12928 = vst [vmem:[#allocation96_spill] sm:$0xff] %v8743_v43  ;;  %v8745_v15 = vpop.f32.mrf.mxu0  ;;  %v404_v43 = vperm.slane %v358_v4, 6  ;;  %v8765_v47 = vadd.f32 %v8132_v28, %v401_v38  ;;  %v8785_v28 = vadd.f32 %v8172_v35, %v409_v21  ;;  %v411_v38 = vperm.slane %v359_v5, 5 }
 0x30f   :  { %12929 = vst [vmem:[#allocation97_spill] sm:$0xff] %v8745_v15  ;;  %v414_v35 = vperm.slane %v360_v26, 0  ;;  %v417_v21 = vperm.slane %v360_v26, 3 }
 0x310   :  { %7348 = vmatmul.msk.bf16.vlgmr.msrb.gmra.mxu1 %vm91_vm1, %v8032_v7  ;;  %12936 = vst [vmem:[#allocation104_spill] sm:$0xff] %v8785_v28 }
 0x313   :  { %v8749_v58 = vpop.f32.mrf.mxu2 }
 0x314   :  { %12930 = vst [vmem:[#allocation98_spill] sm:$0xff] %v8749_v58  ;;  %v8751_v59 = vpop.f32.mrf.mxu3  ;;  %v8754_v58 = vadd.f32 %v8150_v60, %v402_v36  ;;  %v8773_v60 = vadd.f32 %v8146_v42, %v399_v29  ;;  %v8779_v36 = vadd.f32 %v8170_v33, %v406_v49 }
 0x315   :  { %12931 = vst [vmem:[#allocation99_spill] sm:$0xff] %v8751_v59  ;;  %v3989_v0 = vpop.f32.mrf.mxu1  ;;  %v408_v59 = vperm.slane %v359_v5, 2 }
 0x316   :  { %v4028_v24 = vpop.f32.mrf.mxu0  ;;  %v8757_v0 = vadd.f32 %v8152_v62, %v405_v30  ;;  %v8776_v62 = vadd.f32 %v8168_v17, %v404_v43  ;;  %12935 = vst [vmem:[#allocation103_spill] sm:$0xff] %v8779_v36  ;;  %v410_v30 = vperm.slane %v359_v5, 4  ;;  %v4407_v42 = vmax.f32 %v8762_v1, %v8754_v58 }
 0x317   :  { %v407_v24 = vperm.slane %v359_v5, 1  ;;  %v8795_v33 = vadd.f32 %v8188_v55, %v408_v59 }
 0x318   :  { %12932 = vst [vmem:[#allocation100_spill] sm:$0xff] %v8757_v0  ;;  %v4410_v17 = vmax.f32 %v8765_v47, %v8757_v0  ;;  %v4409_v49 = vmax.f32 %v8782_v31, %v8776_v62  ;;  %v4411_v43 = vmax.f32 %v4407_v42, %v8779_v36  ;;  %v8814_v0 = vld [vmem:[#allocation8 + $0x18] sm:$0xff]  ;;  %v421_v36 = vperm.slane %v360_v26, 7 }
 0x319   :  { %12934 = vst [vmem:[#allocation102_spill] sm:$0xff] %v8776_v62  ;;  %v8792_v29 = vadd.f32 %v8186_v51, %v407_v24  ;;  %v416_v24 = vperm.slane %v360_v26, 2 }
 0x31a   :  { %12937 = vst [vmem:[#allocation105_spill] sm:$0xff] %v8795_v33  ;;  %v4414_v55 = vmax.f32 %v4410_v17, %v8785_v28  ;;  %v8821_v17 = vadd.f32 %v8208_v32, %v412_v9 }
 0x31b   :  { %v4002_v15 = vpop.f32.mrf.mxu2 }
 0x31c   :  { %v4015_v7 = vpop.f32.mrf.mxu3  ;;  %v8768_v15 = vadd.f32 %v8166_v13, %v403_v2  ;;  %v413_v13 = vperm.slane %v359_v5, 7  ;;  %v8803_v2 = vadd.f32 %v8190_v8, %v410_v30  ;;  %v8812_v5 = vadd.f32 %v8206_v27, %v411_v38 }
 0x31d   :  { %v8759_v3 = vpop.f32.mrf.mxu1  ;;  %v415_v7 = vperm.slane %v360_v26, 1  ;;  %v4413_v8 = vmax.f32 %v4409_v49, %v8795_v33  ;;  %v418_v30 = vperm.slane %v360_v26, 4  ;;  %v8827_v27 = vadd.f32 %v8212_v53, %v417_v21 }
 0x31e   :  { %12933 = vst [vmem:[#allocation101_spill] sm:$0xff] %v8768_v15  ;;  %v8770_v4 = vpop.f32.mrf.mxu0  ;;  %v4408_v46 = vmax.f32 %v8773_v60, %v8768_v15  ;;  %v8809_v59 = vadd.f32 %v8192_v10, %v413_v13  ;;  %v8824_v10 = vadd.f32 %v8210_v50, %v414_v35  ;;  %v419_v13 = vperm.slane %v360_v26, 5 }
 0x31f   :  { %12940 = vst [vmem:[#allocation108_spill] sm:$0xff] %v8827_v27  ;;  %v4415_v28 = vmax.f32 %v4411_v43, %v8803_v2  ;;  %v420_v49 = vperm.slane %v360_v26, 6  ;;  %v422_v33 = vperm.slane %v8814_v0, 0  ;;  %v8837_v50 = vadd.f32 %v8228_v14, %v416_v24  ;;  %v362_v24 = vld [vmem:[#allocation8 + $0x20] sm:$0xff] }
 0x320   :  { %12938 = vst [vmem:[#allocation106_spill] sm:$0xff] %v8809_v59  ;;  %v4412_v42 = vmax.f32 %v4408_v46, %v8792_v29  ;;  %v8831_v46 = vadd.f32 %v8226_v6, %v415_v7  ;;  %v425_v53 = vperm.slane %v8814_v0, 3  ;;  %v8841_v9 = vadd.f32 %v8230_v34, %v418_v30 }
 0x321   :  { %12939 = vst [vmem:[#allocation107_spill] sm:$0xff] %v8824_v10  ;;  %v8844_v35 = vadd.f32 %v8232_v37, %v421_v36  ;;  %v423_v6 = vperm.slane %v8814_v0, 1  ;;  %v424_v26 = vperm.slane %v8814_v0, 2  ;;  %v4417_v21 = vmax.f32 %v4413_v8, %v8821_v17 }
 0x322   :  { %12941 = vst [vmem:[#allocation109_spill] sm:$0xff] %v8831_v46  ;;  %v4416_v32 = vmax.f32 %v4412_v42, %v8812_v5  ;;  %v4419_v43 = vmax.f32 %v4415_v28, %v8824_v10  ;;  %v8852_v14 = vadd.f32 %v8246_v57, %v419_v13  ;;  %v8856_v34 = vadd.f32 %v8248_v63, %v420_v49 }
 0x323   :  { %v8805_v51 = vpop.f32.mrf.mxu2  ;;  %12942 = vst [vmem:[#allocation110_spill] sm:$0xff] %v8837_v50  ;;  %v8859_v37 = vadd.f32 %v8250_v20, %v422_v33  ;;  %v426_v36 = vperm.slane %v8814_v0, 4  ;;  %v4421_v8 = vmax.f32 %v4417_v21, %v8837_v50  ;;  %v8864_v28 = vadd.f32 %v8252_v22, %v425_v53 }
 0x324   :  { %v8816_v62 = vpop.f32.mrf.mxu3  ;;  %12943 = vst [vmem:[#allocation111_spill] sm:$0xff] %v8841_v9  ;;  %v429_v57 = vperm.slane %v8814_v0, 7  ;;  %v427_v30 = vperm.slane %v8814_v0, 5  ;;  %v4423_v63 = vmax.f32 %v4419_v43, %v8841_v9  ;;  %v8871_v20 = vadd.f32 %v8266_v45, %v423_v6 }
 0x325   :  { %v4041_v15 = vpop.f32.mrf.mxu1  ;;  %12944 = vst [vmem:[#allocation112_spill] sm:$0xff] %v8844_v35  ;;  %v8874_v33 = vadd.f32 %v8268_v52, %v424_v26  ;;  %v433_v53 = vperm.slane %v362_v24, 3  ;;  %v4425_v43 = vmax.f32 %v4421_v8, %v8856_v34  ;;  %v8885_v45 = vadd.f32 %v8270_v12, %v426_v36 }
 0x326   :  { %v4080_v38 = vpop.f32.mrf.mxu0  ;;  %v4418_v15 = vmax.f32 %v4414_v55, %v8809_v59  ;;  %12945 = vst [vmem:[#allocation113_spill] sm:$0xff] %v8852_v14  ;;  %v4420_v55 = vmax.f32 %v4416_v32, %v8831_v46  ;;  %v430_v32 = vperm.slane %v362_v24, 0  ;;  %v431_v6 = vperm.slane %v362_v24, 1  ;;  %v372_v59 = vld [vmem:[#allocation8 + $0x70] sm:$0xff] }
 0x327   :  { %12946 = vst [vmem:[#allocation114_spill] sm:$0xff] %v8856_v34  ;;  %v8889_v26 = vadd.f32 %v8272_v16, %v429_v57  ;;  %v4429_v8 = vmax.f32 %v4425_v43, %v8874_v33  ;;  %v8905_v16 = vadd.f32 %v8292_v18, %v433_v53  ;;  %v13036_v34 = vld [vmem:[#allocation52_spill] sm:$0xff] }
 0x328   :  { %v4422_v7 = vmax.f32 %v4418_v15, %v8827_v27  ;;  %12947 = vst [vmem:[#allocation115_spill] sm:$0xff] %v8859_v37  ;;  %v4424_v22 = vmax.f32 %v4420_v55, %v8852_v14  ;;  %v428_v15 = vperm.slane %v8814_v0, 6  ;;  %v8892_v55 = vadd.f32 %v8286_v41, %v427_v30  ;;  %v13048_v27 = vld [vmem:[#allocation58_spill] sm:$0xff] }
 0x329   :  { %12948 = vst [vmem:[#allocation116_spill] sm:$0xff] %v8864_v28  ;;  %v432_v0 = vperm.slane %v362_v24, 2  ;;  %v8902_v36 = vadd.f32 %v8290_v11, %v430_v32  ;;  %v435_v41 = vperm.slane %v362_v24, 5  ;;  %v8909_v30 = vadd.f32 %v8306_v44, %v431_v6 }
 0x32a   :  { %v4426_v38 = vmax.f32 %v4422_v7, %v8844_v35  ;;  %12949 = vst [vmem:[#allocation117_spill] sm:$0xff] %v8871_v20  ;;  %v4427_v7 = vmax.f32 %v4423_v63, %v8859_v37  ;;  %v434_v63 = vperm.slane %v362_v24, 4  ;;  %v437_v37 = vperm.slane %v362_v24, 7 }
 0x32b   :  { %v4054_v42 = vpop.f32.mrf.mxu2  ;;  %12950 = vst [vmem:[#allocation118_spill] sm:$0xff] %v8874_v33  ;;  %v8899_v12 = vadd.f32 %v8288_v48, %v428_v15  ;;  %v8917_v11 = vadd.f32 %v8308_v56, %v432_v0 }
 0x32c   :  { %v4067_v13 = vpop.f32.mrf.mxu3  ;;  %12951 = vst [vmem:[#allocation119_spill] sm:$0xff] %v8885_v45  ;;  %v4430_v52 = vmax.f32 %v4426_v38, %v8864_v28  ;;  %v8894_v42 = vld [vmem:[#allocation8 + $0x28] sm:$0xff]  ;;  %v4431_v57 = vmax.f32 %v4427_v7, %v8885_v45  ;;  %v436_v38 = vperm.slane %v362_v24, 6  ;;  %v8923_v53 = vadd.f32 %v8310_v23, %v434_v63  ;;  %v364_v45 = vld [vmem:[#allocation8 + $0x30] sm:$0xff] }
 0x32d   :  { %v8876_v49 = vpop.f32.mrf.mxu1  ;;  %12952 = vst [vmem:[#allocation120_spill] sm:$0xff] %v8889_v26  ;;  %v4428_v13 = vmax.f32 %v4424_v22, %v8871_v20  ;;  %v438_v22 = vperm.slane %v8894_v42, 0  ;;  %v441_v18 = vperm.slane %v8894_v42, 3  ;;  %v8926_v44 = vadd.f32 %v8312_v25, %v437_v37  ;;  %v12962_v63 = vld [vmem:[#allocation15_spill] sm:$0xff]  ;;  %v12964_v37 = vld [vmem:[#allocation16_spill] sm:$0xff]  ;;  %v12990_v28 = vld [vmem:[#allocation29_spill] sm:$0xff] }
 0x32e   :  { %v8880_v21 = vpop.f32.mrf.mxu0  ;;  %12953 = vst [vmem:[#allocation121_spill] sm:$0xff] %v8892_v55  ;;  %v4434_v48 = vmax.f32 %v4430_v52, %v8889_v26  ;;  %v439_v24 = vperm.slane %v8894_v42, 1  ;;  %v440_v7 = vperm.slane %v8894_v42, 2  ;;  %v4433_v52 = vmax.f32 %v4429_v8, %v8899_v12 }
 0x32f   :  { %12954 = vst [vmem:[#allocation122_spill] sm:$0xff] %v8899_v12  ;;  %v4432_v15 = vmax.f32 %v4428_v13, %v8892_v55  ;;  %v4435_v56 = vmax.f32 %v4431_v57, %v8902_v36  ;;  %v8934_v13 = vadd.f32 %v8326_v61, %v435_v41  ;;  %v8938_v25 = vadd.f32 %v12962_v63, %v436_v38  ;;  %v12966_v57 = vld [vmem:[#allocation17_spill] sm:$0xff] }
 0x330   :  { %12955 = vst [vmem:[#allocation123_spill] sm:$0xff] %v8902_v36  ;;  %v4438_v0 = vmax.f32 %v4434_v48, %v8905_v16  ;;  %v8941_v55 = vadd.f32 %v12964_v37, %v438_v22  ;;  %v4437_v8 = vmax.f32 %v4433_v52, %v8917_v11  ;;  %v8946_v36 = vadd.f32 %v12966_v57, %v441_v18  ;;  %v12968_v48 = vld [vmem:[#allocation18_spill] sm:$0xff]  ;;  %v12970_v22 = vld [vmem:[#allocation19_spill] sm:$0xff] }
 0x331   :  { %12956 = vst [vmem:[#allocation124_spill] sm:$0xff] %v8905_v16  ;;  %v4436_v23 = vmax.f32 %v4432_v15, %v8909_v30  ;;  %v445_v61 = vperm.slane %v8894_v42, 7  ;;  %v4439_v41 = vmax.f32 %v4435_v56, %v8923_v53  ;;  %v8953_v15 = vadd.f32 %v12968_v48, %v439_v24  ;;  %v12974_v48 = vld [vmem:[#allocation21_spill] sm:$0xff] }
 0x332   :  { %12957 = vst [vmem:[#allocation125_spill] sm:$0xff] %v8909_v30  ;;  %v4442_v38 = vmax.f32 %v4438_v0, %v8926_v44  ;;  %v8956_v63 = vadd.f32 %v12970_v22, %v440_v7  ;;  %v444_v52 = vperm.slane %v8894_v42, 6  ;;  %v446_v18 = vperm.slane %v364_v45, 0  ;;  %v12972_v30 = vld [vmem:[#allocation20_spill] sm:$0xff]  ;;  %v12976_v22 = vld [vmem:[#allocation22_spill] sm:$0xff] }
 0x333   :  { %v8912_v43 = vpop.f32.mrf.mxu2  ;;  %12958 = vst [vmem:[#allocation126_spill] sm:$0xff] %v8917_v11  ;;  %v4440_v37 = vmax.f32 %v4436_v23, %v8934_v13  ;;  %v449_v57 = vperm.slane %v364_v45, 3  ;;  %v4441_v16 = vmax.f32 %v4437_v8, %v8938_v25  ;;  %v4443_v11 = vmax.f32 %v4439_v41, %v8941_v55 }
 0x334   :  { %v8920_v32 = vpop.f32.mrf.mxu3  ;;  %12959 = vst [vmem:[#allocation127_spill] sm:$0xff] %v8923_v53  ;;  %v447_v0 = vperm.slane %v364_v45, 1  ;;  %v4446_v24 = vmax.f32 %v4442_v38, %v8946_v36  ;;  %v8967_v7 = vadd.f32 %v12974_v48, %v445_v61  ;;  %v12980_v61 = vld [vmem:[#allocation24_spill] sm:$0xff] }
 0x335   :  { %12960 = vst [vmem:[#allocation128_spill] sm:$0xff] %v8926_v44  ;;  %v4093_v6 = vpop.f32.mrf.mxu1  ;;  %v4444_v8 = vmax.f32 %v4440_v37, %v8953_v15  ;;  %v4445_v41 = vmax.f32 %v4441_v16, %v8956_v63  ;;  %v8982_v48 = vadd.f32 %v12980_v61, %v446_v18  ;;  %v12984_v37 = vld [vmem:[#allocation26_spill] sm:$0xff]  ;;  %v12986_v18 = vld [vmem:[#allocation27_spill] sm:$0xff] }
 0x336   :  { %12961 = vst [vmem:[#allocation129_spill] sm:$0xff] %v8934_v13  ;;  %v4132_v26 = vpop.f32.mrf.mxu0  ;;  %v442_v6 = vperm.slane %v8894_v42, 4  ;;  %v8972_v13 = vld [vmem:[#allocation8 + $0x38] sm:$0xff]  ;;  %v8991_v16 = vadd.f32 %v12984_v37, %v447_v0 }
 0x337   :  { %12963 = vst [vmem:[#allocation15_spill] sm:$0xff] %v8938_v25  ;;  %v443_v26 = vperm.slane %v8894_v42, 5  ;;  %v448_v42 = vperm.slane %v364_v45, 2  ;;  %v455_v0 = vperm.slane %v8972_v13, 1 }
 0x338   :  { %12965 = vst [vmem:[#allocation16_spill] sm:$0xff] %v8941_v55  ;;  %v8963_v56 = vadd.f32 %v12972_v30, %v442_v6  ;;  %v450_v30 = vperm.slane %v364_v45, 4  ;;  %v453_v6 = vperm.slane %v364_v45, 7 }
 0x339   :  { %12967 = vst [vmem:[#allocation17_spill] sm:$0xff] %v8946_v36  ;;  %v8970_v23 = vadd.f32 %v12976_v22, %v443_v26  ;;  %v12982_v26 = vld [vmem:[#allocation25_spill] sm:$0xff]  ;;  %v451_v36 = vperm.slane %v364_v45, 5  ;;  %v8997_v61 = vadd.f32 %v12986_v18, %v448_v42  ;;  %v12992_v42 = vld [vmem:[#allocation30_spill] sm:$0xff] }
 0x33a   :  { %12969 = vst [vmem:[#allocation18_spill] sm:$0xff] %v8953_v15  ;;  %v8985_v22 = vadd.f32 %v12982_v26, %v449_v57  ;;  %v454_v15 = vperm.slane %v8972_v13, 0  ;;  %v457_v57 = vperm.slane %v8972_v13, 3  ;;  %v12988_v26 = vld [vmem:[#allocation28_spill] sm:$0xff] }
 0x33b   :  { %12971 = vst [vmem:[#allocation19_spill] sm:$0xff] %v8956_v63  ;;  %v4106_v44 = vpop.f32.mrf.mxu2  ;;  %v452_v63 = vperm.slane %v364_v45, 6  ;;  %v9001_v12 = vadd.f32 %v12988_v26, %v450_v30  ;;  %v456_v45 = vperm.slane %v8972_v13, 2  ;;  %v9012_v18 = vadd.f32 %v12992_v42, %v451_v36  ;;  %v12994_v30 = vld [vmem:[#allocation31_spill] sm:$0xff] }
 0x33c   :  { %12973 = vst [vmem:[#allocation20_spill] sm:$0xff] %v8963_v56  ;;  %v4119_v53 = vpop.f32.mrf.mxu3  ;;  %v12978_v44 = vld [vmem:[#allocation23_spill] sm:$0xff]  ;;  %v461_v36 = vperm.slane %v8972_v13, 7 }
 0x33d   :  { %12975 = vst [vmem:[#allocation21_spill] sm:$0xff] %v8967_v7  ;;  %v8976_v55 = vpop.f32.mrf.mxu1  ;;  %v8979_v38 = vadd.f32 %v12978_v44, %v444_v52  ;;  %v4447_v53 = vmax.f32 %v4443_v11, %v8963_v56  ;;  %v4450_v52 = vmax.f32 %v4446_v24, %v8967_v7  ;;  %v4448_v44 = vmax.f32 %v4444_v8, %v8970_v23  ;;  %v366_v56 = vld [vmem:[#allocation8 + $0x40] sm:$0xff] }
 0x33e   :  { %12977 = vst [vmem:[#allocation22_spill] sm:$0xff] %v8970_v23  ;;  %v8987_v25 = vpop.f32.mrf.mxu0  ;;  %v9004_v11 = vadd.f32 %v12990_v28, %v453_v6  ;;  %v9016_v26 = vadd.f32 %v12994_v30, %v452_v63  ;;  %v12996_v28 = vld [vmem:[#allocation32_spill] sm:$0xff]  ;;  %v458_v23 = vperm.slane %v8972_v13, 4  ;;  %v13000_v30 = vld [vmem:[#allocation34_spill] sm:$0xff] }
 0x33f   :  { %12979 = vst [vmem:[#allocation23_spill] sm:$0xff] %v8979_v38  ;;  %v4449_v37 = vmax.f32 %v4445_v41, %v8979_v38  ;;  %v4451_v24 = vmax.f32 %v4447_v53, %v8982_v48  ;;  %v4454_v8 = vmax.f32 %v4450_v52, %v8985_v22  ;;  %v4452_v7 = vmax.f32 %v4448_v44, %v8991_v16  ;;  %v12998_v53 = vld [vmem:[#allocation33_spill] sm:$0xff] }
 0x340   :  { %12981 = vst [vmem:[#allocation24_spill] sm:$0xff] %v8982_v48  ;;  %v9019_v6 = vadd.f32 %v12996_v28, %v454_v15  ;;  %v9026_v52 = vadd.f32 %v12998_v53, %v457_v57  ;;  %v459_v44 = vperm.slane %v8972_v13, 5  ;;  %v9035_v28 = vadd.f32 %v13000_v30, %v455_v0 }
 0x341   :  { %12983 = vst [vmem:[#allocation25_spill] sm:$0xff] %v8985_v22  ;;  %v4453_v41 = vmax.f32 %v4449_v37, %v8997_v61  ;;  %v4455_v63 = vmax.f32 %v4451_v24, %v9001_v12  ;;  %v4458_v15 = vmax.f32 %v4454_v8, %v9004_v11  ;;  %v13002_v22 = vld [vmem:[#allocation35_spill] sm:$0xff]  ;;  %v4456_v57 = vmax.f32 %v4452_v7, %v9012_v18 }
 0x342   :  { %12985 = vst [vmem:[#allocation26_spill] sm:$0xff] %v8991_v16  ;;  %v9038_v16 = vadd.f32 %v13002_v22, %v456_v45  ;;  %v460_v53 = vperm.slane %v8972_v13, 6  ;;  %v465_v48 = vperm.slane %v366_v56, 3  ;;  %v463_v0 = vperm.slane %v366_v56, 1  ;;  %v13006_v22 = vld [vmem:[#allocation37_spill] sm:$0xff] }
 0x343   :  { %12987 = vst [vmem:[#allocation27_spill] sm:$0xff] %v8997_v61  ;;  %v9022_v33 = vpop.f32.mrf.mxu2  ;;  %v462_v61 = vperm.slane %v366_v56, 0  ;;  %v4457_v20 = vmax.f32 %v4453_v41, %v9016_v26  ;;  %v4459_v24 = vmax.f32 %v4455_v63, %v9019_v6  ;;  %v4462_v30 = vmax.f32 %v4458_v15, %v9026_v52 }
 0x344   :  { %12989 = vst [vmem:[#allocation28_spill] sm:$0xff] %v9001_v12  ;;  %v9030_v42 = vpop.f32.mrf.mxu3  ;;  %v13004_v12 = vld [vmem:[#allocation36_spill] sm:$0xff]  ;;  %v9049_v45 = vadd.f32 %v13006_v22, %v461_v36  ;;  %v464_v13 = vperm.slane %v366_v56, 2  ;;  %v466_v63 = vperm.slane %v366_v56, 4  ;;  %v13014_v36 = vld [vmem:[#allocation41_spill] sm:$0xff] }
 0x345   :  { %12991 = vst [vmem:[#allocation29_spill] sm:$0xff] %v9004_v11  ;;  %v4145_v37 = vpop.f32.mrf.mxu1  ;;  %v9045_v8 = vadd.f32 %v13004_v12, %v458_v23  ;;  %v9054_v11 = vld [vmem:[#allocation8 + $0x48] sm:$0xff]  ;;  %v4461_v41 = vmax.f32 %v4457_v20, %v9038_v16  ;;  %v9065_v22 = vadd.f32 %v13014_v36, %v465_v48 }
 0x346   :  { %12993 = vst [vmem:[#allocation30_spill] sm:$0xff] %v9012_v18  ;;  %v4184_v38 = vpop.f32.mrf.mxu0  ;;  %v13008_v37 = vld [vmem:[#allocation38_spill] sm:$0xff]  ;;  %v13010_v12 = vld [vmem:[#allocation39_spill] sm:$0xff]  ;;  %v470_v20 = vperm.slane %v9054_v11, 0  ;;  %v473_v48 = vperm.slane %v9054_v11, 3  ;;  %v13020_v36 = vld [vmem:[#allocation44_spill] sm:$0xff] }
 0x347   :  { %12995 = vst [vmem:[#allocation31_spill] sm:$0xff] %v9016_v26  ;;  %v9052_v7 = vadd.f32 %v13008_v37, %v459_v44  ;;  %v4460_v38 = vmax.f32 %v4456_v57, %v9035_v28  ;;  %v9059_v23 = vadd.f32 %v13010_v12, %v460_v53  ;;  %v13012_v26 = vld [vmem:[#allocation40_spill] sm:$0xff]  ;;  %v467_v44 = vperm.slane %v366_v56, 5  ;;  %v13018_v12 = vld [vmem:[#allocation43_spill] sm:$0xff] }
 0x348   :  { %12997 = vst [vmem:[#allocation32_spill] sm:$0xff] %v9019_v6  ;;  %v469_v6 = vperm.slane %v366_v56, 7  ;;  %v9062_v15 = vadd.f32 %v13012_v26, %v462_v61  ;;  %v4463_v37 = vmax.f32 %v4459_v24, %v9045_v8  ;;  %v468_v57 = vperm.slane %v366_v56, 6  ;;  %v13022_v24 = vld [vmem:[#allocation45_spill] sm:$0xff] }
 0x349   :  { %12999 = vst [vmem:[#allocation33_spill] sm:$0xff] %v9026_v52  ;;  %v13016_v52 = vld [vmem:[#allocation42_spill] sm:$0xff]  ;;  %v4464_v53 = vmax.f32 %v4460_v38, %v9052_v7  ;;  %v9075_v61 = vadd.f32 %v13018_v12, %v464_v13  ;;  %v9079_v35 = vadd.f32 %v13020_v36, %v466_v63  ;;  %v471_v56 = vperm.slane %v9054_v11, 1  ;;  %v13026_v36 = vld [vmem:[#allocation47_spill] sm:$0xff] }
 0x34a   :  { %13001 = vst [vmem:[#allocation34_spill] sm:$0xff] %v9035_v28  ;;  %v9069_v18 = vadd.f32 %v13016_v52, %v463_v0  ;;  %v4466_v28 = vmax.f32 %v4462_v30, %v9049_v45  ;;  %v9082_v52 = vadd.f32 %v13022_v24, %v469_v6  ;;  %v4465_v30 = vmax.f32 %v4461_v41, %v9059_v23  ;;  %v13024_v12 = vld [vmem:[#allocation46_spill] sm:$0xff]  ;;  %v368_v41 = vld [vmem:[#allocation8 + $0x50] sm:$0xff] }
 0x34b   :  { %13003 = vst [vmem:[#allocation35_spill] sm:$0xff] %v9038_v16  ;;  %v4158_v16 = vpop.f32.mrf.mxu2  ;;  %v4467_v13 = vmax.f32 %v4463_v37, %v9062_v15  ;;  %v9098_v24 = vadd.f32 %v13026_v36, %v468_v57  ;;  %v13032_v36 = vld [vmem:[#allocation50_spill] sm:$0xff] }
 0x34c   :  { %13005 = vst [vmem:[#allocation36_spill] sm:$0xff] %v9045_v8  ;;  %v4171_v26 = vpop.f32.mrf.mxu3  ;;  %v472_v16 = vperm.slane %v9054_v11, 2  ;;  %v4470_v38 = vmax.f32 %v4466_v28, %v9065_v22  ;;  %v4468_v6 = vmax.f32 %v4464_v53, %v9069_v18  ;;  %v474_v8 = vperm.slane %v9054_v11, 4 }
 0x34d   :  { %13007 = vst [vmem:[#allocation37_spill] sm:$0xff] %v9049_v45  ;;  %v9086_v0 = vpop.f32.mrf.mxu1  ;;  %v9092_v26 = vadd.f32 %v13024_v12, %v467_v44  ;;  %v13028_v45 = vld [vmem:[#allocation48_spill] sm:$0xff]  ;;  %v4469_v37 = vmax.f32 %v4465_v30, %v9075_v61  ;;  %v477_v44 = vperm.slane %v9054_v11, 7  ;;  %v475_v12 = vperm.slane %v9054_v11, 5 }
 0x34e   :  { %13009 = vst [vmem:[#allocation38_spill] sm:$0xff] %v9052_v7  ;;  %v9094_v63 = vpop.f32.mrf.mxu0  ;;  %v9101_v7 = vadd.f32 %v13028_v45, %v470_v20  ;;  %v4471_v53 = vmax.f32 %v4467_v13, %v9079_v35  ;;  %v4474_v57 = vmax.f32 %v4470_v38, %v9082_v52  ;;  %v13034_v45 = vld [vmem:[#allocation51_spill] sm:$0xff]  ;;  %v476_v30 = vperm.slane %v9054_v11, 6 }
 0x34f   :  { %13011 = vst [vmem:[#allocation39_spill] sm:$0xff] %v9059_v23  ;;  %v9116_v20 = vadd.f32 %v13034_v45, %v472_v16  ;;  %v9123_v13 = vadd.f32 %v13036_v34, %v474_v8  ;;  %v479_v38 = vperm.slane %v368_v41, 1  ;;  %v13038_v16 = vld [vmem:[#allocation53_spill] sm:$0xff]  ;;  %v480_v11 = vperm.slane %v368_v41, 2 }
 0x350   :  { %13013 = vst [vmem:[#allocation40_spill] sm:$0xff] %v9062_v15  ;;  %v13030_v15 = vld [vmem:[#allocation49_spill] sm:$0xff]  ;;  %v4475_v23 = vmax.f32 %v4471_v53, %v9101_v7  ;;  %v482_v8 = vperm.slane %v368_v41, 4 }
 0x351   :  { %13015 = vst [vmem:[#allocation41_spill] sm:$0xff] %v9065_v22  ;;  %v9106_v28 = vadd.f32 %v13030_v15, %v473_v48  ;;  %v9113_v22 = vadd.f32 %v13032_v36, %v471_v56  ;;  %v478_v15 = vperm.slane %v368_v41, 0  ;;  %v481_v48 = vperm.slane %v368_v41, 3 }
 0x352   :  { %13017 = vst [vmem:[#allocation42_spill] sm:$0xff] %v9069_v18  ;;  %v4472_v18 = vmax.f32 %v4468_v6, %v9092_v26  ;;  %v9129_v36 = vadd.f32 %v13038_v16, %v477_v44  ;;  %v13040_v6 = vld [vmem:[#allocation54_spill] sm:$0xff]  ;;  %v13044_v44 = vld [vmem:[#allocation56_spill] sm:$0xff]  ;;  %v4479_v9 = vmax.f32 %v4475_v23, %v9123_v13 }
 0x353   :  { %13019 = vst [vmem:[#allocation43_spill] sm:$0xff] %v9075_v61  ;;  %v4473_v61 = vmax.f32 %v4469_v37, %v9098_v24  ;;  %v4478_v56 = vmax.f32 %v4474_v57, %v9106_v28  ;;  %v9132_v45 = vadd.f32 %v13040_v6, %v475_v12  ;;  %v9144_v16 = vadd.f32 %v13044_v44, %v478_v15  ;;  %v13046_v12 = vld [vmem:[#allocation57_spill] sm:$0xff]  ;;  %v13052_v44 = vld [vmem:[#allocation60_spill] sm:$0xff] }
 0x354   :  { %13021 = vst [vmem:[#allocation44_spill] sm:$0xff] %v9079_v35  ;;  %v9136_v37 = vpop.f32.mrf.mxu3  ;;  %v4476_v53 = vmax.f32 %v4472_v18, %v9113_v22  ;;  %v13042_v35 = vld [vmem:[#allocation55_spill] sm:$0xff]  ;;  %v9147_v6 = vadd.f32 %v13046_v12, %v481_v48  ;;  %v9151_v18 = vadd.f32 %v13048_v27, %v479_v38  ;;  %v9161_v12 = vadd.f32 %v13052_v44, %v482_v8 }
 0x355   :  { %13023 = vst [vmem:[#allocation45_spill] sm:$0xff] %v9082_v52  ;;  %v9125_v52 = vpop.f32.mrf.mxu2  ;;  %v4477_v34 = vmax.f32 %v4473_v61, %v9116_v20  ;;  %v9141_v57 = vadd.f32 %v13042_v35, %v476_v30  ;;  %v484_v61 = vperm.slane %v368_v41, 6  ;;  %v13050_v30 = vld [vmem:[#allocation59_spill] sm:$0xff] }
 0x356   :  { %13025 = vst [vmem:[#allocation46_spill] sm:$0xff] %v9092_v26  ;;  %v9134_v26 = vld [vmem:[#allocation8 + $0x58] sm:$0xff]  ;;  %v4236_v14 = vpop.f32.mrf.mxu0  ;;  %v4480_v35 = vmax.f32 %v4476_v53, %v9132_v45  ;;  %v9157_v15 = vadd.f32 %v13050_v30, %v480_v11  ;;  %v13058_v8 = vld [vmem:[#allocation63_spill] sm:$0xff] }
 0x357   :  { %13027 = vst [vmem:[#allocation47_spill] sm:$0xff] %v9098_v24  ;;  %v4197_v24 = vpop.f32.mrf.mxu1  ;;  %v489_v48 = vperm.slane %v9134_v26, 3  ;;  %v13054_v14 = vld [vmem:[#allocation61_spill] sm:$0xff]  ;;  %v487_v27 = vperm.slane %v9134_v26, 1  ;;  %v4481_v38 = vmax.f32 %v4477_v34, %v9141_v57  ;;  %v13056_v11 = vld [vmem:[#allocation62_spill] sm:$0xff]  ;;  %v9176_v44 = vadd.f32 %v13058_v8, %v484_v61 }
 0x358   :  { %13029 = vst [vmem:[#allocation48_spill] sm:$0xff] %v9101_v7  ;;  %v485_v7 = vperm.slane %v368_v41, 7  ;;  %v4482_v24 = vmax.f32 %v4478_v56, %v9129_v36  ;;  %v4483_v56 = vmax.f32 %v4479_v9, %v9144_v16  ;;  %v13062_v9 = vld [vmem:[#allocation65_spill] sm:$0xff] }
 0x359   :  { %13031 = vst [vmem:[#allocation49_spill] sm:$0xff] %v9106_v28  ;;  %v483_v28 = vperm.slane %v368_v41, 5  ;;  %v488_v41 = vperm.slane %v9134_v26, 2  ;;  %v4485_v34 = vmax.f32 %v4481_v38, %v9157_v15  ;;  %v492_v38 = vperm.slane %v9134_v26, 6 }
 0x35a   :  { %13033 = vst [vmem:[#allocation50_spill] sm:$0xff] %v9113_v22  ;;  %v9164_v23 = vadd.f32 %v13054_v14, %v485_v7  ;;  %v4486_v53 = vmax.f32 %v4482_v24, %v9147_v6  ;;  %v13060_v7 = vld [vmem:[#allocation64_spill] sm:$0xff]  ;;  %v491_v24 = vperm.slane %v9134_v26, 5  ;;  %v4487_v61 = vmax.f32 %v4483_v56, %v9161_v12 }
 0x35b   :  { %13035 = vst [vmem:[#allocation51_spill] sm:$0xff] %v9116_v20  ;;  %v486_v20 = vperm.slane %v9134_v26, 0  ;;  %v9172_v30 = vadd.f32 %v13056_v11, %v483_v28  ;;  %v493_v28 = vperm.slane %v9134_v26, 7  ;;  %v4489_v56 = vmax.f32 %v4485_v34, %v9176_v44 }
 0x35c   :  { %13037 = vst [vmem:[#allocation52_spill] sm:$0xff] %v9123_v13  ;;  %v370_v13 = vld [vmem:[#allocation8 + $0x60] sm:$0xff]  ;;  %v4490_v11 = vmax.f32 %v4486_v53, %v9164_v23 }
 0x35d   :  { %13039 = vst [vmem:[#allocation53_spill] sm:$0xff] %v9129_v36  ;;  %v4484_v36 = vmax.f32 %v4480_v35, %v9151_v18  ;;  %v9179_v14 = vadd.f32 %v13060_v7, %v486_v20  ;;  %v4210_v22 = vpop.f32.mrf.mxu2  ;;  %v4223_v35 = vpop.f32.mrf.mxu3  ;;  %v13064_v20 = vld [vmem:[#allocation66_spill] sm:$0xff]  ;;  %v13066_v7 = vld [vmem:[#allocation67_spill] sm:$0xff] }
 0x35e   :  { %13041 = vst [vmem:[#allocation54_spill] sm:$0xff] %v9132_v45  ;;  %v490_v45 = vperm.slane %v9134_v26, 4  ;;  %v9191_v8 = vadd.f32 %v13064_v20, %v487_v27  ;;  %v13068_v35 = vld [vmem:[#allocation68_spill] sm:$0xff]  ;;  %v495_v20 = vperm.slane %v370_v13, 1  ;;  %v496_v26 = vperm.slane %v370_v13, 2 }
 0x35f   :  { %13043 = vst [vmem:[#allocation55_spill] sm:$0xff] %v9141_v57  ;;  %v9196_v22 = vpop.f32.mrf.mxu1  ;;  %v4491_v53 = vmax.f32 %v4487_v61, %v9179_v14  ;;  %v498_v61 = vperm.slane %v370_v13, 4 }
 0x360   :  { %13045 = vst [vmem:[#allocation56_spill] sm:$0xff] %v9144_v16  ;;  %v9184_v16 = vadd.f32 %v13062_v9, %v489_v48  ;;  %v4488_v48 = vmax.f32 %v4484_v36, %v9172_v30  ;;  %v494_v9 = vperm.slane %v370_v13, 0  ;;  %v9205_v27 = vadd.f32 %v13068_v35, %v490_v45  ;;  %v13072_v36 = vld [vmem:[#allocation70_spill] sm:$0xff]  ;;  %v13074_v45 = vld [vmem:[#allocation71_spill] sm:$0xff] }
 0x361   :  { %13047 = vst [vmem:[#allocation57_spill] sm:$0xff] %v9147_v6  ;;  %v9194_v6 = vadd.f32 %v13066_v7, %v488_v41  ;;  %v13070_v7 = vld [vmem:[#allocation69_spill] sm:$0xff]  ;;  %v9219_v35 = vadd.f32 %v13074_v45, %v492_v38 }
 0x362   :  { %13049 = vst [vmem:[#allocation58_spill] sm:$0xff] %v9151_v18  ;;  %v9200_v18 = vpop.f32.mrf.mxu0  ;;  %v4494_v41 = vmax.f32 %v4490_v11, %v9184_v16  ;;  %v4492_v57 = vmax.f32 %v4488_v48, %v9191_v8  ;;  %v500_v48 = vperm.slane %v370_v13, 6 }
 0x363   :  { %13051 = vst [vmem:[#allocation59_spill] sm:$0xff] %v9157_v15  ;;  %v497_v15 = vperm.slane %v370_v13, 3  ;;  %v4493_v34 = vmax.f32 %v4489_v56, %v9194_v6 }
 0x364   :  { %13053 = vst [vmem:[#allocation60_spill] sm:$0xff] %v9161_v12  ;;  %v9214_v12 = vld [vmem:[#allocation8 + $0x68] sm:$0xff] }
 0x365   :  { %13055 = vst [vmem:[#allocation61_spill] sm:$0xff] %v9164_v23  ;;  %v9209_v23 = vadd.f32 %v13070_v7, %v493_v28  ;;  %v13077_v28 = vld [vmem:[#allocation73_spill] sm:$0xff]  ;;  %v502_v56 = vperm.slane %v9214_v12, 0 }
 0x366   :  { %13057 = vst [vmem:[#allocation62_spill] sm:$0xff] %v9172_v30  ;;  %v9212_v30 = vadd.f32 %v13072_v36, %v491_v24  ;;  %v9225_v7 = vadd.f32 %v13077_v28, %v497_v15  ;;  %v499_v24 = vperm.slane %v370_v13, 5  ;;  %v4495_v36 = vmax.f32 %v4491_v53, %v9205_v27  ;;  %v9240_v28 = vpop.f32.mrf.mxu3  ;;  %v13083_v53 = vld [vmem:[#allocation76_spill] sm:$0xff] }
 0x367   :  { %13059 = vst [vmem:[#allocation63_spill] sm:$0xff] %v9176_v44  ;;  %v13075_v44 = vld [vmem:[#allocation72_spill] sm:$0xff]  ;;  %v4498_v38 = vmax.f32 %v4494_v41, %v9209_v23  ;;  %v505_v15 = vperm.slane %v9214_v12, 3  ;;  %v4249_v41 = vpop.f32.mrf.mxu1 }
 0x368   :  { %13061 = vst [vmem:[#allocation64_spill] sm:$0xff] %v9179_v14  ;;  %v501_v14 = vperm.slane %v370_v13, 7  ;;  %v9222_v11 = vadd.f32 %v13075_v44, %v494_v9  ;;  %v4496_v45 = vmax.f32 %v4492_v57, %v9212_v30  ;;  %v13081_v44 = vld [vmem:[#allocation75_spill] sm:$0xff]  ;;  %v4497_v57 = vmax.f32 %v4493_v34, %v9219_v35 }
 0x369   :  { %13063 = vst [vmem:[#allocation65_spill] sm:$0xff] %v9184_v16  ;;  %v13079_v16 = vld [vmem:[#allocation74_spill] sm:$0xff]  ;;  %v9237_v9 = vadd.f32 %v13081_v44, %v496_v26  ;;  %v4502_v44 = vmax.f32 %v4498_v38, %v9225_v7  ;;  %v506_v41 = vperm.slane %v9214_v12, 4 }
 0x36a   :  { %13065 = vst [vmem:[#allocation66_spill] sm:$0xff] %v9191_v8  ;;  %v9229_v50 = vadd.f32 %v13079_v16, %v495_v20  ;;  %v13085_v16 = vld [vmem:[#allocation77_spill] sm:$0xff]  ;;  %v503_v20 = vperm.slane %v9214_v12, 1  ;;  %v504_v8 = vperm.slane %v9214_v12, 2  ;;  %v4499_v26 = vmax.f32 %v4495_v36, %v9222_v11  ;;  %v4288_v46 = vpop.f32.mrf.mxu0  ;;  %v13095_v38 = vld [vmem:[#allocation82_spill] sm:$0xff] }
 0x36b   :  { %13067 = vst [vmem:[#allocation67_spill] sm:$0xff] %v9194_v6  ;;  %v9232_v6 = vpop.f32.mrf.mxu2  ;;  %v9246_v13 = vadd.f32 %v13085_v16, %v501_v14  ;;  %v13091_v16 = vld [vmem:[#allocation80_spill] sm:$0xff]  ;;  %v4501_v34 = vmax.f32 %v4497_v57, %v9237_v9  ;;  %v13093_v36 = vld [vmem:[#allocation81_spill] sm:$0xff]  ;;  %v507_v46 = vperm.slane %v9214_v12, 5  ;;  %v508_v57 = vperm.slane %v9214_v12, 6 }
 0x36c   :  { %13069 = vst [vmem:[#allocation68_spill] sm:$0xff] %v9205_v27  ;;  %v9243_v27 = vadd.f32 %v13083_v53, %v498_v61  ;;  %v4500_v61 = vmax.f32 %v4496_v45, %v9229_v50  ;;  %v13089_v53 = vld [vmem:[#allocation79_spill] sm:$0xff]  ;;  %v9261_v10 = vadd.f32 %v13091_v16, %v502_v56  ;;  %v9273_v45 = vadd.f32 %v13095_v38, %v503_v20  ;;  %v13101_v38 = vld [vmem:[#allocation85_spill] sm:$0xff] }
 0x36d   :  { %13071 = vst [vmem:[#allocation69_spill] sm:$0xff] %v9209_v23  ;;  %v13087_v23 = vld [vmem:[#allocation78_spill] sm:$0xff]  ;;  %v9258_v14 = vadd.f32 %v13089_v53, %v500_v48  ;;  %v4506_v48 = vmax.f32 %v4502_v44, %v9246_v13  ;;  %v13097_v56 = vld [vmem:[#allocation83_spill] sm:$0xff]  ;;  %v511_v44 = vperm.slane %v372_v59, 1 }
 0x36e   :  { %13073 = vst [vmem:[#allocation70_spill] sm:$0xff] %v9212_v30  ;;  %v9254_v30 = vadd.f32 %v13087_v23, %v499_v24  ;;  %v509_v23 = vperm.slane %v9214_v12, 7  ;;  %v4503_v24 = vmax.f32 %v4499_v26, %v9243_v27  ;;  %v9276_v53 = vadd.f32 %v13097_v56, %v504_v8  ;;  %v9292_v56 = vld [vmem:[#allocation8 + $0x78] sm:$0xff] }
 0x36f   :  { %13076 = vst [vmem:[#allocation71_spill] sm:$0xff] %v9222_v11  ;;  %v9266_v11 = vadd.f32 %v13093_v36, %v505_v15  ;;  %v510_v15 = vperm.slane %v372_v59, 0  ;;  %v513_v36 = vperm.slane %v372_v59, 3  ;;  %v512_v12 = vperm.slane %v372_v59, 2 }
 0x370   :  { %13078 = vst [vmem:[#allocation72_spill] sm:$0xff] %v9225_v7  ;;  %v4504_v16 = vmax.f32 %v4500_v61, %v9254_v30  ;;  %v4505_v7 = vmax.f32 %v4501_v34, %v9258_v14  ;;  %v9287_v8 = vadd.f32 %v13101_v38, %v509_v23  ;;  %v9290_v61 = vadd.f32 %v8686_v19, %v507_v46  ;;  %v13105_v23 = vld [vmem:[#allocation86_spill] sm:$0xff]  ;;  %v13107_v19 = vld [vmem:[#allocation87_spill] sm:$0xff] }
 0x371   :  { %13080 = vst [vmem:[#allocation73_spill] sm:$0xff] %v9229_v50  ;;  %v13099_v50 = vld [vmem:[#allocation84_spill] sm:$0xff]  ;;  %v4510_v20 = vmax.f32 %v4506_v48, %v9266_v11  ;;  %v9302_v48 = vadd.f32 %v13105_v23, %v510_v15  ;;  %v9305_v46 = vadd.f32 %v13107_v19, %v513_v36  ;;  %v515_v38 = vperm.slane %v372_v59, 5 }
 0x372   :  { %13082 = vst [vmem:[#allocation74_spill] sm:$0xff] %v9237_v9  ;;  %v4507_v9 = vmax.f32 %v4503_v24, %v9261_v10  ;;  %v9283_v26 = vadd.f32 %v13099_v50, %v506_v41  ;;  %v4508_v34 = vmax.f32 %v4504_v16, %v9273_v45  ;;  %v4509_v24 = vmax.f32 %v4505_v7, %v9276_v53  ;;  %v13111_v23 = vld [vmem:[#allocation88_spill] sm:$0xff] }
 0x373   :  { %13084 = vst [vmem:[#allocation75_spill] sm:$0xff] %v9243_v27  ;;  %v514_v50 = vperm.slane %v372_v59, 4  ;;  %v517_v41 = vperm.slane %v372_v59, 7  ;;  %v9311_v7 = vadd.f32 %v8706_v39, %v511_v44  ;;  %v516_v16 = vperm.slane %v372_v59, 6 }
 0x374   :  { %13086 = vst [vmem:[#allocation76_spill] sm:$0xff] %v9246_v13  ;;  %v4262_v13 = vpop.f32.mrf.mxu2  ;;  %v9317_v15 = vadd.f32 %v8708_v54, %v512_v12  ;;  %v521_v36 = vperm.slane %v9292_v56, 3  ;;  %v519_v39 = vperm.slane %v9292_v56, 1  ;;  %v520_v59 = vperm.slane %v9292_v56, 2  ;;  %v13115_v54 = vld [vmem:[#allocation90_spill] sm:$0xff] }
 0x375   :  { %13088 = vst [vmem:[#allocation77_spill] sm:$0xff] %v9254_v30  ;;  %v4275_v30 = vpop.f32.mrf.mxu3  ;;  %v9299_v13 = vadd.f32 %v8688_v40, %v508_v57  ;;  %v4514_v40 = vmax.f32 %v4510_v20, %v9287_v8  ;;  %v4512_v57 = vmax.f32 %v4508_v34, %v9290_v61  ;;  %v9321_v19 = vadd.f32 %v13111_v23, %v514_v50  ;;  %v13116_v50 = vld [vmem:[#allocation91_spill] sm:$0xff] }
 0x376   :  { %13090 = vst [vmem:[#allocation78_spill] sm:$0xff] %v9258_v14  ;;  %v4511_v30 = vmax.f32 %v4507_v9, %v9283_v26  ;;  %v9332_v12 = vadd.f32 %v13115_v54, %v515_v38  ;;  %v9336_v23 = vadd.f32 %v13116_v50, %v516_v16  ;;  %v525_v38 = vperm.slane %v9292_v56, 7  ;;  %v13121_v50 = vld [vmem:[#allocation94_spill] sm:$0xff] }
 0x377   :  { %13092 = vst [vmem:[#allocation79_spill] sm:$0xff] %v9261_v10  ;;  %v9296_v10 = vpop.f32.mrf.mxu1  ;;  %v4513_v44 = vmax.f32 %v4509_v24, %v9299_v13  ;;  %v4518_v34 = vmax.f32 %v4514_v40, %v9305_v46 }
 0x378   :  { %13094 = vst [vmem:[#allocation80_spill] sm:$0xff] %v9266_v11  ;;  %v9307_v11 = vpop.f32.mrf.mxu0  ;;  %v4515_v20 = vmax.f32 %v4511_v30, %v9302_v48  ;;  %v13119_v30 = vld [vmem:[#allocation93_spill] sm:$0xff] }
 0x379   :  { %13096 = vst [vmem:[#allocation81_spill] sm:$0xff] %v9273_v45  ;;  %v13113_v45 = vld [vmem:[#allocation89_spill] sm:$0xff]  ;;  %v4517_v24 = vmax.f32 %v4513_v44, %v9317_v15  ;;  %v9346_v40 = vadd.f32 %v13119_v30, %v521_v36  ;;  %v524_v30 = vperm.slane %v9292_v56, 6 }
 0x37a   :  { %13098 = vst [vmem:[#allocation82_spill] sm:$0xff] %v9276_v53  ;;  %v518_v53 = vperm.slane %v9292_v56, 0  ;;  %v9324_v9 = vadd.f32 %v13113_v45, %v517_v41  ;;  %v13117_v45 = vld [vmem:[#allocation92_spill] sm:$0xff]  ;;  %v4519_v16 = vmax.f32 %v4515_v20, %v9321_v19 }
 0x37b   :  { %13100 = vst [vmem:[#allocation83_spill] sm:$0xff] %v9283_v26  ;;  %v374_v26 = vld [vmem:[#allocation8 + $0x80] sm:$0xff]  ;;  %v4521_v27 = vmax.f32 %v4517_v24, %v9336_v23 }
 0x37c   :  { %13102 = vst [vmem:[#allocation84_spill] sm:$0xff] %v9287_v8  ;;  %v4516_v8 = vmax.f32 %v4512_v57, %v9311_v7  ;;  %v9339_v41 = vadd.f32 %v13117_v45, %v518_v53  ;;  %v9342_v14 = vpop.f32.mrf.mxu2  ;;  %v523_v57 = vperm.slane %v9292_v56, 5  ;;  %v4522_v53 = vmax.f32 %v4518_v34, %v9324_v9 }
 0x37d   :  { %13103 = vst [vmem:[#allocation85_spill] sm:$0xff] %v9290_v61  ;;  %v522_v61 = vperm.slane %v9292_v56, 4  ;;  %v9350_v54 = vpop.f32.mrf.mxu3  ;;  %v9355_v45 = vadd.f32 %v13121_v50, %v519_v39  ;;  %v527_v39 = vperm.slane %v374_v26, 1  ;;  %v528_v56 = vperm.slane %v374_v26, 2 }
 0x37e   :  { %13104 = vst [vmem:[#allocation130_spill] sm:$0xff] %v9299_v13  ;;  %v4520_v36 = vmax.f32 %v4516_v8, %v9332_v12  ;;  %v4523_v20 = vmax.f32 %v4519_v16, %v9339_v41  ;;  %v4526_v50 = vmax.f32 %v4522_v53, %v9346_v40  ;;  %v530_v16 = vperm.slane %v374_v26, 4 }
 0x37f   :  { %13106 = vst [vmem:[#allocation86_spill] sm:$0xff] %v9302_v48  ;;  %v4301_v44 = vpop.f32.mrf.mxu1  ;;  %v529_v48 = vperm.slane %v374_v26, 3 }
 0x380   :  { %13108 = vst [vmem:[#allocation87_spill] sm:$0xff] %v9305_v46  ;;  %v13122_v46 = vld [vmem:[#allocation95_spill] sm:$0xff]  ;;  %v4340_v13 = vpop.f32.mrf.mxu0  ;;  %v13126_v44 = vld [vmem:[#allocation98_spill] sm:$0xff] }
 0x381   :  { %13109 = vst [vmem:[#allocation131_spill] sm:$0xff] %v9311_v7  ;;  %v9358_v7 = vadd.f32 %v13122_v46, %v520_v59  ;;  %v13125_v46 = vld [vmem:[#allocation97_spill] sm:$0xff]  ;;  %v9372_v8 = vadd.f32 %v13126_v44, %v523_v57  ;;  %v4524_v13 = vmax.f32 %v4520_v36, %v9355_v45  ;;  %v531_v57 = vperm.slane %v374_v26, 5 }
 0x382   :  { %13110 = vst [vmem:[#allocation132_spill] sm:$0xff] %v9317_v15  ;;  %v526_v15 = vperm.slane %v374_v26, 0  ;;  %v9369_v59 = vadd.f32 %v13125_v46, %v525_v38  ;;  %v9385_v38 = vadd.f32 %v8770_v4, %v529_v48  ;;  %v9389_v44 = vadd.f32 %v8805_v51, %v527_v39 }
 0x383   :  { %13112 = vst [vmem:[#allocation88_spill] sm:$0xff] %v9321_v19  ;;  %v13124_v19 = vld [vmem:[#allocation96_spill] sm:$0xff]  ;;  %v4525_v24 = vmax.f32 %v4521_v27, %v9358_v7  ;;  %v532_v36 = vperm.slane %v374_v26, 6 }
 0x384   :  { %13114 = vst [vmem:[#allocation89_spill] sm:$0xff] %v9324_v9  ;;  %v9365_v34 = vadd.f32 %v13124_v19, %v522_v61  ;;  %v9374_v9 = vld [vmem:[#allocation8 + $0x88] sm:$0xff]  ;;  %v9382_v53 = vadd.f32 %v8759_v3, %v526_v15  ;;  %v9395_v3 = vadd.f32 %v8816_v62, %v528_v56  ;;  %v9399_v15 = vadd.f32 %v8876_v49, %v530_v16 }
 0x385   :  { %13118 = vst [vmem:[#allocation90_spill] sm:$0xff] %v9339_v41  ;;  %v533_v41 = vperm.slane %v374_v26, 7  ;;  %v13127_v61 = vld [vmem:[#allocation99_spill] sm:$0xff]  ;;  %v534_v27 = vperm.slane %v9374_v9, 0  ;;  %v537_v4 = vperm.slane %v9374_v9, 3  ;;  %v4327_v48 = vpop.f32.mrf.mxu3  ;;  %v535_v26 = vperm.slane %v9374_v9, 1 }
 0x386   :  { %13120 = vst [vmem:[#allocation91_spill] sm:$0xff] %v9346_v40  ;;  %v9379_v19 = vadd.f32 %v13127_v61, %v524_v30  ;;  %v4527_v46 = vmax.f32 %v4523_v20, %v9365_v34  ;;  %v4314_v40 = vpop.f32.mrf.mxu2  ;;  %v4528_v30 = vmax.f32 %v4524_v13, %v9372_v8  ;;  %v9410_v56 = vadd.f32 %v8912_v43, %v531_v57 }
 0x387   :  { %13123 = vst [vmem:[#allocation92_spill] sm:$0xff] %v9358_v7  ;;  %v4530_v7 = vmax.f32 %v4526_v50, %v9369_v59  ;;  %v9402_v51 = vadd.f32 %v8880_v21, %v533_v41  ;;  %v536_v40 = vperm.slane %v9374_v9, 2  ;;  %v4351_v20 = vpop.f32.mrf.mxu1  ;;  %v9416_v21 = vadd.f32 %v8920_v32, %v532_v36 }
 0x388   :  { %v4529_v39 = vmax.f32 %v4525_v24, %v9379_v19  ;;  %v4531_v50 = vmax.f32 %v4527_v46, %v9382_v53  ;;  %v9412_v13 = vpop.f32.mrf.mxu0  ;;  %v4532_v49 = vmax.f32 %v4528_v30, %v9389_v44  ;;  %v9419_v41 = vadd.f32 %v8976_v55, %v534_v27  ;;  %v376_v24 = vld [vmem:[#allocation8 + $0x90] sm:$0xff] }
 0x389   :  { %13128 = vst [vmem:[#allocation93_spill] sm:$0xff] %v9402_v51  ;;  %v4534_v62 = vmax.f32 %v4530_v7, %v9385_v38  ;;  %v538_v16 = vperm.slane %v9374_v9, 4  ;;  %v9424_v7 = vadd.f32 %v8987_v25, %v537_v4  ;;  %v541_v43 = vperm.slane %v9374_v9, 7 }
 0x38a   :  { %13129 = vst [vmem:[#allocation94_spill] sm:$0xff] %v9416_v21  ;;  %v4533_v61 = vmax.f32 %v4529_v39, %v9395_v3  ;;  %v540_v57 = vperm.slane %v9374_v9, 6  ;;  %v4535_v46 = vmax.f32 %v4531_v50, %v9399_v15  ;;  %v9431_v36 = vadd.f32 %v9022_v33, %v535_v26 }
 0x38b   :  { %13130 = vst [vmem:[#allocation95_spill] sm:$0xff] %v9419_v41  ;;  %v4538_v32 = vmax.f32 %v4534_v62, %v9402_v51  ;;  %v9434_v55 = vadd.f32 %v9030_v42, %v536_v40  ;;  %v4536_v27 = vmax.f32 %v4532_v49, %v9410_v56  ;;  %v539_v30 = vperm.slane %v9374_v9, 5  ;;  %v377_v40 = vld [vmem:[#allocation8 + $0x98] sm:$0x1f] }
 0x38c   :  { %13131 = vst [vmem:[#allocation96_spill] sm:$0xff] %v9424_v7  ;;  %v542_v25 = vperm.slane %v376_v24, 0  ;;  %v544_v4 = vperm.slane %v376_v24, 2  ;;  %v4537_v48 = vmax.f32 %v4533_v61, %v9416_v21  ;;  %v4539_v39 = vmax.f32 %v4535_v46, %v9419_v41 }
 0x38d   :  { %13132 = vst [vmem:[#allocation97_spill] sm:$0xff] %v9431_v36  ;;  %v9441_v50 = vadd.f32 %v9086_v0, %v538_v16  ;;  %v545_v62 = vperm.slane %v376_v24, 3  ;;  %v4542_v33 = vmax.f32 %v4538_v32, %v9424_v7  ;;  %v9445_v42 = vadd.f32 %v9094_v63, %v541_v43  ;;  %v4377_v49 = vpop.f32.mrf.mxu3 }
 0x38e   :  { %v4364_v51 = vpop.f32.mrf.mxu2  ;;  %v9448_v26 = vadd.f32 %v9136_v37, %v540_v57  ;;  %v543_v9 = vperm.slane %v376_v24, 1  ;;  %v4540_v61 = vmax.f32 %v4536_v27, %v9431_v36  ;;  %v4541_v46 = vmax.f32 %v4537_v48, %v9434_v55 }
 0x38f   :  { %v546_v41 = vperm.slane %v376_v24, 4  ;;  %v548_v0 = vperm.slane %v376_v24, 6  ;;  %v4353_v16 = vpop.f32.mrf.mxu1  ;;  %v9453_v21 = vadd.f32 %v9125_v52, %v539_v30  ;;  %v9456_v32 = vadd.f32 %v9196_v22, %v542_v25 }
 0x390   :  { %v9459_v63 = vadd.f32 %v9240_v28, %v544_v4  ;;  %v549_v37 = vperm.slane %v376_v24, 7  ;;  %v4392_v43 = vpop.f32.mrf.mxu0  ;;  %v4543_v57 = vmax.f32 %v4539_v39, %v9441_v50  ;;  %v547_v7 = vperm.slane %v376_v24, 5 }
 0x391   :  { %v550_v27 = vperm.slane %v377_v40, 0  ;;  %v552_v36 = vperm.slane %v377_v40, 2  ;;  %v4546_v48 = vmax.f32 %v4542_v33, %v9445_v42  ;;  %v4545_v16 = vmax.f32 %v4541_v46, %v9448_v26 }
 0x392   :  { %v9465_v52 = vadd.f32 %v9200_v18, %v545_v62  ;;  %v9468_v22 = vadd.f32 %v9232_v6, %v543_v9  ;;  %v9471_v28 = vadd.f32 %v9296_v10, %v546_v41  ;;  %v9474_v30 = vadd.f32 %v9350_v54, %v548_v0 }
 0x393   :  { %v553_v25 = vperm.slane %v377_v40, 3  ;;  %v551_v24 = vperm.slane %v377_v40, 1  ;;  %v4544_v4 = vmax.f32 %v4540_v61, %v9453_v21  ;;  %v4547_v39 = vmax.f32 %v4543_v57, %v9456_v32 }
 0x394   :  { %v4549_v33 = vmax.f32 %v4545_v16, %v9459_v63  ;;  %v554_v46 = vperm.slane %v377_v40, 4  ;;  %v9480_v18 = vadd.f32 %v9307_v11, %v549_v37  ;;  %v9483_v6 = vadd.f32 %v9342_v14, %v547_v7 }
 0x395   :  { %v9485_v10 = vadd.f32 %v4351_v20, %v550_v27  ;;  %v9487_v41 = vadd.f32 %v4377_v49, %v552_v36  ;;  %v4550_v62 = vmax.f32 %v4546_v48, %v9465_v52  ;;  %v4548_v9 = vmax.f32 %v4544_v4, %v9468_v22  ;;  %v4379_v61 = vpop.f32.mrf.mxu3 }
 0x396   :  { %v4366_v54 = vpop.f32.mrf.mxu2  ;;  %v4551_v0 = vmax.f32 %v4547_v39, %v9471_v28  ;;  %v4553_v40 = vmax.f32 %v4549_v33, %v9474_v30  ;;  %v9494_v11 = vadd.f32 %v9412_v13, %v553_v25  ;;  %v9496_v14 = vadd.f32 %v4364_v51, %v551_v24 }
 0x397   :  { %v4403_v20 = vpop.f32.mrf.mxu1  ;;  %v4554_v36 = vmax.f32 %v4550_v62, %v9480_v18  ;;  %v4552_v49 = vmax.f32 %v4548_v9, %v9483_v6 }
 0x398   :  { %v9498_v7 = vadd.f32 %v4403_v20, %v554_v46  ;;  %v4555_v37 = vmax.f32 %v4551_v0, %v9485_v10  ;;  %v4557_v43 = vmax.f32 %v4553_v40, %v9487_v41  ;;  %v13133_v40 = vld [vmem:[#allocation101_spill] sm:$0xff] }
 0x399   :  { %v4558_v27 = vmax.f32 %v4554_v36, %v9494_v11  ;;  %v4556_v13 = vmax.f32 %v4552_v49, %v9496_v14 }
 0x39a   :  { %v4560_v57 = vsel %vm4559_vm3, %v9498_v7, -inf }
 0x39b   :  { %v4561_v51 = vmax.f32 %v4555_v37, %v4560_v57  ;;  %v4563_v16 = vmax.f32 %v4557_v43, %v4558_v27  ;;  %v13136_v57 = vld [vmem:[#allocation103_spill] sm:$0xff] }
 0x39d   :  { %v4562_v48 = vmax.f32 %v4561_v51, %v4556_v13 }
 0x39f   :  { %v4405_v25 = vpop.f32.mrf.mxu1  ;;  %v4564_v24 = vmax.f32 %v4562_v48, %v4563_v16 }
 0x3a1   :  { %4565 = vmax.xlane.f32.xlu0 %v4564_v24 }
 0x414   :  { %v9508_v4 = vpop.xlane.xlu0 %4565 }
 0x415   :  { %v4567_v39 = vsub.f32 %v8762_v1, %v9508_v4  ;;  %v4568_v33 = vsub.f32 %v8773_v60, %v9508_v4  ;;  %v4569_v54 = vsub.f32 %v8782_v31, %v9508_v4  ;;  %v4570_v9 = vsub.f32 %v8765_v47, %v9508_v4  ;;  %v13134_v60 = vld [vmem:[#allocation102_spill] sm:$0xff]  ;;  %v13135_v47 = vld [vmem:[#allocation100_spill] sm:$0xff] }
 0x416   :  { %v4571_v61 = vsub.f32 %v8754_v58, %v9508_v4  ;;  %v4572_v1 = vsub.f32 %v13133_v40, %v9508_v4  ;;  %v4573_v36 = vsub.f32 %v13134_v60, %v9508_v4  ;;  %v4574_v43 = vsub.f32 %v13135_v47, %v9508_v4 }
 0x417   :  { %v4724_v46 = vmul.f32 1.442695, %v4567_v39  ;;  %v4726_v62 = vmul.f32 1.442695, %v4568_v33  ;;  %v4728_v0 = vmul.f32 1.442695, %v4569_v54  ;;  %v4575_v27 = vsub.f32 %v13136_v57, %v9508_v4 }
 0x418   :  { %v4730_v20 = vmul.f32 1.442695, %v4570_v9  ;;  %v4732_v49 = vmul.f32 1.442695, %v4571_v61  ;;  %v4734_v58 = vmul.f32 1.442695, %v4572_v1  ;;  %v4576_v16 = vsub.f32 %v8792_v29, %v9508_v4 }
 0x419   :  { %7520 = vpow2.f32 %v4724_v46  ;;  %v4736_v13 = vmul.f32 1.442695, %v4573_v36  ;;  %v4738_v25 = vmul.f32 1.442695, %v4574_v43  ;;  %v13137_v33 = vld [vmem:[#allocation105_spill] sm:$0xff]  ;;  %v13138_v61 = vld [vmem:[#allocation104_spill] sm:$0xff]  ;;  %v4580_v47 = vsub.f32 %v8812_v5, %v9508_v4 }
 0x41a   :  { %7522 = vpow2.f32 %v4726_v62  ;;  %v4577_v46 = vsub.f32 %v13137_v33, %v9508_v4  ;;  %v4740_v54 = vmul.f32 1.442695, %v4575_v27  ;;  %v4742_v29 = vmul.f32 1.442695, %v4576_v16  ;;  %v13139_v16 = vld [vmem:[#allocation106_spill] sm:$0xff] }
 0x41b   :  { %7524 = vpow2.f32 %v4728_v0  ;;  %v4578_v0 = vsub.f32 %v13138_v61, %v9508_v4  ;;  %v4581_v27 = vsub.f32 %v8821_v17, %v9508_v4  ;;  %v4750_v5 = vmul.f32 1.442695, %v4580_v47 }
 0x41c   :  { %7526 = vpow2.f32 %v4730_v20  ;;  %v4579_v20 = vsub.f32 %v8803_v2, %v9508_v4  ;;  %v4744_v60 = vmul.f32 1.442695, %v4577_v46  ;;  %v13140_v46 = vld [vmem:[#allocation107_spill] sm:$0xff] }
 0x41d   :  { %7528 = vpow2.f32 %v4732_v49  ;;  %v4746_v43 = vmul.f32 1.442695, %v4578_v0  ;;  %v4752_v17 = vmul.f32 1.442695, %v4581_v27  ;;  %v13141_v0 = vld [vmem:[#allocation109_spill] sm:$0xff] }
 0x41e   :  { %7530 = vpow2.f32 %v4734_v58  ;;  %v4748_v2 = vmul.f32 1.442695, %v4579_v20 }
 0x41f   :  { %v9524_v31 = vpop.eup %7520  ;;  %7532 = vpow2.f32 %v4736_v13 }
 0x420   :  { %v9526_v37 = vpop.eup %7522  ;;  %7534 = vpow2.f32 %v4738_v25  ;;  %v4582_v25 = vsub.f32 %v13139_v16, %v9508_v4 }
 0x421   :  { %v5038_v51 = vadd.f32 %v9526_v37, %v9524_v31  ;;  %v9534_v48 = vpop.eup %7524  ;;  %7536 = vpow2.f32 %v4740_v54  ;;  %v4583_v54 = vsub.f32 %v13140_v46, %v9508_v4 }
 0x422   :  { %v9539_v39 = vpop.eup %7526  ;;  %7538 = vpow2.f32 %v4742_v29  ;;  %v4584_v29 = vsub.f32 %v13141_v0, %v9508_v4  ;;  %v13147_v0 = vld [vmem:[#allocation113_spill] sm:$0xff] }
 0x423   :  { %v5039_v24 = vadd.f32 %v9534_v48, %v5038_v51  ;;  %v9544_v9 = vpop.eup %7528  ;;  %7540 = vpow2.f32 %v4744_v60 }
 0x424   :  { %v9549_v1 = vpop.eup %7530  ;;  %7542 = vpow2.f32 %v4746_v43  ;;  %v4756_v43 = vmul.f32 1.442695, %v4583_v54  ;;  %v4758_v16 = vmul.f32 1.442695, %v4584_v29 }
 0x425   :  { %v5040_v62 = vadd.f32 %v9539_v39, %v5039_v24  ;;  %v9554_v49 = vpop.eup %7532  ;;  %7544 = vpow2.f32 %v4748_v2  ;;  %v13143_v2 = vld [vmem:[#allocation108_spill] sm:$0xff] }
 0x426   :  { %v9559_v57 = vpop.eup %7534  ;;  %7546 = vpow2.f32 %v4750_v5 }
 0x427   :  { %v5041_v40 = vadd.f32 %v9544_v9, %v5040_v62  ;;  %v9564_v51 = vpop.eup %7536  ;;  %7548 = vpow2.f32 %v4752_v17 }
 0x428   :  { %v9569_v33 = vpop.eup %7538 }
 0x429   :  { %v5042_v36 = vadd.f32 %v9549_v1, %v5041_v40  ;;  %v9574_v61 = vpop.eup %7540  ;;  %v4754_v40 = vmul.f32 1.442695, %v4582_v25 }
 0x42a   :  { %v9579_v60 = vpop.eup %7542 }
 0x42b   :  { %v5043_v58 = vadd.f32 %v9554_v49, %v5042_v36  ;;  %v13142_v36 = vld [vmem:[#allocation110_spill] sm:$0xff]  ;;  %v9584_v27 = vpop.eup %7544  ;;  %7550 = vpow2.f32 %v4754_v40 }
 0x42c   :  { %v4585_v47 = vsub.f32 %v13142_v36, %v9508_v4  ;;  %v9589_v5 = vpop.eup %7546  ;;  %7552 = vpow2.f32 %v4756_v43 }
 0x42d   :  { %v5044_v13 = vadd.f32 %v9559_v57, %v5043_v58  ;;  %13144 = vst [vmem:[#allocation98_spill] sm:$0xff] %v9589_v5  ;;  %v9594_v17 = vpop.eup %7548  ;;  %7554 = vpow2.f32 %v4758_v16 }
 0x42e   :  { %13146 = vst [vmem:[#allocation99_spill] sm:$0xff] %v9594_v17 }
 0x42f   :  { %v5045_v24 = vadd.f32 %v9564_v51, %v5044_v13  ;;  %v4586_v13 = vsub.f32 %v13143_v2, %v9508_v4 }
 0x431   :  { %v5046_v62 = vadd.f32 %v9569_v33, %v5045_v24  ;;  %v13145_v24 = vld [vmem:[#allocation111_spill] sm:$0xff]  ;;  %v4762_v36 = vmul.f32 1.442695, %v4586_v13  ;;  %v9599_v40 = vpop.eup %7550 }
 0x432   :  { %v4587_v46 = vsub.f32 %v13145_v24, %v9508_v4  ;;  %13148 = vst [vmem:[#allocation101_spill] sm:$0xff] %v9599_v40  ;;  %v9604_v43 = vpop.eup %7552 }
 0x433   :  { %v5047_v20 = vadd.f32 %v9574_v61, %v5046_v62  ;;  %v4760_v62 = vmul.f32 1.442695, %v4585_v47  ;;  %13150 = vst [vmem:[#allocation102_spill] sm:$0xff] %v9604_v43  ;;  %v9609_v16 = vpop.eup %7554 }
 0x434   :  { %v4764_v24 = vmul.f32 1.442695, %v4587_v46  ;;  %13152 = vst [vmem:[#allocation100_spill] sm:$0xff] %v9609_v16 }
 0x435   :  { %v5048_v58 = vadd.f32 %v9579_v60, %v5047_v20  ;;  %v4588_v20 = vsub.f32 %v13147_v0, %v9508_v4  ;;  %7556 = vpow2.f32 %v4760_v62 }
 0x436   :  { %7558 = vpow2.f32 %v4762_v36 }
 0x437   :  { %v5049_v25 = vadd.f32 %v9584_v27, %v5048_v58  ;;  %v13149_v58 = vld [vmem:[#allocation114_spill] sm:$0xff]  ;;  %v4766_v0 = vmul.f32 1.442695, %v4588_v20  ;;  %7560 = vpow2.f32 %v4764_v24 }
 0x438   :  { %v4589_v2 = vsub.f32 %v13149_v58, %v9508_v4 }
 0x439   :  { %v5050_v54 = vadd.f32 %v9589_v5, %v5049_v25  ;;  %v13151_v25 = vld [vmem:[#allocation112_spill] sm:$0xff]  ;;  %7562 = vpow2.f32 %v4766_v0 }
 0x43a   :  { %v4590_v5 = vsub.f32 %v13151_v25, %v9508_v4  ;;  %v4768_v58 = vmul.f32 1.442695, %v4589_v2 }
 0x43b   :  { %v5051_v29 = vadd.f32 %v9594_v17, %v5050_v54  ;;  %v13153_v54 = vld [vmem:[#allocation115_spill] sm:$0xff]  ;;  %v9614_v62 = vpop.eup %7556 }
 0x43c   :  { %v4591_v17 = vsub.f32 %v13153_v54, %v9508_v4  ;;  %13154 = vst [vmem:[#allocation103_spill] sm:$0xff] %v9614_v62  ;;  %v4770_v25 = vmul.f32 1.442695, %v4590_v5  ;;  %v9619_v36 = vpop.eup %7558  ;;  %7564 = vpow2.f32 %v4768_v58 }
 0x43d   :  { %v5052_v47 = vadd.f32 %v9599_v40, %v5051_v29  ;;  %v13155_v29 = vld [vmem:[#allocation117_spill] sm:$0xff]  ;;  %13156 = vst [vmem:[#allocation105_spill] sm:$0xff] %v9619_v36  ;;  %v9624_v24 = vpop.eup %7560 }
 0x43e   :  { %v4592_v40 = vsub.f32 %v13155_v29, %v9508_v4  ;;  %v4772_v54 = vmul.f32 1.442695, %v4591_v17  ;;  %13158 = vst [vmem:[#allocation104_spill] sm:$0xff] %v9624_v24  ;;  %7566 = vpow2.f32 %v4770_v25 }
 0x43f   :  { %v5053_v13 = vadd.f32 %v9604_v43, %v5052_v47  ;;  %v13157_v47 = vld [vmem:[#allocation118_spill] sm:$0xff]  ;;  %v9629_v0 = vpop.eup %7562 }
 0x440   :  { %v4593_v43 = vsub.f32 %v13157_v47, %v9508_v4  ;;  %v4774_v29 = vmul.f32 1.442695, %v4592_v40  ;;  %13160 = vst [vmem:[#allocation106_spill] sm:$0xff] %v9629_v0  ;;  %7568 = vpow2.f32 %v4772_v54 }
 0x441   :  { %v5054_v46 = vadd.f32 %v9609_v16, %v5053_v13  ;;  %v13159_v13 = vld [vmem:[#allocation116_spill] sm:$0xff] }
 0x442   :  { %v4594_v16 = vsub.f32 %v13159_v13, %v9508_v4  ;;  %v4776_v47 = vmul.f32 1.442695, %v4593_v43  ;;  %v9634_v58 = vpop.eup %7564  ;;  %7570 = vpow2.f32 %v4774_v29 }
 0x443   :  { %v5055_v20 = vadd.f32 %v9614_v62, %v5054_v46  ;;  %v13161_v46 = vld [vmem:[#allocation119_spill] sm:$0xff]  ;;  %13162 = vst [vmem:[#allocation107_spill] sm:$0xff] %v9634_v58 }
 0x444   :  { %v4595_v62 = vsub.f32 %v13161_v46, %v9508_v4  ;;  %v4778_v13 = vmul.f32 1.442695, %v4594_v16  ;;  %v9639_v25 = vpop.eup %7566  ;;  %7572 = vpow2.f32 %v4776_v47 }
 0x445   :  { %v5056_v2 = vadd.f32 %v9619_v36, %v5055_v20  ;;  %v13163_v20 = vld [vmem:[#allocation121_spill] sm:$0xff]  ;;  %13164 = vst [vmem:[#allocation109_spill] sm:$0xff] %v9639_v25 }
 0x446   :  { %v4596_v36 = vsub.f32 %v13163_v20, %v9508_v4  ;;  %v4780_v46 = vmul.f32 1.442695, %v4595_v62  ;;  %v9644_v54 = vpop.eup %7568  ;;  %7574 = vpow2.f32 %v4778_v13 }
 0x447   :  { %v5057_v5 = vadd.f32 %v9624_v24, %v5056_v2  ;;  %v13165_v2 = vld [vmem:[#allocation122_spill] sm:$0xff]  ;;  %13166 = vst [vmem:[#allocation110_spill] sm:$0xff] %v9644_v54 }
 0x448   :  { %v4597_v24 = vsub.f32 %v13165_v2, %v9508_v4  ;;  %v4782_v20 = vmul.f32 1.442695, %v4596_v36  ;;  %v9649_v29 = vpop.eup %7570  ;;  %7576 = vpow2.f32 %v4780_v46 }
 0x449   :  { %v5058_v17 = vadd.f32 %v9629_v0, %v5057_v5  ;;  %v13167_v5 = vld [vmem:[#allocation120_spill] sm:$0xff]  ;;  %13168 = vst [vmem:[#allocation108_spill] sm:$0xff] %v9649_v29 }
 0x44a   :  { %v4598_v0 = vsub.f32 %v13167_v5, %v9508_v4  ;;  %v4784_v2 = vmul.f32 1.442695, %v4597_v24  ;;  %v9654_v47 = vpop.eup %7572  ;;  %7578 = vpow2.f32 %v4782_v20 }
 0x44b   :  { %v5059_v40 = vadd.f32 %v9634_v58, %v5058_v17  ;;  %v13169_v17 = vld [vmem:[#allocation123_spill] sm:$0xff]  ;;  %13170 = vst [vmem:[#allocation111_spill] sm:$0xff] %v9654_v47 }
 0x44c   :  { %v4599_v58 = vsub.f32 %v13169_v17, %v9508_v4  ;;  %v4786_v5 = vmul.f32 1.442695, %v4598_v0  ;;  %v9659_v13 = vpop.eup %7574  ;;  %7580 = vpow2.f32 %v4784_v2 }
 0x44d   :  { %v5060_v43 = vadd.f32 %v9639_v25, %v5059_v40  ;;  %v13171_v40 = vld [vmem:[#allocation125_spill] sm:$0xff]  ;;  %13172 = vst [vmem:[#allocation113_spill] sm:$0xff] %v9659_v13 }
 0x44e   :  { %v4600_v25 = vsub.f32 %v13171_v40, %v9508_v4  ;;  %v4788_v17 = vmul.f32 1.442695, %v4599_v58  ;;  %v9664_v46 = vpop.eup %7576  ;;  %7582 = vpow2.f32 %v4786_v5 }
 0x44f   :  { %v5061_v16 = vadd.f32 %v9644_v54, %v5060_v43  ;;  %v13173_v43 = vld [vmem:[#allocation126_spill] sm:$0xff]  ;;  %13174 = vst [vmem:[#allocation114_spill] sm:$0xff] %v9664_v46 }
 0x450   :  { %v4601_v54 = vsub.f32 %v13173_v43, %v9508_v4  ;;  %v4790_v40 = vmul.f32 1.442695, %v4600_v25  ;;  %v9669_v20 = vpop.eup %7578  ;;  %7584 = vpow2.f32 %v4788_v17 }
 0x451   :  { %v5062_v62 = vadd.f32 %v9649_v29, %v5061_v16  ;;  %v13175_v16 = vld [vmem:[#allocation124_spill] sm:$0xff]  ;;  %13176 = vst [vmem:[#allocation112_spill] sm:$0xff] %v9669_v20 }
 0x452   :  { %v4602_v29 = vsub.f32 %v13175_v16, %v9508_v4  ;;  %v4792_v43 = vmul.f32 1.442695, %v4601_v54  ;;  %v9674_v2 = vpop.eup %7580  ;;  %7586 = vpow2.f32 %v4790_v40 }
 0x453   :  { %v5063_v36 = vadd.f32 %v9654_v47, %v5062_v62  ;;  %v13177_v62 = vld [vmem:[#allocation127_spill] sm:$0xff]  ;;  %13178 = vst [vmem:[#allocation115_spill] sm:$0xff] %v9674_v2 }
 0x454   :  { %v4603_v47 = vsub.f32 %v13177_v62, %v9508_v4  ;;  %v4794_v16 = vmul.f32 1.442695, %v4602_v29  ;;  %v9679_v5 = vpop.eup %7582  ;;  %7588 = vpow2.f32 %v4792_v43 }
 0x455   :  { %v5064_v24 = vadd.f32 %v9659_v13, %v5063_v36  ;;  %v13179_v36 = vld [vmem:[#allocation129_spill] sm:$0xff]  ;;  %13180 = vst [vmem:[#allocation117_spill] sm:$0xff] %v9679_v5 }
 0x456   :  { %v4604_v13 = vsub.f32 %v13179_v36, %v9508_v4  ;;  %v4796_v62 = vmul.f32 1.442695, %v4603_v47  ;;  %v9684_v17 = vpop.eup %7584  ;;  %7590 = vpow2.f32 %v4794_v16 }
 0x457   :  { %v5065_v0 = vadd.f32 %v9664_v46, %v5064_v24  ;;  %v13181_v24 = vld [vmem:[#allocation15_spill] sm:$0xff]  ;;  %13182 = vst [vmem:[#allocation118_spill] sm:$0xff] %v9684_v17 }
 0x458   :  { %v4605_v46 = vsub.f32 %v13181_v24, %v9508_v4  ;;  %v4798_v36 = vmul.f32 1.442695, %v4604_v13  ;;  %v9689_v40 = vpop.eup %7586  ;;  %7592 = vpow2.f32 %v4796_v62 }
 0x459   :  { %v5066_v58 = vadd.f32 %v9669_v20, %v5065_v0  ;;  %v13183_v0 = vld [vmem:[#allocation128_spill] sm:$0xff]  ;;  %13184 = vst [vmem:[#allocation116_spill] sm:$0xff] %v9689_v40 }
 0x45a   :  { %v4606_v20 = vsub.f32 %v13183_v0, %v9508_v4  ;;  %v4800_v24 = vmul.f32 1.442695, %v4605_v46  ;;  %v9694_v43 = vpop.eup %7588  ;;  %7594 = vpow2.f32 %v4798_v36 }
 0x45b   :  { %v5067_v25 = vadd.f32 %v9674_v2, %v5066_v58  ;;  %v13185_v58 = vld [vmem:[#allocation16_spill] sm:$0xff]  ;;  %13186 = vst [vmem:[#allocation119_spill] sm:$0xff] %v9694_v43 }
 0x45c   :  { %v4607_v2 = vsub.f32 %v13185_v58, %v9508_v4  ;;  %v4802_v0 = vmul.f32 1.442695, %v4606_v20  ;;  %v9699_v16 = vpop.eup %7590  ;;  %7596 = vpow2.f32 %v4800_v24 }
 0x45d   :  { %v5068_v54 = vadd.f32 %v9679_v5, %v5067_v25  ;;  %v13187_v25 = vld [vmem:[#allocation18_spill] sm:$0xff]  ;;  %13188 = vst [vmem:[#allocation121_spill] sm:$0xff] %v9699_v16 }
 0x45e   :  { %v4608_v5 = vsub.f32 %v13187_v25, %v9508_v4  ;;  %v4804_v58 = vmul.f32 1.442695, %v4607_v2  ;;  %v9704_v62 = vpop.eup %7592  ;;  %7598 = vpow2.f32 %v4802_v0 }
 0x45f   :  { %v5069_v29 = vadd.f32 %v9684_v17, %v5068_v54  ;;  %v13189_v54 = vld [vmem:[#allocation19_spill] sm:$0xff]  ;;  %13190 = vst [vmem:[#allocation122_spill] sm:$0xff] %v9704_v62 }
 0x460   :  { %v4609_v17 = vsub.f32 %v13189_v54, %v9508_v4  ;;  %v4806_v25 = vmul.f32 1.442695, %v4608_v5  ;;  %v9709_v36 = vpop.eup %7594  ;;  %7600 = vpow2.f32 %v4804_v58 }
 0x461   :  { %v5070_v47 = vadd.f32 %v9689_v40, %v5069_v29  ;;  %v13191_v29 = vld [vmem:[#allocation17_spill] sm:$0xff]  ;;  %13192 = vst [vmem:[#allocation120_spill] sm:$0xff] %v9709_v36 }
 0x462   :  { %v4610_v40 = vsub.f32 %v13191_v29, %v9508_v4  ;;  %v4808_v54 = vmul.f32 1.442695, %v4609_v17  ;;  %v9714_v24 = vpop.eup %7596  ;;  %7602 = vpow2.f32 %v4806_v25 }
 0x463   :  { %v5071_v13 = vadd.f32 %v9694_v43, %v5070_v47  ;;  %v13193_v47 = vld [vmem:[#allocation20_spill] sm:$0xff]  ;;  %13194 = vst [vmem:[#allocation123_spill] sm:$0xff] %v9714_v24 }
 0x464   :  { %v4611_v43 = vsub.f32 %v13193_v47, %v9508_v4  ;;  %v4810_v29 = vmul.f32 1.442695, %v4610_v40  ;;  %v9719_v0 = vpop.eup %7598  ;;  %7604 = vpow2.f32 %v4808_v54 }
 0x465   :  { %v5072_v46 = vadd.f32 %v9699_v16, %v5071_v13  ;;  %v13195_v13 = vld [vmem:[#allocation22_spill] sm:$0xff]  ;;  %13196 = vst [vmem:[#allocation125_spill] sm:$0xff] %v9719_v0 }
 0x466   :  { %v4612_v16 = vsub.f32 %v13195_v13, %v9508_v4  ;;  %v4812_v47 = vmul.f32 1.442695, %v4611_v43  ;;  %v9724_v58 = vpop.eup %7600  ;;  %7606 = vpow2.f32 %v4810_v29 }
 0x467   :  { %v5073_v20 = vadd.f32 %v9704_v62, %v5072_v46  ;;  %v13197_v46 = vld [vmem:[#allocation23_spill] sm:$0xff]  ;;  %13198 = vst [vmem:[#allocation126_spill] sm:$0xff] %v9724_v58 }
 0x468   :  { %v4613_v62 = vsub.f32 %v13197_v46, %v9508_v4  ;;  %v4814_v13 = vmul.f32 1.442695, %v4612_v16  ;;  %v9729_v25 = vpop.eup %7602  ;;  %7608 = vpow2.f32 %v4812_v47 }
 0x469   :  { %v5074_v2 = vadd.f32 %v9709_v36, %v5073_v20  ;;  %v13199_v20 = vld [vmem:[#allocation21_spill] sm:$0xff]  ;;  %13200 = vst [vmem:[#allocation124_spill] sm:$0xff] %v9729_v25 }
 0x46a   :  { %v4614_v36 = vsub.f32 %v13199_v20, %v9508_v4  ;;  %v4816_v46 = vmul.f32 1.442695, %v4613_v62  ;;  %v9734_v54 = vpop.eup %7604  ;;  %7610 = vpow2.f32 %v4814_v13 }
 0x46b   :  { %v5075_v5 = vadd.f32 %v9714_v24, %v5074_v2  ;;  %v13201_v2 = vld [vmem:[#allocation24_spill] sm:$0xff]  ;;  %13202 = vst [vmem:[#allocation127_spill] sm:$0xff] %v9734_v54 }
 0x46c   :  { %v4615_v24 = vsub.f32 %v13201_v2, %v9508_v4  ;;  %v4818_v20 = vmul.f32 1.442695, %v4614_v36  ;;  %v9739_v29 = vpop.eup %7606  ;;  %7612 = vpow2.f32 %v4816_v46 }
 0x46d   :  { %v5076_v17 = vadd.f32 %v9719_v0, %v5075_v5  ;;  %v13203_v5 = vld [vmem:[#allocation26_spill] sm:$0xff]  ;;  %13204 = vst [vmem:[#allocation129_spill] sm:$0xff] %v9739_v29 }
 0x46e   :  { %v4616_v0 = vsub.f32 %v13203_v5, %v9508_v4  ;;  %v4820_v2 = vmul.f32 1.442695, %v4615_v24  ;;  %v9744_v47 = vpop.eup %7608  ;;  %7614 = vpow2.f32 %v4818_v20 }
 0x46f   :  { %v5077_v40 = vadd.f32 %v9724_v58, %v5076_v17  ;;  %v13205_v17 = vld [vmem:[#allocation27_spill] sm:$0xff]  ;;  %13206 = vst [vmem:[#allocation15_spill] sm:$0xff] %v9744_v47 }
 0x470   :  { %v4617_v58 = vsub.f32 %v13205_v17, %v9508_v4  ;;  %v4822_v5 = vmul.f32 1.442695, %v4616_v0  ;;  %v9749_v13 = vpop.eup %7610  ;;  %7616 = vpow2.f32 %v4820_v2 }
 0x471   :  { %v5078_v43 = vadd.f32 %v9729_v25, %v5077_v40  ;;  %v13207_v40 = vld [vmem:[#allocation25_spill] sm:$0xff]  ;;  %13208 = vst [vmem:[#allocation128_spill] sm:$0xff] %v9749_v13 }
 0x472   :  { %v4618_v25 = vsub.f32 %v13207_v40, %v9508_v4  ;;  %v4824_v17 = vmul.f32 1.442695, %v4617_v58  ;;  %v9754_v46 = vpop.eup %7612  ;;  %7618 = vpow2.f32 %v4822_v5 }
 0x473   :  { %v5079_v16 = vadd.f32 %v9734_v54, %v5078_v43  ;;  %v13209_v43 = vld [vmem:[#allocation28_spill] sm:$0xff]  ;;  %13210 = vst [vmem:[#allocation16_spill] sm:$0xff] %v9754_v46 }
 0x474   :  { %v4619_v54 = vsub.f32 %v13209_v43, %v9508_v4  ;;  %v4826_v40 = vmul.f32 1.442695, %v4618_v25  ;;  %v9759_v20 = vpop.eup %7614  ;;  %7620 = vpow2.f32 %v4824_v17 }
 0x475   :  { %v5080_v62 = vadd.f32 %v9739_v29, %v5079_v16  ;;  %v13211_v16 = vld [vmem:[#allocation30_spill] sm:$0xff]  ;;  %13212 = vst [vmem:[#allocation18_spill] sm:$0xff] %v9759_v20 }
 0x476   :  { %v4620_v29 = vsub.f32 %v13211_v16, %v9508_v4  ;;  %v4828_v43 = vmul.f32 1.442695, %v4619_v54  ;;  %v9764_v2 = vpop.eup %7616  ;;  %7622 = vpow2.f32 %v4826_v40 }
 0x477   :  { %v5081_v36 = vadd.f32 %v9744_v47, %v5080_v62  ;;  %v13213_v62 = vld [vmem:[#allocation31_spill] sm:$0xff]  ;;  %13214 = vst [vmem:[#allocation19_spill] sm:$0xff] %v9764_v2 }
 0x478   :  { %v4621_v47 = vsub.f32 %v13213_v62, %v9508_v4  ;;  %v4830_v16 = vmul.f32 1.442695, %v4620_v29  ;;  %v9769_v5 = vpop.eup %7618  ;;  %7624 = vpow2.f32 %v4828_v43 }
 0x479   :  { %v5082_v24 = vadd.f32 %v9749_v13, %v5081_v36  ;;  %v13215_v36 = vld [vmem:[#allocation29_spill] sm:$0xff]  ;;  %13216 = vst [vmem:[#allocation17_spill] sm:$0xff] %v9769_v5 }
 0x47a   :  { %v4622_v13 = vsub.f32 %v13215_v36, %v9508_v4  ;;  %v4832_v62 = vmul.f32 1.442695, %v4621_v47  ;;  %v9774_v17 = vpop.eup %7620  ;;  %7626 = vpow2.f32 %v4830_v16 }
 0x47b   :  { %v5083_v0 = vadd.f32 %v9754_v46, %v5082_v24  ;;  %v13217_v24 = vld [vmem:[#allocation32_spill] sm:$0xff]  ;;  %13218 = vst [vmem:[#allocation20_spill] sm:$0xff] %v9774_v17 }
 0x47c   :  { %v4623_v46 = vsub.f32 %v13217_v24, %v9508_v4  ;;  %v4834_v36 = vmul.f32 1.442695, %v4622_v13  ;;  %v9779_v40 = vpop.eup %7622  ;;  %7628 = vpow2.f32 %v4832_v62 }
 0x47d   :  { %v5084_v58 = vadd.f32 %v9759_v20, %v5083_v0  ;;  %v13219_v0 = vld [vmem:[#allocation34_spill] sm:$0xff]  ;;  %13220 = vst [vmem:[#allocation22_spill] sm:$0xff] %v9779_v40 }
 0x47e   :  { %v4624_v20 = vsub.f32 %v13219_v0, %v9508_v4  ;;  %v4836_v24 = vmul.f32 1.442695, %v4623_v46  ;;  %v9784_v43 = vpop.eup %7624  ;;  %7630 = vpow2.f32 %v4834_v36 }
 0x47f   :  { %v5085_v25 = vadd.f32 %v9764_v2, %v5084_v58  ;;  %v13221_v58 = vld [vmem:[#allocation35_spill] sm:$0xff]  ;;  %13222 = vst [vmem:[#allocation23_spill] sm:$0xff] %v9784_v43 }
 0x480   :  { %v4625_v2 = vsub.f32 %v13221_v58, %v9508_v4  ;;  %v4838_v0 = vmul.f32 1.442695, %v4624_v20  ;;  %v9789_v16 = vpop.eup %7626  ;;  %7632 = vpow2.f32 %v4836_v24 }
 0x481   :  { %v5086_v54 = vadd.f32 %v9769_v5, %v5085_v25  ;;  %v13223_v25 = vld [vmem:[#allocation33_spill] sm:$0xff]  ;;  %13224 = vst [vmem:[#allocation21_spill] sm:$0xff] %v9789_v16 }
 0x482   :  { %v4626_v5 = vsub.f32 %v13223_v25, %v9508_v4  ;;  %v4840_v58 = vmul.f32 1.442695, %v4625_v2  ;;  %v9794_v62 = vpop.eup %7628  ;;  %7634 = vpow2.f32 %v4838_v0 }
 0x483   :  { %v5087_v29 = vadd.f32 %v9774_v17, %v5086_v54  ;;  %v13225_v54 = vld [vmem:[#allocation36_spill] sm:$0xff]  ;;  %13226 = vst [vmem:[#allocation24_spill] sm:$0xff] %v9794_v62 }
 0x484   :  { %v4627_v17 = vsub.f32 %v13225_v54, %v9508_v4  ;;  %v4842_v25 = vmul.f32 1.442695, %v4626_v5  ;;  %v9799_v36 = vpop.eup %7630  ;;  %7636 = vpow2.f32 %v4840_v58 }
 0x485   :  { %v5088_v47 = vadd.f32 %v9779_v40, %v5087_v29  ;;  %v13227_v29 = vld [vmem:[#allocation38_spill] sm:$0xff]  ;;  %13228 = vst [vmem:[#allocation26_spill] sm:$0xff] %v9799_v36 }
 0x486   :  { %v4628_v40 = vsub.f32 %v13227_v29, %v9508_v4  ;;  %v4844_v54 = vmul.f32 1.442695, %v4627_v17  ;;  %v9804_v24 = vpop.eup %7632  ;;  %7638 = vpow2.f32 %v4842_v25 }
 0x487   :  { %v5089_v13 = vadd.f32 %v9784_v43, %v5088_v47  ;;  %v13229_v47 = vld [vmem:[#allocation39_spill] sm:$0xff]  ;;  %13230 = vst [vmem:[#allocation27_spill] sm:$0xff] %v9804_v24 }
 0x488   :  { %v4629_v43 = vsub.f32 %v13229_v47, %v9508_v4  ;;  %v4846_v29 = vmul.f32 1.442695, %v4628_v40  ;;  %v9809_v0 = vpop.eup %7634  ;;  %7640 = vpow2.f32 %v4844_v54 }
 0x489   :  { %v5090_v46 = vadd.f32 %v9789_v16, %v5089_v13  ;;  %v13231_v13 = vld [vmem:[#allocation37_spill] sm:$0xff]  ;;  %13232 = vst [vmem:[#allocation25_spill] sm:$0xff] %v9809_v0 }
 0x48a   :  { %v4630_v16 = vsub.f32 %v13231_v13, %v9508_v4  ;;  %v4848_v47 = vmul.f32 1.442695, %v4629_v43  ;;  %v9814_v58 = vpop.eup %7636  ;;  %7642 = vpow2.f32 %v4846_v29 }
 0x48b   :  { %v5091_v20 = vadd.f32 %v9794_v62, %v5090_v46  ;;  %v13233_v46 = vld [vmem:[#allocation40_spill] sm:$0xff]  ;;  %13234 = vst [vmem:[#allocation28_spill] sm:$0xff] %v9814_v58 }
 0x48c   :  { %v4631_v62 = vsub.f32 %v13233_v46, %v9508_v4  ;;  %v4850_v13 = vmul.f32 1.442695, %v4630_v16  ;;  %v9819_v25 = vpop.eup %7638  ;;  %7644 = vpow2.f32 %v4848_v47 }
 0x48d   :  { %v5092_v2 = vadd.f32 %v9799_v36, %v5091_v20  ;;  %v13235_v20 = vld [vmem:[#allocation42_spill] sm:$0xff]  ;;  %13236 = vst [vmem:[#allocation30_spill] sm:$0xff] %v9819_v25 }
 0x48e   :  { %v4632_v36 = vsub.f32 %v13235_v20, %v9508_v4  ;;  %v4852_v46 = vmul.f32 1.442695, %v4631_v62  ;;  %v9824_v54 = vpop.eup %7640  ;;  %7646 = vpow2.f32 %v4850_v13 }
 0x48f   :  { %v5093_v5 = vadd.f32 %v9804_v24, %v5092_v2  ;;  %v13237_v2 = vld [vmem:[#allocation43_spill] sm:$0xff]  ;;  %13238 = vst [vmem:[#allocation31_spill] sm:$0xff] %v9824_v54 }
 0x490   :  { %v4633_v24 = vsub.f32 %v13237_v2, %v9508_v4  ;;  %v4854_v20 = vmul.f32 1.442695, %v4632_v36  ;;  %v9829_v29 = vpop.eup %7642  ;;  %7648 = vpow2.f32 %v4852_v46 }
 0x491   :  { %v5094_v17 = vadd.f32 %v9809_v0, %v5093_v5  ;;  %v13239_v5 = vld [vmem:[#allocation41_spill] sm:$0xff]  ;;  %13240 = vst [vmem:[#allocation29_spill] sm:$0xff] %v9829_v29 }
 0x492   :  { %v4634_v0 = vsub.f32 %v13239_v5, %v9508_v4  ;;  %v4856_v2 = vmul.f32 1.442695, %v4633_v24  ;;  %v9834_v47 = vpop.eup %7644  ;;  %7650 = vpow2.f32 %v4854_v20 }
 0x493   :  { %v5095_v40 = vadd.f32 %v9814_v58, %v5094_v17  ;;  %v13241_v17 = vld [vmem:[#allocation44_spill] sm:$0xff]  ;;  %13242 = vst [vmem:[#allocation32_spill] sm:$0xff] %v9834_v47 }
 0x494   :  { %v4635_v58 = vsub.f32 %v13241_v17, %v9508_v4  ;;  %v4858_v5 = vmul.f32 1.442695, %v4634_v0  ;;  %v9839_v13 = vpop.eup %7646  ;;  %7652 = vpow2.f32 %v4856_v2 }
 0x495   :  { %v5096_v43 = vadd.f32 %v9819_v25, %v5095_v40  ;;  %v13243_v40 = vld [vmem:[#allocation46_spill] sm:$0xff]  ;;  %13244 = vst [vmem:[#allocation34_spill] sm:$0xff] %v9839_v13 }
 0x496   :  { %v4636_v25 = vsub.f32 %v13243_v40, %v9508_v4  ;;  %v4860_v17 = vmul.f32 1.442695, %v4635_v58  ;;  %v9844_v46 = vpop.eup %7648  ;;  %7654 = vpow2.f32 %v4858_v5 }
 0x497   :  { %v5097_v16 = vadd.f32 %v9824_v54, %v5096_v43  ;;  %v13245_v43 = vld [vmem:[#allocation47_spill] sm:$0xff]  ;;  %13246 = vst [vmem:[#allocation35_spill] sm:$0xff] %v9844_v46 }
 0x498   :  { %v4637_v54 = vsub.f32 %v13245_v43, %v9508_v4  ;;  %v4862_v40 = vmul.f32 1.442695, %v4636_v25  ;;  %v9849_v20 = vpop.eup %7650  ;;  %7656 = vpow2.f32 %v4860_v17 }
 0x499   :  { %v5098_v62 = vadd.f32 %v9829_v29, %v5097_v16  ;;  %v13247_v16 = vld [vmem:[#allocation45_spill] sm:$0xff]  ;;  %13248 = vst [vmem:[#allocation33_spill] sm:$0xff] %v9849_v20 }
 0x49a   :  { %v4638_v29 = vsub.f32 %v13247_v16, %v9508_v4  ;;  %v4864_v43 = vmul.f32 1.442695, %v4637_v54  ;;  %v9854_v2 = vpop.eup %7652  ;;  %7658 = vpow2.f32 %v4862_v40 }
 0x49b   :  { %v5099_v36 = vadd.f32 %v9834_v47, %v5098_v62  ;;  %v13249_v62 = vld [vmem:[#allocation48_spill] sm:$0xff]  ;;  %13250 = vst [vmem:[#allocation36_spill] sm:$0xff] %v9854_v2 }
 0x49c   :  { %v4639_v47 = vsub.f32 %v13249_v62, %v9508_v4  ;;  %v4866_v16 = vmul.f32 1.442695, %v4638_v29  ;;  %v9859_v5 = vpop.eup %7654  ;;  %7660 = vpow2.f32 %v4864_v43 }
 0x49d   :  { %v5100_v24 = vadd.f32 %v9839_v13, %v5099_v36  ;;  %v13251_v36 = vld [vmem:[#allocation50_spill] sm:$0xff]  ;;  %13252 = vst [vmem:[#allocation38_spill] sm:$0xff] %v9859_v5 }
 0x49e   :  { %v4640_v13 = vsub.f32 %v13251_v36, %v9508_v4  ;;  %v4868_v62 = vmul.f32 1.442695, %v4639_v47  ;;  %v9864_v17 = vpop.eup %7656  ;;  %7662 = vpow2.f32 %v4866_v16 }
 0x49f   :  { %v5101_v0 = vadd.f32 %v9844_v46, %v5100_v24  ;;  %v13253_v24 = vld [vmem:[#allocation51_spill] sm:$0xff]  ;;  %13254 = vst [vmem:[#allocation39_spill] sm:$0xff] %v9864_v17 }
 0x4a0   :  { %v4641_v46 = vsub.f32 %v13253_v24, %v9508_v4  ;;  %v4870_v36 = vmul.f32 1.442695, %v4640_v13  ;;  %v9869_v40 = vpop.eup %7658  ;;  %7664 = vpow2.f32 %v4868_v62 }
 0x4a1   :  { %v5102_v58 = vadd.f32 %v9849_v20, %v5101_v0  ;;  %v13255_v0 = vld [vmem:[#allocation49_spill] sm:$0xff]  ;;  %13256 = vst [vmem:[#allocation37_spill] sm:$0xff] %v9869_v40 }
 0x4a2   :  { %v4642_v20 = vsub.f32 %v13255_v0, %v9508_v4  ;;  %v4872_v24 = vmul.f32 1.442695, %v4641_v46  ;;  %v9874_v43 = vpop.eup %7660  ;;  %7666 = vpow2.f32 %v4870_v36 }
 0x4a3   :  { %v5103_v25 = vadd.f32 %v9854_v2, %v5102_v58  ;;  %v13257_v58 = vld [vmem:[#allocation52_spill] sm:$0xff]  ;;  %13258 = vst [vmem:[#allocation40_spill] sm:$0xff] %v9874_v43 }
 0x4a4   :  { %v4643_v2 = vsub.f32 %v13257_v58, %v9508_v4  ;;  %v4874_v0 = vmul.f32 1.442695, %v4642_v20  ;;  %v9879_v16 = vpop.eup %7662  ;;  %7668 = vpow2.f32 %v4872_v24 }
 0x4a5   :  { %v5104_v54 = vadd.f32 %v9859_v5, %v5103_v25  ;;  %v13259_v25 = vld [vmem:[#allocation54_spill] sm:$0xff]  ;;  %13260 = vst [vmem:[#allocation42_spill] sm:$0xff] %v9879_v16 }
 0x4a6   :  { %v4644_v5 = vsub.f32 %v13259_v25, %v9508_v4  ;;  %v4876_v58 = vmul.f32 1.442695, %v4643_v2  ;;  %v9884_v62 = vpop.eup %7664  ;;  %7670 = vpow2.f32 %v4874_v0 }
 0x4a7   :  { %v5105_v29 = vadd.f32 %v9864_v17, %v5104_v54  ;;  %v13261_v54 = vld [vmem:[#allocation55_spill] sm:$0xff]  ;;  %13262 = vst [vmem:[#allocation43_spill] sm:$0xff] %v9884_v62 }
 0x4a8   :  { %v4645_v17 = vsub.f32 %v13261_v54, %v9508_v4  ;;  %v4878_v25 = vmul.f32 1.442695, %v4644_v5  ;;  %v9889_v36 = vpop.eup %7666  ;;  %7672 = vpow2.f32 %v4876_v58 }
 0x4a9   :  { %v5106_v47 = vadd.f32 %v9869_v40, %v5105_v29  ;;  %v13263_v29 = vld [vmem:[#allocation53_spill] sm:$0xff]  ;;  %13264 = vst [vmem:[#allocation41_spill] sm:$0xff] %v9889_v36 }
 0x4aa   :  { %v4646_v40 = vsub.f32 %v13263_v29, %v9508_v4  ;;  %v4880_v54 = vmul.f32 1.442695, %v4645_v17  ;;  %v9894_v24 = vpop.eup %7668  ;;  %7674 = vpow2.f32 %v4878_v25 }
 0x4ab   :  { %v5107_v13 = vadd.f32 %v9874_v43, %v5106_v47  ;;  %v13265_v47 = vld [vmem:[#allocation56_spill] sm:$0xff]  ;;  %13266 = vst [vmem:[#allocation44_spill] sm:$0xff] %v9894_v24 }
 0x4ac   :  { %v4647_v43 = vsub.f32 %v13265_v47, %v9508_v4  ;;  %v4882_v29 = vmul.f32 1.442695, %v4646_v40  ;;  %v9899_v0 = vpop.eup %7670  ;;  %7676 = vpow2.f32 %v4880_v54 }
 0x4ad   :  { %v5108_v46 = vadd.f32 %v9879_v16, %v5107_v13  ;;  %v13267_v13 = vld [vmem:[#allocation58_spill] sm:$0xff]  ;;  %13268 = vst [vmem:[#allocation46_spill] sm:$0xff] %v9899_v0 }
 0x4ae   :  { %v4648_v16 = vsub.f32 %v13267_v13, %v9508_v4  ;;  %v4884_v47 = vmul.f32 1.442695, %v4647_v43  ;;  %v9904_v58 = vpop.eup %7672  ;;  %7678 = vpow2.f32 %v4882_v29 }
 0x4af   :  { %v5109_v20 = vadd.f32 %v9884_v62, %v5108_v46  ;;  %v13269_v46 = vld [vmem:[#allocation59_spill] sm:$0xff]  ;;  %13270 = vst [vmem:[#allocation47_spill] sm:$0xff] %v9904_v58 }
 0x4b0   :  { %v4649_v62 = vsub.f32 %v13269_v46, %v9508_v4  ;;  %v4886_v13 = vmul.f32 1.442695, %v4648_v16  ;;  %v9909_v25 = vpop.eup %7674  ;;  %7680 = vpow2.f32 %v4884_v47 }
 0x4b1   :  { %v5110_v2 = vadd.f32 %v9889_v36, %v5109_v20  ;;  %v13271_v20 = vld [vmem:[#allocation57_spill] sm:$0xff]  ;;  %13272 = vst [vmem:[#allocation45_spill] sm:$0xff] %v9909_v25 }
 0x4b2   :  { %v4650_v36 = vsub.f32 %v13271_v20, %v9508_v4  ;;  %v4888_v46 = vmul.f32 1.442695, %v4649_v62  ;;  %v9914_v54 = vpop.eup %7676  ;;  %7682 = vpow2.f32 %v4886_v13 }
 0x4b3   :  { %v5111_v5 = vadd.f32 %v9894_v24, %v5110_v2  ;;  %v13273_v2 = vld [vmem:[#allocation60_spill] sm:$0xff]  ;;  %13274 = vst [vmem:[#allocation48_spill] sm:$0xff] %v9914_v54 }
 0x4b4   :  { %v4651_v24 = vsub.f32 %v13273_v2, %v9508_v4  ;;  %v4890_v20 = vmul.f32 1.442695, %v4650_v36  ;;  %v9919_v29 = vpop.eup %7678  ;;  %7684 = vpow2.f32 %v4888_v46 }
 0x4b5   :  { %v5112_v17 = vadd.f32 %v9899_v0, %v5111_v5  ;;  %v13275_v5 = vld [vmem:[#allocation62_spill] sm:$0xff]  ;;  %13276 = vst [vmem:[#allocation50_spill] sm:$0xff] %v9919_v29 }
 0x4b6   :  { %v4652_v0 = vsub.f32 %v13275_v5, %v9508_v4  ;;  %v4892_v2 = vmul.f32 1.442695, %v4651_v24  ;;  %v9924_v47 = vpop.eup %7680  ;;  %7686 = vpow2.f32 %v4890_v20 }
 0x4b7   :  { %v5113_v40 = vadd.f32 %v9904_v58, %v5112_v17  ;;  %v13277_v17 = vld [vmem:[#allocation63_spill] sm:$0xff]  ;;  %13278 = vst [vmem:[#allocation51_spill] sm:$0xff] %v9924_v47 }
 0x4b8   :  { %v4653_v58 = vsub.f32 %v13277_v17, %v9508_v4  ;;  %v4894_v5 = vmul.f32 1.442695, %v4652_v0  ;;  %v9929_v13 = vpop.eup %7682  ;;  %7688 = vpow2.f32 %v4892_v2 }
 0x4b9   :  { %v5114_v43 = vadd.f32 %v9909_v25, %v5113_v40  ;;  %v13279_v40 = vld [vmem:[#allocation61_spill] sm:$0xff]  ;;  %13280 = vst [vmem:[#allocation49_spill] sm:$0xff] %v9929_v13 }
 0x4ba   :  { %v4654_v25 = vsub.f32 %v13279_v40, %v9508_v4  ;;  %v4896_v17 = vmul.f32 1.442695, %v4653_v58  ;;  %v9934_v46 = vpop.eup %7684  ;;  %7690 = vpow2.f32 %v4894_v5 }
 0x4bb   :  { %v5115_v16 = vadd.f32 %v9914_v54, %v5114_v43  ;;  %v13281_v43 = vld [vmem:[#allocation64_spill] sm:$0xff]  ;;  %13282 = vst [vmem:[#allocation52_spill] sm:$0xff] %v9934_v46 }
 0x4bc   :  { %v4655_v54 = vsub.f32 %v13281_v43, %v9508_v4  ;;  %v4898_v40 = vmul.f32 1.442695, %v4654_v25  ;;  %v9939_v20 = vpop.eup %7686  ;;  %7692 = vpow2.f32 %v4896_v17 }
 0x4bd   :  { %v5116_v62 = vadd.f32 %v9919_v29, %v5115_v16  ;;  %v13283_v16 = vld [vmem:[#allocation66_spill] sm:$0xff]  ;;  %13284 = vst [vmem:[#allocation54_spill] sm:$0xff] %v9939_v20 }
 0x4be   :  { %v4656_v29 = vsub.f32 %v13283_v16, %v9508_v4  ;;  %v4900_v43 = vmul.f32 1.442695, %v4655_v54  ;;  %v9944_v2 = vpop.eup %7688  ;;  %7694 = vpow2.f32 %v4898_v40 }
 0x4bf   :  { %v5117_v36 = vadd.f32 %v9924_v47, %v5116_v62  ;;  %v13285_v62 = vld [vmem:[#allocation67_spill] sm:$0xff] }
 0x4c0   :  { %v4657_v47 = vsub.f32 %v13285_v62, %v9508_v4  ;;  %v4902_v16 = vmul.f32 1.442695, %v4656_v29  ;;  %v9949_v5 = vpop.eup %7690  ;;  %7696 = vpow2.f32 %v4900_v43 }
 0x4c1   :  { %v5118_v24 = vadd.f32 %v9929_v13, %v5117_v36  ;;  %v13286_v36 = vld [vmem:[#allocation65_spill] sm:$0xff]  ;;  %13287 = vst [vmem:[#allocation55_spill] sm:$0xff] %v9949_v5 }
 0x4c2   :  { %v4658_v13 = vsub.f32 %v13286_v36, %v9508_v4  ;;  %v4904_v62 = vmul.f32 1.442695, %v4657_v47  ;;  %v9954_v17 = vpop.eup %7692  ;;  %7698 = vpow2.f32 %v4902_v16 }
 0x4c3   :  { %v5119_v0 = vadd.f32 %v9934_v46, %v5118_v24  ;;  %v13288_v24 = vld [vmem:[#allocation68_spill] sm:$0xff]  ;;  %13289 = vst [vmem:[#allocation53_spill] sm:$0xff] %v9954_v17 }
 0x4c4   :  { %v4659_v46 = vsub.f32 %v13288_v24, %v9508_v4  ;;  %v4906_v36 = vmul.f32 1.442695, %v4658_v13  ;;  %v9959_v40 = vpop.eup %7694  ;;  %7700 = vpow2.f32 %v4904_v62 }
 0x4c5   :  { %v5120_v58 = vadd.f32 %v9939_v20, %v5119_v0  ;;  %v13290_v0 = vld [vmem:[#allocation70_spill] sm:$0xff]  ;;  %13291 = vst [vmem:[#allocation56_spill] sm:$0xff] %v9959_v40 }
 0x4c6   :  { %v4660_v20 = vsub.f32 %v13290_v0, %v9508_v4  ;;  %v4908_v24 = vmul.f32 1.442695, %v4659_v46  ;;  %v9964_v43 = vpop.eup %7696  ;;  %7702 = vpow2.f32 %v4906_v36 }
 0x4c7   :  { %v5121_v25 = vadd.f32 %v9944_v2, %v5120_v58  ;;  %v4661_v58 = vsub.f32 %v9219_v35, %v9508_v4  ;;  %13292 = vst [vmem:[#allocation58_spill] sm:$0xff] %v9964_v43 }
 0x4c8   :  { %v4910_v0 = vmul.f32 1.442695, %v4660_v20  ;;  %v9969_v16 = vpop.eup %7698  ;;  %7704 = vpow2.f32 %v4908_v24 }
 0x4c9   :  { %v5122_v54 = vadd.f32 %v9949_v5, %v5121_v25  ;;  %v13293_v25 = vld [vmem:[#allocation69_spill] sm:$0xff]  ;;  %13294 = vst [vmem:[#allocation59_spill] sm:$0xff] %v9969_v16  ;;  %v4912_v35 = vmul.f32 1.442695, %v4661_v58 }
 0x4ca   :  { %v4662_v5 = vsub.f32 %v13293_v25, %v9508_v4  ;;  %v9974_v62 = vpop.eup %7700  ;;  %7706 = vpow2.f32 %v4910_v0 }
 0x4cb   :  { %v5123_v29 = vadd.f32 %v9954_v17, %v5122_v54  ;;  %v13295_v54 = vld [vmem:[#allocation71_spill] sm:$0xff]  ;;  %13296 = vst [vmem:[#allocation57_spill] sm:$0xff] %v9974_v62  ;;  %7708 = vpow2.f32 %v4912_v35 }
 0x4cc   :  { %v4663_v17 = vsub.f32 %v13295_v54, %v9508_v4  ;;  %v4914_v25 = vmul.f32 1.442695, %v4662_v5  ;;  %v9979_v36 = vpop.eup %7702 }
 0x4cd   :  { %v5124_v47 = vadd.f32 %v9959_v40, %v5123_v29  ;;  %v13297_v29 = vld [vmem:[#allocation73_spill] sm:$0xff]  ;;  %13298 = vst [vmem:[#allocation60_spill] sm:$0xff] %v9979_v36 }
 0x4ce   :  { %v4664_v40 = vsub.f32 %v13297_v29, %v9508_v4  ;;  %v4916_v54 = vmul.f32 1.442695, %v4663_v17  ;;  %v9984_v24 = vpop.eup %7704  ;;  %7710 = vpow2.f32 %v4914_v25 }
 0x4cf   :  { %v5125_v13 = vadd.f32 %v9964_v43, %v5124_v47  ;;  %v13299_v47 = vld [vmem:[#allocation74_spill] sm:$0xff]  ;;  %13300 = vst [vmem:[#allocation62_spill] sm:$0xff] %v9984_v24 }
 0x4d0   :  { %v4665_v43 = vsub.f32 %v13299_v47, %v9508_v4  ;;  %v4918_v29 = vmul.f32 1.442695, %v4664_v40  ;;  %v9989_v0 = vpop.eup %7706  ;;  %7712 = vpow2.f32 %v4916_v54 }
 0x4d1   :  { %v5126_v46 = vadd.f32 %v9969_v16, %v5125_v13  ;;  %v13301_v13 = vld [vmem:[#allocation72_spill] sm:$0xff]  ;;  %13302 = vst [vmem:[#allocation63_spill] sm:$0xff] %v9989_v0  ;;  %v9994_v35 = vpop.eup %7708 }
 0x4d2   :  { %v4666_v16 = vsub.f32 %v13301_v13, %v9508_v4  ;;  %v4920_v47 = vmul.f32 1.442695, %v4665_v43  ;;  %13304 = vst [vmem:[#allocation61_spill] sm:$0xff] %v9994_v35  ;;  %7714 = vpow2.f32 %v4918_v29 }
 0x4d3   :  { %v5127_v20 = vadd.f32 %v9974_v62, %v5126_v46  ;;  %v13303_v46 = vld [vmem:[#allocation75_spill] sm:$0xff] }
 0x4d4   :  { %v4667_v62 = vsub.f32 %v13303_v46, %v9508_v4  ;;  %v4922_v13 = vmul.f32 1.442695, %v4666_v16  ;;  %v9999_v25 = vpop.eup %7710  ;;  %7716 = vpow2.f32 %v4920_v47 }
 0x4d5   :  { %v5128_v58 = vadd.f32 %v9979_v36, %v5127_v20  ;;  %v13305_v20 = vld [vmem:[#allocation77_spill] sm:$0xff]  ;;  %13306 = vst [vmem:[#allocation64_spill] sm:$0xff] %v9999_v25 }
 0x4d6   :  { %v4668_v36 = vsub.f32 %v13305_v20, %v9508_v4  ;;  %v4924_v46 = vmul.f32 1.442695, %v4667_v62  ;;  %v10004_v54 = vpop.eup %7712  ;;  %7718 = vpow2.f32 %v4922_v13 }
 0x4d7   :  { %v5129_v5 = vadd.f32 %v9984_v24, %v5128_v58  ;;  %v13307_v58 = vld [vmem:[#allocation78_spill] sm:$0xff]  ;;  %13308 = vst [vmem:[#allocation66_spill] sm:$0xff] %v10004_v54 }
 0x4d8   :  { %v4669_v24 = vsub.f32 %v13307_v58, %v9508_v4  ;;  %v4926_v20 = vmul.f32 1.442695, %v4668_v36  ;;  %v10009_v29 = vpop.eup %7714  ;;  %7720 = vpow2.f32 %v4924_v46 }
 0x4d9   :  { %v5130_v17 = vadd.f32 %v9989_v0, %v5129_v5  ;;  %v13309_v5 = vld [vmem:[#allocation76_spill] sm:$0xff]  ;;  %13310 = vst [vmem:[#allocation67_spill] sm:$0xff] %v10009_v29 }
 0x4da   :  { %v4670_v0 = vsub.f32 %v13309_v5, %v9508_v4  ;;  %v4928_v58 = vmul.f32 1.442695, %v4669_v24  ;;  %v10014_v47 = vpop.eup %7716  ;;  %7722 = vpow2.f32 %v4926_v20 }
 0x4db   :  { %v5131_v40 = vadd.f32 %v9994_v35, %v5130_v17  ;;  %v13311_v17 = vld [vmem:[#allocation79_spill] sm:$0xff]  ;;  %13312 = vst [vmem:[#allocation65_spill] sm:$0xff] %v10014_v47 }
 0x4dc   :  { %v4671_v35 = vsub.f32 %v13311_v17, %v9508_v4  ;;  %v4930_v5 = vmul.f32 1.442695, %v4670_v0  ;;  %v10019_v13 = vpop.eup %7718  ;;  %7724 = vpow2.f32 %v4928_v58 }
 0x4dd   :  { %v5132_v43 = vadd.f32 %v9999_v25, %v5131_v40  ;;  %v13313_v40 = vld [vmem:[#allocation81_spill] sm:$0xff]  ;;  %13314 = vst [vmem:[#allocation68_spill] sm:$0xff] %v10019_v13 }
 0x4de   :  { %v4672_v25 = vsub.f32 %v13313_v40, %v9508_v4  ;;  %v4932_v17 = vmul.f32 1.442695, %v4671_v35  ;;  %v10024_v46 = vpop.eup %7720  ;;  %7726 = vpow2.f32 %v4930_v5 }
 0x4df   :  { %v5133_v16 = vadd.f32 %v10004_v54, %v5132_v43  ;;  %v13315_v43 = vld [vmem:[#allocation82_spill] sm:$0xff]  ;;  %13316 = vst [vmem:[#allocation70_spill] sm:$0xff] %v10024_v46 }
 0x4e0   :  { %v4673_v54 = vsub.f32 %v13315_v43, %v9508_v4  ;;  %v4934_v40 = vmul.f32 1.442695, %v4672_v25  ;;  %v10029_v20 = vpop.eup %7722  ;;  %7728 = vpow2.f32 %v4932_v17 }
 0x4e1   :  { %v5134_v62 = vadd.f32 %v10009_v29, %v5133_v16  ;;  %v13317_v16 = vld [vmem:[#allocation80_spill] sm:$0xff]  ;;  %13318 = vst [vmem:[#allocation69_spill] sm:$0xff] %v10029_v20 }
 0x4e2   :  { %v4674_v29 = vsub.f32 %v13317_v16, %v9508_v4  ;;  %v4936_v43 = vmul.f32 1.442695, %v4673_v54  ;;  %v10034_v58 = vpop.eup %7724  ;;  %7730 = vpow2.f32 %v4934_v40 }
 0x4e3   :  { %v5135_v36 = vadd.f32 %v10014_v47, %v5134_v62  ;;  %v13319_v62 = vld [vmem:[#allocation83_spill] sm:$0xff]  ;;  %13320 = vst [vmem:[#allocation71_spill] sm:$0xff] %v10034_v58 }
 0x4e4   :  { %v4675_v47 = vsub.f32 %v13319_v62, %v9508_v4  ;;  %v4938_v16 = vmul.f32 1.442695, %v4674_v29  ;;  %v10039_v5 = vpop.eup %7726  ;;  %7732 = vpow2.f32 %v4936_v43 }
 0x4e5   :  { %v5136_v24 = vadd.f32 %v10019_v13, %v5135_v36  ;;  %v13321_v36 = vld [vmem:[#allocation85_spill] sm:$0xff]  ;;  %13322 = vst [vmem:[#allocation73_spill] sm:$0xff] %v10039_v5 }
 0x4e6   :  { %v4676_v13 = vsub.f32 %v13321_v36, %v9508_v4  ;;  %v4940_v62 = vmul.f32 1.442695, %v4675_v47  ;;  %v10044_v17 = vpop.eup %7728  ;;  %7734 = vpow2.f32 %v4938_v16 }
 0x4e7   :  { %v5137_v0 = vadd.f32 %v10024_v46, %v5136_v24  ;;  %v13323_v24 = vld [vmem:[#allocation130_spill] sm:$0xff]  ;;  %13324 = vst [vmem:[#allocation74_spill] sm:$0xff] %v10044_v17 }
 0x4e8   :  { %v4677_v46 = vsub.f32 %v13323_v24, %v9508_v4  ;;  %v4942_v36 = vmul.f32 1.442695, %v4676_v13  ;;  %v10049_v40 = vpop.eup %7730  ;;  %7736 = vpow2.f32 %v4940_v62 }
 0x4e9   :  { %v5138_v35 = vadd.f32 %v10029_v20, %v5137_v0  ;;  %v13325_v0 = vld [vmem:[#allocation84_spill] sm:$0xff]  ;;  %13326 = vst [vmem:[#allocation72_spill] sm:$0xff] %v10049_v40 }
 0x4ea   :  { %v4678_v20 = vsub.f32 %v13325_v0, %v9508_v4  ;;  %v4944_v24 = vmul.f32 1.442695, %v4677_v46  ;;  %v10054_v43 = vpop.eup %7732  ;;  %7738 = vpow2.f32 %v4942_v36 }
 0x4eb   :  { %v5139_v25 = vadd.f32 %v10034_v58, %v5138_v35  ;;  %v13327_v35 = vld [vmem:[#allocation86_spill] sm:$0xff]  ;;  %13328 = vst [vmem:[#allocation75_spill] sm:$0xff] %v10054_v43 }
 0x4ec   :  { %v4679_v58 = vsub.f32 %v13327_v35, %v9508_v4  ;;  %v4946_v0 = vmul.f32 1.442695, %v4678_v20  ;;  %v10059_v16 = vpop.eup %7734  ;;  %7740 = vpow2.f32 %v4944_v24 }
 0x4ed   :  { %v5140_v54 = vadd.f32 %v10039_v5, %v5139_v25  ;;  %v13329_v25 = vld [vmem:[#allocation131_spill] sm:$0xff] }
 0x4ee   :  { %v4680_v5 = vsub.f32 %v13329_v25, %v9508_v4  ;;  %v4948_v35 = vmul.f32 1.442695, %v4679_v58  ;;  %v10064_v62 = vpop.eup %7736  ;;  %7742 = vpow2.f32 %v4946_v0 }
 0x4ef   :  { %v5141_v29 = vadd.f32 %v10044_v17, %v5140_v54  ;;  %v13330_v54 = vld [vmem:[#allocation132_spill] sm:$0xff] }
 0x4f0   :  { %v4681_v17 = vsub.f32 %v13330_v54, %v9508_v4  ;;  %v4950_v25 = vmul.f32 1.442695, %v4680_v5  ;;  %v10069_v36 = vpop.eup %7738  ;;  %7744 = vpow2.f32 %v4948_v35 }
 0x4f1   :  { %v5142_v47 = vadd.f32 %v10049_v40, %v5141_v29  ;;  %v13331_v29 = vld [vmem:[#allocation87_spill] sm:$0xff]  ;;  %13332 = vst [vmem:[#allocation77_spill] sm:$0xff] %v10069_v36 }
 0x4f2   :  { %v4682_v40 = vsub.f32 %v13331_v29, %v9508_v4  ;;  %v4952_v54 = vmul.f32 1.442695, %v4681_v17  ;;  %v10074_v24 = vpop.eup %7740  ;;  %7746 = vpow2.f32 %v4950_v25 }
 0x4f3   :  { %v5143_v13 = vadd.f32 %v10054_v43, %v5142_v47  ;;  %v13333_v47 = vld [vmem:[#allocation88_spill] sm:$0xff]  ;;  %13334 = vst [vmem:[#allocation78_spill] sm:$0xff] %v10074_v24 }
 0x4f4   :  { %v4683_v43 = vsub.f32 %v13333_v47, %v9508_v4  ;;  %v4954_v29 = vmul.f32 1.442695, %v4682_v40  ;;  %v10079_v0 = vpop.eup %7742  ;;  %7748 = vpow2.f32 %v4952_v54 }
 0x4f5   :  { %v5144_v46 = vadd.f32 %v10059_v16, %v5143_v13  ;;  %v4684_v13 = vsub.f32 %v9332_v12, %v9508_v4 }
 0x4f6   :  { %v4956_v47 = vmul.f32 1.442695, %v4683_v43  ;;  %v10084_v35 = vpop.eup %7744  ;;  %7750 = vpow2.f32 %v4954_v29 }
 0x4f7   :  { %v5145_v20 = vadd.f32 %v10064_v62, %v5144_v46  ;;  %v4685_v46 = vsub.f32 %v9336_v23, %v9508_v4  ;;  %13335 = vst [vmem:[#allocation76_spill] sm:$0xff] %v10084_v35  ;;  %v4958_v12 = vmul.f32 1.442695, %v4684_v13 }
 0x4f8   :  { %v10089_v25 = vpop.eup %7746  ;;  %7752 = vpow2.f32 %v4956_v47 }
 0x4f9   :  { %v5146_v58 = vadd.f32 %v10069_v36, %v5145_v20  ;;  %v13336_v20 = vld [vmem:[#allocation89_spill] sm:$0xff]  ;;  %13337 = vst [vmem:[#allocation79_spill] sm:$0xff] %v10089_v25  ;;  %v4960_v23 = vmul.f32 1.442695, %v4685_v46  ;;  %7754 = vpow2.f32 %v4958_v12 }
 0x4fa   :  { %v4686_v36 = vsub.f32 %v13336_v20, %v9508_v4  ;;  %v10094_v54 = vpop.eup %7748 }
 0x4fb   :  { %v5147_v5 = vadd.f32 %v10074_v24, %v5146_v58  ;;  %v13338_v58 = vld [vmem:[#allocation90_spill] sm:$0xff]  ;;  %7756 = vpow2.f32 %v4960_v23 }
 0x4fc   :  { %v4687_v24 = vsub.f32 %v13338_v58, %v9508_v4  ;;  %v4962_v20 = vmul.f32 1.442695, %v4686_v36  ;;  %v10099_v29 = vpop.eup %7750 }
 0x4fd   :  { %v5148_v17 = vadd.f32 %v10079_v0, %v5147_v5  ;;  %v4688_v5 = vsub.f32 %v9355_v45, %v9508_v4 }
 0x4fe   :  { %v4964_v58 = vmul.f32 1.442695, %v4687_v24  ;;  %v10104_v47 = vpop.eup %7752  ;;  %7758 = vpow2.f32 %v4962_v20 }
 0x4ff   :  { %v5149_v40 = vadd.f32 %v10084_v35, %v5148_v17  ;;  %v13339_v17 = vld [vmem:[#allocation92_spill] sm:$0xff]  ;;  %v4966_v45 = vmul.f32 1.442695, %v4688_v5  ;;  %v10109_v12 = vpop.eup %7754 }
 0x500   :  { %v4689_v35 = vsub.f32 %v13339_v17, %v9508_v4  ;;  %7760 = vpow2.f32 %v4964_v58 }
 0x501   :  { %v5150_v43 = vadd.f32 %v10089_v25, %v5149_v40  ;;  %v13340_v40 = vld [vmem:[#allocation91_spill] sm:$0xff]  ;;  %v10114_v23 = vpop.eup %7756  ;;  %7762 = vpow2.f32 %v4966_v45 }
 0x502   :  { %v4690_v25 = vsub.f32 %v13340_v40, %v9508_v4  ;;  %v4968_v17 = vmul.f32 1.442695, %v4689_v35 }
 0x503   :  { %v5151_v13 = vadd.f32 %v10094_v54, %v5150_v43  ;;  %v4691_v43 = vsub.f32 %v9365_v34, %v9508_v4 }
 0x504   :  { %v4970_v40 = vmul.f32 1.442695, %v4690_v25  ;;  %v10119_v20 = vpop.eup %7758  ;;  %7764 = vpow2.f32 %v4968_v17 }
 0x505   :  { %v5152_v46 = vadd.f32 %v10099_v29, %v5151_v13  ;;  %v4692_v13 = vsub.f32 %v9372_v8, %v9508_v4  ;;  %v4972_v34 = vmul.f32 1.442695, %v4691_v43 }
 0x506   :  { %v10124_v58 = vpop.eup %7760  ;;  %7766 = vpow2.f32 %v4970_v40 }
 0x507   :  { %v5153_v36 = vadd.f32 %v10104_v47, %v5152_v46  ;;  %v4693_v46 = vsub.f32 %v9379_v19, %v9508_v4  ;;  %v4974_v8 = vmul.f32 1.442695, %v4692_v13  ;;  %v10129_v45 = vpop.eup %7762  ;;  %7768 = vpow2.f32 %v4972_v34 }
 0x509   :  { %v5154_v24 = vadd.f32 %v10109_v12, %v5153_v36  ;;  %v4694_v36 = vsub.f32 %v9369_v59, %v9508_v4  ;;  %v4976_v19 = vmul.f32 1.442695, %v4693_v46  ;;  %7770 = vpow2.f32 %v4974_v8 }
 0x50a   :  { %v10134_v17 = vpop.eup %7764 }
 0x50b   :  { %v5155_v5 = vadd.f32 %v10114_v23, %v5154_v24  ;;  %v4695_v24 = vsub.f32 %v9382_v53, %v9508_v4  ;;  %v4978_v59 = vmul.f32 1.442695, %v4694_v36  ;;  %7772 = vpow2.f32 %v4976_v19 }
 0x50c   :  { %v10139_v40 = vpop.eup %7766 }
 0x50d   :  { %v5156_v35 = vadd.f32 %v10119_v20, %v5155_v5  ;;  %v4696_v5 = vsub.f32 %v9389_v44, %v9508_v4  ;;  %v4980_v53 = vmul.f32 1.442695, %v4695_v24  ;;  %v10144_v34 = vpop.eup %7768  ;;  %7774 = vpow2.f32 %v4978_v59 }
 0x50e   :  { %13341 = vst [vmem:[#allocation81_spill] sm:$0xff] %v10144_v34 }
 0x50f   :  { %v5157_v25 = vadd.f32 %v10124_v58, %v5156_v35  ;;  %v4697_v35 = vsub.f32 %v9395_v3, %v9508_v4  ;;  %v4982_v44 = vmul.f32 1.442695, %v4696_v5  ;;  %v10149_v8 = vpop.eup %7770  ;;  %7776 = vpow2.f32 %v4980_v53 }
 0x510   :  { %13342 = vst [vmem:[#allocation82_spill] sm:$0xff] %v10149_v8 }
 0x511   :  { %v5158_v43 = vadd.f32 %v10129_v45, %v5157_v25  ;;  %v4698_v25 = vsub.f32 %v9385_v38, %v9508_v4  ;;  %v4984_v3 = vmul.f32 1.442695, %v4697_v35  ;;  %v10154_v19 = vpop.eup %7772  ;;  %7778 = vpow2.f32 %v4982_v44 }
 0x512   :  { %13343 = vst [vmem:[#allocation80_spill] sm:$0xff] %v10154_v19 }
 0x513   :  { %v5159_v13 = vadd.f32 %v10134_v17, %v5158_v43  ;;  %v4699_v43 = vsub.f32 %v9399_v15, %v9508_v4  ;;  %v4986_v38 = vmul.f32 1.442695, %v4698_v25  ;;  %v10159_v59 = vpop.eup %7774  ;;  %7780 = vpow2.f32 %v4984_v3 }
 0x514   :  { %13344 = vst [vmem:[#allocation83_spill] sm:$0xff] %v10159_v59 }
 0x515   :  { %v5160_v46 = vadd.f32 %v10139_v40, %v5159_v13  ;;  %v4700_v13 = vsub.f32 %v9410_v56, %v9508_v4  ;;  %v4988_v15 = vmul.f32 1.442695, %v4699_v43  ;;  %v10164_v53 = vpop.eup %7776  ;;  %7782 = vpow2.f32 %v4986_v38 }
 0x517   :  { %v5161_v36 = vadd.f32 %v10144_v34, %v5160_v46  ;;  %v13345_v46 = vld [vmem:[#allocation94_spill] sm:$0xff]  ;;  %v4990_v56 = vmul.f32 1.442695, %v4700_v13  ;;  %v10169_v44 = vpop.eup %7778  ;;  %7784 = vpow2.f32 %v4988_v15 }
 0x518   :  { %v4701_v34 = vsub.f32 %v13345_v46, %v9508_v4  ;;  %13347 = vst [vmem:[#allocation85_spill] sm:$0xff] %v10169_v44 }
 0x519   :  { %v5162_v24 = vadd.f32 %v10149_v8, %v5161_v36  ;;  %v13346_v36 = vld [vmem:[#allocation93_spill] sm:$0xff]  ;;  %v10174_v3 = vpop.eup %7780  ;;  %7786 = vpow2.f32 %v4990_v56 }
 0x51a   :  { %v4702_v8 = vsub.f32 %v13346_v36, %v9508_v4  ;;  %v4992_v46 = vmul.f32 1.442695, %v4701_v34 }
 0x51b   :  { %v5163_v5 = vadd.f32 %v10154_v19, %v5162_v24  ;;  %v13348_v24 = vld [vmem:[#allocation95_spill] sm:$0xff]  ;;  %v10179_v38 = vpop.eup %7782 }
 0x51c   :  { %v4703_v19 = vsub.f32 %v13348_v24, %v9508_v4  ;;  %v4994_v36 = vmul.f32 1.442695, %v4702_v8  ;;  %7788 = vpow2.f32 %v4992_v46 }
 0x51d   :  { %v5164_v35 = vadd.f32 %v10159_v59, %v5163_v5  ;;  %v13349_v5 = vld [vmem:[#allocation97_spill] sm:$0xff]  ;;  %v10184_v15 = vpop.eup %7784 }
 0x51e   :  { %v4704_v59 = vsub.f32 %v13349_v5, %v9508_v4  ;;  %v4996_v24 = vmul.f32 1.442695, %v4703_v19  ;;  %7790 = vpow2.f32 %v4994_v36 }
 0x51f   :  { %v5165_v25 = vadd.f32 %v10164_v53, %v5164_v35  ;;  %v4705_v35 = vsub.f32 %v9434_v55, %v9508_v4  ;;  %v10189_v56 = vpop.eup %7786 }
 0x520   :  { %v4998_v5 = vmul.f32 1.442695, %v4704_v59  ;;  %7792 = vpow2.f32 %v4996_v24 }
 0x521   :  { %v5166_v43 = vadd.f32 %v10169_v44, %v5165_v25  ;;  %v13350_v25 = vld [vmem:[#allocation96_spill] sm:$0xff]  ;;  %v5000_v55 = vmul.f32 1.442695, %v4705_v35 }
 0x522   :  { %v4706_v44 = vsub.f32 %v13350_v25, %v9508_v4  ;;  %v10194_v46 = vpop.eup %7788  ;;  %7794 = vpow2.f32 %v4998_v5 }
 0x523   :  { %v5167_v13 = vadd.f32 %v10174_v3, %v5166_v43  ;;  %v4707_v43 = vsub.f32 %v9441_v50, %v9508_v4  ;;  %7796 = vpow2.f32 %v5000_v55 }
 0x524   :  { %v5002_v25 = vmul.f32 1.442695, %v4706_v44  ;;  %v10199_v36 = vpop.eup %7790 }
 0x525   :  { %v5168_v34 = vadd.f32 %v10179_v38, %v5167_v13  ;;  %v4708_v13 = vsub.f32 %v9453_v21, %v9508_v4  ;;  %v5004_v50 = vmul.f32 1.442695, %v4707_v43 }
 0x526   :  { %v10204_v24 = vpop.eup %7792  ;;  %7798 = vpow2.f32 %v5002_v25 }
 0x527   :  { %v5169_v8 = vadd.f32 %v10184_v15, %v5168_v34  ;;  %v4709_v34 = vsub.f32 %v9448_v26, %v9508_v4  ;;  %v5006_v21 = vmul.f32 1.442695, %v4708_v13  ;;  %7800 = vpow2.f32 %v5004_v50 }
 0x528   :  { %v10209_v5 = vpop.eup %7794 }
 0x529   :  { %v5170_v19 = vadd.f32 %v10189_v56, %v5169_v8  ;;  %v4710_v8 = vsub.f32 %v9445_v42, %v9508_v4  ;;  %v5008_v26 = vmul.f32 1.442695, %v4709_v34  ;;  %v10214_v55 = vpop.eup %7796  ;;  %7802 = vpow2.f32 %v5006_v21 }
 0x52b   :  { %v5171_v59 = vadd.f32 %v10194_v46, %v5170_v19  ;;  %v4711_v19 = vsub.f32 %v9456_v32, %v9508_v4  ;;  %v5010_v42 = vmul.f32 1.442695, %v4710_v8  ;;  %7804 = vpow2.f32 %v5008_v26 }
 0x52c   :  { %v10219_v25 = vpop.eup %7798 }
 0x52d   :  { %v5172_v35 = vadd.f32 %v10199_v36, %v5171_v59  ;;  %v4712_v59 = vsub.f32 %v9468_v22, %v9508_v4  ;;  %v5012_v32 = vmul.f32 1.442695, %v4711_v19  ;;  %v10224_v50 = vpop.eup %7800  ;;  %7806 = vpow2.f32 %v5010_v42 }
 0x52f   :  { %v5173_v44 = vadd.f32 %v10204_v24, %v5172_v35  ;;  %v4713_v35 = vsub.f32 %v9459_v63, %v9508_v4  ;;  %v5014_v22 = vmul.f32 1.442695, %v4712_v59  ;;  %v10229_v21 = vpop.eup %7802  ;;  %7808 = vpow2.f32 %v5012_v32 }
 0x531   :  { %v5174_v43 = vadd.f32 %v10209_v5, %v5173_v44  ;;  %v4714_v44 = vsub.f32 %v9465_v52, %v9508_v4  ;;  %v5016_v63 = vmul.f32 1.442695, %v4713_v35  ;;  %v10234_v26 = vpop.eup %7804  ;;  %7810 = vpow2.f32 %v5014_v22 }
 0x533   :  { %v5175_v13 = vadd.f32 %v10214_v55, %v5174_v43  ;;  %v4715_v43 = vsub.f32 %v9471_v28, %v9508_v4  ;;  %v5018_v52 = vmul.f32 1.442695, %v4714_v44  ;;  %v10239_v42 = vpop.eup %7806  ;;  %7812 = vpow2.f32 %v5016_v63 }
 0x535   :  { %v5176_v34 = vadd.f32 %v10219_v25, %v5175_v13  ;;  %v4716_v13 = vsub.f32 %v9483_v6, %v9508_v4  ;;  %v5020_v28 = vmul.f32 1.442695, %v4715_v43  ;;  %v10244_v32 = vpop.eup %7808  ;;  %7814 = vpow2.f32 %v5018_v52 }
 0x537   :  { %v5177_v8 = vadd.f32 %v10224_v50, %v5176_v34  ;;  %v4717_v34 = vsub.f32 %v9474_v30, %v9508_v4  ;;  %v5022_v6 = vmul.f32 1.442695, %v4716_v13  ;;  %v10249_v22 = vpop.eup %7810  ;;  %7816 = vpow2.f32 %v5020_v28 }
 0x539   :  { %v5178_v19 = vadd.f32 %v10229_v21, %v5177_v8  ;;  %v4718_v8 = vsub.f32 %v9480_v18, %v9508_v4  ;;  %v5024_v30 = vmul.f32 1.442695, %v4717_v34  ;;  %v10254_v63 = vpop.eup %7812  ;;  %7818 = vpow2.f32 %v5022_v6 }
 0x53a   :  { %13351 = vst [vmem:[#allocation130_spill] sm:$0xff] %v10254_v63  ;;  %v4723_v34 = vsub.f32 %v9498_v7, %v9508_v4 }
 0x53b   :  { %v5179_v59 = vadd.f32 %v10234_v26, %v5178_v19  ;;  %v4719_v19 = vsub.f32 %v9485_v10, %v9508_v4  ;;  %v5026_v18 = vmul.f32 1.442695, %v4718_v8  ;;  %v10259_v52 = vpop.eup %7814  ;;  %7820 = vpow2.f32 %v5024_v30 }
 0x53c   :  { %13352 = vst [vmem:[#allocation84_spill] sm:$0xff] %v10259_v52  ;;  %v5036_v30 = vmul.f32 1.442695, %v4723_v34 }
 0x53d   :  { %v5180_v35 = vadd.f32 %v10239_v42, %v5179_v59  ;;  %v4720_v59 = vsub.f32 %v9496_v14, %v9508_v4  ;;  %v5028_v10 = vmul.f32 1.442695, %v4719_v19  ;;  %v4722_v14 = vsub.f32 %v9494_v11, %v9508_v4 }
 0x53e   :  { %7822 = vpow2.f32 %v5026_v18 }
 0x53f   :  { %v5181_v44 = vadd.f32 %v10244_v32, %v5180_v35  ;;  %v4721_v35 = vsub.f32 %v9487_v41, %v9508_v4  ;;  %v5030_v8 = vmul.f32 1.442695, %v4720_v59  ;;  %7824 = vpow2.f32 %v5028_v10 }
 0x540   :  { %v5034_v7 = vmul.f32 1.442695, %v4722_v14 }
 0x541   :  { %v5182_v43 = vadd.f32 %v10249_v22, %v5181_v44  ;;  %v10266_v44 = vpop.eup %7816  ;;  %v5032_v41 = vmul.f32 1.442695, %v4721_v35  ;;  %7826 = vpow2.f32 %v5030_v8 }
 0x543   :  { %v5183_v13 = vadd.f32 %v10254_v63, %v5182_v43  ;;  %v10271_v43 = vpop.eup %7818  ;;  %7828 = vpow2.f32 %v5032_v41 }
 0x544   :  { %v10274_v63 = vpop.eup %7820  ;;  %7830 = vpow2.f32 %v5036_v30 }
 0x545   :  { %v5184_v28 = vadd.f32 %v10259_v52, %v5183_v13  ;;  %v10277_v52 = vpop.eup %7822  ;;  %7832 = vpow2.f32 %v5034_v7 }
 0x546   :  { %v10280_v4 = vpop.eup %7824 }
 0x547   :  { %v5185_v6 = vadd.f32 %v10266_v44, %v5184_v28  ;;  %v10283_v18 = vpop.eup %7826 }
 0x549   :  { %v5186_v19 = vadd.f32 %v10271_v43, %v5185_v6  ;;  %v10286_v10 = vpop.eup %7828 }
 0x54a   :  { %v10288_v34 = vpop.eup %7830 }
 0x54b   :  { %v5187_v13 = vadd.f32 %v10274_v63, %v5186_v19  ;;  %v10291_v14 = vpop.eup %7832  ;;  %v5193_v6 = vsel %vm4559_vm3, %v10288_v34, 0.0 }
 0x54d   :  { %v5188_v11 = vadd.f32 %v10277_v52, %v5187_v13 }
 0x54f   :  { %v5189_v59 = vadd.f32 %v10280_v4, %v5188_v11 }
 0x551   :  { %v5190_v35 = vadd.f32 %v10283_v18, %v5189_v59 }
 0x553   :  { %v5191_v28 = vadd.f32 %v10286_v10, %v5190_v35 }
 0x555   :  { %v5192_v8 = vadd.f32 %v10291_v14, %v5191_v28  ;;  %v13357_v28 = vld [vmem:[#allocation98_spill] sm:$0xff] }
 0x557   :  { %v5194_v41 = vadd.f32 %v5193_v6, %v5192_v8  ;;  %v13358_v8 = vld [vmem:[#allocation99_spill] sm:$0xff]  ;;  %v13359_v6 = vld [vmem:[#allocation101_spill] sm:$0xff] }
 0x559   :  { %5195 = vadd.xlane.f32.xlu0 %v5194_v41  ;;  %v13360_v41 = vld [vmem:[#allocation102_spill] sm:$0xff] }
 0x5cc   :  { %v5196_v30 = vpop.xlane.xlu0 %5195 }
 0x5cd   :  { %7834 = vrcp.f32 %v5196_v30  ;;  %v13362_v30 = vld [vmem:[#allocation100_spill] sm:$0xff] }
 0x5d3   :  { %v10296_v19 = vpop.eup %7834 }
 0x5d4   :  { %v10300_v7 = vmul.f32 %v10296_v19, %v9524_v31  ;;  %v10304_v13 = vmul.f32 %v10296_v19, %v9526_v37  ;;  %v10308_v11 = vmul.f32 %v10296_v19, %v9534_v48  ;;  %v10312_v59 = vmul.f32 %v10296_v19, %v9539_v39 }
 0x5d5   :  { %v10316_v35 = vmul.f32 %v10296_v19, %v9544_v9  ;;  %v10320_v31 = vmul.f32 %v10296_v19, %v9549_v1  ;;  %v10324_v37 = vmul.f32 %v10296_v19, %v9554_v49  ;;  %v10328_v48 = vmul.f32 %v10296_v19, %v9559_v57 }
 0x5d6   :  { %13353 = vst [vmem:[#allocation86_spill] sm:$0xff] %v10300_v7  ;;  %v10332_v39 = vmul.f32 %v10296_v19, %v9564_v51  ;;  %v10336_v9 = vmul.f32 %v10296_v19, %v9569_v33  ;;  %v10340_v1 = vmul.f32 %v10296_v19, %v9574_v61  ;;  %v10344_v49 = vmul.f32 %v10296_v19, %v9579_v60  ;;  %v13370_v7 = vld [vmem:[#allocation106_spill] sm:$0xff] }
 0x5d7   :  { %13354 = vst [vmem:[#allocation131_spill] sm:$0xff] %v10316_v35  ;;  %v10348_v57 = vmul.f32 %v10296_v19, %v9584_v27  ;;  %v10352_v51 = vmul.f32 %v10296_v19, %v13357_v28  ;;  %v10356_v33 = vmul.f32 %v10296_v19, %v13358_v8  ;;  %v10360_v61 = vmul.f32 %v10296_v19, %v13359_v6  ;;  %v13368_v35 = vld [vmem:[#allocation104_spill] sm:$0xff] }
 0x5d8   :  { %13355 = vst [vmem:[#allocation132_spill] sm:$0xff] %v10332_v39  ;;  %v10364_v60 = vmul.f32 %v10296_v19, %v13360_v41  ;;  %v10368_v27 = vmul.f32 %v10296_v19, %v13362_v30  ;;  %v13366_v39 = vld [vmem:[#allocation105_spill] sm:$0xff]  ;;  %v10380_v6 = vmul.f32 %v10296_v19, %v13368_v35  ;;  %v10384_v41 = vmul.f32 %v10296_v19, %v13370_v7 }
 0x5d9   :  { %13356 = vst [vmem:[#allocation87_spill] sm:$0xff] %v10348_v57  ;;  %v13364_v57 = vld [vmem:[#allocation103_spill] sm:$0xff]  ;;  %v10376_v8 = vmul.f32 %v10296_v19, %v13366_v39 }
 0x5da   :  { %13361 = vst [vmem:[#allocation88_spill] sm:$0xff] %v10364_v60  ;;  %v10372_v28 = vmul.f32 %v10296_v19, %v13364_v57  ;;  %v13372_v60 = vld [vmem:[#allocation107_spill] sm:$0xff] }
 0x5db   :  { %13363 = vst [vmem:[#allocation89_spill] sm:$0xff] %v10368_v27  ;;  %v10388_v30 = vmul.f32 %v10296_v19, %v13372_v60  ;;  %v13374_v27 = vld [vmem:[#allocation109_spill] sm:$0xff] }
 0x5dc   :  { %13365 = vst [vmem:[#allocation90_spill] sm:$0xff] %v10372_v28  ;;  %v10392_v57 = vmul.f32 %v10296_v19, %v13374_v27  ;;  %v13376_v28 = vld [vmem:[#allocation110_spill] sm:$0xff] }
 0x5dd   :  { %13367 = vst [vmem:[#allocation92_spill] sm:$0xff] %v10376_v8  ;;  %v10396_v39 = vmul.f32 %v10296_v19, %v13376_v28  ;;  %v13378_v8 = vld [vmem:[#allocation108_spill] sm:$0xff] }
 0x5de   :  { %13369 = vst [vmem:[#allocation91_spill] sm:$0xff] %v10380_v6  ;;  %v10400_v35 = vmul.f32 %v10296_v19, %v13378_v8  ;;  %v13380_v6 = vld [vmem:[#allocation111_spill] sm:$0xff] }
 0x5df   :  { %13371 = vst [vmem:[#allocation94_spill] sm:$0xff] %v10384_v41  ;;  %v10404_v7 = vmul.f32 %v10296_v19, %v13380_v6  ;;  %v13382_v41 = vld [vmem:[#allocation113_spill] sm:$0xff] }
 0x5e0   :  { %13373 = vst [vmem:[#allocation93_spill] sm:$0xff] %v10388_v30  ;;  %v10408_v60 = vmul.f32 %v10296_v19, %v13382_v41  ;;  %v13384_v30 = vld [vmem:[#allocation114_spill] sm:$0xff] }
 0x5e1   :  { %13375 = vst [vmem:[#allocation95_spill] sm:$0xff] %v10392_v57  ;;  %v10412_v27 = vmul.f32 %v10296_v19, %v13384_v30  ;;  %v13386_v57 = vld [vmem:[#allocation112_spill] sm:$0xff] }
 0x5e2   :  { %13377 = vst [vmem:[#allocation97_spill] sm:$0xff] %v10396_v39  ;;  %v10416_v28 = vmul.f32 %v10296_v19, %v13386_v57  ;;  %v13388_v39 = vld [vmem:[#allocation115_spill] sm:$0xff] }
 0x5e3   :  { %13379 = vst [vmem:[#allocation96_spill] sm:$0xff] %v10400_v35  ;;  %v10420_v8 = vmul.f32 %v10296_v19, %v13388_v39  ;;  %v13390_v35 = vld [vmem:[#allocation117_spill] sm:$0xff] }
 0x5e4   :  { %13381 = vst [vmem:[#allocation98_spill] sm:$0xff] %v10404_v7  ;;  %v10424_v6 = vmul.f32 %v10296_v19, %v13390_v35  ;;  %v13392_v7 = vld [vmem:[#allocation118_spill] sm:$0xff] }
 0x5e5   :  { %13383 = vst [vmem:[#allocation99_spill] sm:$0xff] %v10408_v60  ;;  %v10428_v41 = vmul.f32 %v10296_v19, %v13392_v7  ;;  %v13394_v60 = vld [vmem:[#allocation116_spill] sm:$0xff] }
 0x5e6   :  { %13385 = vst [vmem:[#allocation101_spill] sm:$0xff] %v10412_v27  ;;  %v10432_v30 = vmul.f32 %v10296_v19, %v13394_v60  ;;  %v13396_v27 = vld [vmem:[#allocation119_spill] sm:$0xff] }
 0x5e7   :  { %13387 = vst [vmem:[#allocation102_spill] sm:$0xff] %v10416_v28  ;;  %v10436_v57 = vmul.f32 %v10296_v19, %v13396_v27  ;;  %v13398_v28 = vld [vmem:[#allocation121_spill] sm:$0xff] }
 0x5e8   :  { %13389 = vst [vmem:[#allocation100_spill] sm:$0xff] %v10420_v8  ;;  %v10440_v39 = vmul.f32 %v10296_v19, %v13398_v28  ;;  %v13400_v8 = vld [vmem:[#allocation122_spill] sm:$0xff] }
 0x5e9   :  { %13391 = vst [vmem:[#allocation103_spill] sm:$0xff] %v10424_v6  ;;  %v10444_v35 = vmul.f32 %v10296_v19, %v13400_v8  ;;  %v13402_v6 = vld [vmem:[#allocation120_spill] sm:$0xff] }
 0x5ea   :  { %13393 = vst [vmem:[#allocation105_spill] sm:$0xff] %v10428_v41  ;;  %v10448_v7 = vmul.f32 %v10296_v19, %v13402_v6  ;;  %v13404_v41 = vld [vmem:[#allocation123_spill] sm:$0xff] }
 0x5eb   :  { %13395 = vst [vmem:[#allocation104_spill] sm:$0xff] %v10432_v30  ;;  %v10452_v60 = vmul.f32 %v10296_v19, %v13404_v41  ;;  %v13406_v30 = vld [vmem:[#allocation125_spill] sm:$0xff] }
 0x5ec   :  { %13397 = vst [vmem:[#allocation106_spill] sm:$0xff] %v10436_v57  ;;  %v10456_v27 = vmul.f32 %v10296_v19, %v13406_v30  ;;  %v13408_v57 = vld [vmem:[#allocation126_spill] sm:$0xff] }
 0x5ed   :  { %13399 = vst [vmem:[#allocation107_spill] sm:$0xff] %v10440_v39  ;;  %v10460_v28 = vmul.f32 %v10296_v19, %v13408_v57  ;;  %v13410_v39 = vld [vmem:[#allocation124_spill] sm:$0xff] }
 0x5ee   :  { %13401 = vst [vmem:[#allocation109_spill] sm:$0xff] %v10444_v35  ;;  %v10464_v8 = vmul.f32 %v10296_v19, %v13410_v39  ;;  %v13412_v35 = vld [vmem:[#allocation127_spill] sm:$0xff] }
 0x5ef   :  { %13403 = vst [vmem:[#allocation110_spill] sm:$0xff] %v10448_v7  ;;  %v10468_v6 = vmul.f32 %v10296_v19, %v13412_v35  ;;  %v13414_v7 = vld [vmem:[#allocation129_spill] sm:$0xff] }
 0x5f0   :  { %13405 = vst [vmem:[#allocation108_spill] sm:$0xff] %v10452_v60  ;;  %v10472_v41 = vmul.f32 %v10296_v19, %v13414_v7  ;;  %v13416_v60 = vld [vmem:[#allocation15_spill] sm:$0xff] }
 0x5f1   :  { %13407 = vst [vmem:[#allocation111_spill] sm:$0xff] %v10456_v27  ;;  %v10476_v30 = vmul.f32 %v10296_v19, %v13416_v60  ;;  %v13418_v27 = vld [vmem:[#allocation128_spill] sm:$0xff] }
 0x5f2   :  { %13409 = vst [vmem:[#allocation113_spill] sm:$0xff] %v10460_v28  ;;  %v10480_v57 = vmul.f32 %v10296_v19, %v13418_v27  ;;  %v13420_v28 = vld [vmem:[#allocation16_spill] sm:$0xff] }
 0x5f3   :  { %13411 = vst [vmem:[#allocation114_spill] sm:$0xff] %v10464_v8  ;;  %v10484_v39 = vmul.f32 %v10296_v19, %v13420_v28  ;;  %v13422_v8 = vld [vmem:[#allocation18_spill] sm:$0xff] }
 0x5f4   :  { %13413 = vst [vmem:[#allocation112_spill] sm:$0xff] %v10468_v6  ;;  %v10488_v35 = vmul.f32 %v10296_v19, %v13422_v8  ;;  %v13424_v6 = vld [vmem:[#allocation19_spill] sm:$0xff] }
 0x5f5   :  { %13415 = vst [vmem:[#allocation115_spill] sm:$0xff] %v10472_v41  ;;  %v10492_v7 = vmul.f32 %v10296_v19, %v13424_v6  ;;  %v13426_v41 = vld [vmem:[#allocation17_spill] sm:$0xff] }
 0x5f6   :  { %13417 = vst [vmem:[#allocation117_spill] sm:$0xff] %v10476_v30  ;;  %v10496_v60 = vmul.f32 %v10296_v19, %v13426_v41  ;;  %v13428_v30 = vld [vmem:[#allocation20_spill] sm:$0xff] }
 0x5f7   :  { %13419 = vst [vmem:[#allocation118_spill] sm:$0xff] %v10480_v57  ;;  %v10500_v27 = vmul.f32 %v10296_v19, %v13428_v30  ;;  %v13430_v57 = vld [vmem:[#allocation22_spill] sm:$0xff] }
 0x5f8   :  { %13421 = vst [vmem:[#allocation116_spill] sm:$0xff] %v10484_v39  ;;  %v10504_v28 = vmul.f32 %v10296_v19, %v13430_v57  ;;  %v13432_v39 = vld [vmem:[#allocation23_spill] sm:$0xff] }
 0x5f9   :  { %13423 = vst [vmem:[#allocation119_spill] sm:$0xff] %v10488_v35  ;;  %v10508_v8 = vmul.f32 %v10296_v19, %v13432_v39  ;;  %v13434_v35 = vld [vmem:[#allocation21_spill] sm:$0xff] }
 0x5fa   :  { %13425 = vst [vmem:[#allocation121_spill] sm:$0xff] %v10492_v7  ;;  %v10512_v6 = vmul.f32 %v10296_v19, %v13434_v35  ;;  %v13436_v7 = vld [vmem:[#allocation24_spill] sm:$0xff] }
 0x5fb   :  { %13427 = vst [vmem:[#allocation122_spill] sm:$0xff] %v10496_v60  ;;  %v10516_v41 = vmul.f32 %v10296_v19, %v13436_v7  ;;  %v13438_v60 = vld [vmem:[#allocation26_spill] sm:$0xff] }
 0x5fc   :  { %13429 = vst [vmem:[#allocation120_spill] sm:$0xff] %v10500_v27  ;;  %v10520_v30 = vmul.f32 %v10296_v19, %v13438_v60  ;;  %v13440_v27 = vld [vmem:[#allocation27_spill] sm:$0xff] }
 0x5fd   :  { %13431 = vst [vmem:[#allocation123_spill] sm:$0xff] %v10504_v28  ;;  %v10524_v57 = vmul.f32 %v10296_v19, %v13440_v27  ;;  %v13442_v28 = vld [vmem:[#allocation25_spill] sm:$0xff] }
 0x5fe   :  { %13433 = vst [vmem:[#allocation125_spill] sm:$0xff] %v10508_v8  ;;  %v10528_v39 = vmul.f32 %v10296_v19, %v13442_v28  ;;  %v13444_v8 = vld [vmem:[#allocation28_spill] sm:$0xff] }
 0x5ff   :  { %13435 = vst [vmem:[#allocation126_spill] sm:$0xff] %v10512_v6  ;;  %v10532_v35 = vmul.f32 %v10296_v19, %v13444_v8  ;;  %v13446_v6 = vld [vmem:[#allocation30_spill] sm:$0xff] }
 0x600   :  { %13437 = vst [vmem:[#allocation124_spill] sm:$0xff] %v10516_v41  ;;  %v10536_v7 = vmul.f32 %v10296_v19, %v13446_v6  ;;  %v13448_v41 = vld [vmem:[#allocation31_spill] sm:$0xff] }
 0x601   :  { %13439 = vst [vmem:[#allocation127_spill] sm:$0xff] %v10520_v30  ;;  %v10540_v60 = vmul.f32 %v10296_v19, %v13448_v41  ;;  %v13450_v30 = vld [vmem:[#allocation29_spill] sm:$0xff] }
 0x602   :  { %13441 = vst [vmem:[#allocation129_spill] sm:$0xff] %v10524_v57  ;;  %v10544_v27 = vmul.f32 %v10296_v19, %v13450_v30  ;;  %v13452_v57 = vld [vmem:[#allocation32_spill] sm:$0xff] }
 0x603   :  { %13443 = vst [vmem:[#allocation15_spill] sm:$0xff] %v10528_v39  ;;  %v10548_v28 = vmul.f32 %v10296_v19, %v13452_v57  ;;  %v13454_v39 = vld [vmem:[#allocation34_spill] sm:$0xff] }
 0x604   :  { %13445 = vst [vmem:[#allocation128_spill] sm:$0xff] %v10532_v35  ;;  %v10552_v8 = vmul.f32 %v10296_v19, %v13454_v39  ;;  %v13456_v35 = vld [vmem:[#allocation35_spill] sm:$0xff] }
 0x605   :  { %13447 = vst [vmem:[#allocation16_spill] sm:$0xff] %v10536_v7  ;;  %v10556_v6 = vmul.f32 %v10296_v19, %v13456_v35  ;;  %v13458_v7 = vld [vmem:[#allocation33_spill] sm:$0xff] }
 0x606   :  { %13449 = vst [vmem:[#allocation18_spill] sm:$0xff] %v10540_v60  ;;  %v10560_v41 = vmul.f32 %v10296_v19, %v13458_v7  ;;  %v13460_v60 = vld [vmem:[#allocation36_spill] sm:$0xff] }
 0x607   :  { %13451 = vst [vmem:[#allocation19_spill] sm:$0xff] %v10544_v27  ;;  %v10564_v30 = vmul.f32 %v10296_v19, %v13460_v60  ;;  %v13462_v27 = vld [vmem:[#allocation38_spill] sm:$0xff] }
 0x608   :  { %13453 = vst [vmem:[#allocation17_spill] sm:$0xff] %v10548_v28  ;;  %v10568_v57 = vmul.f32 %v10296_v19, %v13462_v27  ;;  %v13464_v28 = vld [vmem:[#allocation39_spill] sm:$0xff] }
 0x609   :  { %13455 = vst [vmem:[#allocation20_spill] sm:$0xff] %v10552_v8  ;;  %v10572_v39 = vmul.f32 %v10296_v19, %v13464_v28  ;;  %v13466_v8 = vld [vmem:[#allocation37_spill] sm:$0xff] }
 0x60a   :  { %13457 = vst [vmem:[#allocation22_spill] sm:$0xff] %v10556_v6  ;;  %v10576_v35 = vmul.f32 %v10296_v19, %v13466_v8  ;;  %v13468_v6 = vld [vmem:[#allocation40_spill] sm:$0xff] }
 0x60b   :  { %13459 = vst [vmem:[#allocation23_spill] sm:$0xff] %v10560_v41  ;;  %v10580_v7 = vmul.f32 %v10296_v19, %v13468_v6  ;;  %v13470_v41 = vld [vmem:[#allocation42_spill] sm:$0xff] }
 0x60c   :  { %13461 = vst [vmem:[#allocation21_spill] sm:$0xff] %v10564_v30  ;;  %v10584_v60 = vmul.f32 %v10296_v19, %v13470_v41  ;;  %v13472_v30 = vld [vmem:[#allocation43_spill] sm:$0xff] }
 0x60d   :  { %13463 = vst [vmem:[#allocation24_spill] sm:$0xff] %v10568_v57  ;;  %v10588_v27 = vmul.f32 %v10296_v19, %v13472_v30  ;;  %v13474_v57 = vld [vmem:[#allocation41_spill] sm:$0xff] }
 0x60e   :  { %13465 = vst [vmem:[#allocation26_spill] sm:$0xff] %v10572_v39  ;;  %v10592_v28 = vmul.f32 %v10296_v19, %v13474_v57  ;;  %v13476_v39 = vld [vmem:[#allocation44_spill] sm:$0xff] }
 0x60f   :  { %13467 = vst [vmem:[#allocation27_spill] sm:$0xff] %v10576_v35  ;;  %v10596_v8 = vmul.f32 %v10296_v19, %v13476_v39  ;;  %v13478_v35 = vld [vmem:[#allocation46_spill] sm:$0xff] }
 0x610   :  { %13469 = vst [vmem:[#allocation25_spill] sm:$0xff] %v10580_v7  ;;  %v10600_v6 = vmul.f32 %v10296_v19, %v13478_v35  ;;  %v13480_v7 = vld [vmem:[#allocation47_spill] sm:$0xff] }
 0x611   :  { %13471 = vst [vmem:[#allocation28_spill] sm:$0xff] %v10584_v60  ;;  %v10604_v41 = vmul.f32 %v10296_v19, %v13480_v7  ;;  %v13482_v60 = vld [vmem:[#allocation45_spill] sm:$0xff] }
 0x612   :  { %13473 = vst [vmem:[#allocation30_spill] sm:$0xff] %v10588_v27  ;;  %v10608_v30 = vmul.f32 %v10296_v19, %v13482_v60  ;;  %v13484_v27 = vld [vmem:[#allocation48_spill] sm:$0xff] }
 0x613   :  { %13475 = vst [vmem:[#allocation31_spill] sm:$0xff] %v10592_v28  ;;  %v10612_v57 = vmul.f32 %v10296_v19, %v13484_v27  ;;  %v13485_v28 = vld [vmem:[#allocation50_spill] sm:$0xff] }
 0x614   :  { %13477 = vst [vmem:[#allocation29_spill] sm:$0xff] %v10596_v8  ;;  %v10616_v39 = vmul.f32 %v10296_v19, %v13485_v28  ;;  %v13487_v8 = vld [vmem:[#allocation51_spill] sm:$0xff]  ;;  %v10636_v28 = vmul.f32 %v10296_v19, %v9944_v2 }
 0x615   :  { %13479 = vst [vmem:[#allocation32_spill] sm:$0xff] %v10600_v6  ;;  %v10620_v35 = vmul.f32 %v10296_v19, %v13487_v8  ;;  %v13489_v6 = vld [vmem:[#allocation49_spill] sm:$0xff] }
 0x616   :  { %13481 = vst [vmem:[#allocation34_spill] sm:$0xff] %v10604_v41  ;;  %v10624_v7 = vmul.f32 %v10296_v19, %v13489_v6  ;;  %v13491_v41 = vld [vmem:[#allocation52_spill] sm:$0xff] }
 0x617   :  { %13483 = vst [vmem:[#allocation35_spill] sm:$0xff] %v10608_v30  ;;  %v10628_v60 = vmul.f32 %v10296_v19, %v13491_v41  ;;  %v13493_v30 = vld [vmem:[#allocation54_spill] sm:$0xff] }
 0x618   :  { %13486 = vst [vmem:[#allocation33_spill] sm:$0xff] %v10616_v39  ;;  %v10632_v27 = vmul.f32 %v10296_v19, %v13493_v30  ;;  %v13496_v39 = vld [vmem:[#allocation55_spill] sm:$0xff] }
 0x619   :  { %13488 = vst [vmem:[#allocation36_spill] sm:$0xff] %v10620_v35  ;;  %v10640_v8 = vmul.f32 %v10296_v19, %v13496_v39  ;;  %v13498_v35 = vld [vmem:[#allocation53_spill] sm:$0xff] }
 0x61a   :  { %13490 = vst [vmem:[#allocation38_spill] sm:$0xff] %v10624_v7  ;;  %v10644_v6 = vmul.f32 %v10296_v19, %v13498_v35  ;;  %v13500_v7 = vld [vmem:[#allocation56_spill] sm:$0xff] }
 0x61b   :  { %13492 = vst [vmem:[#allocation39_spill] sm:$0xff] %v10628_v60  ;;  %v10648_v41 = vmul.f32 %v10296_v19, %v13500_v7  ;;  %v13502_v60 = vld [vmem:[#allocation58_spill] sm:$0xff] }
 0x61c   :  { %13494 = vst [vmem:[#allocation37_spill] sm:$0xff] %v10632_v27  ;;  %v10652_v30 = vmul.f32 %v10296_v19, %v13502_v60  ;;  %v13504_v27 = vld [vmem:[#allocation59_spill] sm:$0xff] }
 0x61d   :  { %13495 = vst [vmem:[#allocation40_spill] sm:$0xff] %v10636_v28  ;;  %v10656_v2 = vmul.f32 %v10296_v19, %v13504_v27  ;;  %v13506_v28 = vld [vmem:[#allocation57_spill] sm:$0xff] }
 0x61e   :  { %13497 = vst [vmem:[#allocation42_spill] sm:$0xff] %v10640_v8  ;;  %v10660_v39 = vmul.f32 %v10296_v19, %v13506_v28  ;;  %v13508_v8 = vld [vmem:[#allocation60_spill] sm:$0xff] }
 0x61f   :  { %13499 = vst [vmem:[#allocation43_spill] sm:$0xff] %v10644_v6  ;;  %v10664_v35 = vmul.f32 %v10296_v19, %v13508_v8  ;;  %v13510_v6 = vld [vmem:[#allocation62_spill] sm:$0xff] }
 0x620   :  { %13501 = vst [vmem:[#allocation41_spill] sm:$0xff] %v10648_v41  ;;  %v10668_v7 = vmul.f32 %v10296_v19, %v13510_v6  ;;  %v13512_v41 = vld [vmem:[#allocation63_spill] sm:$0xff] }
 0x621   :  { %13503 = vst [vmem:[#allocation44_spill] sm:$0xff] %v10652_v30  ;;  %v10672_v60 = vmul.f32 %v10296_v19, %v13512_v41  ;;  %v13514_v30 = vld [vmem:[#allocation61_spill] sm:$0xff] }
 0x622   :  { %13505 = vst [vmem:[#allocation46_spill] sm:$0xff] %v10656_v2  ;;  %v10676_v27 = vmul.f32 %v10296_v19, %v13514_v30  ;;  %v13516_v2 = vld [vmem:[#allocation64_spill] sm:$0xff] }
 0x623   :  { %13507 = vst [vmem:[#allocation47_spill] sm:$0xff] %v10660_v39  ;;  %v10680_v28 = vmul.f32 %v10296_v19, %v13516_v2  ;;  %v13518_v39 = vld [vmem:[#allocation66_spill] sm:$0xff] }
 0x624   :  { %13509 = vst [vmem:[#allocation45_spill] sm:$0xff] %v10664_v35  ;;  %v10684_v8 = vmul.f32 %v10296_v19, %v13518_v39  ;;  %v13520_v35 = vld [vmem:[#allocation67_spill] sm:$0xff] }
 0x625   :  { %13511 = vst [vmem:[#allocation48_spill] sm:$0xff] %v10668_v7  ;;  %v10688_v6 = vmul.f32 %v10296_v19, %v13520_v35  ;;  %v13522_v7 = vld [vmem:[#allocation65_spill] sm:$0xff] }
 0x626   :  { %13513 = vst [vmem:[#allocation50_spill] sm:$0xff] %v10672_v60  ;;  %v10692_v41 = vmul.f32 %v10296_v19, %v13522_v7  ;;  %v13524_v60 = vld [vmem:[#allocation68_spill] sm:$0xff] }
 0x627   :  { %13515 = vst [vmem:[#allocation51_spill] sm:$0xff] %v10676_v27  ;;  %v10696_v30 = vmul.f32 %v10296_v19, %v13524_v60  ;;  %v13526_v27 = vld [vmem:[#allocation70_spill] sm:$0xff] }
 0x628   :  { %13517 = vst [vmem:[#allocation49_spill] sm:$0xff] %v10680_v28  ;;  %v10700_v2 = vmul.f32 %v10296_v19, %v13526_v27  ;;  %v13528_v28 = vld [vmem:[#allocation69_spill] sm:$0xff] }
 0x629   :  { %13519 = vst [vmem:[#allocation52_spill] sm:$0xff] %v10684_v8  ;;  %v10704_v39 = vmul.f32 %v10296_v19, %v13528_v28  ;;  %v13529_v8 = vld [vmem:[#allocation71_spill] sm:$0xff] }
 0x62a   :  { %13521 = vst [vmem:[#allocation54_spill] sm:$0xff] %v10688_v6  ;;  %v10708_v35 = vmul.f32 %v10296_v19, %v13529_v8  ;;  %v13530_v6 = vld [vmem:[#allocation73_spill] sm:$0xff]  ;;  %v10728_v8 = vmul.f32 %v10296_v19, %v10059_v16 }
 0x62b   :  { %13523 = vst [vmem:[#allocation55_spill] sm:$0xff] %v10692_v41  ;;  %v10712_v7 = vmul.f32 %v10296_v19, %v13530_v6  ;;  %v13532_v41 = vld [vmem:[#allocation74_spill] sm:$0xff]  ;;  %v10732_v6 = vmul.f32 %v10296_v19, %v10064_v62 }
 0x62c   :  { %13525 = vst [vmem:[#allocation53_spill] sm:$0xff] %v10696_v30  ;;  %v10716_v60 = vmul.f32 %v10296_v19, %v13532_v41  ;;  %v13534_v30 = vld [vmem:[#allocation72_spill] sm:$0xff] }
 0x62d   :  { %13527 = vst [vmem:[#allocation56_spill] sm:$0xff] %v10700_v2  ;;  %v10720_v27 = vmul.f32 %v10296_v19, %v13534_v30  ;;  %v13535_v2 = vld [vmem:[#allocation75_spill] sm:$0xff] }
 0x62e   :  { %13531 = vst [vmem:[#allocation58_spill] sm:$0xff] %v10712_v7  ;;  %v10724_v28 = vmul.f32 %v10296_v19, %v13535_v2  ;;  %v13539_v7 = vld [vmem:[#allocation77_spill] sm:$0xff]  ;;  %v10744_v2 = vmul.f32 %v10296_v19, %v10079_v0  ;;  %v10764_v0 = vmul.f32 %v10296_v19, %v10104_v47  ;;  %v10784_v47 = vmul.f32 %v10296_v19, %v10129_v45 }
 0x62f   :  { %13533 = vst [vmem:[#allocation59_spill] sm:$0xff] %v10716_v60  ;;  %v10736_v41 = vmul.f32 %v10296_v19, %v13539_v7  ;;  %v13540_v60 = vld [vmem:[#allocation78_spill] sm:$0xff]  ;;  %v10756_v7 = vmul.f32 %v10296_v19, %v10094_v54  ;;  %v10776_v54 = vmul.f32 %v10296_v19, %v10119_v20 }
 0x630   :  { %13536 = vst [vmem:[#allocation57_spill] sm:$0xff] %v10724_v28  ;;  %v10740_v30 = vmul.f32 %v10296_v19, %v13540_v60  ;;  %v13541_v28 = vld [vmem:[#allocation76_spill] sm:$0xff]  ;;  %v10760_v60 = vmul.f32 %v10296_v19, %v10099_v29  ;;  %v10780_v29 = vmul.f32 %v10296_v19, %v10124_v58 }
 0x631   :  { %13537 = vst [vmem:[#allocation60_spill] sm:$0xff] %v10728_v8  ;;  %v10748_v16 = vmul.f32 %v10296_v19, %v13541_v28  ;;  %v13543_v8 = vld [vmem:[#allocation79_spill] sm:$0xff]  ;;  %v10768_v28 = vmul.f32 %v10296_v19, %v10109_v12  ;;  %v10788_v12 = vmul.f32 %v10296_v19, %v10134_v17 }
 0x632   :  { %13538 = vst [vmem:[#allocation62_spill] sm:$0xff] %v10732_v6  ;;  %v10752_v62 = vmul.f32 %v10296_v19, %v13543_v8  ;;  %v10772_v8 = vmul.f32 %v10296_v19, %v10114_v23  ;;  %v10792_v23 = vmul.f32 %v10296_v19, %v10139_v40  ;;  %v13551_v6 = vld [vmem:[#allocation83_spill] sm:$0xff]  ;;  %v10812_v40 = vmul.f32 %v10296_v19, %v10164_v53 }
 0x633   :  { %13542 = vst [vmem:[#allocation63_spill] sm:$0xff] %v10748_v16  ;;  %v13549_v16 = vld [vmem:[#allocation82_spill] sm:$0xff]  ;;  %v10808_v17 = vmul.f32 %v10296_v19, %v13551_v6  ;;  %v10828_v6 = vmul.f32 %v10296_v19, %v10184_v15  ;;  %v10832_v53 = vmul.f32 %v10296_v19, %v10189_v56  ;;  %v10848_v15 = vmul.f32 %v10296_v19, %v10209_v5 }
 0x634   :  { %13544 = vst [vmem:[#allocation61_spill] sm:$0xff] %v10764_v0  ;;  %v13547_v0 = vld [vmem:[#allocation81_spill] sm:$0xff]  ;;  %v10800_v58 = vmul.f32 %v10296_v19, %v13549_v16  ;;  %v10820_v16 = vmul.f32 %v10296_v19, %v10174_v3  ;;  %v10840_v3 = vmul.f32 %v10296_v19, %v10199_v36  ;;  %v10852_v56 = vmul.f32 %v10296_v19, %v10214_v55 }
 0x635   :  { %13545 = vst [vmem:[#allocation64_spill] sm:$0xff] %v10780_v29  ;;  %v10796_v20 = vmul.f32 %v10296_v19, %v13547_v0  ;;  %v13550_v29 = vld [vmem:[#allocation80_spill] sm:$0xff]  ;;  %v10860_v36 = vmul.f32 %v10296_v19, %v10224_v50  ;;  %v10868_v5 = vmul.f32 %v10296_v19, %v10234_v26  ;;  %v10872_v55 = vmul.f32 %v10296_v19, %v10239_v42 }
 0x636   :  { %13546 = vst [vmem:[#allocation66_spill] sm:$0xff] %v10792_v23  ;;  %v10804_v45 = vmul.f32 %v10296_v19, %v13550_v29  ;;  %v13553_v23 = vld [vmem:[#allocation85_spill] sm:$0xff]  ;;  %v10824_v29 = vmul.f32 %v10296_v19, %v10179_v38  ;;  %v10844_v38 = vmul.f32 %v10296_v19, %v10204_v24  ;;  %v10864_v24 = vmul.f32 %v10296_v19, %v10229_v21 }
 0x637   :  { %13548 = vst [vmem:[#allocation67_spill] sm:$0xff] %v10796_v20  ;;  %v10816_v0 = vmul.f32 %v10296_v19, %v13553_v23  ;;  %v10836_v23 = vmul.f32 %v10296_v19, %v10194_v46  ;;  %v10856_v46 = vmul.f32 %v10296_v19, %v10219_v25  ;;  %v10876_v25 = vmul.f32 %v10296_v19, %v10244_v32 }
 0x638   :  { %13552 = vst [vmem:[#allocation65_spill] sm:$0xff] %v10812_v40  ;;  %v10880_v50 = vmul.f32 %v10296_v19, %v10288_v34  ;;  %v10884_v21 = vmul.f32 %v10296_v19, %v10249_v22  ;;  %v10896_v32 = vmul.f32 %v10296_v19, %v10266_v44  ;;  %v10900_v34 = vmul.f32 %v10296_v19, %v10271_v43 }
 0x639   :  { %13554 = vst [vmem:[#allocation68_spill] sm:$0xff] %v10828_v6  ;;  %v10904_v22 = vmul.f32 %v10296_v19, %v10274_v63  ;;  %v10918_v44 = vmul.f32 %v10296_v19, %v10283_v18  ;;  %v10922_v43 = vmul.f32 %v10296_v19, %v10286_v10  ;;  %v10926_v63 = vmul.f32 %v10296_v19, %v10291_v14 }
 0x63a   :  { %13555 = vst [vmem:[#allocation70_spill] sm:$0xff] %v10844_v38  ;;  %v13567_v38 = vld [vmem:[#allocation84_spill] sm:$0xff]  ;;  %v10938_v18 = vrot.slane %v10320_v31, 6  ;;  %v10944_v10 = vrot.slane %v10328_v48, 2  ;;  %v10947_v14 = vrot.slane %v10336_v9, 6  ;;  %v10962_v31 = vrot.slane %v10360_v61, 2 }
 0x63b   :  { %13556 = vst [vmem:[#allocation69_spill] sm:$0xff] %v10852_v56  ;;  %v10892_v42 = vmul.f32 %v10296_v19, %v13567_v38  ;;  %v10912_v38 = vmul.f32 %v10296_v19, %v10280_v4  ;;  %v10932_v4 = vrot.slane %v10308_v11, 4  ;;  %v10956_v11 = vrot.slane %v10352_v51, 6  ;;  %v13591_v9 = vld [vmem:[#allocation90_spill] sm:$0xff]  ;;  %v13597_v51 = vld [vmem:[#allocation93_spill] sm:$0xff]  ;;  %v13601_v61 = vld [vmem:[#allocation96_spill] sm:$0xff] }
 0x63c   :  { %13557 = vst [vmem:[#allocation71_spill] sm:$0xff] %v10856_v46 }
 0x63d   :  { %13558 = vst [vmem:[#allocation73_spill] sm:$0xff] %v10860_v36  ;;  %v13565_v36 = vld [vmem:[#allocation130_spill] sm:$0xff] }
 0x63e   :  { %13559 = vst [vmem:[#allocation74_spill] sm:$0xff] %v10864_v24  ;;  %v10888_v26 = vmul.f32 %v10296_v19, %v13565_v36  ;;  %v10908_v36 = vmul.f32 %v10296_v19, %v10277_v52  ;;  %v10929_v52 = vrot.slane %v10304_v13, 6  ;;  %v10950_v19 = vrot.slane %v10340_v1, 4  ;;  %v13593_v1 = vld [vmem:[#allocation92_spill] sm:$0xff] }
 0x63f   :  { %13560 = vst [vmem:[#allocation72_spill] sm:$0xff] %v10868_v5  ;;  %v10953_v13 = vrot.slane %v10344_v49, 2  ;;  %v13595_v49 = vld [vmem:[#allocation94_spill] sm:$0xff] }
 0x640   :  { %13561 = vst [vmem:[#allocation75_spill] sm:$0xff] %v10872_v55 }
 0x641   :  { %13562 = vst [vmem:[#allocation77_spill] sm:$0xff] %v10876_v25  ;;  %v10971_v25 = vrot.slane %v13593_v1, 2  ;;  %v13607_v1 = vld [vmem:[#allocation102_spill] sm:$0xff] }
 0x642   :  { %13563 = vst [vmem:[#allocation78_spill] sm:$0xff] %v10880_v50  ;;  %v10992_v40 = vrot.slane %v13607_v1, 6  ;;  %v13621_v1 = vld [vmem:[#allocation108_spill] sm:$0xff] }
 0x643   :  { %13564 = vst [vmem:[#allocation76_spill] sm:$0xff] %v10884_v21  ;;  %v11013_v5 = vrot.slane %v13621_v1, 4  ;;  %v13635_v1 = vld [vmem:[#allocation119_spill] sm:$0xff] }
 0x644   :  { %13566 = vst [vmem:[#allocation79_spill] sm:$0xff] %v10888_v26 }
 0x645   :  { %13568 = vst [vmem:[#allocation81_spill] sm:$0xff] %v10892_v42 }
 0x646   :  { %13569 = vst [vmem:[#allocation82_spill] sm:$0xff] %v10896_v32  ;;  %v10968_v32 = vrot.slane %v13591_v9, 4  ;;  %v13605_v9 = vld [vmem:[#allocation99_spill] sm:$0xff] }
 0x647   :  { %13570 = vst [vmem:[#allocation80_spill] sm:$0xff] %v10900_v34  ;;  %v10989_v6 = vrot.slane %v13605_v9, 2  ;;  %v13619_v9 = vld [vmem:[#allocation110_spill] sm:$0xff] }
 0x648   :  { %13571 = vst [vmem:[#allocation83_spill] sm:$0xff] %v10904_v22  ;;  %v11010_v55 = vrot.slane %v13619_v9, 6  ;;  %v13633_v9 = vld [vmem:[#allocation116_spill] sm:$0xff] }
 0x649   :  { %13572 = vst [vmem:[#allocation85_spill] sm:$0xff] %v10908_v36  ;;  %v10983_v36 = vrot.slane %v13601_v61, 6  ;;  %v13615_v61 = vld [vmem:[#allocation106_spill] sm:$0xff] }
 0x64a   :  { %13573 = vst [vmem:[#allocation130_spill] sm:$0xff] %v10912_v38  ;;  %v10941_v38 = vrot.slane %v10324_v37, 4  ;;  %v13589_v37 = vld [vmem:[#allocation89_spill] sm:$0xff]  ;;  %v11004_v26 = vrot.slane %v13615_v61, 4  ;;  %v13629_v61 = vld [vmem:[#allocation115_spill] sm:$0xff] }
 0x64b   :  { %6420 = vst.msk [vmem:[#allocation10 + $0x138] sm:$0x3] %vm6419_vm4, %v10880_v50  ;;  %v10935_v50 = vrot.slane %v10312_v59, 2  ;;  %v10959_v59 = vrot.slane %v10356_v33, 4  ;;  %v10965_v48 = vrot.slane %v13589_v37, 6  ;;  %v13599_v33 = vld [vmem:[#allocation95_spill] sm:$0xff] }
 0x64c   :  { %13574 = vst [vmem:[#allocation84_spill] sm:$0xff] %v10918_v44  ;;  %v10980_v44 = vrot.slane %v13599_v33, 2  ;;  %v13603_v37 = vld [vmem:[#allocation98_spill] sm:$0xff]  ;;  %v13613_v33 = vld [vmem:[#allocation104_spill] sm:$0xff] }
 0x64d   :  { %13575 = vst [vmem:[#allocation133_spill] sm:$0xff] %v10922_v43  ;;  %v10977_v43 = vrot.slane %v13597_v51, 4  ;;  %v10986_v22 = vrot.slane %v13603_v37, 4  ;;  %v13611_v51 = vld [vmem:[#allocation103_spill] sm:$0xff]  ;;  %v11001_v42 = vrot.slane %v13613_v33, 6  ;;  %v13627_v33 = vld [vmem:[#allocation112_spill] sm:$0xff] }
 0x64e   :  { %13576 = vst [vmem:[#allocation134_spill] sm:$0xff] %v10926_v63  ;;  %v10974_v63 = vrot.slane %v13595_v49, 6  ;;  %v13609_v49 = vld [vmem:[#allocation100_spill] sm:$0xff]  ;;  %v10998_v34 = vrot.slane %v13611_v51, 2  ;;  %v13617_v37 = vld [vmem:[#allocation107_spill] sm:$0xff]  ;;  %v13625_v51 = vld [vmem:[#allocation114_spill] sm:$0xff] }
 0x64f   :  { %13577 = vst [vmem:[#allocation135_spill] sm:$0xff] %v10929_v52  ;;  %v10995_v20 = vrot.slane %v13609_v49, 4  ;;  %v11007_v21 = vrot.slane %v13617_v37, 2  ;;  %v13623_v49 = vld [vmem:[#allocation111_spill] sm:$0xff]  ;;  %v11019_v46 = vrot.slane %v13625_v51, 6  ;;  %v11022_v56 = vrot.slane %v13627_v33, 4 }
 0x650   :  { %13578 = vst [vmem:[#allocation136_spill] sm:$0xff] %v10932_v4  ;;  %v11016_v24 = vrot.slane %v13623_v49, 2  ;;  %v13631_v37 = vld [vmem:[#allocation118_spill] sm:$0xff]  ;;  %v13639_v51 = vld [vmem:[#allocation120_spill] sm:$0xff]  ;;  %v13641_v33 = vld [vmem:[#allocation123_spill] sm:$0xff] }
 0x651   :  { %13579 = vst [vmem:[#allocation137_spill] sm:$0xff] %v10935_v50  ;;  %v13637_v49 = vld [vmem:[#allocation122_spill] sm:$0xff] }
 0x652   :  { %13580 = vst [vmem:[#allocation138_spill] sm:$0xff] %v10938_v18 }
 0x653   :  { %13581 = vst [vmem:[#allocation139_spill] sm:$0xff] %v10941_v38 }
 0x654   :  { %13582 = vst [vmem:[#allocation140_spill] sm:$0xff] %v10944_v10 }
 0x655   :  { %13583 = vst [vmem:[#allocation141_spill] sm:$0xff] %v10947_v14 }
 0x656   :  { %13584 = vst [vmem:[#allocation142_spill] sm:$0xff] %v10950_v19 }
 0x657   :  { %13585 = vst [vmem:[#allocation143_spill] sm:$0xff] %v10953_v13 }
 0x658   :  { %13586 = vst [vmem:[#allocation144_spill] sm:$0xff] %v10956_v11 }
 0x659   :  { %13587 = vst [vmem:[#allocation145_spill] sm:$0xff] %v10959_v59 }
 0x65a   :  { %13588 = vst [vmem:[#allocation146_spill] sm:$0xff] %v10962_v31 }
 0x65b   :  { %13590 = vst [vmem:[#allocation89_spill] sm:$0xff] %v10965_v48 }
 0x65c   :  { %13592 = vst [vmem:[#allocation90_spill] sm:$0xff] %v10968_v32 }
 0x65d   :  { %13594 = vst [vmem:[#allocation92_spill] sm:$0xff] %v10971_v25 }
 0x65e   :  { %13596 = vst [vmem:[#allocation94_spill] sm:$0xff] %v10974_v63 }
 0x65f   :  { %13598 = vst [vmem:[#allocation93_spill] sm:$0xff] %v10977_v43 }
 0x660   :  { %13600 = vst [vmem:[#allocation95_spill] sm:$0xff] %v10980_v44 }
 0x661   :  { %13602 = vst [vmem:[#allocation96_spill] sm:$0xff] %v10983_v36 }
 0x662   :  { %13604 = vst [vmem:[#allocation98_spill] sm:$0xff] %v10986_v22 }
 0x663   :  { %13606 = vst [vmem:[#allocation99_spill] sm:$0xff] %v10989_v6 }
 0x664   :  { %13608 = vst [vmem:[#allocation102_spill] sm:$0xff] %v10992_v40 }
 0x665   :  { %13610 = vst [vmem:[#allocation100_spill] sm:$0xff] %v10995_v20 }
 0x666   :  { %13612 = vst [vmem:[#allocation103_spill] sm:$0xff] %v10998_v34 }
 0x667   :  { %13614 = vst [vmem:[#allocation104_spill] sm:$0xff] %v11001_v42 }
 0x668   :  { %13616 = vst [vmem:[#allocation106_spill] sm:$0xff] %v11004_v26  ;;  %v11025_v26 = vrot.slane %v13629_v61, 2  ;;  %v13643_v61 = vld [vmem:[#allocation126_spill] sm:$0xff] }
 0x669   :  { %13618 = vst [vmem:[#allocation107_spill] sm:$0xff] %v11007_v21  ;;  %v11028_v21 = vrot.slane %v13631_v37, 6  ;;  %v13645_v37 = vld [vmem:[#allocation124_spill] sm:$0xff] }
 0x66a   :  { %13620 = vst [vmem:[#allocation110_spill] sm:$0xff] %v11010_v55  ;;  %v11031_v55 = vrot.slane %v13633_v9, 4  ;;  %v13647_v9 = vld [vmem:[#allocation127_spill] sm:$0xff] }
 0x66b   :  { %13622 = vst [vmem:[#allocation108_spill] sm:$0xff] %v11013_v5  ;;  %v11034_v5 = vrot.slane %v13635_v1, 2  ;;  %v13649_v1 = vld [vmem:[#allocation15_spill] sm:$0xff] }
 0x66c   :  { %13624 = vst [vmem:[#allocation111_spill] sm:$0xff] %v11016_v24  ;;  %v11037_v24 = vrot.slane %v13637_v49, 6  ;;  %v13651_v49 = vld [vmem:[#allocation128_spill] sm:$0xff] }
 0x66d   :  { %13626 = vst [vmem:[#allocation114_spill] sm:$0xff] %v11019_v46  ;;  %v11040_v46 = vrot.slane %v13639_v51, 4  ;;  %v13653_v51 = vld [vmem:[#allocation16_spill] sm:$0xff] }
 0x66e   :  { %13628 = vst [vmem:[#allocation112_spill] sm:$0xff] %v11022_v56  ;;  %v11043_v56 = vrot.slane %v13641_v33, 2  ;;  %v13655_v33 = vld [vmem:[#allocation19_spill] sm:$0xff] }
 0x66f   :  { %13630 = vst [vmem:[#allocation115_spill] sm:$0xff] %v11025_v26  ;;  %v11046_v26 = vrot.slane %v13643_v61, 6  ;;  %v13657_v61 = vld [vmem:[#allocation17_spill] sm:$0xff] }
 0x670   :  { %13632 = vst [vmem:[#allocation118_spill] sm:$0xff] %v11028_v21  ;;  %v11049_v21 = vrot.slane %v13645_v37, 4  ;;  %v13659_v37 = vld [vmem:[#allocation20_spill] sm:$0xff] }
 0x671   :  { %13634 = vst [vmem:[#allocation116_spill] sm:$0xff] %v11031_v55  ;;  %v11052_v55 = vrot.slane %v13647_v9, 2  ;;  %v13661_v9 = vld [vmem:[#allocation23_spill] sm:$0xff] }
 0x672   :  { %13636 = vst [vmem:[#allocation119_spill] sm:$0xff] %v11034_v5  ;;  %v11055_v5 = vrot.slane %v13649_v1, 6  ;;  %v13663_v1 = vld [vmem:[#allocation21_spill] sm:$0xff] }
 0x673   :  { %13638 = vst [vmem:[#allocation122_spill] sm:$0xff] %v11037_v24  ;;  %v11058_v24 = vrot.slane %v13651_v49, 4  ;;  %v13665_v49 = vld [vmem:[#allocation24_spill] sm:$0xff] }
 0x674   :  { %13640 = vst [vmem:[#allocation120_spill] sm:$0xff] %v11040_v46  ;;  %v11061_v46 = vrot.slane %v13653_v51, 2  ;;  %v13667_v51 = vld [vmem:[#allocation27_spill] sm:$0xff] }
 0x675   :  { %13642 = vst [vmem:[#allocation123_spill] sm:$0xff] %v11043_v56  ;;  %v11064_v56 = vrot.slane %v13655_v33, 6  ;;  %v13669_v33 = vld [vmem:[#allocation25_spill] sm:$0xff] }
 0x676   :  { %13644 = vst [vmem:[#allocation126_spill] sm:$0xff] %v11046_v26  ;;  %v11067_v26 = vrot.slane %v13657_v61, 4  ;;  %v13671_v61 = vld [vmem:[#allocation28_spill] sm:$0xff] }
 0x677   :  { %13646 = vst [vmem:[#allocation124_spill] sm:$0xff] %v11049_v21  ;;  %v11070_v21 = vrot.slane %v13659_v37, 2  ;;  %v13673_v37 = vld [vmem:[#allocation31_spill] sm:$0xff] }
 0x678   :  { %13648 = vst [vmem:[#allocation127_spill] sm:$0xff] %v11052_v55  ;;  %v11073_v55 = vrot.slane %v13661_v9, 6  ;;  %v13675_v9 = vld [vmem:[#allocation29_spill] sm:$0xff] }
 0x679   :  { %13650 = vst [vmem:[#allocation15_spill] sm:$0xff] %v11055_v5  ;;  %v11076_v5 = vrot.slane %v13663_v1, 4  ;;  %v13677_v1 = vld [vmem:[#allocation32_spill] sm:$0xff] }
 0x67a   :  { %13652 = vst [vmem:[#allocation128_spill] sm:$0xff] %v11058_v24  ;;  %v11079_v24 = vrot.slane %v13665_v49, 2  ;;  %v13679_v49 = vld [vmem:[#allocation35_spill] sm:$0xff] }
 0x67b   :  { %13654 = vst [vmem:[#allocation16_spill] sm:$0xff] %v11061_v46  ;;  %v11082_v46 = vrot.slane %v13667_v51, 6  ;;  %v11103_v51 = vrot.slane %v10612_v57, 4  ;;  %v13694_v57 = vld [vmem:[#allocation41_spill] sm:$0xff] }
 0x67c   :  { %13656 = vst [vmem:[#allocation19_spill] sm:$0xff] %v11064_v56  ;;  %v11085_v56 = vrot.slane %v13669_v33, 4  ;;  %v13682_v33 = vld [vmem:[#allocation33_spill] sm:$0xff] }
 0x67d   :  { %13658 = vst [vmem:[#allocation17_spill] sm:$0xff] %v11067_v26  ;;  %v11088_v26 = vrot.slane %v13671_v61, 2  ;;  %v13684_v61 = vld [vmem:[#allocation38_spill] sm:$0xff] }
 0x67e   :  { %13660 = vst [vmem:[#allocation20_spill] sm:$0xff] %v11070_v21  ;;  %v11091_v21 = vrot.slane %v13673_v37, 6  ;;  %v13686_v37 = vld [vmem:[#allocation39_spill] sm:$0xff] }
 0x67f   :  { %13662 = vst [vmem:[#allocation23_spill] sm:$0xff] %v11073_v55  ;;  %v11094_v55 = vrot.slane %v13675_v9, 4  ;;  %v13688_v9 = vld [vmem:[#allocation37_spill] sm:$0xff] }
 0x680   :  { %13664 = vst [vmem:[#allocation21_spill] sm:$0xff] %v11076_v5  ;;  %v11097_v5 = vrot.slane %v13677_v1, 2  ;;  %v13690_v1 = vld [vmem:[#allocation42_spill] sm:$0xff] }
 0x681   :  { %13666 = vst [vmem:[#allocation24_spill] sm:$0xff] %v11079_v24  ;;  %v11100_v24 = vrot.slane %v13679_v49, 6  ;;  %v13692_v49 = vld [vmem:[#allocation43_spill] sm:$0xff] }
 0x682   :  { %13668 = vst [vmem:[#allocation27_spill] sm:$0xff] %v11082_v46 }
 0x683   :  { %13670 = vst [vmem:[#allocation25_spill] sm:$0xff] %v11085_v56  ;;  %v11106_v56 = vrot.slane %v13682_v33, 2  ;;  %v13696_v33 = vld [vmem:[#allocation46_spill] sm:$0xff] }
 0x684   :  { %13672 = vst [vmem:[#allocation28_spill] sm:$0xff] %v11088_v26  ;;  %v11109_v26 = vrot.slane %v13684_v61, 6  ;;  %v13698_v61 = vld [vmem:[#allocation47_spill] sm:$0xff] }
 0x685   :  { %13674 = vst [vmem:[#allocation31_spill] sm:$0xff] %v11091_v21  ;;  %v11112_v21 = vrot.slane %v13686_v37, 4  ;;  %v13700_v37 = vld [vmem:[#allocation45_spill] sm:$0xff] }
 0x686   :  { %13676 = vst [vmem:[#allocation29_spill] sm:$0xff] %v11094_v55  ;;  %v11115_v55 = vrot.slane %v13688_v9, 2  ;;  %v13702_v9 = vld [vmem:[#allocation50_spill] sm:$0xff] }
 0x687   :  { %13678 = vst [vmem:[#allocation32_spill] sm:$0xff] %v11097_v5  ;;  %v11118_v5 = vrot.slane %v13690_v1, 6  ;;  %v13704_v1 = vld [vmem:[#allocation51_spill] sm:$0xff] }
 0x688   :  { %13680 = vst [vmem:[#allocation35_spill] sm:$0xff] %v11100_v24  ;;  %v11121_v24 = vrot.slane %v13692_v49, 4  ;;  %v13706_v49 = vld [vmem:[#allocation49_spill] sm:$0xff] }
 0x689   :  { %13681 = vst [vmem:[#allocation147_spill] sm:$0xff] %v11103_v51  ;;  %v11124_v51 = vrot.slane %v13694_v57, 2  ;;  %v13708_v57 = vld [vmem:[#allocation54_spill] sm:$0xff] }
 0x68a   :  { %13683 = vst [vmem:[#allocation33_spill] sm:$0xff] %v11106_v56  ;;  %v11127_v56 = vrot.slane %v13696_v33, 6  ;;  %v13710_v33 = vld [vmem:[#allocation55_spill] sm:$0xff] }
 0x68b   :  { %13685 = vst [vmem:[#allocation38_spill] sm:$0xff] %v11109_v26  ;;  %v11130_v26 = vrot.slane %v13698_v61, 4  ;;  %v13712_v61 = vld [vmem:[#allocation53_spill] sm:$0xff] }
 0x68c   :  { %13687 = vst [vmem:[#allocation39_spill] sm:$0xff] %v11112_v21  ;;  %v11133_v21 = vrot.slane %v13700_v37, 2  ;;  %v11154_v37 = vrot.slane %v10704_v39, 6  ;;  %v11175_v39 = vrot.slane %v10740_v30, 4  ;;  %v11196_v30 = vrot.slane %v10776_v54, 2 }
 0x68d   :  { %13689 = vst [vmem:[#allocation37_spill] sm:$0xff] %v11115_v55  ;;  %v11136_v55 = vrot.slane %v13702_v9, 6  ;;  %v11157_v9 = vrot.slane %v10708_v35, 4  ;;  %v11178_v35 = vrot.slane %v10744_v2, 2  ;;  %v11199_v2 = vrot.slane %v10784_v47, 6 }
 0x68e   :  { %13691 = vst [vmem:[#allocation42_spill] sm:$0xff] %v11118_v5  ;;  %v11139_v5 = vrot.slane %v13704_v1, 4  ;;  %v13716_v1 = vld [vmem:[#allocation58_spill] sm:$0xff]  ;;  %v11217_v54 = vrot.slane %v10816_v0, 6  ;;  %v11220_v47 = vrot.slane %v10820_v16, 4 }
 0x68f   :  { %13693 = vst [vmem:[#allocation43_spill] sm:$0xff] %v11121_v24  ;;  %v11142_v24 = vrot.slane %v13706_v49, 2  ;;  %v11163_v49 = vrot.slane %v10720_v27, 6  ;;  %v11184_v27 = vrot.slane %v10756_v7, 4  ;;  %v13734_v7 = vld [vmem:[#allocation66_spill] sm:$0xff] }
 0x690   :  { %13695 = vst [vmem:[#allocation41_spill] sm:$0xff] %v11124_v51  ;;  %v11145_v51 = vrot.slane %v13708_v57, 6  ;;  %v13719_v57 = vld [vmem:[#allocation57_spill] sm:$0xff]  ;;  %v13746_v0 = vld [vmem:[#allocation86_spill] sm:$0xff] }
 0x691   :  { %13697 = vst [vmem:[#allocation46_spill] sm:$0xff] %v11127_v56  ;;  %v11148_v56 = vrot.slane %v13710_v33, 4  ;;  %v13721_v33 = vld [vmem:[#allocation60_spill] sm:$0xff]  ;;  %v5629_v16 = vsel %vm1894_vm2, %v13746_v0, %v10929_v52 }
 0x692   :  { %13699 = vst [vmem:[#allocation47_spill] sm:$0xff] %v11130_v26  ;;  %v11151_v26 = vrot.slane %v13712_v61, 2  ;;  %v11172_v61 = vrot.slane %v10736_v41, 6  ;;  %v11193_v41 = vrot.slane %v10772_v8, 4  ;;  %v11214_v8 = vrot.slane %v10808_v17, 2 }
 0x693   :  { %13701 = vst [vmem:[#allocation45_spill] sm:$0xff] %v11133_v21  ;;  %v11235_v17 = vrot.slane %v10848_v15, 6  ;;  %v13748_v15 = vld [vmem:[#allocation132_spill] sm:$0xff] }
 0x694   :  { %13703 = vst [vmem:[#allocation50_spill] sm:$0xff] %v11136_v55 }
 0x695   :  { %13705 = vst [vmem:[#allocation51_spill] sm:$0xff] %v11139_v5  ;;  %v11160_v5 = vrot.slane %v13716_v1, 2  ;;  %v11181_v1 = vrot.slane %v10752_v62, 6  ;;  %v11202_v62 = vrot.slane %v10788_v12, 4  ;;  %v11223_v12 = vrot.slane %v10824_v29, 2 }
 0x696   :  { %13707 = vst [vmem:[#allocation49_spill] sm:$0xff] %v11142_v24  ;;  %v5631_v29 = vsel %vm5630_vm5, %v10932_v4, %v10935_v50  ;;  %v5637_v50 = vsel %vm5630_vm5, %v10950_v19, %v10953_v13 }
 0x697   :  { %13709 = vst [vmem:[#allocation54_spill] sm:$0xff] %v11145_v51  ;;  %v11166_v51 = vrot.slane %v13719_v57, 4  ;;  %v11187_v57 = vrot.slane %v10760_v60, 2  ;;  %v11208_v60 = vrot.slane %v10800_v58, 6  ;;  %v11229_v58 = vrot.slane %v10836_v23, 4 }
 0x698   :  { %13711 = vst [vmem:[#allocation55_spill] sm:$0xff] %v11148_v56  ;;  %v11169_v56 = vrot.slane %v13721_v33, 2  ;;  %v11190_v33 = vrot.slane %v10768_v28, 6  ;;  %v11211_v28 = vrot.slane %v10804_v45, 4  ;;  %v11232_v45 = vrot.slane %v10840_v3, 2 }
 0x699   :  { %13713 = vst [vmem:[#allocation53_spill] sm:$0xff] %v11151_v26  ;;  %v5634_v3 = vsel %vm5630_vm5, %v10941_v38, %v10944_v10 }
 0x69a   :  { %13714 = vst [vmem:[#allocation148_spill] sm:$0xff] %v11154_v37 }
 0x69b   :  { %13715 = vst [vmem:[#allocation149_spill] sm:$0xff] %v11157_v9 }
 0x69c   :  { %13717 = vst [vmem:[#allocation58_spill] sm:$0xff] %v11160_v5 }
 0x69d   :  { %13718 = vst [vmem:[#allocation150_spill] sm:$0xff] %v11163_v49 }
 0x69e   :  { %13720 = vst [vmem:[#allocation57_spill] sm:$0xff] %v11166_v51 }
 0x69f   :  { %13722 = vst [vmem:[#allocation60_spill] sm:$0xff] %v11169_v56 }
 0x6a0   :  { %13723 = vst [vmem:[#allocation151_spill] sm:$0xff] %v11172_v61 }
 0x6a1   :  { %13724 = vst [vmem:[#allocation152_spill] sm:$0xff] %v11175_v39 }
 0x6a2   :  { %13725 = vst [vmem:[#allocation153_spill] sm:$0xff] %v11178_v35 }
 0x6a3   :  { %13726 = vst [vmem:[#allocation154_spill] sm:$0xff] %v11181_v1 }
 0x6a4   :  { %13727 = vst [vmem:[#allocation155_spill] sm:$0xff] %v11184_v27  ;;  %v11205_v27 = vrot.slane %v13734_v7, 2  ;;  %v11226_v7 = vrot.slane %v10832_v53, 6  ;;  %v5632_v53 = vsel %vm95_vm0, %v5629_v16, %v5631_v29  ;;  %v13749_v16 = vld [vmem:[#allocation87_spill] sm:$0xff] }
 0x6a5   :  { %13728 = vst [vmem:[#allocation156_spill] sm:$0xff] %v11187_v57  ;;  %v5639_v29 = vsel %vm1894_vm2, %v13749_v16, %v10956_v11  ;;  %v13751_v11 = vld [vmem:[#allocation91_spill] sm:$0xff] }
 0x6a6   :  { %13729 = vst [vmem:[#allocation157_spill] sm:$0xff] %v11190_v33 }
 0x6a7   :  { %13730 = vst [vmem:[#allocation158_spill] sm:$0xff] %v11193_v41 }
 0x6a8   :  { %13731 = vst [vmem:[#allocation159_spill] sm:$0xff] %v11196_v30 }
 0x6a9   :  { %13732 = vst [vmem:[#allocation160_spill] sm:$0xff] %v11199_v2 }
 0x6aa   :  { %13733 = vst [vmem:[#allocation161_spill] sm:$0xff] %v11202_v62 }
 0x6ab   :  { %13735 = vst [vmem:[#allocation66_spill] sm:$0xff] %v11205_v27 }
 0x6ac   :  { %13736 = vst [vmem:[#allocation162_spill] sm:$0xff] %v11208_v60 }
 0x6ad   :  { %13737 = vst [vmem:[#allocation163_spill] sm:$0xff] %v11211_v28 }
 0x6ae   :  { %13738 = vst [vmem:[#allocation164_spill] sm:$0xff] %v11214_v8 }
 0x6af   :  { %13739 = vst [vmem:[#allocation165_spill] sm:$0xff] %v11217_v54 }
 0x6b0   :  { %13740 = vst [vmem:[#allocation166_spill] sm:$0xff] %v11220_v47 }
 0x6b1   :  { %13741 = vst [vmem:[#allocation167_spill] sm:$0xff] %v11223_v12 }
 0x6b2   :  { %13742 = vst [vmem:[#allocation168_spill] sm:$0xff] %v11226_v7  ;;  %v13747_v7 = vld [vmem:[#allocation131_spill] sm:$0xff] }
 0x6b3   :  { %13743 = vst [vmem:[#allocation169_spill] sm:$0xff] %v11229_v58  ;;  %v5633_v23 = vsel %vm1894_vm2, %v13747_v7, %v10938_v18  ;;  %v5640_v7 = vsel %vm5630_vm5, %v10959_v59, %v10962_v31  ;;  %v5645_v31 = vsel %vm1894_vm2, %v13751_v11, %v10974_v63  ;;  %v13776_v11 = vld [vmem:[#allocation125_spill] sm:$0xff] }
 0x6b4   :  { %13744 = vst [vmem:[#allocation170_spill] sm:$0xff] %v11232_v45  ;;  %v5635_v0 = vsel %vm95_vm0, %v5633_v23, %v5634_v3  ;;  %v5641_v38 = vsel %vm95_vm0, %v5639_v29, %v5640_v7  ;;  %v5643_v3 = vsel %vm5630_vm5, %v10968_v32, %v10971_v25  ;;  %v13752_v7 = vld [vmem:[#allocation97_spill] sm:$0xff] }
 0x6b5   :  { %13745 = vst [vmem:[#allocation171_spill] sm:$0xff] %v11235_v17  ;;  %v5636_v17 = vsel %vm1894_vm2, %v13748_v15, %v10947_v14  ;;  %v13750_v15 = vld [vmem:[#allocation88_spill] sm:$0xff]  ;;  %v13753_v29 = vld [vmem:[#allocation101_spill] sm:$0xff] }
 0x6b6   :  { %6380 = vst [vmem:[#allocation10] sm:$0xff] %v5632_v53  ;;  %v5638_v10 = vsel %vm95_vm0, %v5636_v17, %v5637_v50  ;;  %v5642_v23 = vsel %vm1894_vm2, %v13750_v15, %v10965_v48  ;;  %v5646_v50 = vsel %vm5630_vm5, %v10977_v43, %v10980_v44  ;;  %v5648_v17 = vsel %vm1894_vm2, %v13752_v7, %v10983_v36  ;;  %v13756_v36 = vld [vmem:[#allocation106_spill] sm:$0xff]  ;;  %v13801_v32 = vld [vmem:[#allocation29_spill] sm:$0xff] }
 0x6b7   :  { %6381 = vst [vmem:[#allocation10 + $0x8] sm:$0xff] %v5635_v0  ;;  %v5644_v16 = vsel %vm95_vm0, %v5642_v23, %v5643_v3  ;;  %v5647_v53 = vsel %vm95_vm0, %v5645_v31, %v5646_v50  ;;  %v5649_v0 = vsel %vm5630_vm5, %v10986_v22, %v10989_v6  ;;  %v5651_v23 = vsel %vm1894_vm2, %v13753_v29, %v10992_v40  ;;  %v13755_v50 = vld [vmem:[#allocation107_spill] sm:$0xff]  ;;  %v13757_v40 = vld [vmem:[#allocation110_spill] sm:$0xff]  ;;  %v13758_v22 = vld [vmem:[#allocation109_spill] sm:$0xff] }
 0x6b8   :  { %6382 = vst [vmem:[#allocation10 + $0x10] sm:$0xff] %v5638_v10  ;;  %v5652_v3 = vsel %vm5630_vm5, %v10995_v20, %v10998_v34  ;;  %v5650_v44 = vsel %vm95_vm0, %v5648_v17, %v5649_v0  ;;  %v13754_v10 = vld [vmem:[#allocation105_spill] sm:$0xff]  ;;  %v5655_v6 = vsel %vm5630_vm5, %v13756_v36, %v13755_v50  ;;  %v5657_v34 = vsel %vm1894_vm2, %v13758_v22, %v13757_v40  ;;  %v13760_v20 = vld [vmem:[#allocation108_spill] sm:$0xff]  ;;  %v13761_v0 = vld [vmem:[#allocation114_spill] sm:$0xff] }
 0x6b9   :  { %6383 = vst [vmem:[#allocation10 + $0x18] sm:$0xff] %v5641_v38  ;;  %v5653_v7 = vsel %vm95_vm0, %v5651_v23, %v5652_v3  ;;  %v5654_v31 = vsel %vm1894_vm2, %v13754_v10, %v11001_v42  ;;  %v13759_v38 = vld [vmem:[#allocation111_spill] sm:$0xff]  ;;  %v13762_v23 = vld [vmem:[#allocation113_spill] sm:$0xff]  ;;  %v13764_v50 = vld [vmem:[#allocation112_spill] sm:$0xff] }
 0x6ba   :  { %6384 = vst [vmem:[#allocation10 + $0x20] sm:$0xff] %v5644_v16  ;;  %v5656_v29 = vsel %vm95_vm0, %v5654_v31, %v5655_v6  ;;  %v5658_v17 = vsel %vm5630_vm5, %v13760_v20, %v13759_v38  ;;  %v5660_v3 = vsel %vm1894_vm2, %v13762_v23, %v13761_v0  ;;  %v13763_v42 = vld [vmem:[#allocation115_spill] sm:$0xff]  ;;  %v13765_v6 = vld [vmem:[#allocation118_spill] sm:$0xff]  ;;  %v13766_v31 = vld [vmem:[#allocation117_spill] sm:$0xff] }
 0x6bb   :  { %6385 = vst [vmem:[#allocation10 + $0x28] sm:$0xff] %v5647_v53  ;;  %v5659_v10 = vsel %vm95_vm0, %v5657_v34, %v5658_v17  ;;  %v5661_v16 = vsel %vm5630_vm5, %v13764_v50, %v13763_v42  ;;  %v5663_v36 = vsel %vm1894_vm2, %v13766_v31, %v13765_v6  ;;  %v13767_v22 = vld [vmem:[#allocation119_spill] sm:$0xff]  ;;  %v13768_v40 = vld [vmem:[#allocation116_spill] sm:$0xff]  ;;  %v13769_v38 = vld [vmem:[#allocation69_spill] sm:$0xff] }
 0x6bc   :  { %v5664_v43 = vsel %vm5630_vm5, %v13768_v40, %v13767_v22  ;;  %6386 = vst [vmem:[#allocation10 + $0x30] sm:$0xff] %v5650_v44  ;;  %v11320_v20 = vrot.slane %v13769_v38, 4  ;;  %v5662_v53 = vsel %vm95_vm0, %v5660_v3, %v5661_v16  ;;  %v13771_v23 = vld [vmem:[#allocation122_spill] sm:$0xff]  ;;  %v13772_v34 = vld [vmem:[#allocation121_spill] sm:$0xff]  ;;  %v13773_v0 = vld [vmem:[#allocation123_spill] sm:$0xff] }
 0x6bd   :  { %v5666_v17 = vsel %vm1894_vm2, %v13772_v34, %v13771_v23  ;;  %v13774_v42 = vld [vmem:[#allocation120_spill] sm:$0xff]  ;;  %6387 = vst [vmem:[#allocation10 + $0x38] sm:$0xff] %v5653_v7  ;;  %v5665_v31 = vsel %vm95_vm0, %v5663_v36, %v5664_v43  ;;  %v13775_v6 = vld [vmem:[#allocation126_spill] sm:$0xff]  ;;  %v13777_v22 = vld [vmem:[#allocation127_spill] sm:$0xff] }
 0x6be   :  { %13770 = vst [vmem:[#allocation69_spill] sm:$0xff] %v11320_v20  ;;  %v5667_v50 = vsel %vm5630_vm5, %v13774_v42, %v13773_v0  ;;  %v5669_v44 = vsel %vm1894_vm2, %v13776_v11, %v13775_v6  ;;  %v13778_v38 = vld [vmem:[#allocation124_spill] sm:$0xff]  ;;  %v13779_v3 = vld [vmem:[#allocation15_spill] sm:$0xff]  ;;  %v13780_v16 = vld [vmem:[#allocation129_spill] sm:$0xff] }
 0x6bf   :  { %v5670_v40 = vsel %vm5630_vm5, %v13778_v38, %v13777_v22  ;;  %v5672_v63 = vsel %vm1894_vm2, %v13780_v16, %v13779_v3  ;;  %6388 = vst [vmem:[#allocation10 + $0x40] sm:$0xff] %v5656_v29  ;;  %v5668_v34 = vsel %vm95_vm0, %v5666_v17, %v5667_v50  ;;  %v13781_v23 = vld [vmem:[#allocation16_spill] sm:$0xff]  ;;  %v13783_v36 = vld [vmem:[#allocation19_spill] sm:$0xff]  ;;  %v13784_v43 = vld [vmem:[#allocation18_spill] sm:$0xff] }
 0x6c0   :  { %v13782_v0 = vld [vmem:[#allocation128_spill] sm:$0xff]  ;;  %v5675_v42 = vsel %vm1894_vm2, %v13784_v43, %v13783_v36  ;;  %v13786_v6 = vld [vmem:[#allocation17_spill] sm:$0xff]  ;;  %6389 = vst [vmem:[#allocation10 + $0x48] sm:$0xff] %v5659_v10  ;;  %v13787_v22 = vld [vmem:[#allocation71_spill] sm:$0xff]  ;;  %v5671_v29 = vsel %vm95_vm0, %v5669_v44, %v5670_v40 }
 0x6c1   :  { %v5673_v7 = vsel %vm5630_vm5, %v13782_v0, %v13781_v23  ;;  %v13785_v11 = vld [vmem:[#allocation20_spill] sm:$0xff]  ;;  %v11350_v38 = vrot.slane %v13787_v22, 2  ;;  %v13789_v16 = vld [vmem:[#allocation23_spill] sm:$0xff]  ;;  %v13790_v50 = vld [vmem:[#allocation22_spill] sm:$0xff]  ;;  %6390 = vst [vmem:[#allocation10 + $0x50] sm:$0xff] %v5662_v53 }
 0x6c2   :  { %v5676_v25 = vsel %vm5630_vm5, %v13786_v6, %v13785_v11  ;;  %v5678_v17 = vsel %vm1894_vm2, %v13790_v50, %v13789_v16  ;;  %v13791_v3 = vld [vmem:[#allocation24_spill] sm:$0xff]  ;;  %v13792_v23 = vld [vmem:[#allocation21_spill] sm:$0xff]  ;;  %v13793_v43 = vld [vmem:[#allocation74_spill] sm:$0xff]  ;;  %v5674_v11 = vsel %vm95_vm0, %v5672_v63, %v5673_v7  ;;  %6391 = vst [vmem:[#allocation10 + $0x58] sm:$0xff] %v5665_v31 }
 0x6c3   :  { %13788 = vst [vmem:[#allocation71_spill] sm:$0xff] %v11350_v38  ;;  %v5679_v0 = vsel %vm5630_vm5, %v13792_v23, %v13791_v3  ;;  %v11360_v36 = vrot.slane %v13793_v43, 6  ;;  %v13795_v10 = vld [vmem:[#allocation26_spill] sm:$0xff]  ;;  %v13796_v6 = vld [vmem:[#allocation28_spill] sm:$0xff]  ;;  %v13797_v40 = vld [vmem:[#allocation25_spill] sm:$0xff]  ;;  %v5677_v50 = vsel %vm95_vm0, %v5675_v42, %v5676_v25 }
 0x6c4   :  { %v5681_v22 = vsel %vm1894_vm2, %v13795_v10, %v11082_v46  ;;  %v5682_v44 = vsel %vm5630_vm5, %v13797_v40, %v13796_v6  ;;  %v5680_v16 = vsel %vm95_vm0, %v5678_v17, %v5679_v0  ;;  %v13798_v3 = vld [vmem:[#allocation31_spill] sm:$0xff]  ;;  %v13799_v53 = vld [vmem:[#allocation30_spill] sm:$0xff]  ;;  %v13800_v23 = vld [vmem:[#allocation32_spill] sm:$0xff]  ;;  %6392 = vst [vmem:[#allocation10 + $0x60] sm:$0xff] %v5668_v34 }
 0x6c5   :  { %13794 = vst [vmem:[#allocation74_spill] sm:$0xff] %v11360_v36  ;;  %v5684_v43 = vsel %vm1894_vm2, %v13799_v53, %v13798_v3  ;;  %v5685_v63 = vsel %vm5630_vm5, %v13801_v32, %v13800_v23  ;;  %v13802_v7 = vld [vmem:[#allocation35_spill] sm:$0xff]  ;;  %v13803_v10 = vld [vmem:[#allocation34_spill] sm:$0xff]  ;;  %v13804_v15 = vld [vmem:[#allocation33_spill] sm:$0xff]  ;;  %v5683_v23 = vsel %vm95_vm0, %v5681_v22, %v5682_v44 }
 0x6c6   :  { %v5687_v46 = vsel %vm1894_vm2, %v13803_v10, %v13802_v7  ;;  %v13805_v6 = vld [vmem:[#allocation147_spill] sm:$0xff]  ;;  %v13806_v25 = vld [vmem:[#allocation38_spill] sm:$0xff]  ;;  %v13807_v42 = vld [vmem:[#allocation36_spill] sm:$0xff]  ;;  %6393 = vst [vmem:[#allocation10 + $0x68] sm:$0xff] %v5671_v29  ;;  %v5686_v22 = vsel %vm95_vm0, %v5684_v43, %v5685_v63 }
 0x6c7   :  { %v5688_v31 = vsel %vm5630_vm5, %v13805_v6, %v13804_v15  ;;  %v5690_v0 = vsel %vm1894_vm2, %v13807_v42, %v13806_v25  ;;  %v13808_v17 = vld [vmem:[#allocation37_spill] sm:$0xff]  ;;  %v13809_v40 = vld [vmem:[#allocation39_spill] sm:$0xff]  ;;  %v13810_v34 = vld [vmem:[#allocation42_spill] sm:$0xff]  ;;  %6394 = vst [vmem:[#allocation10 + $0x70] sm:$0xff] %v5674_v11 }
 0x6c8   :  { %v5691_v53 = vsel %vm5630_vm5, %v13809_v40, %v13808_v17  ;;  %v13811_v32 = vld [vmem:[#allocation40_spill] sm:$0xff]  ;;  %v13812_v10 = vld [vmem:[#allocation41_spill] sm:$0xff]  ;;  %v13813_v7 = vld [vmem:[#allocation43_spill] sm:$0xff]  ;;  %6395 = vst [vmem:[#allocation10 + $0x78] sm:$0xff] %v5677_v50 }
 0x6c9   :  { %v5693_v3 = vsel %vm1894_vm2, %v13811_v32, %v13810_v34  ;;  %v5694_v48 = vsel %vm5630_vm5, %v13813_v7, %v13812_v10  ;;  %v13814_v15 = vld [vmem:[#allocation46_spill] sm:$0xff]  ;;  %v13815_v6 = vld [vmem:[#allocation44_spill] sm:$0xff]  ;;  %v13818_v17 = vld [vmem:[#allocation75_spill] sm:$0xff]  ;;  %v5689_v10 = vsel %vm95_vm0, %v5687_v46, %v5688_v31  ;;  %v5692_v7 = vsel %vm95_vm0, %v5690_v0, %v5691_v53  ;;  %6396 = vst [vmem:[#allocation10 + $0x80] sm:$0xff] %v5680_v16 }
 0x6ca   :  { %v5696_v59 = vsel %vm1894_vm2, %v13815_v6, %v13814_v15  ;;  %v13816_v42 = vld [vmem:[#allocation72_spill] sm:$0xff]  ;;  %v11403_v29 = vrot.slane %v13818_v17, 2  ;;  %v13820_v44 = vld [vmem:[#allocation47_spill] sm:$0xff]  ;;  %v5695_v6 = vsel %vm95_vm0, %v5693_v3, %v5694_v48  ;;  %v13823_v15 = vld [vmem:[#allocation54_spill] sm:$0xff]  ;;  %6397 = vst [vmem:[#allocation10 + $0x88] sm:$0xff] %v5683_v23  ;;  %v5709_v31 = vsel %vm5630_vm5, %v11166_v51, %v11169_v56 }
 0x6cb   :  { %v11400_v25 = vrot.slane %v13816_v42, 4  ;;  %v5697_v32 = vsel %vm5630_vm5, %v13820_v44, %v11133_v21  ;;  %v13821_v11 = vld [vmem:[#allocation48_spill] sm:$0xff]  ;;  %v13822_v43 = vld [vmem:[#allocation51_spill] sm:$0xff]  ;;  %6398 = vst [vmem:[#allocation10 + $0x90] sm:$0xff] %v5686_v22  ;;  %v13828_v23 = vld [vmem:[#allocation62_spill] sm:$0xff] }
 0x6cc   :  { %13819 = vst [vmem:[#allocation72_spill] sm:$0xff] %v11403_v29  ;;  %v5699_v42 = vsel %vm1894_vm2, %v13821_v11, %v11136_v55  ;;  %v5698_v17 = vsel %vm95_vm0, %v5696_v59, %v5697_v32  ;;  %v5700_v63 = vsel %vm5630_vm5, %v13822_v43, %v11142_v24  ;;  %v13824_v21 = vld [vmem:[#allocation52_spill] sm:$0xff]  ;;  %v13825_v46 = vld [vmem:[#allocation55_spill] sm:$0xff]  ;;  %v5706_v32 = vsel %vm5630_vm5, %v11157_v9, %v11160_v5 }
 0x6cd   :  { %13817 = vst [vmem:[#allocation42_spill] sm:$0xff] %v11400_v25  ;;  %v5702_v50 = vsel %vm1894_vm2, %v13824_v21, %v13823_v15  ;;  %v5703_v53 = vsel %vm5630_vm5, %v13825_v46, %v11151_v26  ;;  %v13826_v48 = vld [vmem:[#allocation56_spill] sm:$0xff]  ;;  %v13827_v59 = vld [vmem:[#allocation59_spill] sm:$0xff]  ;;  %v5711_v0 = vsel %vm1894_vm2, %v13828_v23, %v11172_v61  ;;  %v13835_v23 = vld [vmem:[#allocation81_spill] sm:$0xff] }
 0x6ce   :  { %v5705_v3 = vsel %vm1894_vm2, %v13826_v48, %v11154_v37  ;;  %v5708_v16 = vsel %vm1894_vm2, %v13827_v59, %v11163_v49  ;;  %v5712_v48 = vsel %vm5630_vm5, %v11175_v39, %v11178_v35  ;;  %v13829_v37 = vld [vmem:[#allocation63_spill] sm:$0xff]  ;;  %6399 = vst [vmem:[#allocation10 + $0x98] sm:$0xff] %v5689_v10  ;;  %v13831_v49 = vld [vmem:[#allocation76_spill] sm:$0xff]  ;;  %v11456_v61 = vrot.slane %v13835_v23, 2  ;;  %v13838_v23 = vld [vmem:[#allocation61_spill] sm:$0xff] }
 0x6cf   :  { %v5714_v5 = vsel %vm1894_vm2, %v13829_v37, %v11181_v1  ;;  %v13830_v9 = vld [vmem:[#allocation155_spill] sm:$0xff]  ;;  %v11450_v56 = vrot.slane %v13831_v49, 6  ;;  %v5701_v35 = vsel %vm95_vm0, %v5699_v42, %v5700_v63  ;;  %6400 = vst [vmem:[#allocation10 + $0xa0] sm:$0xff] %v5692_v7  ;;  %v13836_v39 = vld [vmem:[#allocation80_spill] sm:$0xff]  ;;  %v5704_v1 = vsel %vm95_vm0, %v5702_v50, %v5703_v53 }
 0x6d0   :  { %v5715_v59 = vsel %vm5630_vm5, %v13830_v9, %v11187_v57  ;;  %v13833_v22 = vld [vmem:[#allocation79_spill] sm:$0xff]  ;;  %v11460_v37 = vrot.slane %v13836_v39, 6  ;;  %v5707_v10 = vsel %vm95_vm0, %v5705_v3, %v5706_v32  ;;  %v5710_v49 = vsel %vm95_vm0, %v5708_v16, %v5709_v31  ;;  %6401 = vst [vmem:[#allocation10 + $0xa8] sm:$0xff] %v5695_v6  ;;  %v13839_v7 = vld [vmem:[#allocation64_spill] sm:$0xff] }
 0x6d1   :  { %13832 = vst [vmem:[#allocation75_spill] sm:$0xff] %v11450_v56  ;;  %v11453_v51 = vrot.slane %v13833_v22, 4  ;;  %v5713_v22 = vsel %vm95_vm0, %v5711_v0, %v5712_v48  ;;  %v5716_v57 = vsel %vm95_vm0, %v5714_v5, %v5715_v59  ;;  %v5717_v42 = vsel %vm1894_vm2, %v13838_v23, %v11190_v33  ;;  %v13840_v50 = vld [vmem:[#allocation67_spill] sm:$0xff]  ;;  %v13841_v48 = vld [vmem:[#allocation65_spill] sm:$0xff]  ;;  %v13842_v32 = vld [vmem:[#allocation168_spill] sm:$0xff] }
 0x6d2   :  { %13837 = vst [vmem:[#allocation79_spill] sm:$0xff] %v11460_v37  ;;  %v5718_v39 = vsel %vm5630_vm5, %v11193_v41, %v11196_v30  ;;  %v5720_v63 = vsel %vm1894_vm2, %v13839_v7, %v11199_v2  ;;  %v5721_v6 = vsel %vm5630_vm5, %v11202_v62, %v11205_v27  ;;  %v5723_v5 = vsel %vm1894_vm2, %v13840_v50, %v11208_v60  ;;  %v13843_v59 = vld [vmem:[#allocation68_spill] sm:$0xff]  ;;  %v13844_v0 = vld [vmem:[#allocation171_spill] sm:$0xff] }
 0x6d3   :  { %13834 = vst [vmem:[#allocation76_spill] sm:$0xff] %v11453_v51  ;;  %v5724_v53 = vsel %vm5630_vm5, %v11211_v28, %v11214_v8  ;;  %v5727_v3 = vsel %vm5630_vm5, %v11220_v47, %v11223_v12  ;;  %v5729_v16 = vsel %vm1894_vm2, %v13843_v59, %v13842_v32  ;;  %v5730_v31 = vsel %vm5630_vm5, %v11229_v58, %v11232_v45  ;;  %v13845_v8 = vld [vmem:[#allocation70_spill] sm:$0xff]  ;;  %v13847_v32 = vld [vmem:[#allocation83_spill] sm:$0xff] }
 0x6d4   :  { %6402 = vst [vmem:[#allocation10 + $0xb0] sm:$0xff] %v5698_v17  ;;  %v5726_v17 = vsel %vm1894_vm2, %v13841_v48, %v11217_v54  ;;  %v5733_v48 = vsel %vm5630_vm5, %v11320_v20, %v11350_v38  ;;  %v13846_v54 = vld [vmem:[#allocation73_spill] sm:$0xff]  ;;  %v5736_v59 = vsel %vm5630_vm5, %v11400_v25, %v11403_v29  ;;  %v11510_v45 = vrot.slane %v13847_v32, 4 }
 0x6d5   :  { %6403 = vst [vmem:[#allocation10 + $0xb8] sm:$0xff] %v5701_v35  ;;  %v5732_v35 = vsel %vm1894_vm2, %v13845_v8, %v13844_v0  ;;  %v5735_v12 = vsel %vm1894_vm2, %v13846_v54, %v11360_v36  ;;  %v13851_v8 = vld [vmem:[#allocation84_spill] sm:$0xff]  ;;  %v5719_v38 = vsel %vm95_vm0, %v5717_v42, %v5718_v39  ;;  %v13853_v20 = vld [vmem:[#allocation133_spill] sm:$0xff]  ;;  %v13855_v54 = vld [vmem:[#allocation134_spill] sm:$0xff]  ;;  %v5725_v32 = vsel %vm95_vm0, %v5723_v5, %v5724_v53 }
 0x6d6   :  { %6404 = vst [vmem:[#allocation10 + $0xc0] sm:$0xff] %v5704_v1  ;;  %v13849_v1 = vld [vmem:[#allocation85_spill] sm:$0xff]  ;;  %v11516_v0 = vrot.slane %v13851_v8, 6  ;;  %v11520_v47 = vrot.slane %v13853_v20, 4  ;;  %v11523_v36 = vrot.slane %v13855_v54, 2  ;;  %v5731_v29 = vsel %vm95_vm0, %v5729_v16, %v5730_v31  ;;  %v13858_v39 = vld [vmem:[#allocation86_spill] sm:$0xff] }
 0x6d7   :  { %6405 = vst [vmem:[#allocation10 + $0xc8] sm:$0xff] %v5707_v10  ;;  %v11513_v58 = vrot.slane %v13849_v1, 2  ;;  %v5722_v10 = vsel %vm95_vm0, %v5720_v63, %v5721_v6  ;;  %v5728_v1 = vsel %vm95_vm0, %v5726_v17, %v5727_v3  ;;  %v5734_v8 = vsel %vm95_vm0, %v5732_v35, %v5733_v48  ;;  %v13857_v20 = vld [vmem:[#allocation77_spill] sm:$0xff]  ;;  %v13861_v53 = vld [vmem:[#allocation131_spill] sm:$0xff]  ;;  %v13863_v3 = vld [vmem:[#allocation140_spill] sm:$0xff] }
 0x6d8   :  { %13848 = vst [vmem:[#allocation81_spill] sm:$0xff] %v11510_v45  ;;  %v5737_v42 = vsel %vm95_vm0, %v5735_v12, %v5736_v59  ;;  %v5739_v54 = vsel %vm5630_vm5, %v11453_v51, %v11456_v61  ;;  %v13859_v63 = vld [vmem:[#allocation137_spill] sm:$0xff]  ;;  %v13860_v12 = vld [vmem:[#allocation82_spill] sm:$0xff]  ;;  %v5754_v48 = vsel %vm5747_vm6, %v13861_v53, %v10938_v18  ;;  %v13862_v17 = vld [vmem:[#allocation139_spill] sm:$0xff]  ;;  %v5745_v31 = vsel %vm5630_vm5, %v11520_v47, %v11523_v36 }
 0x6d9   :  { %13850 = vst [vmem:[#allocation80_spill] sm:$0xff] %v11513_v58  ;;  %v5750_v6 = vsel %vm5749_vm7, %v13859_v63, %v10932_v4  ;;  %v5742_v5 = vsel %vm5630_vm5, %v11510_v45, %v11513_v58  ;;  %v5755_v59 = vsel %vm5749_vm7, %v13863_v3, %v13862_v17  ;;  %v13864_v16 = vld [vmem:[#allocation130_spill] sm:$0xff]  ;;  %v13865_v35 = vld [vmem:[#allocation132_spill] sm:$0xff]  ;;  %v5759_v53 = vsel %vm5749_vm7, %v10953_v13, %v10950_v19  ;;  %v13867_v18 = vld [vmem:[#allocation87_spill] sm:$0xff] }
 0x6da   :  { %13852 = vst [vmem:[#allocation83_spill] sm:$0xff] %v11516_v0  ;;  %v5758_v4 = vsel %vm5747_vm6, %v13865_v35, %v10947_v14  ;;  %v13866_v3 = vld [vmem:[#allocation144_spill] sm:$0xff]  ;;  %v5756_v14 = vsel %vm5751_vm8, %v5754_v48, %v5755_v59 }
 0x6db   :  { %6406 = vst [vmem:[#allocation10 + $0xd0] sm:$0xff] %v5710_v49  ;;  %v5738_v49 = vsel %vm1894_vm2, %v13857_v20, %v11450_v56  ;;  %v5762_v63 = vsel %vm5747_vm6, %v13867_v18, %v13866_v3  ;;  %v13871_v19 = vld [vmem:[#allocation88_spill] sm:$0xff]  ;;  %v5760_v18 = vsel %vm5751_vm8, %v5758_v4, %v5759_v53  ;;  %v13874_v3 = vld [vmem:[#allocation94_spill] sm:$0xff]  ;;  %v5757_v53 = vrot.slane %v5756_v14, 2  ;;  %v13889_v14 = vld [vmem:[#allocation107_spill] sm:$0xff] }
 0x6dc   :  { %13854 = vst [vmem:[#allocation85_spill] sm:$0xff] %v11520_v47  ;;  %v5740_v17 = vsel %vm95_vm0, %v5738_v49, %v5739_v54  ;;  %v13870_v47 = vld [vmem:[#allocation89_spill] sm:$0xff]  ;;  %v13872_v49 = vld [vmem:[#allocation90_spill] sm:$0xff]  ;;  %v13873_v54 = vld [vmem:[#allocation92_spill] sm:$0xff] }
 0x6dd   :  { %13856 = vst [vmem:[#allocation84_spill] sm:$0xff] %v11523_v36 }
 0x6de   :  { %6407 = vst [vmem:[#allocation10 + $0xd8] sm:$0xff] %v5713_v22  ;;  %v5748_v22 = vsel %vm5747_vm6, %v13858_v39, %v10929_v52  ;;  %v13868_v39 = vld [vmem:[#allocation145_spill] sm:$0xff]  ;;  %v13869_v52 = vld [vmem:[#allocation146_spill] sm:$0xff] }
 0x6df   :  { %6408 = vst [vmem:[#allocation10 + $0xe0] sm:$0xff] %v5716_v57  ;;  %v5741_v57 = vsel %vm1894_vm2, %v13860_v12, %v11460_v37  ;;  %v5763_v36 = vsel %vm5749_vm7, %v13869_v52, %v13868_v39  ;;  %v13875_v39 = vld [vmem:[#allocation91_spill] sm:$0xff]  ;;  %v13879_v52 = vld [vmem:[#allocation97_spill] sm:$0xff] }
 0x6e0   :  { %6409 = vst [vmem:[#allocation10 + $0xe8] sm:$0xff] %v5719_v38  ;;  %v5744_v38 = vsel %vm1894_vm2, %v13864_v16, %v11516_v0  ;;  %v5743_v35 = vsel %vm95_vm0, %v5741_v57, %v5742_v5  ;;  %v13876_v57 = vld [vmem:[#allocation93_spill] sm:$0xff]  ;;  %v13877_v5 = vld [vmem:[#allocation95_spill] sm:$0xff] }
 0x6e1   :  { %6410 = vst [vmem:[#allocation10 + $0xf0] sm:$0xff] %v5722_v10  ;;  %v5752_v10 = vsel %vm5751_vm8, %v5748_v22, %v5750_v6  ;;  %v5767_v22 = vsel %vm5749_vm7, %v13873_v54, %v13872_v49  ;;  %v5746_v6 = vsel %vm95_vm0, %v5744_v38, %v5745_v31  ;;  %v5771_v48 = vsel %vm5749_vm7, %v13877_v5, %v13876_v57  ;;  %v13880_v49 = vld [vmem:[#allocation98_spill] sm:$0xff]  ;;  %v13881_v38 = vld [vmem:[#allocation99_spill] sm:$0xff]  ;;  %v13887_v5 = vld [vmem:[#allocation105_spill] sm:$0xff] }
 0x6e2   :  { %6411 = vst [vmem:[#allocation10 + $0xf8] sm:$0xff] %v5725_v32  ;;  %v5766_v32 = vsel %vm5747_vm6, %v13871_v19, %v13870_v47  ;;  %v5753_v59 = vrot.slane %v5752_v10, 2  ;;  %v5764_v19 = vsel %vm5751_vm8, %v5762_v63, %v5763_v36  ;;  %v13878_v47 = vld [vmem:[#allocation96_spill] sm:$0xff]  ;;  %v5775_v4 = vsel %vm5749_vm7, %v13881_v38, %v13880_v49  ;;  %v13885_v10 = vld [vmem:[#allocation103_spill] sm:$0xff]  ;;  %v13891_v38 = vld [vmem:[#allocation109_spill] sm:$0xff] }
 0x6e3   :  { %6412 = vst [vmem:[#allocation10 + $0x100] sm:$0xff] %v5728_v1  ;;  %v5770_v1 = vsel %vm5747_vm6, %v13875_v39, %v13874_v3  ;;  %v5768_v31 = vsel %vm5751_vm8, %v5766_v32, %v5767_v22  ;;  %v13882_v39 = vld [vmem:[#allocation102_spill] sm:$0xff]  ;;  %v13883_v3 = vld [vmem:[#allocation101_spill] sm:$0xff]  ;;  %v5761_v63 = vrot.slane %v5760_v18, 2  ;;  %v5765_v22 = vrot.slane %v5764_v19, 2  ;;  %v13893_v18 = vld [vmem:[#allocation111_spill] sm:$0xff] }
 0x6e4   :  { %6413 = vst [vmem:[#allocation10 + $0x108] sm:$0xff] %v5731_v29  ;;  %v5774_v29 = vsel %vm5747_vm6, %v13879_v52, %v13878_v47  ;;  %v5778_v57 = vsel %vm5747_vm6, %v13883_v3, %v13882_v39  ;;  %v5772_v52 = vsel %vm5751_vm8, %v5770_v1, %v5771_v48  ;;  %v13886_v47 = vld [vmem:[#allocation104_spill] sm:$0xff]  ;;  %v13890_v39 = vld [vmem:[#allocation110_spill] sm:$0xff]  ;;  %v5769_v48 = vrot.slane %v5768_v31, 2  ;;  %v13897_v19 = vld [vmem:[#allocation115_spill] sm:$0xff] }
 0x6e5   :  { %6414 = vst [vmem:[#allocation10 + $0x110] sm:$0xff] %v5734_v8  ;;  %v13884_v8 = vld [vmem:[#allocation100_spill] sm:$0xff]  ;;  %v5782_v49 = vsel %vm5747_vm6, %v13887_v5, %v13886_v47  ;;  %v5776_v3 = vsel %vm5751_vm8, %v5774_v29, %v5775_v4  ;;  %v13894_v47 = vld [vmem:[#allocation114_spill] sm:$0xff]  ;;  %v5773_v4 = vrot.slane %v5772_v52, 2  ;;  %v13901_v31 = vld [vmem:[#allocation119_spill] sm:$0xff] }
 0x6e6   :  { %6415 = vst [vmem:[#allocation10 + $0x118] sm:$0xff] %v5737_v42  ;;  %v5779_v36 = vsel %vm5749_vm7, %v13885_v10, %v13884_v8  ;;  %v13888_v42 = vld [vmem:[#allocation106_spill] sm:$0xff]  ;;  %v5786_v8 = vsel %vm5747_vm6, %v13891_v38, %v13890_v39  ;;  %v13895_v10 = vld [vmem:[#allocation113_spill] sm:$0xff]  ;;  %v13905_v52 = vld [vmem:[#allocation123_spill] sm:$0xff] }
 0x6e7   :  { %6416 = vst [vmem:[#allocation10 + $0x120] sm:$0xff] %v5740_v17  ;;  %v5783_v32 = vsel %vm5749_vm7, %v13889_v14, %v13888_v42  ;;  %v13892_v17 = vld [vmem:[#allocation108_spill] sm:$0xff]  ;;  %v5780_v5 = vsel %vm5751_vm8, %v5778_v57, %v5779_v36  ;;  %v5790_v42 = vsel %vm5747_vm6, %v13895_v10, %v13894_v47  ;;  %v13898_v39 = vld [vmem:[#allocation118_spill] sm:$0xff]  ;;  %v13899_v14 = vld [vmem:[#allocation117_spill] sm:$0xff]  ;;  %v5777_v36 = vrot.slane %v5776_v3, 2 }
 0x6e8   :  { %6417 = vst [vmem:[#allocation10 + $0x128] sm:$0xff] %v5743_v35  ;;  %v5787_v1 = vsel %vm5749_vm7, %v13893_v18, %v13892_v17  ;;  %v13896_v35 = vld [vmem:[#allocation112_spill] sm:$0xff]  ;;  %v5784_v38 = vsel %vm5751_vm8, %v5782_v49, %v5783_v32  ;;  %v5794_v17 = vsel %vm5747_vm6, %v13899_v14, %v13898_v39  ;;  %v13902_v47 = vld [vmem:[#allocation122_spill] sm:$0xff]  ;;  %v13903_v18 = vld [vmem:[#allocation121_spill] sm:$0xff]  ;;  %v5781_v32 = vrot.slane %v5780_v5, 2 }
 0x6e9   :  { %6418 = vst [vmem:[#allocation10 + $0x130] sm:$0xff] %v5746_v6  ;;  %v5791_v29 = vsel %vm5749_vm7, %v13897_v19, %v13896_v35  ;;  %v13900_v6 = vld [vmem:[#allocation116_spill] sm:$0xff]  ;;  %v5788_v10 = vsel %vm5751_vm8, %v5786_v8, %v5787_v1  ;;  %v5798_v35 = vsel %vm5747_vm6, %v13903_v18, %v13902_v47  ;;  %v13906_v39 = vld [vmem:[#allocation126_spill] sm:$0xff]  ;;  %v13907_v19 = vld [vmem:[#allocation125_spill] sm:$0xff]  ;;  %v5785_v1 = vrot.slane %v5784_v38, 2 }
 0x6ea   :  { %6421 = vst [vmem:[#allocation10 + $0x13a] sm:$0xff] %v5753_v59  ;;  %v5795_v57 = vsel %vm5749_vm7, %v13901_v31, %v13900_v6  ;;  %v13904_v59 = vld [vmem:[#allocation120_spill] sm:$0xff]  ;;  %v5792_v14 = vsel %vm5751_vm8, %v5790_v42, %v5791_v29  ;;  %v5802_v6 = vsel %vm5747_vm6, %v13907_v19, %v13906_v39  ;;  %v13909_v3 = vld [vmem:[#allocation127_spill] sm:$0xff]  ;;  %v13911_v31 = vld [vmem:[#allocation129_spill] sm:$0xff]  ;;  %v5789_v29 = vrot.slane %v5788_v10, 2 }
 0x6eb   :  { %6422 = vst [vmem:[#allocation10 + $0x142] sm:$0xff] %v5757_v53  ;;  %v5799_v49 = vsel %vm5749_vm7, %v13905_v52, %v13904_v59  ;;  %v13908_v53 = vld [vmem:[#allocation124_spill] sm:$0xff]  ;;  %v5796_v18 = vsel %vm5751_vm8, %v5794_v17, %v5795_v57  ;;  %v13910_v47 = vld [vmem:[#allocation15_spill] sm:$0xff]  ;;  %v13915_v52 = vld [vmem:[#allocation18_spill] sm:$0xff]  ;;  %v5793_v57 = vrot.slane %v5792_v14, 2 }
 0x6ec   :  { %6423 = vst [vmem:[#allocation10 + $0x14a] sm:$0xff] %v5761_v63  ;;  %v5803_v8 = vsel %vm5749_vm7, %v13909_v3, %v13908_v53  ;;  %v5806_v59 = vsel %vm5747_vm6, %v13911_v31, %v13910_v47  ;;  %v13912_v63 = vld [vmem:[#allocation128_spill] sm:$0xff]  ;;  %v5800_v19 = vsel %vm5751_vm8, %v5798_v35, %v5799_v49  ;;  %v13914_v39 = vld [vmem:[#allocation19_spill] sm:$0xff]  ;;  %v13919_v3 = vld [vmem:[#allocation22_spill] sm:$0xff]  ;;  %v5797_v49 = vrot.slane %v5796_v18, 2 }
 0x6ed   :  { %6424 = vst [vmem:[#allocation10 + $0x152] sm:$0xff] %v5765_v22  ;;  %v13913_v5 = vld [vmem:[#allocation16_spill] sm:$0xff]  ;;  %v5810_v53 = vsel %vm5747_vm6, %v13915_v52, %v13914_v39  ;;  %v13916_v22 = vld [vmem:[#allocation17_spill] sm:$0xff]  ;;  %v5804_v31 = vsel %vm5751_vm8, %v5802_v6, %v5803_v8  ;;  %v13918_v47 = vld [vmem:[#allocation23_spill] sm:$0xff]  ;;  %v5801_v8 = vrot.slane %v5800_v19, 2 }
 0x6ee   :  { %v5807_v42 = vsel %vm5749_vm7, %v13913_v5, %v13912_v63  ;;  %6425 = vst [vmem:[#allocation10 + $0x15a] sm:$0xff] %v5769_v48  ;;  %v13917_v38 = vld [vmem:[#allocation20_spill] sm:$0xff]  ;;  %v5814_v63 = vsel %vm5747_vm6, %v13919_v3, %v13918_v47  ;;  %v13920_v48 = vld [vmem:[#allocation21_spill] sm:$0xff]  ;;  %v13922_v39 = vld [vmem:[#allocation27_spill] sm:$0xff] }
 0x6ef   :  { %v5811_v17 = vsel %vm5749_vm7, %v13917_v38, %v13916_v22  ;;  %6426 = vst [vmem:[#allocation10 + $0x162] sm:$0xff] %v5773_v4  ;;  %v13921_v10 = vld [vmem:[#allocation24_spill] sm:$0xff]  ;;  %v5808_v52 = vsel %vm5751_vm8, %v5806_v59, %v5807_v42  ;;  %v13923_v5 = vld [vmem:[#allocation26_spill] sm:$0xff]  ;;  %v13924_v4 = vld [vmem:[#allocation25_spill] sm:$0xff]  ;;  %v5805_v42 = vrot.slane %v5804_v31, 2 }
 0x6f0   :  { %v5815_v35 = vsel %vm5749_vm7, %v13921_v10, %v13920_v48  ;;  %6427 = vst [vmem:[#allocation10 + $0x16a] sm:$0xff] %v5777_v36  ;;  %v5818_v22 = vsel %vm5747_vm6, %v13923_v5, %v13922_v39  ;;  %v13925_v14 = vld [vmem:[#allocation28_spill] sm:$0xff]  ;;  %v5812_v3 = vsel %vm5751_vm8, %v5810_v53, %v5811_v17  ;;  %v13926_v47 = vld [vmem:[#allocation31_spill] sm:$0xff]  ;;  %v13927_v38 = vld [vmem:[#allocation30_spill] sm:$0xff]  ;;  %v5809_v17 = vrot.slane %v5808_v52, 2 }
 0x6f1   :  { %v5819_v6 = vsel %vm5749_vm7, %v13925_v14, %v13924_v4  ;;  %6428 = vst [vmem:[#allocation10 + $0x172] sm:$0xff] %v5781_v32  ;;  %v5822_v48 = vsel %vm5747_vm6, %v13927_v38, %v13926_v47  ;;  %v13928_v36 = vld [vmem:[#allocation29_spill] sm:$0xff]  ;;  %v13929_v18 = vld [vmem:[#allocation32_spill] sm:$0xff]  ;;  %v5816_v5 = vsel %vm5751_vm8, %v5814_v63, %v5815_v35  ;;  %v13930_v39 = vld [vmem:[#allocation35_spill] sm:$0xff]  ;;  %v5813_v63 = vrot.slane %v5812_v3, 2 }
 0x6f2   :  { %v5823_v59 = vsel %vm5749_vm7, %v13929_v18, %v13928_v36  ;;  %6429 = vst [vmem:[#allocation10 + $0x17a] sm:$0xff] %v5785_v1  ;;  %v13931_v10 = vld [vmem:[#allocation34_spill] sm:$0xff]  ;;  %v13932_v32 = vld [vmem:[#allocation147_spill] sm:$0xff]  ;;  %v13933_v19 = vld [vmem:[#allocation33_spill] sm:$0xff]  ;;  %v5820_v38 = vsel %vm5751_vm8, %v5818_v22, %v5819_v6  ;;  %v5817_v6 = vrot.slane %v5816_v5, 2  ;;  %v5843_v5 = vsel %vm5749_vm7, %v11142_v24, %v13822_v43 }
 0x6f3   :  { %v5826_v4 = vsel %vm5747_vm6, %v13931_v10, %v13930_v39  ;;  %v5827_v53 = vsel %vm5749_vm7, %v13933_v19, %v13932_v32  ;;  %6430 = vst [vmem:[#allocation10 + $0x182] sm:$0xff] %v5789_v29  ;;  %v13934_v47 = vld [vmem:[#allocation38_spill] sm:$0xff]  ;;  %v13935_v14 = vld [vmem:[#allocation36_spill] sm:$0xff]  ;;  %v13936_v31 = vld [vmem:[#allocation37_spill] sm:$0xff]  ;;  %v5824_v35 = vsel %vm5751_vm8, %v5822_v48, %v5823_v59  ;;  %v5821_v48 = vrot.slane %v5820_v38, 2 }
 0x6f4   :  { %v5830_v36 = vsel %vm5747_vm6, %v13935_v14, %v13934_v47  ;;  %v5831_v1 = vsel %vm5749_vm7, %v13936_v31, %v13809_v40  ;;  %6431 = vst [vmem:[#allocation10 + $0x18a] sm:$0xff] %v5793_v57  ;;  %v13937_v10 = vld [vmem:[#allocation40_spill] sm:$0xff]  ;;  %v13938_v29 = vld [vmem:[#allocation43_spill] sm:$0xff]  ;;  %v13939_v52 = vld [vmem:[#allocation41_spill] sm:$0xff]  ;;  %v5828_v14 = vsel %vm5751_vm8, %v5826_v4, %v5827_v53  ;;  %v5846_v53 = vsel %vm5747_vm6, %v13824_v21, %v13823_v15 }
 0x6f5   :  { %v5834_v32 = vsel %vm5747_vm6, %v13937_v10, %v13810_v34  ;;  %v5835_v22 = vsel %vm5749_vm7, %v13939_v52, %v13938_v29  ;;  %6432 = vst [vmem:[#allocation10 + $0x192] sm:$0xff] %v5797_v49  ;;  %v13940_v47 = vld [vmem:[#allocation46_spill] sm:$0xff]  ;;  %v13941_v19 = vld [vmem:[#allocation44_spill] sm:$0xff]  ;;  %v13942_v3 = vld [vmem:[#allocation45_spill] sm:$0xff]  ;;  %v5832_v59 = vsel %vm5751_vm8, %v5830_v36, %v5831_v1  ;;  %v5842_v29 = vsel %vm5747_vm6, %v13821_v11, %v11136_v55 }
 0x6f6   :  { %v5838_v40 = vsel %vm5747_vm6, %v13941_v19, %v13940_v47  ;;  %v5839_v57 = vsel %vm5749_vm7, %v13942_v3, %v13820_v44  ;;  %6433 = vst [vmem:[#allocation10 + $0x19a] sm:$0xff] %v5801_v8  ;;  %v5825_v49 = vrot.slane %v5824_v35, 2  ;;  %v5836_v4 = vsel %vm5751_vm8, %v5834_v32, %v5835_v22  ;;  %v13943_v1 = vld [vmem:[#allocation148_spill] sm:$0xff]  ;;  %v13946_v35 = vld [vmem:[#allocation58_spill] sm:$0xff]  ;;  %v13948_v24 = vld [vmem:[#allocation59_spill] sm:$0xff] }
 0x6f7   :  { %6434 = vst [vmem:[#allocation10 + $0x1a2] sm:$0xff] %v5805_v42  ;;  %v5847_v38 = vsel %vm5749_vm7, %v11151_v26, %v13825_v46  ;;  %v5829_v8 = vrot.slane %v5828_v14, 2  ;;  %v5840_v36 = vsel %vm5751_vm8, %v5838_v40, %v5839_v57  ;;  %v13944_v11 = vld [vmem:[#allocation56_spill] sm:$0xff]  ;;  %v13945_v42 = vld [vmem:[#allocation149_spill] sm:$0xff]  ;;  %v5833_v22 = vrot.slane %v5832_v59, 2  ;;  %v13947_v15 = vld [vmem:[#allocation150_spill] sm:$0xff] }
 0x6f8   :  { %6435 = vst [vmem:[#allocation10 + $0x1aa] sm:$0xff] %v5809_v17  ;;  %v5850_v43 = vsel %vm5747_vm6, %v13944_v11, %v13943_v1  ;;  %v5851_v32 = vsel %vm5749_vm7, %v13946_v35, %v13945_v42  ;;  %v5844_v21 = vsel %vm5751_vm8, %v5842_v29, %v5843_v5  ;;  %v5854_v46 = vsel %vm5747_vm6, %v13948_v24, %v13947_v15  ;;  %v13949_v17 = vld [vmem:[#allocation57_spill] sm:$0xff]  ;;  %v13950_v14 = vld [vmem:[#allocation60_spill] sm:$0xff]  ;;  %v13951_v1 = vld [vmem:[#allocation151_spill] sm:$0xff] }
 0x6f9   :  { %6436 = vst [vmem:[#allocation10 + $0x1b2] sm:$0xff] %v5813_v63  ;;  %v5855_v40 = vsel %vm5749_vm7, %v13950_v14, %v13949_v17  ;;  %v5837_v57 = vrot.slane %v5836_v4, 2  ;;  %v5848_v11 = vsel %vm5751_vm8, %v5846_v53, %v5847_v38  ;;  %v13952_v26 = vld [vmem:[#allocation62_spill] sm:$0xff]  ;;  %v13953_v63 = vld [vmem:[#allocation152_spill] sm:$0xff]  ;;  %v13954_v59 = vld [vmem:[#allocation153_spill] sm:$0xff]  ;;  %v5841_v5 = vrot.slane %v5840_v36, 2 }
 0x6fa   :  { %6437 = vst [vmem:[#allocation10 + $0x1ba] sm:$0xff] %v5817_v6  ;;  %v5858_v42 = vsel %vm5747_vm6, %v13952_v26, %v13951_v1  ;;  %v5859_v29 = vsel %vm5749_vm7, %v13954_v59, %v13953_v63  ;;  %v5852_v24 = vsel %vm5751_vm8, %v5850_v43, %v5851_v32  ;;  %v13955_v15 = vld [vmem:[#allocation154_spill] sm:$0xff]  ;;  %v13956_v35 = vld [vmem:[#allocation63_spill] sm:$0xff]  ;;  %v13957_v6 = vld [vmem:[#allocation156_spill] sm:$0xff]  ;;  %v5845_v53 = vrot.slane %v5844_v21, 2 }
 0x6fb   :  { %6438 = vst [vmem:[#allocation10 + $0x1c2] sm:$0xff] %v5821_v48  ;;  %v5862_v17 = vsel %vm5747_vm6, %v13956_v35, %v13955_v15  ;;  %v5863_v4 = vsel %vm5749_vm7, %v13957_v6, %v13830_v9  ;;  %v5856_v38 = vsel %vm5751_vm8, %v5854_v46, %v5855_v40  ;;  %v5866_v63 = vsel %vm5747_vm6, %v13838_v23, %v11190_v33 }
 0x6fc   :  { %6439 = vst [vmem:[#allocation10 + $0x1ca] sm:$0xff] %v5825_v49  ;;  %v5867_v43 = vsel %vm5749_vm7, %v11196_v30, %v11193_v41  ;;  %v5849_v48 = vrot.slane %v5848_v11, 2  ;;  %v5860_v36 = vsel %vm5751_vm8, %v5858_v42, %v5859_v29  ;;  %v5870_v32 = vsel %vm5747_vm6, %v13839_v7, %v11199_v2  ;;  %v13958_v11 = vld [vmem:[#allocation164_spill] sm:$0xff]  ;;  %v13959_v7 = vld [vmem:[#allocation165_spill] sm:$0xff] }
 0x6fd   :  { %6440 = vst [vmem:[#allocation10 + $0x1d2] sm:$0xff] %v5829_v8  ;;  %v5871_v21 = vsel %vm5749_vm7, %v11205_v27, %v11202_v62  ;;  %v5853_v46 = vrot.slane %v5852_v24, 2  ;;  %v5864_v49 = vsel %vm5751_vm8, %v5862_v17, %v5863_v4  ;;  %v5874_v40 = vsel %vm5747_vm6, %v13840_v50, %v11208_v60  ;;  %v13960_v2 = vld [vmem:[#allocation65_spill] sm:$0xff]  ;;  %v13962_v24 = vld [vmem:[#allocation167_spill] sm:$0xff]  ;;  %v13963_v60 = vld [vmem:[#allocation168_spill] sm:$0xff] }
 0x6fe   :  { %6441 = vst [vmem:[#allocation10 + $0x1da] sm:$0xff] %v5833_v22  ;;  %v5875_v8 = vsel %vm5749_vm7, %v13958_v11, %v11211_v28  ;;  %v5857_v42 = vrot.slane %v5856_v38, 2  ;;  %v5868_v29 = vsel %vm5751_vm8, %v5866_v63, %v5867_v43  ;;  %v5878_v62 = vsel %vm5747_vm6, %v13960_v2, %v13959_v7  ;;  %v13961_v22 = vld [vmem:[#allocation166_spill] sm:$0xff]  ;;  %v13964_v27 = vld [vmem:[#allocation68_spill] sm:$0xff]  ;;  %v13967_v7 = vld [vmem:[#allocation171_spill] sm:$0xff] }
 0x6ff   :  { %6442 = vst [vmem:[#allocation10 + $0x1e2] sm:$0xff] %v5837_v57  ;;  %v5879_v17 = vsel %vm5749_vm7, %v13962_v24, %v13961_v22  ;;  %v5861_v4 = vrot.slane %v5860_v36, 2  ;;  %v5872_v50 = vsel %vm5751_vm8, %v5870_v32, %v5871_v21  ;;  %v5882_v28 = vsel %vm5747_vm6, %v13964_v27, %v13963_v60  ;;  %v13965_v57 = vld [vmem:[#allocation169_spill] sm:$0xff]  ;;  %v13966_v38 = vld [vmem:[#allocation170_spill] sm:$0xff]  ;;  %v13970_v36 = vld [vmem:[#allocation71_spill] sm:$0xff] }
 0x700   :  { %6443 = vst [vmem:[#allocation10 + $0x1ea] sm:$0xff] %v5841_v5  ;;  %v5883_v63 = vsel %vm5749_vm7, %v13966_v38, %v13965_v57  ;;  %v5865_v43 = vrot.slane %v5864_v49, 2  ;;  %v5876_v2 = vsel %vm5751_vm8, %v5874_v40, %v5875_v8  ;;  %v13968_v11 = vld [vmem:[#allocation70_spill] sm:$0xff]  ;;  %v13969_v5 = vld [vmem:[#allocation69_spill] sm:$0xff]  ;;  %v5869_v21 = vrot.slane %v5868_v29, 2 }
 0x701   :  { %6444 = vst [vmem:[#allocation10 + $0x1f2] sm:$0xff] %v5845_v53  ;;  %v5886_v22 = vsel %vm5747_vm6, %v13968_v11, %v13967_v7  ;;  %v5887_v32 = vsel %vm5749_vm7, %v13970_v36, %v13969_v5  ;;  %v5880_v27 = vsel %vm5751_vm8, %v5878_v62, %v5879_v17  ;;  %v13971_v60 = vld [vmem:[#allocation74_spill] sm:$0xff]  ;;  %v13972_v24 = vld [vmem:[#allocation73_spill] sm:$0xff]  ;;  %v13973_v53 = vld [vmem:[#allocation72_spill] sm:$0xff]  ;;  %v5873_v40 = vrot.slane %v5872_v50, 2 }
 0x702   :  { %6445 = vst [vmem:[#allocation10 + $0x1fa] sm:$0xff] %v5849_v48  ;;  %v5890_v57 = vsel %vm5747_vm6, %v13972_v24, %v13971_v60  ;;  %v5891_v49 = vsel %vm5749_vm7, %v13973_v53, %v11400_v25  ;;  %v5884_v8 = vsel %vm5751_vm8, %v5882_v28, %v5883_v63  ;;  %v5894_v5 = vsel %vm5747_vm6, %v13857_v20, %v11450_v56 }
 0x703   :  { %6446 = vst [vmem:[#allocation10 + $0x202] sm:$0xff] %v5853_v46  ;;  %v5895_v62 = vsel %vm5749_vm7, %v11456_v61, %v11453_v51  ;;  %v5877_v48 = vrot.slane %v5876_v2, 2  ;;  %v5888_v29 = vsel %vm5751_vm8, %v5886_v22, %v5887_v32  ;;  %v5898_v17 = vsel %vm5747_vm6, %v13860_v12, %v11460_v37  ;;  %v13975_v2 = vld [vmem:[#allocation84_spill] sm:$0xff] }
 0x704   :  { %6447 = vst [vmem:[#allocation10 + $0x20a] sm:$0xff] %v5857_v42  ;;  %v5899_v28 = vsel %vm5749_vm7, %v11513_v58, %v11510_v45  ;;  %v5881_v50 = vrot.slane %v5880_v27, 2  ;;  %v5892_v46 = vsel %vm5751_vm8, %v5890_v57, %v5891_v49  ;;  %v5902_v63 = vsel %vm5747_vm6, %v13864_v16, %v11516_v0  ;;  %v13974_v42 = vld [vmem:[#allocation85_spill] sm:$0xff]  ;;  %v13977_v27 = vld [vmem:[#allocation86_spill] sm:$0xff]  ;;  %v13979_v58 = vld [vmem:[#allocation136_spill] sm:$0xff] }
 0x705   :  { %6448 = vst [vmem:[#allocation10 + $0x212] sm:$0xff] %v5861_v4  ;;  %v5903_v22 = vsel %vm5749_vm7, %v13975_v2, %v13974_v42  ;;  %v5885_v32 = vrot.slane %v5884_v8, 2  ;;  %v5896_v12 = vsel %vm5751_vm8, %v5894_v5, %v5895_v62  ;;  %v5889_v37 = vrot.slane %v5888_v29, 2  ;;  %v13976_v4 = vld [vmem:[#allocation135_spill] sm:$0xff]  ;;  %v13978_v49 = vld [vmem:[#allocation137_spill] sm:$0xff] }
 0x706   :  { %6449 = vst [vmem:[#allocation10 + $0x21a] sm:$0xff] %v5865_v43  ;;  %v5900_v45 = vsel %vm5751_vm8, %v5898_v17, %v5899_v28  ;;  %v5907_v57 = vsel %vm5630_vm5, %v13977_v27, %v13976_v4  ;;  %v5908_v16 = vsel %vm1894_vm2, %v13979_v58, %v13978_v49  ;;  %v5893_v0 = vrot.slane %v5892_v46, 2  ;;  %v13980_v43 = vld [vmem:[#allocation138_spill] sm:$0xff]  ;;  %v13981_v8 = vld [vmem:[#allocation131_spill] sm:$0xff]  ;;  %v13984_v28 = vld [vmem:[#allocation141_spill] sm:$0xff] }
 0x707   :  { %6450 = vst [vmem:[#allocation10 + $0x222] sm:$0xff] %v5869_v21  ;;  %v5904_v42 = vsel %vm5751_vm8, %v5902_v63, %v5903_v22  ;;  %v5911_v5 = vsel %vm5630_vm5, %v13981_v8, %v13980_v43  ;;  %v13982_v21 = vld [vmem:[#allocation140_spill] sm:$0xff]  ;;  %v13983_v62 = vld [vmem:[#allocation139_spill] sm:$0xff]  ;;  %v5897_v17 = vrot.slane %v5896_v12, 2  ;;  %v13986_v58 = vld [vmem:[#allocation142_spill] sm:$0xff]  ;;  %v5901_v46 = vrot.slane %v5900_v45, 2 }
 0x708   :  { %6451 = vst [vmem:[#allocation10 + $0x22a] sm:$0xff] %v5873_v40  ;;  %v5912_v29 = vsel %vm1894_vm2, %v13983_v62, %v13982_v21  ;;  %v13985_v4 = vld [vmem:[#allocation132_spill] sm:$0xff]  ;;  %v5916_v40 = vsel %vm1894_vm2, %v13986_v58, %v10953_v13  ;;  %v5909_v63 = vsel %vm95_vm0, %v5908_v16, %v5907_v57  ;;  %v13988_v43 = vld [vmem:[#allocation87_spill] sm:$0xff]  ;;  %v13989_v49 = vld [vmem:[#allocation146_spill] sm:$0xff] }
 0x709   :  { %6452 = vst [vmem:[#allocation10 + $0x232] sm:$0xff] %v5877_v48  ;;  %v5915_v27 = vsel %vm5630_vm5, %v13985_v4, %v13984_v28  ;;  %v13987_v22 = vld [vmem:[#allocation144_spill] sm:$0xff]  ;;  %v13990_v62 = vld [vmem:[#allocation145_spill] sm:$0xff]  ;;  %v5905_v48 = vrot.slane %v5904_v42, 2  ;;  %v5913_v28 = vsel %vm95_vm0, %v5912_v29, %v5911_v5  ;;  %v13993_v45 = vld [vmem:[#allocation90_spill] sm:$0xff]  ;;  %v5910_v29 = vrot.slane %v5909_v63, 4 }
 0x70a   :  { %6453 = vst [vmem:[#allocation10 + $0x23a] sm:$0xff] %v5881_v50  ;;  %v5919_v8 = vsel %vm5630_vm5, %v13988_v43, %v13987_v22  ;;  %v5920_v12 = vsel %vm1894_vm2, %v13990_v62, %v13989_v49  ;;  %v13991_v4 = vld [vmem:[#allocation89_spill] sm:$0xff]  ;;  %v13992_v21 = vld [vmem:[#allocation88_spill] sm:$0xff]  ;;  %v5924_v16 = vsel %vm1894_vm2, %v13993_v45, %v13873_v54  ;;  %v13994_v50 = vld [vmem:[#allocation78_spill] sm:$0xff]  ;;  %v5917_v22 = vsel %vm95_vm0, %v5916_v40, %v5915_v27 }
 0x70b   :  { %6454 = vst [vmem:[#allocation10 + $0x242] sm:$0xff] %v5885_v32  ;;  %v5923_v58 = vsel %vm5630_vm5, %v13992_v21, %v13991_v4  ;;  %v5906_v57 = vrot.slane %v13994_v50, 2  ;;  %v13995_v43 = vld [vmem:[#allocation94_spill] sm:$0xff]  ;;  %v13996_v13 = vld [vmem:[#allocation91_spill] sm:$0xff]  ;;  %v13998_v62 = vld [vmem:[#allocation93_spill] sm:$0xff]  ;;  %v5921_v4 = vsel %vm95_vm0, %v5920_v12, %v5919_v8  ;;  %v5914_v40 = vrot.slane %v5913_v28, 4 }
 0x70c   :  { %6455 = vst [vmem:[#allocation10 + $0x24a] sm:$0xff] %v5889_v37  ;;  %v5927_v32 = vsel %vm5630_vm5, %v13996_v13, %v13995_v43  ;;  %v13997_v42 = vld [vmem:[#allocation95_spill] sm:$0xff]  ;;  %v13999_v21 = vld [vmem:[#allocation96_spill] sm:$0xff]  ;;  %v14000_v49 = vld [vmem:[#allocation97_spill] sm:$0xff]  ;;  %v5925_v43 = vsel %vm95_vm0, %v5924_v16, %v5923_v58  ;;  %v5918_v12 = vrot.slane %v5917_v22, 4  ;;  %v5922_v16 = vrot.slane %v5921_v4, 4 }
 0x70d   :  { %v5928_v5 = vsel %vm1894_vm2, %v13998_v62, %v13997_v42  ;;  %6456 = vst [vmem:[#allocation10 + $0x252] sm:$0xff] %v5893_v0  ;;  %v5931_v37 = vsel %vm5630_vm5, %v14000_v49, %v13999_v21  ;;  %v14001_v45 = vld [vmem:[#allocation99_spill] sm:$0xff]  ;;  %v14002_v50 = vld [vmem:[#allocation98_spill] sm:$0xff]  ;;  %v14004_v54 = vld [vmem:[#allocation101_spill] sm:$0xff] }
 0x70e   :  { %v5932_v27 = vsel %vm1894_vm2, %v14002_v50, %v14001_v45  ;;  %6457 = vst [vmem:[#allocation10 + $0x25a] sm:$0xff] %v5897_v17  ;;  %v14003_v13 = vld [vmem:[#allocation102_spill] sm:$0xff]  ;;  %v14005_v0 = vld [vmem:[#allocation103_spill] sm:$0xff]  ;;  %v14006_v63 = vld [vmem:[#allocation100_spill] sm:$0xff]  ;;  %v5929_v21 = vsel %vm95_vm0, %v5928_v5, %v5927_v32  ;;  %v5926_v5 = vrot.slane %v5925_v43, 4 }
 0x70f   :  { %v5935_v62 = vsel %vm5630_vm5, %v14004_v54, %v14003_v13  ;;  %v5936_v8 = vsel %vm1894_vm2, %v14006_v63, %v14005_v0  ;;  %6458 = vst [vmem:[#allocation10 + $0x262] sm:$0xff] %v5901_v46  ;;  %v14007_v49 = vld [vmem:[#allocation104_spill] sm:$0xff]  ;;  %v14008_v42 = vld [vmem:[#allocation105_spill] sm:$0xff]  ;;  %v14009_v17 = vld [vmem:[#allocation107_spill] sm:$0xff]  ;;  %v5933_v13 = vsel %vm95_vm0, %v5932_v27, %v5931_v37  ;;  %v5930_v27 = vrot.slane %v5929_v21, 4 }
 0x710   :  { %v5939_v50 = vsel %vm5630_vm5, %v14008_v42, %v14007_v49  ;;  %v14010_v28 = vld [vmem:[#allocation106_spill] sm:$0xff]  ;;  %6459 = vst [vmem:[#allocation10 + $0x26a] sm:$0xff] %v5905_v48  ;;  %v14012_v45 = vld [vmem:[#allocation109_spill] sm:$0xff]  ;;  %v14013_v46 = vld [vmem:[#allocation111_spill] sm:$0xff]  ;;  %v5937_v49 = vsel %vm95_vm0, %v5936_v8, %v5935_v62  ;;  %v5934_v8 = vrot.slane %v5933_v13, 4 }
 0x711   :  { %v5940_v58 = vsel %vm1894_vm2, %v14010_v28, %v14009_v17  ;;  %v14011_v54 = vld [vmem:[#allocation110_spill] sm:$0xff]  ;;  %v14014_v22 = vld [vmem:[#allocation108_spill] sm:$0xff]  ;;  %6460 = vst.msk [vmem:[#allocation10 + $0x272] sm:$0x3] %vm6419_vm4, %v5906_v57  ;;  %v14016_v0 = vld [vmem:[#allocation113_spill] sm:$0xff] }
 0x712   :  { %v5943_v63 = vsel %vm5630_vm5, %v14012_v45, %v14011_v54  ;;  %v5944_v32 = vsel %vm1894_vm2, %v14014_v22, %v14013_v46  ;;  %v14015_v42 = vld [vmem:[#allocation114_spill] sm:$0xff]  ;;  %v14017_v4 = vld [vmem:[#allocation115_spill] sm:$0xff]  ;;  %v14018_v28 = vld [vmem:[#allocation112_spill] sm:$0xff]  ;;  %6461 = vst [vmem:[#allocation10 + $0x274] sm:$0xff] %v5910_v29  ;;  %v5941_v54 = vsel %vm95_vm0, %v5940_v58, %v5939_v50  ;;  %v5938_v58 = vrot.slane %v5937_v49, 4 }
 0x713   :  { %v5947_v48 = vsel %vm5630_vm5, %v14016_v0, %v14015_v42  ;;  %v5948_v37 = vsel %vm1894_vm2, %v14018_v28, %v14017_v4  ;;  %v14019_v45 = vld [vmem:[#allocation118_spill] sm:$0xff]  ;;  %v14020_v17 = vld [vmem:[#allocation117_spill] sm:$0xff]  ;;  %v14021_v57 = vld [vmem:[#allocation119_spill] sm:$0xff]  ;;  %6462 = vst [vmem:[#allocation10 + $0x27c] sm:$0xff] %v5914_v40  ;;  %v5945_v42 = vsel %vm95_vm0, %v5944_v32, %v5943_v63  ;;  %v5942_v32 = vrot.slane %v5941_v54, 4 }
 0x714   :  { %v5951_v22 = vsel %vm5630_vm5, %v14020_v17, %v14019_v45  ;;  %v14022_v43 = vld [vmem:[#allocation116_spill] sm:$0xff]  ;;  %v14023_v0 = vld [vmem:[#allocation122_spill] sm:$0xff]  ;;  %v14024_v46 = vld [vmem:[#allocation121_spill] sm:$0xff]  ;;  %6463 = vst [vmem:[#allocation10 + $0x284] sm:$0xff] %v5918_v12  ;;  %v5949_v45 = vsel %vm95_vm0, %v5948_v37, %v5947_v48  ;;  %v5946_v37 = vrot.slane %v5945_v42, 4 }
 0x715   :  { %v5952_v62 = vsel %vm1894_vm2, %v14022_v43, %v14021_v57  ;;  %v5955_v28 = vsel %vm5630_vm5, %v14024_v46, %v14023_v0  ;;  %v14025_v29 = vld [vmem:[#allocation123_spill] sm:$0xff]  ;;  %v14026_v21 = vld [vmem:[#allocation120_spill] sm:$0xff]  ;;  %v14027_v17 = vld [vmem:[#allocation126_spill] sm:$0xff]  ;;  %6464 = vst [vmem:[#allocation10 + $0x28c] sm:$0xff] %v5922_v16 }
 0x716   :  { %v5956_v50 = vsel %vm1894_vm2, %v14026_v21, %v14025_v29  ;;  %v14028_v4 = vld [vmem:[#allocation125_spill] sm:$0xff]  ;;  %v14029_v40 = vld [vmem:[#allocation127_spill] sm:$0xff]  ;;  %v14030_v13 = vld [vmem:[#allocation124_spill] sm:$0xff]  ;;  %v5953_v0 = vsel %vm95_vm0, %v5952_v62, %v5951_v22  ;;  %6465 = vst [vmem:[#allocation10 + $0x294] sm:$0xff] %v5926_v5  ;;  %v5950_v62 = vrot.slane %v5949_v45, 4 }
 0x717   :  { %v5959_v43 = vsel %vm5630_vm5, %v14028_v4, %v14027_v17  ;;  %v5960_v63 = vsel %vm1894_vm2, %v14030_v13, %v14029_v40  ;;  %v14031_v46 = vld [vmem:[#allocation15_spill] sm:$0xff]  ;;  %v14032_v57 = vld [vmem:[#allocation129_spill] sm:$0xff]  ;;  %v14033_v12 = vld [vmem:[#allocation16_spill] sm:$0xff]  ;;  %v5957_v17 = vsel %vm95_vm0, %v5956_v50, %v5955_v28  ;;  %6466 = vst [vmem:[#allocation10 + $0x29c] sm:$0xff] %v5930_v27  ;;  %v5954_v50 = vrot.slane %v5953_v0, 4 }
 0x718   :  { %v5963_v21 = vsel %vm5630_vm5, %v14032_v57, %v14031_v46  ;;  %v14034_v49 = vld [vmem:[#allocation128_spill] sm:$0xff]  ;;  %v14035_v4 = vld [vmem:[#allocation19_spill] sm:$0xff]  ;;  %v14036_v29 = vld [vmem:[#allocation18_spill] sm:$0xff]  ;;  %v5961_v46 = vsel %vm95_vm0, %v5960_v63, %v5959_v43  ;;  %6467 = vst [vmem:[#allocation10 + $0x2a4] sm:$0xff] %v5934_v8  ;;  %v5958_v63 = vrot.slane %v5957_v17, 4 }
 0x719   :  { %v5964_v48 = vsel %vm1894_vm2, %v14034_v49, %v14033_v12  ;;  %v5967_v13 = vsel %vm5630_vm5, %v14036_v29, %v14035_v4  ;;  %v14037_v16 = vld [vmem:[#allocation20_spill] sm:$0xff]  ;;  %v14038_v54 = vld [vmem:[#allocation17_spill] sm:$0xff]  ;;  %v14039_v57 = vld [vmem:[#allocation23_spill] sm:$0xff]  ;;  %6468 = vst [vmem:[#allocation10 + $0x2ac] sm:$0xff] %v5938_v58 }
 0x71a   :  { %v5968_v22 = vsel %vm1894_vm2, %v14038_v54, %v14037_v16  ;;  %v14040_v40 = vld [vmem:[#allocation22_spill] sm:$0xff]  ;;  %v14041_v5 = vld [vmem:[#allocation24_spill] sm:$0xff]  ;;  %v14042_v42 = vld [vmem:[#allocation21_spill] sm:$0xff]  ;;  %v5965_v4 = vsel %vm95_vm0, %v5964_v48, %v5963_v21  ;;  %6469 = vst [vmem:[#allocation10 + $0x2b4] sm:$0xff] %v5942_v32  ;;  %v5962_v21 = vrot.slane %v5961_v46, 4 }
 0x71b   :  { %v5971_v49 = vsel %vm5630_vm5, %v14040_v40, %v14039_v57  ;;  %v5972_v28 = vsel %vm1894_vm2, %v14042_v42, %v14041_v5  ;;  %v14043_v29 = vld [vmem:[#allocation27_spill] sm:$0xff]  ;;  %v14044_v12 = vld [vmem:[#allocation26_spill] sm:$0xff]  ;;  %v14045_v27 = vld [vmem:[#allocation28_spill] sm:$0xff]  ;;  %v5969_v57 = vsel %vm95_vm0, %v5968_v22, %v5967_v13  ;;  %6470 = vst [vmem:[#allocation10 + $0x2bc] sm:$0xff] %v5946_v37  ;;  %v5966_v22 = vrot.slane %v5965_v4, 4 }
 0x71c   :  { %v5975_v54 = vsel %vm5630_vm5, %v14044_v12, %v14043_v29  ;;  %v14046_v45 = vld [vmem:[#allocation25_spill] sm:$0xff]  ;;  %v14047_v40 = vld [vmem:[#allocation31_spill] sm:$0xff]  ;;  %v14048_v16 = vld [vmem:[#allocation30_spill] sm:$0xff]  ;;  %v5973_v48 = vsel %vm95_vm0, %v5972_v28, %v5971_v49  ;;  %6471 = vst [vmem:[#allocation10 + $0x2c4] sm:$0xff] %v5950_v62  ;;  %v5970_v49 = vrot.slane %v5969_v57, 4  ;;  %v5996_v57 = vsel %vm1894_vm2, %v13820_v44, %v13942_v3 }
 0x71d   :  { %v5976_v43 = vsel %vm1894_vm2, %v14046_v45, %v14045_v27  ;;  %v5979_v42 = vsel %vm5630_vm5, %v14048_v16, %v14047_v40  ;;  %v14049_v0 = vld [vmem:[#allocation29_spill] sm:$0xff]  ;;  %v14050_v29 = vld [vmem:[#allocation34_spill] sm:$0xff]  ;;  %v14052_v17 = vld [vmem:[#allocation147_spill] sm:$0xff]  ;;  %6472 = vst [vmem:[#allocation10 + $0x2cc] sm:$0xff] %v5954_v50 }
 0x71e   :  { %v5980_v8 = vsel %vm1894_vm2, %v14049_v0, %v13929_v18  ;;  %v5983_v45 = vsel %vm5630_vm5, %v14050_v29, %v13930_v39  ;;  %v14051_v58 = vld [vmem:[#allocation33_spill] sm:$0xff]  ;;  %v5977_v40 = vsel %vm95_vm0, %v5976_v43, %v5975_v54  ;;  %v14053_v16 = vld [vmem:[#allocation38_spill] sm:$0xff]  ;;  %v14054_v27 = vld [vmem:[#allocation36_spill] sm:$0xff]  ;;  %v5974_v54 = vrot.slane %v5973_v48, 4  ;;  %6473 = vst [vmem:[#allocation10 + $0x2d4] sm:$0xff] %v5958_v63 }
 0x71f   :  { %v5984_v13 = vsel %vm1894_vm2, %v14052_v17, %v14051_v58  ;;  %v5987_v0 = vsel %vm5630_vm5, %v14054_v27, %v14053_v16  ;;  %v14055_v46 = vld [vmem:[#allocation39_spill] sm:$0xff]  ;;  %v5981_v28 = vsel %vm95_vm0, %v5980_v8, %v5979_v42  ;;  %v5991_v17 = vsel %vm5630_vm5, %v13937_v10, %v13810_v34  ;;  %v14057_v8 = vld [vmem:[#allocation48_spill] sm:$0xff]  ;;  %v14058_v50 = vld [vmem:[#allocation49_spill] sm:$0xff]  ;;  %6474 = vst [vmem:[#allocation10 + $0x2dc] sm:$0xff] %v5962_v21 }
 0x720   :  { %v5988_v32 = vsel %vm1894_vm2, %v14055_v46, %v13936_v31  ;;  %v14056_v4 = vld [vmem:[#allocation43_spill] sm:$0xff]  ;;  %v5985_v43 = vsel %vm95_vm0, %v5984_v13, %v5983_v45  ;;  %v5995_v46 = vsel %vm5630_vm5, %v13941_v19, %v13940_v47  ;;  %v5978_v62 = vrot.slane %v5977_v40, 4  ;;  %v14060_v19 = vld [vmem:[#allocation54_spill] sm:$0xff]  ;;  %v14062_v63 = vld [vmem:[#allocation53_spill] sm:$0xff]  ;;  %6475 = vst [vmem:[#allocation10 + $0x2e4] sm:$0xff] %v5966_v22 }
 0x721   :  { %v5992_v37 = vsel %vm1894_vm2, %v14056_v4, %v13939_v52  ;;  %v5989_v42 = vsel %vm95_vm0, %v5988_v32, %v5987_v0  ;;  %v5999_v4 = vsel %vm5630_vm5, %v14057_v8, %v11136_v55  ;;  %v14059_v48 = vld [vmem:[#allocation51_spill] sm:$0xff]  ;;  %v5982_v13 = vrot.slane %v5981_v28, 4  ;;  %v14061_v52 = vld [vmem:[#allocation52_spill] sm:$0xff]  ;;  %v14066_v21 = vld [vmem:[#allocation58_spill] sm:$0xff]  ;;  %6476 = vst [vmem:[#allocation10 + $0x2ec] sm:$0xff] %v5970_v49 }
 0x722   :  { %v6000_v45 = vsel %vm1894_vm2, %v14059_v48, %v14058_v50  ;;  %v5993_v47 = vsel %vm95_vm0, %v5992_v37, %v5991_v17  ;;  %v6003_v44 = vsel %vm5630_vm5, %v14061_v52, %v14060_v19  ;;  %v14063_v40 = vld [vmem:[#allocation55_spill] sm:$0xff]  ;;  %v5986_v32 = vrot.slane %v5985_v43, 4  ;;  %v14064_v8 = vld [vmem:[#allocation148_spill] sm:$0xff]  ;;  %v14067_v28 = vld [vmem:[#allocation149_spill] sm:$0xff]  ;;  %6477 = vst [vmem:[#allocation10 + $0x2f4] sm:$0xff] %v5974_v54 }
 0x723   :  { %v6004_v0 = vsel %vm1894_vm2, %v14063_v40, %v14062_v63  ;;  %v5997_v55 = vsel %vm95_vm0, %v5996_v57, %v5995_v46  ;;  %v14065_v3 = vld [vmem:[#allocation56_spill] sm:$0xff]  ;;  %v6008_v17 = vsel %vm1894_vm2, %v14067_v28, %v14066_v21  ;;  %v5990_v37 = vrot.slane %v5989_v42, 4  ;;  %v14068_v52 = vld [vmem:[#allocation150_spill] sm:$0xff]  ;;  %v14069_v50 = vld [vmem:[#allocation59_spill] sm:$0xff]  ;;  %6478 = vst [vmem:[#allocation10 + $0x2fc] sm:$0xff] %v5978_v62 }
 0x724   :  { %v6007_v48 = vsel %vm5630_vm5, %v14065_v3, %v14064_v8  ;;  %v6001_v19 = vsel %vm95_vm0, %v6000_v45, %v5999_v4  ;;  %v6011_v40 = vsel %vm5630_vm5, %v14069_v50, %v14068_v52  ;;  %v14070_v22 = vld [vmem:[#allocation57_spill] sm:$0xff]  ;;  %v5994_v43 = vrot.slane %v5993_v47, 4  ;;  %v14071_v49 = vld [vmem:[#allocation152_spill] sm:$0xff]  ;;  %6479 = vst [vmem:[#allocation10 + $0x304] sm:$0xff] %v5982_v13  ;;  %v14074_v13 = vld [vmem:[#allocation66_spill] sm:$0xff] }
 0x725   :  { %v6012_v46 = vsel %vm1894_vm2, %v14070_v22, %v13950_v14  ;;  %v6005_v57 = vsel %vm95_vm0, %v6004_v0, %v6003_v44  ;;  %v6015_v28 = vsel %vm5630_vm5, %v13952_v26, %v13951_v1  ;;  %v6016_v4 = vsel %vm1894_vm2, %v14071_v49, %v13954_v59  ;;  %6480 = vst [vmem:[#allocation10 + $0x30c] sm:$0xff] %v5986_v32  ;;  %v14078_v32 = vld [vmem:[#allocation164_spill] sm:$0xff] }
 0x726   :  { %v5998_v42 = vrot.slane %v5997_v55, 4  ;;  %v6009_v45 = vsel %vm95_vm0, %v6008_v17, %v6007_v48  ;;  %v6019_v22 = vsel %vm5630_vm5, %v13956_v35, %v13955_v15  ;;  %v6020_v47 = vsel %vm1894_vm2, %v13830_v9, %v13957_v6  ;;  %v14072_v17 = vld [vmem:[#allocation160_spill] sm:$0xff]  ;;  %6481 = vst [vmem:[#allocation10 + $0x314] sm:$0xff] %v5990_v37  ;;  %v14077_v6 = vld [vmem:[#allocation67_spill] sm:$0xff] }
 0x727   :  { %v6002_v44 = vrot.slane %v6001_v19, 4  ;;  %v6013_v54 = vsel %vm95_vm0, %v6012_v46, %v6011_v40  ;;  %v6023_v0 = vsel %vm5630_vm5, %v13838_v23, %v11190_v33  ;;  %v6024_v55 = vsel %vm1894_vm2, %v11193_v41, %v11196_v30  ;;  %v14073_v15 = vld [vmem:[#allocation64_spill] sm:$0xff]  ;;  %v14075_v19 = vld [vmem:[#allocation161_spill] sm:$0xff]  ;;  %v14076_v23 = vld [vmem:[#allocation162_spill] sm:$0xff]  ;;  %6482 = vst [vmem:[#allocation10 + $0x31c] sm:$0xff] %v5994_v43 }
 0x728   :  { %v6006_v62 = vrot.slane %v6005_v57, 4  ;;  %v6017_v48 = vsel %vm95_vm0, %v6016_v4, %v6015_v28  ;;  %v6027_v9 = vsel %vm5630_vm5, %v14073_v15, %v14072_v17  ;;  %v6028_v40 = vsel %vm1894_vm2, %v14075_v19, %v14074_v13  ;;  %v14079_v57 = vld [vmem:[#allocation163_spill] sm:$0xff]  ;;  %v14080_v15 = vld [vmem:[#allocation165_spill] sm:$0xff]  ;;  %6483 = vst [vmem:[#allocation10 + $0x324] sm:$0xff] %v5998_v42  ;;  %v14085_v13 = vld [vmem:[#allocation68_spill] sm:$0xff] }
 0x729   :  { %v6010_v46 = vrot.slane %v6009_v45, 4  ;;  %v6021_v33 = vsel %vm95_vm0, %v6020_v47, %v6019_v22  ;;  %v6031_v41 = vsel %vm5630_vm5, %v14077_v6, %v14076_v23  ;;  %v6032_v28 = vsel %vm1894_vm2, %v14079_v57, %v14078_v32  ;;  %v14081_v30 = vld [vmem:[#allocation65_spill] sm:$0xff]  ;;  %v14082_v37 = vld [vmem:[#allocation167_spill] sm:$0xff]  ;;  %v14083_v45 = vld [vmem:[#allocation166_spill] sm:$0xff]  ;;  %6484 = vst [vmem:[#allocation10 + $0x32c] sm:$0xff] %v6002_v44 }
 0x72a   :  { %v6014_v4 = vrot.slane %v6013_v54, 4  ;;  %v6025_v17 = vsel %vm95_vm0, %v6024_v55, %v6023_v0  ;;  %v6035_v19 = vsel %vm5630_vm5, %v14081_v30, %v14080_v15  ;;  %v6036_v22 = vsel %vm1894_vm2, %v14083_v45, %v14082_v37  ;;  %v14084_v6 = vld [vmem:[#allocation168_spill] sm:$0xff]  ;;  %v14086_v43 = vld [vmem:[#allocation169_spill] sm:$0xff]  ;;  %6485 = vst [vmem:[#allocation10 + $0x334] sm:$0xff] %v6006_v62 }
 0x72b   :  { %v6018_v47 = vrot.slane %v6017_v48, 4  ;;  %v6029_v23 = vsel %vm95_vm0, %v6028_v40, %v6027_v9  ;;  %v6039_v57 = vsel %vm5630_vm5, %v14085_v13, %v14084_v6  ;;  %v6040_v54 = vsel %vm1894_vm2, %v14086_v43, %v13966_v38  ;;  %v14087_v42 = vld [vmem:[#allocation69_spill] sm:$0xff]  ;;  %6486 = vst [vmem:[#allocation10 + $0x33c] sm:$0xff] %v6010_v46  ;;  %v14090_v46 = vld [vmem:[#allocation80_spill] sm:$0xff] }
 0x72c   :  { %v6022_v0 = vrot.slane %v6021_v33, 4  ;;  %v6033_v55 = vsel %vm95_vm0, %v6032_v28, %v6031_v41  ;;  %v6043_v45 = vsel %vm5630_vm5, %v13968_v11, %v13967_v7  ;;  %v6044_v9 = vsel %vm1894_vm2, %v14087_v42, %v13970_v36  ;;  %6487 = vst [vmem:[#allocation10 + $0x344] sm:$0xff] %v6014_v4  ;;  %v14094_v4 = vld [vmem:[#allocation85_spill] sm:$0xff] }
 0x72d   :  { %v6026_v48 = vrot.slane %v6025_v17, 4  ;;  %v6037_v40 = vsel %vm95_vm0, %v6036_v22, %v6035_v19  ;;  %v6047_v43 = vsel %vm5630_vm5, %v13972_v24, %v13971_v60  ;;  %v6048_v33 = vsel %vm1894_vm2, %v11400_v25, %v13973_v53  ;;  %v14088_v22 = vld [vmem:[#allocation79_spill] sm:$0xff]  ;;  %v14089_v60 = vld [vmem:[#allocation82_spill] sm:$0xff]  ;;  %6488 = vst [vmem:[#allocation10 + $0x34c] sm:$0xff] %v6018_v47 }
 0x72e   :  { %v6030_v41 = vrot.slane %v6029_v23, 4  ;;  %v6041_v44 = vsel %vm95_vm0, %v6040_v54, %v6039_v57  ;;  %v6051_v28 = vsel %vm5630_vm5, %v13857_v20, %v11450_v56  ;;  %v6052_v62 = vsel %vm1894_vm2, %v11453_v51, %v11456_v61  ;;  %v14091_v23 = vld [vmem:[#allocation81_spill] sm:$0xff]  ;;  %v14092_v20 = vld [vmem:[#allocation83_spill] sm:$0xff]  ;;  %v14093_v53 = vld [vmem:[#allocation130_spill] sm:$0xff]  ;;  %6489 = vst [vmem:[#allocation10 + $0x354] sm:$0xff] %v6022_v0 }
 0x72f   :  { %v6034_v17 = vrot.slane %v6033_v55, 4  ;;  %v6045_v19 = vsel %vm95_vm0, %v6044_v9, %v6043_v45  ;;  %v6055_v25 = vsel %vm5630_vm5, %v14089_v60, %v14088_v22  ;;  %v6056_v57 = vsel %vm1894_vm2, %v14091_v23, %v14090_v46  ;;  %6490 = vst [vmem:[#allocation10 + $0x35c] sm:$0xff] %v6026_v48  ;;  %v14095_v47 = vld [vmem:[#allocation86_spill] sm:$0xff]  ;;  %v14098_v46 = vld [vmem:[#allocation136_spill] sm:$0xff]  ;;  %v14099_v0 = vld [vmem:[#allocation131_spill] sm:$0xff] }
 0x730   :  { %v6038_v54 = vrot.slane %v6037_v40, 4  ;;  %v6049_v56 = vsel %vm95_vm0, %v6048_v33, %v6047_v43  ;;  %v6059_v51 = vsel %vm5630_vm5, %v14093_v53, %v14092_v20  ;;  %v6060_v45 = vsel %vm1894_vm2, %v14094_v4, %v13975_v2  ;;  %v14096_v40 = vld [vmem:[#allocation135_spill] sm:$0xff]  ;;  %v14097_v33 = vld [vmem:[#allocation137_spill] sm:$0xff]  ;;  %6491 = vst [vmem:[#allocation10 + $0x364] sm:$0xff] %v6030_v41  ;;  %v14101_v48 = vld [vmem:[#allocation140_spill] sm:$0xff] }
 0x731   :  { %v6042_v55 = vrot.slane %v6041_v44, 4  ;;  %v6053_v9 = vsel %vm95_vm0, %v6052_v62, %v6051_v28  ;;  %v6046_v22 = vrot.slane %v6045_v19, 4  ;;  %v6057_v23 = vsel %vm95_vm0, %v6056_v57, %v6055_v25  ;;  %v14100_v44 = vld [vmem:[#allocation138_spill] sm:$0xff]  ;;  %v14102_v62 = vld [vmem:[#allocation139_spill] sm:$0xff]  ;;  %6492 = vst [vmem:[#allocation10 + $0x36c] sm:$0xff] %v6034_v17  ;;  %v14103_v57 = vld [vmem:[#allocation132_spill] sm:$0xff] }
 0x732   :  { %v6064_v43 = vsel %vm5749_vm7, %v14096_v40, %v14095_v47  ;;  %v6065_v20 = vsel %vm5747_vm6, %v14098_v46, %v14097_v33  ;;  %v6050_v53 = vrot.slane %v6049_v56, 4  ;;  %v6061_v4 = vsel %vm95_vm0, %v6060_v45, %v6059_v51  ;;  %v14104_v47 = vld [vmem:[#allocation141_spill] sm:$0xff]  ;;  %v14105_v2 = vld [vmem:[#allocation143_spill] sm:$0xff]  ;;  %v14106_v46 = vld [vmem:[#allocation142_spill] sm:$0xff]  ;;  %6493 = vst [vmem:[#allocation10 + $0x374] sm:$0xff] %v6038_v54 }
 0x733   :  { %v6068_v28 = vsel %vm5749_vm7, %v14100_v44, %v14099_v0  ;;  %v6069_v25 = vsel %vm5747_vm6, %v14102_v62, %v14101_v48  ;;  %v6054_v19 = vrot.slane %v6053_v9, 4  ;;  %v6072_v40 = vsel %vm5749_vm7, %v14104_v47, %v14103_v57  ;;  %v14107_v45 = vld [vmem:[#allocation87_spill] sm:$0xff]  ;;  %v14108_v33 = vld [vmem:[#allocation144_spill] sm:$0xff]  ;;  %v14109_v44 = vld [vmem:[#allocation146_spill] sm:$0xff]  ;;  %6494 = vst [vmem:[#allocation10 + $0x37c] sm:$0xff] %v6042_v55 }
 0x734   :  { %v6073_v56 = vsel %vm5747_vm6, %v14106_v46, %v14105_v2  ;;  %v6058_v51 = vrot.slane %v6057_v23, 4  ;;  %v6066_v41 = vsel %vm5751_vm8, %v6065_v20, %v6064_v43  ;;  %v6076_v0 = vsel %vm5749_vm7, %v14108_v33, %v14107_v45  ;;  %v14110_v48 = vld [vmem:[#allocation145_spill] sm:$0xff]  ;;  %v14111_v57 = vld [vmem:[#allocation88_spill] sm:$0xff]  ;;  %v14114_v23 = vld [vmem:[#allocation90_spill] sm:$0xff]  ;;  %6495 = vst [vmem:[#allocation10 + $0x384] sm:$0xff] %v6046_v22 }
 0x735   :  { %v6077_v17 = vsel %vm5747_vm6, %v14110_v48, %v14109_v44  ;;  %v6062_v9 = vrot.slane %v6061_v4, 4  ;;  %v6070_v62 = vsel %vm5751_vm8, %v6069_v25, %v6068_v28  ;;  %v14112_v47 = vld [vmem:[#allocation89_spill] sm:$0xff]  ;;  %v14113_v54 = vld [vmem:[#allocation92_spill] sm:$0xff]  ;;  %v14115_v43 = vld [vmem:[#allocation78_spill] sm:$0xff]  ;;  %v6074_v45 = vsel %vm5751_vm8, %v6073_v56, %v6072_v40  ;;  %6496 = vst [vmem:[#allocation10 + $0x38c] sm:$0xff] %v6050_v53 }
 0x736   :  { %v6080_v2 = vsel %vm5749_vm7, %v14112_v47, %v14111_v57  ;;  %v6081_v20 = vsel %vm5747_vm6, %v14114_v23, %v14113_v54  ;;  %v6063_v46 = vrot.slane %v14115_v43, 4  ;;  %v14116_v33 = vld [vmem:[#allocation91_spill] sm:$0xff]  ;;  %v14117_v60 = vld [vmem:[#allocation94_spill] sm:$0xff]  ;;  %v14119_v44 = vld [vmem:[#allocation93_spill] sm:$0xff]  ;;  %v6067_v25 = vrot.slane %v6066_v41, 6  ;;  %6497 = vst [vmem:[#allocation10 + $0x394] sm:$0xff] %v6054_v19 }
 0x737   :  { %v6084_v55 = vsel %vm5749_vm7, %v14117_v60, %v14116_v33  ;;  %v14118_v4 = vld [vmem:[#allocation95_spill] sm:$0xff]  ;;  %v6078_v48 = vsel %vm5751_vm8, %v6077_v17, %v6076_v0  ;;  %v14120_v57 = vld [vmem:[#allocation97_spill] sm:$0xff]  ;;  %v14121_v47 = vld [vmem:[#allocation96_spill] sm:$0xff]  ;;  %v6071_v56 = vrot.slane %v6070_v62, 6  ;;  %v6082_v60 = vsel %vm5751_vm8, %v6081_v20, %v6080_v2  ;;  %6498 = vst [vmem:[#allocation10 + $0x39c] sm:$0xff] %v6058_v51 }
 0x738   :  { %v6085_v28 = vsel %vm5747_vm6, %v14119_v44, %v14118_v4  ;;  %v6088_v22 = vsel %vm5749_vm7, %v14121_v47, %v14120_v57  ;;  %v14122_v54 = vld [vmem:[#allocation99_spill] sm:$0xff]  ;;  %v14123_v23 = vld [vmem:[#allocation98_spill] sm:$0xff]  ;;  %v14124_v33 = vld [vmem:[#allocation101_spill] sm:$0xff]  ;;  %v6075_v17 = vrot.slane %v6074_v45, 6  ;;  %6499 = vst [vmem:[#allocation10 + $0x3a4] sm:$0xff] %v6062_v9  ;;  %v6079_v20 = vrot.slane %v6078_v48, 6 }
 0x739   :  { %v6089_v40 = vsel %vm5747_vm6, %v14123_v23, %v14122_v54  ;;  %v14125_v43 = vld [vmem:[#allocation102_spill] sm:$0xff]  ;;  %v14126_v53 = vld [vmem:[#allocation103_spill] sm:$0xff]  ;;  %v14127_v41 = vld [vmem:[#allocation100_spill] sm:$0xff]  ;;  %v6086_v44 = vsel %vm5751_vm8, %v6085_v28, %v6084_v55  ;;  %6500 = vst.msk [vmem:[#allocation10 + $0x3ac] sm:$0x3] %vm6419_vm4, %v6063_v46  ;;  %v6083_v28 = vrot.slane %v6082_v60, 6 }
 0x73a   :  { %v6092_v4 = vsel %vm5749_vm7, %v14125_v43, %v14124_v33  ;;  %v6093_v0 = vsel %vm5747_vm6, %v14127_v41, %v14126_v53  ;;  %v14128_v57 = vld [vmem:[#allocation105_spill] sm:$0xff]  ;;  %v14129_v47 = vld [vmem:[#allocation104_spill] sm:$0xff]  ;;  %v14130_v19 = vld [vmem:[#allocation107_spill] sm:$0xff]  ;;  %v6090_v43 = vsel %vm5751_vm8, %v6089_v40, %v6088_v22  ;;  %6501 = vst [vmem:[#allocation10 + $0x3ae] sm:$0xff] %v6067_v25  ;;  %v6087_v40 = vrot.slane %v6086_v44, 6 }
 0x73b   :  { %v6096_v54 = vsel %vm5749_vm7, %v14129_v47, %v14128_v57  ;;  %v14131_v62 = vld [vmem:[#allocation106_spill] sm:$0xff]  ;;  %v14132_v23 = vld [vmem:[#allocation109_spill] sm:$0xff]  ;;  %v14134_v51 = vld [vmem:[#allocation111_spill] sm:$0xff]  ;;  %v6094_v41 = vsel %vm5751_vm8, %v6093_v0, %v6092_v4  ;;  %6502 = vst [vmem:[#allocation10 + $0x3b6] sm:$0xff] %v6071_v56  ;;  %v6091_v0 = vrot.slane %v6090_v43, 6 }
 0x73c   :  { %v6097_v2 = vsel %vm5747_vm6, %v14131_v62, %v14130_v19  ;;  %v14133_v33 = vld [vmem:[#allocation110_spill] sm:$0xff]  ;;  %v14135_v45 = vld [vmem:[#allocation108_spill] sm:$0xff]  ;;  %v14136_v57 = vld [vmem:[#allocation113_spill] sm:$0xff]  ;;  %6503 = vst [vmem:[#allocation10 + $0x3be] sm:$0xff] %v6075_v17 }
 0x73d   :  { %v6100_v53 = vsel %vm5749_vm7, %v14133_v33, %v14132_v23  ;;  %v6101_v55 = vsel %vm5747_vm6, %v14135_v45, %v14134_v51  ;;  %v14137_v47 = vld [vmem:[#allocation114_spill] sm:$0xff]  ;;  %v14138_v48 = vld [vmem:[#allocation115_spill] sm:$0xff]  ;;  %v14139_v19 = vld [vmem:[#allocation112_spill] sm:$0xff]  ;;  %v6098_v62 = vsel %vm5751_vm8, %v6097_v2, %v6096_v54  ;;  %v6095_v2 = vrot.slane %v6094_v41, 6  ;;  %6504 = vst [vmem:[#allocation10 + $0x3c6] sm:$0xff] %v6079_v20 }
 0x73e   :  { %v6104_v9 = vsel %vm5749_vm7, %v14137_v47, %v14136_v57  ;;  %v6105_v22 = vsel %vm5747_vm6, %v14139_v19, %v14138_v48  ;;  %v14140_v23 = vld [vmem:[#allocation117_spill] sm:$0xff]  ;;  %v14141_v33 = vld [vmem:[#allocation118_spill] sm:$0xff]  ;;  %v14142_v46 = vld [vmem:[#allocation119_spill] sm:$0xff]  ;;  %v6102_v45 = vsel %vm5751_vm8, %v6101_v55, %v6100_v53  ;;  %v6099_v55 = vrot.slane %v6098_v62, 6  ;;  %6505 = vst [vmem:[#allocation10 + $0x3ce] sm:$0xff] %v6083_v28 }
 0x73f   :  { %v6108_v51 = vsel %vm5749_vm7, %v14141_v33, %v14140_v23  ;;  %v14143_v60 = vld [vmem:[#allocation116_spill] sm:$0xff]  ;;  %v14144_v57 = vld [vmem:[#allocation121_spill] sm:$0xff]  ;;  %v14145_v47 = vld [vmem:[#allocation122_spill] sm:$0xff]  ;;  %v6106_v19 = vsel %vm5751_vm8, %v6105_v22, %v6104_v9  ;;  %v6103_v22 = vrot.slane %v6102_v45, 6  ;;  %6506 = vst [vmem:[#allocation10 + $0x3d6] sm:$0xff] %v6087_v40 }
 0x740   :  { %v6109_v4 = vsel %vm5747_vm6, %v14143_v60, %v14142_v46  ;;  %v6112_v48 = vsel %vm5749_vm7, %v14145_v47, %v14144_v57  ;;  %v14146_v25 = vld [vmem:[#allocation123_spill] sm:$0xff]  ;;  %v14147_v44 = vld [vmem:[#allocation120_spill] sm:$0xff]  ;;  %v14148_v23 = vld [vmem:[#allocation125_spill] sm:$0xff]  ;;  %6507 = vst [vmem:[#allocation10 + $0x3de] sm:$0xff] %v6091_v0 }
 0x741   :  { %v6113_v54 = vsel %vm5747_vm6, %v14147_v44, %v14146_v25  ;;  %v14149_v33 = vld [vmem:[#allocation126_spill] sm:$0xff]  ;;  %v14150_v56 = vld [vmem:[#allocation127_spill] sm:$0xff]  ;;  %v14151_v43 = vld [vmem:[#allocation124_spill] sm:$0xff]  ;;  %v6110_v60 = vsel %vm5751_vm8, %v6109_v4, %v6108_v51  ;;  %v6107_v4 = vrot.slane %v6106_v19, 6  ;;  %6508 = vst [vmem:[#allocation10 + $0x3e6] sm:$0xff] %v6095_v2 }
 0x742   :  { %v6116_v46 = vsel %vm5749_vm7, %v14149_v33, %v14148_v23  ;;  %v6117_v53 = vsel %vm5747_vm6, %v14151_v43, %v14150_v56  ;;  %v14152_v57 = vld [vmem:[#allocation129_spill] sm:$0xff]  ;;  %v14153_v47 = vld [vmem:[#allocation15_spill] sm:$0xff]  ;;  %v14154_v17 = vld [vmem:[#allocation16_spill] sm:$0xff]  ;;  %v6114_v44 = vsel %vm5751_vm8, %v6113_v54, %v6112_v48  ;;  %v6111_v48 = vrot.slane %v6110_v60, 6  ;;  %6509 = vst [vmem:[#allocation10 + $0x3ee] sm:$0xff] %v6099_v55 }
 0x743   :  { %v6120_v25 = vsel %vm5749_vm7, %v14153_v47, %v14152_v57  ;;  %v14155_v41 = vld [vmem:[#allocation128_spill] sm:$0xff]  ;;  %v14156_v23 = vld [vmem:[#allocation18_spill] sm:$0xff]  ;;  %v14157_v33 = vld [vmem:[#allocation19_spill] sm:$0xff]  ;;  %v6118_v43 = vsel %vm5751_vm8, %v6117_v53, %v6116_v46  ;;  %v6115_v53 = vrot.slane %v6114_v44, 6  ;;  %6510 = vst [vmem:[#allocation10 + $0x3f6] sm:$0xff] %v6103_v22 }
 0x744   :  { %v6121_v9 = vsel %vm5747_vm6, %v14155_v41, %v14154_v17  ;;  %v6124_v56 = vsel %vm5749_vm7, %v14157_v33, %v14156_v23  ;;  %v14158_v20 = vld [vmem:[#allocation20_spill] sm:$0xff]  ;;  %v14159_v62 = vld [vmem:[#allocation17_spill] sm:$0xff]  ;;  %v14160_v57 = vld [vmem:[#allocation22_spill] sm:$0xff]  ;;  %6511 = vst [vmem:[#allocation10 + $0x3fe] sm:$0xff] %v6107_v4 }
 0x745   :  { %v6125_v51 = vsel %vm5747_vm6, %v14159_v62, %v14158_v20  ;;  %v14161_v47 = vld [vmem:[#allocation23_spill] sm:$0xff]  ;;  %v14162_v28 = vld [vmem:[#allocation21_spill] sm:$0xff]  ;;  %v6122_v54 = vsel %vm5751_vm8, %v6121_v9, %v6120_v25  ;;  %v14164_v40 = vld [vmem:[#allocation28_spill] sm:$0xff]  ;;  %v6119_v25 = vrot.slane %v6118_v43, 6  ;;  %v6140_v9 = vsel %vm5749_vm7, %v13930_v39, %v14050_v29  ;;  %6512 = vst [vmem:[#allocation10 + $0x406] sm:$0xff] %v6111_v48 }
 0x746   :  { %v6128_v17 = vsel %vm5749_vm7, %v14161_v47, %v14160_v57  ;;  %v6129_v45 = vsel %vm5747_vm6, %v14162_v28, %v14041_v5  ;;  %v14163_v41 = vld [vmem:[#allocation27_spill] sm:$0xff]  ;;  %v14165_v19 = vld [vmem:[#allocation25_spill] sm:$0xff]  ;;  %v6126_v33 = vsel %vm5751_vm8, %v6125_v51, %v6124_v56  ;;  %v14166_v20 = vld [vmem:[#allocation30_spill] sm:$0xff]  ;;  %v6123_v56 = vrot.slane %v6122_v54, 6  ;;  %6513 = vst [vmem:[#allocation10 + $0x40e] sm:$0xff] %v6115_v53 }
 0x747   :  { %v6132_v23 = vsel %vm5749_vm7, %v14163_v41, %v14044_v12  ;;  %v6133_v46 = vsel %vm5747_vm6, %v14165_v19, %v14164_v40  ;;  %v14167_v62 = vld [vmem:[#allocation31_spill] sm:$0xff]  ;;  %v14168_v0 = vld [vmem:[#allocation29_spill] sm:$0xff]  ;;  %v6130_v12 = vsel %vm5751_vm8, %v6129_v45, %v6128_v17  ;;  %v6127_v57 = vrot.slane %v6126_v33, 6  ;;  %v14174_v28 = vld [vmem:[#allocation46_spill] sm:$0xff]  ;;  %6514 = vst [vmem:[#allocation10 + $0x416] sm:$0xff] %v6119_v25 }
 0x748   :  { %v6136_v5 = vsel %vm5749_vm7, %v14167_v62, %v14166_v20  ;;  %v6137_v60 = vsel %vm5747_vm6, %v14168_v0, %v13929_v18  ;;  %v14169_v2 = vld [vmem:[#allocation147_spill] sm:$0xff]  ;;  %v6134_v51 = vsel %vm5751_vm8, %v6133_v46, %v6132_v23  ;;  %v6144_v18 = vsel %vm5749_vm7, %v14053_v16, %v14054_v27  ;;  %v14173_v27 = vld [vmem:[#allocation44_spill] sm:$0xff]  ;;  %v14175_v4 = vld [vmem:[#allocation45_spill] sm:$0xff]  ;;  %6515 = vst [vmem:[#allocation10 + $0x41e] sm:$0xff] %v6123_v56 }
 0x749   :  { %v6141_v44 = vsel %vm5747_vm6, %v14169_v2, %v14051_v58  ;;  %v14170_v55 = vld [vmem:[#allocation39_spill] sm:$0xff]  ;;  %v6138_v39 = vsel %vm5751_vm8, %v6137_v60, %v6136_v5  ;;  %v6148_v29 = vsel %vm5749_vm7, %v13810_v34, %v13937_v10  ;;  %v14171_v58 = vld [vmem:[#allocation41_spill] sm:$0xff]  ;;  %v6131_v17 = vrot.slane %v6130_v12, 6  ;;  %v14177_v10 = vld [vmem:[#allocation48_spill] sm:$0xff]  ;;  %6516 = vst [vmem:[#allocation10 + $0x426] sm:$0xff] %v6127_v57 }
 0x74a   :  { %v6145_v43 = vsel %vm5747_vm6, %v14170_v55, %v13936_v31  ;;  %v14172_v22 = vld [vmem:[#allocation43_spill] sm:$0xff]  ;;  %v6142_v16 = vsel %vm5751_vm8, %v6141_v44, %v6140_v9  ;;  %v6152_v31 = vsel %vm5749_vm7, %v14174_v28, %v14173_v27  ;;  %v6135_v41 = vrot.slane %v6134_v51, 6  ;;  %v14178_v23 = vld [vmem:[#allocation50_spill] sm:$0xff]  ;;  %v14179_v48 = vld [vmem:[#allocation49_spill] sm:$0xff] }
 0x74b   :  { %v6149_v47 = vsel %vm5747_vm6, %v14172_v22, %v14171_v58  ;;  %v14176_v45 = vld [vmem:[#allocation47_spill] sm:$0xff]  ;;  %v6146_v34 = vsel %vm5751_vm8, %v6145_v43, %v6144_v18  ;;  %v6156_v40 = vsel %vm5749_vm7, %v14178_v23, %v14177_v10  ;;  %v6139_v33 = vrot.slane %v6138_v39, 6  ;;  %v14181_v62 = vld [vmem:[#allocation52_spill] sm:$0xff]  ;;  %v14182_v5 = vld [vmem:[#allocation54_spill] sm:$0xff]  ;;  %6517 = vst [vmem:[#allocation10 + $0x42e] sm:$0xff] %v6131_v17 }
 0x74c   :  { %v6153_v54 = vsel %vm5747_vm6, %v14176_v45, %v14175_v4  ;;  %v14180_v19 = vld [vmem:[#allocation51_spill] sm:$0xff]  ;;  %v6150_v20 = vsel %vm5751_vm8, %v6149_v47, %v6148_v29  ;;  %v6160_v0 = vsel %vm5749_vm7, %v14182_v5, %v14181_v62  ;;  %v6143_v12 = vrot.slane %v6142_v16, 6  ;;  %v14184_v25 = vld [vmem:[#allocation149_spill] sm:$0xff]  ;;  %6518 = vst [vmem:[#allocation10 + $0x436] sm:$0xff] %v6135_v41  ;;  %v14187_v39 = vld [vmem:[#allocation156_spill] sm:$0xff] }
 0x74d   :  { %v6157_v46 = vsel %vm5747_vm6, %v14180_v19, %v14179_v48  ;;  %v14183_v53 = vld [vmem:[#allocation55_spill] sm:$0xff]  ;;  %v6154_v9 = vsel %vm5751_vm8, %v6153_v54, %v6152_v31  ;;  %v6164_v2 = vsel %vm5749_vm7, %v14064_v8, %v14065_v3  ;;  %v6165_v44 = vsel %vm5747_vm6, %v14184_v25, %v14066_v21  ;;  %v14185_v56 = vld [vmem:[#allocation57_spill] sm:$0xff]  ;;  %6519 = vst [vmem:[#allocation10 + $0x43e] sm:$0xff] %v6139_v33  ;;  %v14192_v17 = vld [vmem:[#allocation158_spill] sm:$0xff] }
 0x74e   :  { %v6161_v60 = vsel %vm5747_vm6, %v14183_v53, %v14062_v63  ;;  %v6147_v51 = vrot.slane %v6146_v34, 6  ;;  %v6158_v18 = vsel %vm5751_vm8, %v6157_v46, %v6156_v40  ;;  %v6168_v63 = vsel %vm5749_vm7, %v14068_v52, %v14069_v50  ;;  %v14186_v50 = vld [vmem:[#allocation154_spill] sm:$0xff]  ;;  %v14188_v29 = vld [vmem:[#allocation155_spill] sm:$0xff]  ;;  %v14190_v47 = vld [vmem:[#allocation157_spill] sm:$0xff]  ;;  %6520 = vst [vmem:[#allocation10 + $0x446] sm:$0xff] %v6143_v12 }
 0x74f   :  { %v6169_v55 = vsel %vm5747_vm6, %v14185_v56, %v13950_v14  ;;  %v6151_v43 = vrot.slane %v6150_v20, 6  ;;  %v6162_v3 = vsel %vm5751_vm8, %v6161_v60, %v6160_v0  ;;  %v6172_v8 = vsel %vm5749_vm7, %v13951_v1, %v13952_v26  ;;  %v14189_v1 = vld [vmem:[#allocation61_spill] sm:$0xff]  ;;  %v14193_v28 = vld [vmem:[#allocation64_spill] sm:$0xff]  ;;  %v14195_v45 = vld [vmem:[#allocation66_spill] sm:$0xff] }
 0x750   :  { %v6173_v21 = vsel %vm5747_vm6, %v14071_v49, %v13954_v59  ;;  %v6155_v57 = vrot.slane %v6154_v9, 6  ;;  %v6166_v52 = vsel %vm5751_vm8, %v6165_v44, %v6164_v2  ;;  %v6176_v14 = vsel %vm5749_vm7, %v14186_v50, %v13956_v35  ;;  %v14191_v49 = vld [vmem:[#allocation159_spill] sm:$0xff]  ;;  %v14194_v31 = vld [vmem:[#allocation160_spill] sm:$0xff]  ;;  %v14196_v54 = vld [vmem:[#allocation161_spill] sm:$0xff]  ;;  %6521 = vst [vmem:[#allocation10 + $0x44e] sm:$0xff] %v6147_v51 }
 0x751   :  { %v6177_v58 = vsel %vm5747_vm6, %v14188_v29, %v14187_v39  ;;  %v6159_v22 = vrot.slane %v6158_v18, 6  ;;  %v6170_v26 = vsel %vm5751_vm8, %v6169_v55, %v6168_v63  ;;  %v6180_v59 = vsel %vm5749_vm7, %v14190_v47, %v14189_v1  ;;  %v14197_v23 = vld [vmem:[#allocation67_spill] sm:$0xff]  ;;  %v14198_v40 = vld [vmem:[#allocation162_spill] sm:$0xff]  ;;  %6522 = vst [vmem:[#allocation10 + $0x456] sm:$0xff] %v6151_v43  ;;  %v14201_v12 = vld [vmem:[#allocation169_spill] sm:$0xff] }
 0x752   :  { %v6181_v16 = vsel %vm5747_vm6, %v14192_v17, %v14191_v49  ;;  %v6163_v27 = vrot.slane %v6162_v3, 6  ;;  %v6174_v35 = vsel %vm5751_vm8, %v6173_v21, %v6172_v8  ;;  %v6184_v4 = vsel %vm5749_vm7, %v14194_v31, %v14193_v28  ;;  %v14199_v19 = vld [vmem:[#allocation163_spill] sm:$0xff]  ;;  %v14200_v5 = vld [vmem:[#allocation166_spill] sm:$0xff]  ;;  %6523 = vst [vmem:[#allocation10 + $0x45e] sm:$0xff] %v6155_v57  ;;  %v14203_v44 = vld [vmem:[#allocation72_spill] sm:$0xff] }
 0x753   :  { %v6185_v41 = vsel %vm5747_vm6, %v14196_v54, %v14195_v45  ;;  %v6167_v34 = vrot.slane %v6166_v52, 6  ;;  %v6178_v10 = vsel %vm5751_vm8, %v6177_v58, %v6176_v14  ;;  %v6188_v48 = vsel %vm5749_vm7, %v14198_v40, %v14197_v23  ;;  %6524 = vst [vmem:[#allocation10 + $0x466] sm:$0xff] %v6159_v22  ;;  %v14204_v51 = vld [vmem:[#allocation42_spill] sm:$0xff]  ;;  %v14206_v56 = vld [vmem:[#allocation75_spill] sm:$0xff]  ;;  %v14210_v57 = vld [vmem:[#allocation80_spill] sm:$0xff] }
 0x754   :  { %v6189_v46 = vsel %vm5747_vm6, %v14199_v19, %v14078_v32  ;;  %v6171_v33 = vrot.slane %v6170_v26, 6  ;;  %v6182_v20 = vsel %vm5751_vm8, %v6181_v16, %v6180_v59  ;;  %v6192_v62 = vsel %vm5749_vm7, %v14080_v15, %v14081_v30  ;;  %6525 = vst [vmem:[#allocation10 + $0x46e] sm:$0xff] %v6163_v27  ;;  %v14208_v3 = vld [vmem:[#allocation82_spill] sm:$0xff]  ;;  %v14209_v8 = vld [vmem:[#allocation79_spill] sm:$0xff]  ;;  %v14211_v52 = vld [vmem:[#allocation81_spill] sm:$0xff] }
 0x755   :  { %v6193_v0 = vsel %vm5747_vm6, %v14200_v5, %v14082_v37  ;;  %v6175_v53 = vrot.slane %v6174_v35, 6  ;;  %v6186_v60 = vsel %vm5751_vm8, %v6185_v41, %v6184_v4  ;;  %v6196_v32 = vsel %vm5749_vm7, %v14084_v6, %v14085_v13  ;;  %v14202_v13 = vld [vmem:[#allocation74_spill] sm:$0xff]  ;;  %6526 = vst [vmem:[#allocation10 + $0x476] sm:$0xff] %v6167_v34  ;;  %v14213_v58 = vld [vmem:[#allocation83_spill] sm:$0xff]  ;;  %v14214_v22 = vld [vmem:[#allocation84_spill] sm:$0xff] }
 0x756   :  { %v6197_v9 = vsel %vm5747_vm6, %v14201_v12, %v13966_v38  ;;  %v6179_v2 = vrot.slane %v6178_v10, 6  ;;  %v6190_v30 = vsel %vm5751_vm8, %v6189_v46, %v6188_v48  ;;  %v6200_v15 = vsel %vm5749_vm7, %v13967_v7, %v13968_v11  ;;  %v14205_v11 = vld [vmem:[#allocation77_spill] sm:$0xff]  ;;  %6527 = vst [vmem:[#allocation10 + $0x47e] sm:$0xff] %v6171_v33  ;;  %v14212_v29 = vld [vmem:[#allocation130_spill] sm:$0xff] }
 0x757   :  { %v6201_v37 = vsel %vm5747_vm6, %v14087_v42, %v13970_v36  ;;  %v6183_v25 = vrot.slane %v6182_v20, 6  ;;  %v6194_v6 = vsel %vm5751_vm8, %v6193_v0, %v6192_v62  ;;  %v6204_v38 = vsel %vm5749_vm7, %v14202_v13, %v13972_v24  ;;  %v14207_v42 = vld [vmem:[#allocation76_spill] sm:$0xff]  ;;  %6528 = vst [vmem:[#allocation10 + $0x486] sm:$0xff] %v6175_v53  ;;  %v14215_v26 = vld [vmem:[#allocation85_spill] sm:$0xff]  ;;  %v14216_v4 = vld [vmem:[#allocation78_spill] sm:$0xff] }
 0x758   :  { %v6205_v18 = vsel %vm5747_vm6, %v14204_v51, %v14203_v44  ;;  %v6187_v63 = vrot.slane %v6186_v60, 6  ;;  %v6198_v7 = vsel %vm5751_vm8, %v6197_v9, %v6196_v32  ;;  %v6208_v36 = vsel %vm5749_vm7, %v14206_v56, %v14205_v11  ;;  %6529 = vst [vmem:[#allocation10 + $0x48e] sm:$0xff] %v6179_v2 }
 0x759   :  { %v6209_v55 = vsel %vm5747_vm6, %v14207_v42, %v11456_v61  ;;  %v6191_v43 = vrot.slane %v6190_v30, 6  ;;  %v6202_v24 = vsel %vm5751_vm8, %v6201_v37, %v6200_v15  ;;  %v6212_v21 = vsel %vm5749_vm7, %v14209_v8, %v14208_v3  ;;  %6530 = vst [vmem:[#allocation10 + $0x496] sm:$0xff] %v6183_v25 }
 0x75a   :  { %v6213_v50 = vsel %vm5747_vm6, %v14211_v52, %v14210_v57  ;;  %v6195_v14 = vrot.slane %v6194_v6, 6  ;;  %v6206_v39 = vsel %vm5751_vm8, %v6205_v18, %v6204_v38  ;;  %v6216_v61 = vsel %vm5749_vm7, %v14213_v58, %v14212_v29  ;;  %6531 = vst [vmem:[#allocation10 + $0x49e] sm:$0xff] %v6187_v63 }
 0x75b   :  { %v6217_v1 = vsel %vm5747_vm6, %v14215_v26, %v14214_v22  ;;  %v6199_v47 = vrot.slane %v6198_v7, 6  ;;  %v6210_v59 = vsel %vm5751_vm8, %v6209_v55, %v6208_v36  ;;  %v6203_v49 = vrot.slane %v6202_v24, 6  ;;  %6532 = vst [vmem:[#allocation10 + $0x4a6] sm:$0xff] %v6191_v43 }
 0x75c   :  { %v6214_v17 = vsel %vm5751_vm8, %v6213_v50, %v6212_v21  ;;  %v6207_v16 = vrot.slane %v6206_v39, 6  ;;  %v6218_v27 = vsel %vm5751_vm8, %v6217_v1, %v6216_v61  ;;  %v6211_v35 = vrot.slane %v6210_v59, 6  ;;  %6533 = vst [vmem:[#allocation10 + $0x4ae] sm:$0xff] %v6195_v14 }
 0x75d   :  { %v6215_v28 = vrot.slane %v6214_v17, 6  ;;  %6534 = vst [vmem:[#allocation10 + $0x4b6] sm:$0xff] %v6199_v47  ;;  %v6219_v31 = vrot.slane %v6218_v27, 6  ;;  %v6220_v45 = vrot.slane %v14216_v4, 6 }
 0x75e   :  { %6535 = vst [vmem:[#allocation10 + $0x4be] sm:$0xff] %v6203_v49 }
 0x75f   :  { %6536 = vst [vmem:[#allocation10 + $0x4c6] sm:$0xff] %v6207_v16 }
 0x760   :  { %6537 = vst [vmem:[#allocation10 + $0x4ce] sm:$0xff] %v6211_v35 }
 0x761   :  { %6538 = vst [vmem:[#allocation10 + $0x4d6] sm:$0xff] %v6215_v28 }
 0x762   :  { %6539 = vst [vmem:[#allocation10 + $0x4de] sm:$0xff] %v6219_v31 }
 0x763   :  { %6540 = vst.msk [vmem:[#allocation10 + $0x4e6] sm:$0x3] %vm6419_vm4, %v6220_v45 }
 0x764   :  { %6544 = vsyncadd [#allocation4], 15072  ;;  %s6547_s18 = sshll.u32 %s12385_s5, 4  ;;  %s7974_s19 = smov [#allocation10]   ;;  %s6548_s18 = int_to_ptr.hbm [resolvable:$true] %s6547_s18 }
 0x765   :  { %s6545_s20 = sshll.u32 %s7974_s19, 4  ;;  %s7975_s21 = smov 5024   ;;  %s6546_s20 = int_to_ptr.vmem [resolvable:$true] %s6545_s20 }
 0x766   :  { %s7976_s22 = smov 314  }
 0x767   :  { %6553 = dma.vmem_to_hbm [thread:$0]  %s6546_s20, 5024, %s6548_s18, [#allocation4], %s7975_s21, %s7975_s21, %s7976_s22  }
 0x768   :  { %7962 = dma.done.wait [#allocation4], 20096  }
 0x769   :  { %7963 = vsyncadd [#allocation4], 4294947200 }
 0x76a   :  { %6558 = vsyncpa [#allocation3], 1 }
 0x76b   :  { %6559 = vsyncpa [#allocation6], 1 }
 0x76c   :  { %6560 = vsyncpa [#allocation9], 1 }
 0x76d   :  { %6561 = vsyncpa [#allocation4], 1 }

</bundles_post_ra>
